<compile_context>
chip_gen: v7x
topology: tpu7x:2x2x1
jax: 0.10.0
libtpu: 0.0.40
codegen_flags: <defaults>
</compile_context>

<pallas_src>
import functools

import numpy as np
import jax
import jax.numpy as jnp
from jax.experimental import pallas as pl
from jax.experimental.pallas import tpu as pltpu


# ----------------------------- Pallas kernels ------------------------------ #

def _conv_layer_kernel(x_ref, w_ref, b_ref, o_ref, sum_ref, sq_ref, *,
                       Do, HoWo, Cout):
    """Conv3d(k=4, s=2, p=1) + fused BatchNorm partial stats for one sample.

    x_ref : [1, D+2, Ho*Wo, 16*Cin] bf16  (in-plane 4x4 taps gathered, depth padded)
    w_ref : [4, 16*Cin, Cout]       bf16  (one matmul weight per depth tap, resident)
    b_ref : [1, Cout]               f32
    o_ref : [1, Do, Ho*Wo, Cout]    bf16  conv output for this sample
    sum_ref / sq_ref : [1, 1, Cout] f32   per-sample BN partial sums

    Depth taps and output-depth rows are static unrolled loops; accumulation is
    in f32 registers (no scratch), bias added once per row.
    """
    bias = b_ref[...]                                        # [1, Cout] f32
    s_tot = jnp.zeros((1, Cout), jnp.float32)
    sq_tot = jnp.zeros((1, Cout), jnp.float32)
    for d in range(Do):
        acc = jnp.zeros((HoWo, Cout), jnp.float32)
        for kd in range(4):                                  # depth taps folded in-body
            xk = x_ref[0, 2 * d + kd]                        # [Ho*Wo, 16*Cin] bf16
            acc = acc + jnp.dot(xk, w_ref[kd],
                                preferred_element_type=jnp.float32)
        acc = acc + bias                                     # conv row, f32
        s_tot = s_tot + jnp.sum(acc, axis=0, keepdims=True)
        sq_tot = sq_tot + jnp.sum(acc * acc, axis=0, keepdims=True)
        o_ref[0, pl.ds(d, 1)] = acc[None].astype(o_ref.dtype)
    sum_ref[0] = s_tot
    sq_ref[0] = sq_tot


def _bn_lrelu_kernel(x_ref, scale_ref, shift_ref, o_ref):
    """Fused BatchNorm affine + LeakyReLU(0.2); lane-dense bf16 in/out, f32 math."""
    y = x_ref[...].astype(jnp.float32) * scale_ref[...] + shift_ref[...]
    o_ref[...] = jnp.where(y >= 0, y, 0.2 * y).astype(o_ref.dtype)


def _fc_kernel(x_ref, w_ref, b_ref, o_ref):
    """Final Linear(F -> 1): bf16 MXU dot with f32 accumulation."""
    o_ref[...] = jnp.dot(x_ref[...], w_ref[...],
                         preferred_element_type=jnp.float32) + b_ref[...]


# ----------------------------- Pallas wrappers ----------------------------- #

def conv3d_bnstats(xhw, w4, bias, Do, HoWo, cout):
    """xhw: [N, D+2, Ho*Wo, 16*Cin] bf16; w4: [4, 16*Cin, Cout] bf16; bias [1, Cout] f32.

    Returns conv [N, Do, Ho*Wo, Cout] bf16 plus per-sample BN partial sum / sumsq
    [N, 1, Cout] f32.  Grid is one step per sample; everything else is unrolled
    inside the kernel and the weights stay VMEM-resident (constant index_map).
    """
    N, Dp, _, K16 = xhw.shape
    kernel = functools.partial(_conv_layer_kernel, Do=Do, HoWo=HoWo, Cout=cout)
    return pl.pallas_call(
        kernel,
        out_shape=(
            jax.ShapeDtypeStruct((N, Do, HoWo, cout), jnp.bfloat16),
            jax.ShapeDtypeStruct((N, 1, cout), jnp.float32),
            jax.ShapeDtypeStruct((N, 1, cout), jnp.float32),
        ),
        grid=(N,),
        in_specs=[
            pl.BlockSpec((1, Dp, HoWo, K16), lambda n: (n, 0, 0, 0)),
            pl.BlockSpec((4, K16, cout), lambda n: (0, 0, 0)),   # resident weights
            pl.BlockSpec((1, cout), lambda n: (0, 0)),           # resident bias
        ],
        out_specs=(
            pl.BlockSpec((1, Do, HoWo, cout), lambda n: (n, 0, 0, 0)),
            pl.BlockSpec((1, 1, cout), lambda n: (n, 0, 0)),
            pl.BlockSpec((1, 1, cout), lambda n: (n, 0, 0)),
        ),
        compiler_params=pltpu.CompilerParams(
            dimension_semantics=("parallel",)),
    )(xhw, w4, bias)


def bn_lrelu(conv2d, scale_row, shift_row):
    """conv2d: [R, Ccols] bf16 (R = N*Do, Ccols = Ho*Wo*Cout, lane-dense view),
    scale/shift: [1, Ccols] f32.  Returns bf16 activation [R, Ccols]."""
    R, Ccols = conv2d.shape
    # >=2 parallel row blocks when it keeps (8,128) alignment (v7x has 2 cores).
    rb = R // 2 if (R % 2 == 0 and (R // 2) % 8 == 0) else R
    return pl.pallas_call(
        _bn_lrelu_kernel,
        out_shape=jax.ShapeDtypeStruct((R, Ccols), jnp.bfloat16),
        grid=(R // rb,),
        in_specs=[
            pl.BlockSpec((rb, Ccols), lambda i: (i, 0)),
            pl.BlockSpec((1, Ccols), lambda i: (0, 0)),
            pl.BlockSpec((1, Ccols), lambda i: (0, 0)),
        ],
        out_specs=pl.BlockSpec((rb, Ccols), lambda i: (i, 0)),
        compiler_params=pltpu.CompilerParams(dimension_semantics=("parallel",)),
    )(conv2d, scale_row, shift_row)


def fc_linear(feats, w_col, b):
    """feats: [N, F] bf16 (NDHWC flatten), w_col: [F, 1] bf16 (pre-permuted), b: [1,1] f32."""
    N, F = feats.shape
    return pl.pallas_call(
        _fc_kernel,
        out_shape=jax.ShapeDtypeStruct((N, 1), jnp.float32),
        grid=(1,),
        in_specs=[
            pl.BlockSpec((N, F), lambda i: (0, 0)),
            pl.BlockSpec((F, 1), lambda i: (0, 0)),
            pl.BlockSpec((1, 1), lambda i: (0, 0)),
        ],
        out_specs=pl.BlockSpec((N, 1), lambda i: (0, 0)),
    )(feats, w_col, b)


# ------------------------------- JAX glue ---------------------------------- #

def _build_hw_patches(x):
    """x: [N, D, H, W, C] (bf16) -> [N, D+2, Ho*Wo, 16*C] (bf16).

    Zero-pads spatially by 1 and gathers the 4x4 in-plane (kh, kw) taps for every
    stride-2 output (h, w) position.  K ordering is (kh, kw, Cin), matching the
    reshaped conv weight; the 4 depth taps remain for the Pallas kernel.
    """
    N, D, H, W, C = x.shape
    Ho, Wo = H // 2, W // 2
    xp = jnp.pad(x, ((0, 0), (1, 1), (1, 1), (1, 1), (0, 0)))
    cols = []
    for kh in range(4):
        for kw in range(4):
            cols.append(xp[:, :, kh:kh + 2 * Ho:2, kw:kw + 2 * Wo:2, :])
    xhw = jnp.stack(cols, axis=4)                     # [N, D+2, Ho, Wo, 16, C]
    return xhw.reshape(N, D + 2, Ho * Wo, 16 * C).astype(jnp.bfloat16)


def prepare_params(params, feat_dims, input_size):
    """Convert PyTorch-layout params into kernel-friendly layout (done once)."""
    kp = {}
    in_ch = 1
    for li, out_ch in enumerate(feat_dims):
        w = params[f"conv{li}_w"]                     # [Cout, Cin, 4, 4, 4]
        kp[f"w{li}"] = (jnp.transpose(w, (2, 3, 4, 1, 0))
                        .reshape(4, 16 * in_ch, out_ch).astype(jnp.bfloat16))
        kp[f"b{li}"] = params[f"conv{li}_b"].reshape(1, out_ch).astype(jnp.float32)
        kp[f"gamma{li}"] = params[f"bn{li}_gamma"].astype(jnp.float32)
        kp[f"beta{li}"] = params[f"bn{li}_beta"].astype(jnp.float32)
        in_ch = out_ch
    L = len(feat_dims)
    sfin = input_size // (2 ** L)
    c_last = feat_dims[-1]
    # Fold PyTorch's NCDHW flatten into the FC weight (columns permuted to NDHWC).
    w_perm = params["fc_w"].reshape(c_last, sfin, sfin, sfin)
    w_perm = jnp.transpose(w_perm, (1, 2, 3, 0)).reshape(-1, 1).astype(jnp.bfloat16)
    kp["fc_w"] = w_perm                               # [F, 1]
    kp["fc_b"] = params["fc_b"].reshape(1, 1).astype(jnp.float32)
    return kp


def discriminator3d_forward(x_nchw, kparams, feat_dims):
    """Forward pass.  x_nchw: [N, 1, D, D, D] (PyTorch layout, f32)."""
    x = jnp.transpose(x_nchw, (0, 2, 3, 4, 1)).astype(jnp.bfloat16)   # NDHWC bf16
    N = x.shape[0]
    eps = 1e-5
    for li, cout in enumerate(feat_dims):
        _, D, H, W, _ = x.shape
        Do, Ho, Wo = D // 2, H // 2, W // 2

        xhw = _build_hw_patches(x)                                    # bf16 glue
        conv, s, ss = conv3d_bnstats(xhw, kparams[f"w{li}"], kparams[f"b{li}"],
                                     Do, Ho * Wo, cout)               # Pallas

        # BatchNorm3d training-mode batch stats from fused per-sample sums (f32).
        cnt = N * Do * Ho * Wo
        mean = jnp.sum(s, axis=(0, 1)) / cnt
        var = jnp.maximum(jnp.sum(ss, axis=(0, 1)) / cnt - mean * mean, 0.0)
        scale = kparams[f"gamma{li}"] / jnp.sqrt(var + eps)
        shift = kparams[f"beta{li}"] - mean * scale
        scale_row = jnp.tile(scale, Ho * Wo).reshape(1, -1)
        shift_row = jnp.tile(shift, Ho * Wo).reshape(1, -1)

        # Free XLA reshape -> lane-dense [N*Do, Ho*Wo*Cout] view for BN/LReLU.
        act = bn_lrelu(conv.reshape(N * Do, Ho * Wo * cout),
                       scale_row, shift_row)                          # Pallas, bf16
        x = act.reshape(N, Do, Ho, Wo, cout)

    feats = x.reshape(N, -1)                       # NDHWC flatten; FC weight pre-permuted
    return fc_linear(feats, kparams["fc_w"], kparams["fc_b"])         # Pallas


# ------------------------------- reference --------------------------------- #

def _ref_forward(x_nchw, params, feat_dims):
    """Pure-JAX reference mirroring the same math (incl. bf16 conv intermediate)."""
    x = jnp.transpose(x_nchw, (0, 2, 3, 4, 1)).astype(jnp.bfloat16)
    N = x.shape[0]
    eps = 1e-5
    for li, cout in enumerate(feat_dims):
        _, D, H, W, C = x.shape
        Do, Ho, Wo = D // 2, H // 2, W // 2
        w = params[f"conv{li}_w"]
        wt = (jnp.transpose(w, (2, 3, 4, 1, 0))
              .reshape(4, 16 * C, cout).astype(jnp.bfloat16))
        xhw = _build_hw_patches(x)
        conv = jnp.zeros((N, Do, Ho * Wo, cout), jnp.float32)
        for kd in range(4):
            xk = xhw[:, kd:kd + 2 * Do:2]
            conv = conv + jnp.einsum("ndmk,kc->ndmc", xk, wt[kd],
                                     preferred_element_type=jnp.float32)
        conv = conv + params[f"conv{li}_b"].reshape(1, 1, 1, cout)
        cnt = N * Do * Ho * Wo
        mean = jnp.sum(conv, axis=(0, 1, 2)) / cnt
        var = jnp.maximum(jnp.sum(conv * conv, axis=(0, 1, 2)) / cnt - mean * mean, 0.0)
        scale = params[f"bn{li}_gamma"] / jnp.sqrt(var + eps)
        shift = params[f"bn{li}_beta"] - mean * scale
        convq = conv.astype(jnp.bfloat16).astype(jnp.float32)   # mirror bf16 intermediate
        y = convq * scale.reshape(1, 1, 1, cout) + shift.reshape(1, 1, 1, cout)
        act = jnp.where(y >= 0, y, 0.2 * y).astype(jnp.bfloat16)
        x = act.reshape(N, Do, Ho, Wo, cout)
    feats = jnp.transpose(x, (0, 4, 1, 2, 3)).reshape(N, -1)   # NCDHW flatten (PyTorch)
    wf = params["fc_w"].astype(jnp.bfloat16)
    out = jnp.dot(feats, wf.T, preferred_element_type=jnp.float32)
    return out + params["fc_b"].reshape(1, 1)


# ------------------------------ init & main --------------------------------- #

def init_params(key, feat_dims, input_size):
    params = {}
    in_ch = 1
    for li, out_ch in enumerate(feat_dims):
        key, k1, k2 = jax.random.split(key, 3)
        params[f"conv{li}_w"] = 0.1 * jax.random.normal(
            k1, (out_ch, in_ch, 4, 4, 4), jnp.float32)
        params[f"conv{li}_b"] = 0.1 * jax.random.normal(k2, (out_ch,), jnp.float32)
        params[f"bn{li}_gamma"] = jnp.ones((out_ch,), jnp.float32)
        params[f"bn{li}_beta"] = jnp.zeros((out_ch,), jnp.float32)
        in_ch = out_ch
    final_spatial = input_size // (2 ** len(feat_dims))
    final_features = feat_dims[-1] * final_spatial ** 3
    key, k1, _ = jax.random.split(key, 3)
    params["fc_w"] = 0.05 * jax.random.normal(k1, (1, final_features), jnp.float32)
    params["fc_b"] = jnp.zeros((1,), jnp.float32)
    return params


if __name__ == "__main__":
    # Small config: input_size=16 -> log2(16/2)=3 downsample layers.
    input_size = 16
    feat_dims_full = [8, 16, 32, 64, 128]
    num_layers = int(np.log2(input_size / 2))       # = 3
    feat_dims = tuple(feat_dims_full[:num_layers])  # (8, 16, 32)
    batch = 2

    key = jax.random.PRNGKey(0)
    kx, kp = jax.random.split(key)
    x = jax.random.normal(kx, (batch, 1, input_size, input_size, input_size),
                          jnp.float32)
    params = init_params(kp, feat_dims, input_size)
    kparams = prepare_params(params, feat_dims, input_size)

    fwd = jax.jit(discriminator3d_forward, static_argnames=("feat_dims",))
    out = jax.block_until_ready(fwd(x, kparams, feat_dims=feat_dims))
    assert out.shape == (batch, 1), out.shape

    ref_fn = jax.jit(_ref_forward, static_argnames=("feat_dims",))
    ref = jax.block_until_ready(ref_fn(x, params, feat_dims=feat_dims))
    np.testing.assert_allclose(np.asarray(out), np.asarray(ref),
                               rtol=2e-3, atol=2e-3)
    print("KERNEL_OK")
</pallas_src>

<mosaic_0001>
module attributes {stable_mosaic.version = 11 : i64} {
  func.func @_conv_layer_kernel(%arg0: i32, %arg1: memref<1x18x64x16xbf16, #tpu.memory_space<vmem>>, %arg2: memref<4x16x8xbf16, #tpu.memory_space<vmem>>, %arg3: memref<1x8xf32, #tpu.memory_space<vmem>>, %arg4: memref<1x8x64x8xbf16, #tpu.memory_space<vmem>>, %arg5: memref<1x1x8xf32, #tpu.memory_space<vmem>>, %arg6: memref<1x1x8xf32, #tpu.memory_space<vmem>>) attributes {dimension_semantics = [#tpu.dimension_semantics<parallel>], iteration_bounds = array<i64: 2>, scalar_prefetch = 0 : i64, scratch_operands = 0 : i64, tpu.core_type = #tpu.core_type<tc>, window_params = [{transform_indices = @transform_0, window_bounds = array<i64: 1, 18, 64, 16>}, {pipeline_mode = #tpu.pipeline_mode<synchronous>, transform_indices = @transform_1, window_bounds = array<i64: 4, 16, 8>}, {pipeline_mode = #tpu.pipeline_mode<synchronous>, transform_indices = @transform_2, window_bounds = array<i64: 1, 8>}, {transform_indices = @transform_3, window_bounds = array<i64: 1, 8, 64, 8>}, {transform_indices = @transform_4, window_bounds = array<i64: 1, 1, 8>}, {transform_indices = @transform_5, window_bounds = array<i64: 1, 1, 8>}]} {
    %c0 = arith.constant 0 : index
    %c0_0 = arith.constant 0 : index
    %0 = vector.load %arg3[%c0, %c0_0] : memref<1x8xf32, #tpu.memory_space<vmem>>, vector<1x8xf32>
    %cst = arith.constant 0.000000e+00 : f32
    %1 = vector.broadcast %cst : f32 to vector<1x8xf32>
    %cst_1 = arith.constant 0.000000e+00 : f32
    %2 = vector.broadcast %cst_1 : f32 to vector<1x8xf32>
    %cst_2 = arith.constant 0.000000e+00 : f32
    %3 = vector.broadcast %cst_2 : f32 to vector<64x8xf32>
    %c0_3 = arith.constant 0 : index
    %c0_4 = arith.constant 0 : index
    %c0_5 = arith.constant 0 : index
    %c0_6 = arith.constant 0 : index
    %4 = vector.load %arg1[%c0_3, %c0_4, %c0_5, %c0_6] : memref<1x18x64x16xbf16, #tpu.memory_space<vmem>>, vector<1x1x64x16xbf16>
    %5 = vector.shape_cast %4 : vector<1x1x64x16xbf16> to vector<64x16xbf16>
    %c0_7 = arith.constant 0 : index
    %c0_8 = arith.constant 0 : index
    %c0_9 = arith.constant 0 : index
    %6 = vector.load %arg2[%c0_7, %c0_8, %c0_9] : memref<4x16x8xbf16, #tpu.memory_space<vmem>>, vector<1x16x8xbf16>
    %7 = vector.shape_cast %6 : vector<1x16x8xbf16> to vector<16x8xbf16>
    %cst_10 = arith.constant dense<0.000000e+00> : vector<64x8xf32>
    %8 = tpu.matmul %5, %7, %cst_10 {dimension_numbers = #tpu.dot_dimension_numbers<[1], [0], [0], [1], [0, 0, 1, 1], [], []>} : vector<64x16xbf16>, vector<16x8xbf16>, vector<64x8xf32> -> vector<64x8xf32>
    %9 = arith.addf %3, %8 : vector<64x8xf32>
    %c0_11 = arith.constant 0 : index
    %c1 = arith.constant 1 : index
    %c0_12 = arith.constant 0 : index
    %c0_13 = arith.constant 0 : index
    %10 = vector.load %arg1[%c0_11, %c1, %c0_12, %c0_13] : memref<1x18x64x16xbf16, #tpu.memory_space<vmem>>, vector<1x1x64x16xbf16>
    %11 = vector.shape_cast %10 : vector<1x1x64x16xbf16> to vector<64x16xbf16>
    %c1_14 = arith.constant 1 : index
    %c0_15 = arith.constant 0 : index
    %c0_16 = arith.constant 0 : index
    %12 = vector.load %arg2[%c1_14, %c0_15, %c0_16] : memref<4x16x8xbf16, #tpu.memory_space<vmem>>, vector<1x16x8xbf16>
    %13 = vector.shape_cast %12 : vector<1x16x8xbf16> to vector<16x8xbf16>
    %cst_17 = arith.constant dense<0.000000e+00> : vector<64x8xf32>
    %14 = tpu.matmul %11, %13, %cst_17 {dimension_numbers = #tpu.dot_dimension_numbers<[1], [0], [0], [1], [0, 0, 1, 1], [], []>} : vector<64x16xbf16>, vector<16x8xbf16>, vector<64x8xf32> -> vector<64x8xf32>
    %15 = arith.addf %9, %14 : vector<64x8xf32>
    %c0_18 = arith.constant 0 : index
    %c2 = arith.constant 2 : index
    %c0_19 = arith.constant 0 : index
    %c0_20 = arith.constant 0 : index
    %16 = vector.load %arg1[%c0_18, %c2, %c0_19, %c0_20] : memref<1x18x64x16xbf16, #tpu.memory_space<vmem>>, vector<1x1x64x16xbf16>
    %17 = vector.shape_cast %16 : vector<1x1x64x16xbf16> to vector<64x16xbf16>
    %c2_21 = arith.constant 2 : index
    %c0_22 = arith.constant 0 : index
    %c0_23 = arith.constant 0 : index
    %18 = vector.load %arg2[%c2_21, %c0_22, %c0_23] : memref<4x16x8xbf16, #tpu.memory_space<vmem>>, vector<1x16x8xbf16>
    %19 = vector.shape_cast %18 : vector<1x16x8xbf16> to vector<16x8xbf16>
    %cst_24 = arith.constant dense<0.000000e+00> : vector<64x8xf32>
    %20 = tpu.matmul %17, %19, %cst_24 {dimension_numbers = #tpu.dot_dimension_numbers<[1], [0], [0], [1], [0, 0, 1, 1], [], []>} : vector<64x16xbf16>, vector<16x8xbf16>, vector<64x8xf32> -> vector<64x8xf32>
    %21 = arith.addf %15, %20 : vector<64x8xf32>
    %c0_25 = arith.constant 0 : index
    %c3 = arith.constant 3 : index
    %c0_26 = arith.constant 0 : index
    %c0_27 = arith.constant 0 : index
    %22 = vector.load %arg1[%c0_25, %c3, %c0_26, %c0_27] : memref<1x18x64x16xbf16, #tpu.memory_space<vmem>>, vector<1x1x64x16xbf16>
    %23 = vector.shape_cast %22 : vector<1x1x64x16xbf16> to vector<64x16xbf16>
    %c3_28 = arith.constant 3 : index
    %c0_29 = arith.constant 0 : index
    %c0_30 = arith.constant 0 : index
    %24 = vector.load %arg2[%c3_28, %c0_29, %c0_30] : memref<4x16x8xbf16, #tpu.memory_space<vmem>>, vector<1x16x8xbf16>
    %25 = vector.shape_cast %24 : vector<1x16x8xbf16> to vector<16x8xbf16>
    %cst_31 = arith.constant dense<0.000000e+00> : vector<64x8xf32>
    %26 = tpu.matmul %23, %25, %cst_31 {dimension_numbers = #tpu.dot_dimension_numbers<[1], [0], [0], [1], [0, 0, 1, 1], [], []>} : vector<64x16xbf16>, vector<16x8xbf16>, vector<64x8xf32> -> vector<64x8xf32>
    %27 = arith.addf %21, %26 : vector<64x8xf32>
    %28 = vector.broadcast %0 : vector<1x8xf32> to vector<64x8xf32>
    %29 = arith.addf %27, %28 : vector<64x8xf32>
    %cst_32 = arith.constant dense<0.000000e+00> : vector<8xf32>
    %30 = vector.multi_reduction <add>, %29, %cst_32 [0] : vector<64x8xf32> to vector<8xf32>
    %31 = vector.shape_cast %30 : vector<8xf32> to vector<1x8xf32>
    %32 = arith.addf %1, %31 : vector<1x8xf32>
    %33 = arith.mulf %29, %29 : vector<64x8xf32>
    %cst_33 = arith.constant dense<0.000000e+00> : vector<8xf32>
    %34 = vector.multi_reduction <add>, %33, %cst_33 [0] : vector<64x8xf32> to vector<8xf32>
    %35 = vector.shape_cast %34 : vector<8xf32> to vector<1x8xf32>
    %36 = arith.addf %2, %35 : vector<1x8xf32>
    %37 = vector.shape_cast %29 : vector<64x8xf32> to vector<1x64x8xf32>
    %38 = arith.truncf %37 : vector<1x64x8xf32> to vector<1x64x8xbf16>
    %c0_34 = arith.constant 0 : index
    %c0_35 = arith.constant 0 : index
    %c0_36 = arith.constant 0 : index
    %c0_37 = arith.constant 0 : index
    %39 = vector.load %arg4[%c0_34, %c0_35, %c0_36, %c0_37] : memref<1x8x64x8xbf16, #tpu.memory_space<vmem>>, vector<1x1x64x8xbf16>
    %40 = vector.shape_cast %39 : vector<1x1x64x8xbf16> to vector<1x64x8xbf16>
    %41 = vector.shape_cast %38 : vector<1x64x8xbf16> to vector<1x1x64x8xbf16>
    tpu.vector_store %arg4[%c0_34, %c0_35, %c0_36, %c0_37], %41 {strides = array<i32>} : memref<1x8x64x8xbf16, #tpu.memory_space<vmem>>, vector<1x1x64x8xbf16>,
    %cst_38 = arith.constant 0.000000e+00 : f32
    %42 = vector.broadcast %cst_38 : f32 to vector<64x8xf32>
    %c0_39 = arith.constant 0 : index
    %c2_40 = arith.constant 2 : index
    %c0_41 = arith.constant 0 : index
    %c0_42 = arith.constant 0 : index
    %43 = vector.load %arg1[%c0_39, %c2_40, %c0_41, %c0_42] : memref<1x18x64x16xbf16, #tpu.memory_space<vmem>>, vector<1x1x64x16xbf16>
    %44 = vector.shape_cast %43 : vector<1x1x64x16xbf16> to vector<64x16xbf16>
    %c0_43 = arith.constant 0 : index
    %c0_44 = arith.constant 0 : index
    %c0_45 = arith.constant 0 : index
    %45 = vector.load %arg2[%c0_43, %c0_44, %c0_45] : memref<4x16x8xbf16, #tpu.memory_space<vmem>>, vector<1x16x8xbf16>
    %46 = vector.shape_cast %45 : vector<1x16x8xbf16> to vector<16x8xbf16>
    %cst_46 = arith.constant dense<0.000000e+00> : vector<64x8xf32>
    %47 = tpu.matmul %44, %46, %cst_46 {dimension_numbers = #tpu.dot_dimension_numbers<[1], [0], [0], [1], [0, 0, 1, 1], [], []>} : vector<64x16xbf16>, vector<16x8xbf16>, vector<64x8xf32> -> vector<64x8xf32>
    %48 = arith.addf %42, %47 : vector<64x8xf32>
    %c0_47 = arith.constant 0 : index
    %c3_48 = arith.constant 3 : index
    %c0_49 = arith.constant 0 : index
    %c0_50 = arith.constant 0 : index
    %49 = vector.load %arg1[%c0_47, %c3_48, %c0_49, %c0_50] : memref<1x18x64x16xbf16, #tpu.memory_space<vmem>>, vector<1x1x64x16xbf16>
    %50 = vector.shape_cast %49 : vector<1x1x64x16xbf16> to vector<64x16xbf16>
    %c1_51 = arith.constant 1 : index
    %c0_52 = arith.constant 0 : index
    %c0_53 = arith.constant 0 : index
    %51 = vector.load %arg2[%c1_51, %c0_52, %c0_53] : memref<4x16x8xbf16, #tpu.memory_space<vmem>>, vector<1x16x8xbf16>
    %52 = vector.shape_cast %51 : vector<1x16x8xbf16> to vector<16x8xbf16>
    %cst_54 = arith.constant dense<0.000000e+00> : vector<64x8xf32>
    %53 = tpu.matmul %50, %52, %cst_54 {dimension_numbers = #tpu.dot_dimension_numbers<[1], [0], [0], [1], [0, 0, 1, 1], [], []>} : vector<64x16xbf16>, vector<16x8xbf16>, vector<64x8xf32> -> vector<64x8xf32>
    %54 = arith.addf %48, %53 : vector<64x8xf32>
    %c0_55 = arith.constant 0 : index
    %c4 = arith.constant 4 : index
    %c0_56 = arith.constant 0 : index
    %c0_57 = arith.constant 0 : index
    %55 = vector.load %arg1[%c0_55, %c4, %c0_56, %c0_57] : memref<1x18x64x16xbf16, #tpu.memory_space<vmem>>, vector<1x1x64x16xbf16>
    %56 = vector.shape_cast %55 : vector<1x1x64x16xbf16> to vector<64x16xbf16>
    %c2_58 = arith.constant 2 : index
    %c0_59 = arith.constant 0 : index
    %c0_60 = arith.constant 0 : index
    %57 = vector.load %arg2[%c2_58, %c0_59, %c0_60] : memref<4x16x8xbf16, #tpu.memory_space<vmem>>, vector<1x16x8xbf16>
    %58 = vector.shape_cast %57 : vector<1x16x8xbf16> to vector<16x8xbf16>
    %cst_61 = arith.constant dense<0.000000e+00> : vector<64x8xf32>
    %59 = tpu.matmul %56, %58, %cst_61 {dimension_numbers = #tpu.dot_dimension_numbers<[1], [0], [0], [1], [0, 0, 1, 1], [], []>} : vector<64x16xbf16>, vector<16x8xbf16>, vector<64x8xf32> -> vector<64x8xf32>
    %60 = arith.addf %54, %59 : vector<64x8xf32>
    %c0_62 = arith.constant 0 : index
    %c5 = arith.constant 5 : index
    %c0_63 = arith.constant 0 : index
    %c0_64 = arith.constant 0 : index
    %61 = vector.load %arg1[%c0_62, %c5, %c0_63, %c0_64] : memref<1x18x64x16xbf16, #tpu.memory_space<vmem>>, vector<1x1x64x16xbf16>
    %62 = vector.shape_cast %61 : vector<1x1x64x16xbf16> to vector<64x16xbf16>
    %c3_65 = arith.constant 3 : index
    %c0_66 = arith.constant 0 : index
    %c0_67 = arith.constant 0 : index
    %63 = vector.load %arg2[%c3_65, %c0_66, %c0_67] : memref<4x16x8xbf16, #tpu.memory_space<vmem>>, vector<1x16x8xbf16>
    %64 = vector.shape_cast %63 : vector<1x16x8xbf16> to vector<16x8xbf16>
    %cst_68 = arith.constant dense<0.000000e+00> : vector<64x8xf32>
    %65 = tpu.matmul %62, %64, %cst_68 {dimension_numbers = #tpu.dot_dimension_numbers<[1], [0], [0], [1], [0, 0, 1, 1], [], []>} : vector<64x16xbf16>, vector<16x8xbf16>, vector<64x8xf32> -> vector<64x8xf32>
    %66 = arith.addf %60, %65 : vector<64x8xf32>
    %67 = vector.broadcast %0 : vector<1x8xf32> to vector<64x8xf32>
    %68 = arith.addf %66, %67 : vector<64x8xf32>
    %cst_69 = arith.constant dense<0.000000e+00> : vector<8xf32>
    %69 = vector.multi_reduction <add>, %68, %cst_69 [0] : vector<64x8xf32> to vector<8xf32>
    %70 = vector.shape_cast %69 : vector<8xf32> to vector<1x8xf32>
    %71 = arith.addf %32, %70 : vector<1x8xf32>
    %72 = arith.mulf %68, %68 : vector<64x8xf32>
    %cst_70 = arith.constant dense<0.000000e+00> : vector<8xf32>
    %73 = vector.multi_reduction <add>, %72, %cst_70 [0] : vector<64x8xf32> to vector<8xf32>
    %74 = vector.shape_cast %73 : vector<8xf32> to vector<1x8xf32>
    %75 = arith.addf %36, %74 : vector<1x8xf32>
    %76 = vector.shape_cast %68 : vector<64x8xf32> to vector<1x64x8xf32>
    %77 = arith.truncf %76 : vector<1x64x8xf32> to vector<1x64x8xbf16>
    %c0_71 = arith.constant 0 : index
    %c1_72 = arith.constant 1 : index
    %c0_73 = arith.constant 0 : index
    %c0_74 = arith.constant 0 : index
    %78 = vector.load %arg4[%c0_71, %c1_72, %c0_73, %c0_74] : memref<1x8x64x8xbf16, #tpu.memory_space<vmem>>, vector<1x1x64x8xbf16>
    %79 = vector.shape_cast %78 : vector<1x1x64x8xbf16> to vector<1x64x8xbf16>
    %80 = vector.shape_cast %77 : vector<1x64x8xbf16> to vector<1x1x64x8xbf16>
    tpu.vector_store %arg4[%c0_71, %c1_72, %c0_73, %c0_74], %80 {strides = array<i32>} : memref<1x8x64x8xbf16, #tpu.memory_space<vmem>>, vector<1x1x64x8xbf16>,
    %cst_75 = arith.constant 0.000000e+00 : f32
    %81 = vector.broadcast %cst_75 : f32 to vector<64x8xf32>
    %c0_76 = arith.constant 0 : index
    %c4_77 = arith.constant 4 : index
    %c0_78 = arith.constant 0 : index
    %c0_79 = arith.constant 0 : index
    %82 = vector.load %arg1[%c0_76, %c4_77, %c0_78, %c0_79] : memref<1x18x64x16xbf16, #tpu.memory_space<vmem>>, vector<1x1x64x16xbf16>
    %83 = vector.shape_cast %82 : vector<1x1x64x16xbf16> to vector<64x16xbf16>
    %c0_80 = arith.constant 0 : index
    %c0_81 = arith.constant 0 : index
    %c0_82 = arith.constant 0 : index
    %84 = vector.load %arg2[%c0_80, %c0_81, %c0_82] : memref<4x16x8xbf16, #tpu.memory_space<vmem>>, vector<1x16x8xbf16>
    %85 = vector.shape_cast %84 : vector<1x16x8xbf16> to vector<16x8xbf16>
    %cst_83 = arith.constant dense<0.000000e+00> : vector<64x8xf32>
    %86 = tpu.matmul %83, %85, %cst_83 {dimension_numbers = #tpu.dot_dimension_numbers<[1], [0], [0], [1], [0, 0, 1, 1], [], []>} : vector<64x16xbf16>, vector<16x8xbf16>, vector<64x8xf32> -> vector<64x8xf32>
    %87 = arith.addf %81, %86 : vector<64x8xf32>
    %c0_84 = arith.constant 0 : index
    %c5_85 = arith.constant 5 : index
    %c0_86 = arith.constant 0 : index
    %c0_87 = arith.constant 0 : index
    %88 = vector.load %arg1[%c0_84, %c5_85, %c0_86, %c0_87] : memref<1x18x64x16xbf16, #tpu.memory_space<vmem>>, vector<1x1x64x16xbf16>
    %89 = vector.shape_cast %88 : vector<1x1x64x16xbf16> to vector<64x16xbf16>
    %c1_88 = arith.constant 1 : index
    %c0_89 = arith.constant 0 : index
    %c0_90 = arith.constant 0 : index
    %90 = vector.load %arg2[%c1_88, %c0_89, %c0_90] : memref<4x16x8xbf16, #tpu.memory_space<vmem>>, vector<1x16x8xbf16>
    %91 = vector.shape_cast %90 : vector<1x16x8xbf16> to vector<16x8xbf16>
    %cst_91 = arith.constant dense<0.000000e+00> : vector<64x8xf32>
    %92 = tpu.matmul %89, %91, %cst_91 {dimension_numbers = #tpu.dot_dimension_numbers<[1], [0], [0], [1], [0, 0, 1, 1], [], []>} : vector<64x16xbf16>, vector<16x8xbf16>, vector<64x8xf32> -> vector<64x8xf32>
    %93 = arith.addf %87, %92 : vector<64x8xf32>
    %c0_92 = arith.constant 0 : index
    %c6 = arith.constant 6 : index
    %c0_93 = arith.constant 0 : index
    %c0_94 = arith.constant 0 : index
    %94 = vector.load %arg1[%c0_92, %c6, %c0_93, %c0_94] : memref<1x18x64x16xbf16, #tpu.memory_space<vmem>>, vector<1x1x64x16xbf16>
    %95 = vector.shape_cast %94 : vector<1x1x64x16xbf16> to vector<64x16xbf16>
    %c2_95 = arith.constant 2 : index
    %c0_96 = arith.constant 0 : index
    %c0_97 = arith.constant 0 : index
    %96 = vector.load %arg2[%c2_95, %c0_96, %c0_97] : memref<4x16x8xbf16, #tpu.memory_space<vmem>>, vector<1x16x8xbf16>
    %97 = vector.shape_cast %96 : vector<1x16x8xbf16> to vector<16x8xbf16>
    %cst_98 = arith.constant dense<0.000000e+00> : vector<64x8xf32>
    %98 = tpu.matmul %95, %97, %cst_98 {dimension_numbers = #tpu.dot_dimension_numbers<[1], [0], [0], [1], [0, 0, 1, 1], [], []>} : vector<64x16xbf16>, vector<16x8xbf16>, vector<64x8xf32> -> vector<64x8xf32>
    %99 = arith.addf %93, %98 : vector<64x8xf32>
    %c0_99 = arith.constant 0 : index
    %c7 = arith.constant 7 : index
    %c0_100 = arith.constant 0 : index
    %c0_101 = arith.constant 0 : index
    %100 = vector.load %arg1[%c0_99, %c7, %c0_100, %c0_101] : memref<1x18x64x16xbf16, #tpu.memory_space<vmem>>, vector<1x1x64x16xbf16>
    %101 = vector.shape_cast %100 : vector<1x1x64x16xbf16> to vector<64x16xbf16>
    %c3_102 = arith.constant 3 : index
    %c0_103 = arith.constant 0 : index
    %c0_104 = arith.constant 0 : index
    %102 = vector.load %arg2[%c3_102, %c0_103, %c0_104] : memref<4x16x8xbf16, #tpu.memory_space<vmem>>, vector<1x16x8xbf16>
    %103 = vector.shape_cast %102 : vector<1x16x8xbf16> to vector<16x8xbf16>
    %cst_105 = arith.constant dense<0.000000e+00> : vector<64x8xf32>
    %104 = tpu.matmul %101, %103, %cst_105 {dimension_numbers = #tpu.dot_dimension_numbers<[1], [0], [0], [1], [0, 0, 1, 1], [], []>} : vector<64x16xbf16>, vector<16x8xbf16>, vector<64x8xf32> -> vector<64x8xf32>
    %105 = arith.addf %99, %104 : vector<64x8xf32>
    %106 = vector.broadcast %0 : vector<1x8xf32> to vector<64x8xf32>
    %107 = arith.addf %105, %106 : vector<64x8xf32>
    %cst_106 = arith.constant dense<0.000000e+00> : vector<8xf32>
    %108 = vector.multi_reduction <add>, %107, %cst_106 [0] : vector<64x8xf32> to vector<8xf32>
    %109 = vector.shape_cast %108 : vector<8xf32> to vector<1x8xf32>
    %110 = arith.addf %71, %109 : vector<1x8xf32>
    %111 = arith.mulf %107, %107 : vector<64x8xf32>
    %cst_107 = arith.constant dense<0.000000e+00> : vector<8xf32>
    %112 = vector.multi_reduction <add>, %111, %cst_107 [0] : vector<64x8xf32> to vector<8xf32>
    %113 = vector.shape_cast %112 : vector<8xf32> to vector<1x8xf32>
    %114 = arith.addf %75, %113 : vector<1x8xf32>
    %115 = vector.shape_cast %107 : vector<64x8xf32> to vector<1x64x8xf32>
    %116 = arith.truncf %115 : vector<1x64x8xf32> to vector<1x64x8xbf16>
    %c0_108 = arith.constant 0 : index
    %c2_109 = arith.constant 2 : index
    %c0_110 = arith.constant 0 : index
    %c0_111 = arith.constant 0 : index
    %117 = vector.load %arg4[%c0_108, %c2_109, %c0_110, %c0_111] : memref<1x8x64x8xbf16, #tpu.memory_space<vmem>>, vector<1x1x64x8xbf16>
    %118 = vector.shape_cast %117 : vector<1x1x64x8xbf16> to vector<1x64x8xbf16>
    %119 = vector.shape_cast %116 : vector<1x64x8xbf16> to vector<1x1x64x8xbf16>
    tpu.vector_store %arg4[%c0_108, %c2_109, %c0_110, %c0_111], %119 {strides = array<i32>} : memref<1x8x64x8xbf16, #tpu.memory_space<vmem>>, vector<1x1x64x8xbf16>,
    %cst_112 = arith.constant 0.000000e+00 : f32
    %120 = vector.broadcast %cst_112 : f32 to vector<64x8xf32>
    %c0_113 = arith.constant 0 : index
    %c6_114 = arith.constant 6 : index
    %c0_115 = arith.constant 0 : index
    %c0_116 = arith.constant 0 : index
    %121 = vector.load %arg1[%c0_113, %c6_114, %c0_115, %c0_116] : memref<1x18x64x16xbf16, #tpu.memory_space<vmem>>, vector<1x1x64x16xbf16>
    %122 = vector.shape_cast %121 : vector<1x1x64x16xbf16> to vector<64x16xbf16>
    %c0_117 = arith.constant 0 : index
    %c0_118 = arith.constant 0 : index
    %c0_119 = arith.constant 0 : index
    %123 = vector.load %arg2[%c0_117, %c0_118, %c0_119] : memref<4x16x8xbf16, #tpu.memory_space<vmem>>, vector<1x16x8xbf16>
    %124 = vector.shape_cast %123 : vector<1x16x8xbf16> to vector<16x8xbf16>
    %cst_120 = arith.constant dense<0.000000e+00> : vector<64x8xf32>
    %125 = tpu.matmul %122, %124, %cst_120 {dimension_numbers = #tpu.dot_dimension_numbers<[1], [0], [0], [1], [0, 0, 1, 1], [], []>} : vector<64x16xbf16>, vector<16x8xbf16>, vector<64x8xf32> -> vector<64x8xf32>
    %126 = arith.addf %120, %125 : vector<64x8xf32>
    %c0_121 = arith.constant 0 : index
    %c7_122 = arith.constant 7 : index
    %c0_123 = arith.constant 0 : index
    %c0_124 = arith.constant 0 : index
    %127 = vector.load %arg1[%c0_121, %c7_122, %c0_123, %c0_124] : memref<1x18x64x16xbf16, #tpu.memory_space<vmem>>, vector<1x1x64x16xbf16>
    %128 = vector.shape_cast %127 : vector<1x1x64x16xbf16> to vector<64x16xbf16>
    %c1_125 = arith.constant 1 : index
    %c0_126 = arith.constant 0 : index
    %c0_127 = arith.constant 0 : index
    %129 = vector.load %arg2[%c1_125, %c0_126, %c0_127] : memref<4x16x8xbf16, #tpu.memory_space<vmem>>, vector<1x16x8xbf16>
    %130 = vector.shape_cast %129 : vector<1x16x8xbf16> to vector<16x8xbf16>
    %cst_128 = arith.constant dense<0.000000e+00> : vector<64x8xf32>
    %131 = tpu.matmul %128, %130, %cst_128 {dimension_numbers = #tpu.dot_dimension_numbers<[1], [0], [0], [1], [0, 0, 1, 1], [], []>} : vector<64x16xbf16>, vector<16x8xbf16>, vector<64x8xf32> -> vector<64x8xf32>
    %132 = arith.addf %126, %131 : vector<64x8xf32>
    %c0_129 = arith.constant 0 : index
    %c8 = arith.constant 8 : index
    %c0_130 = arith.constant 0 : index
    %c0_131 = arith.constant 0 : index
    %133 = vector.load %arg1[%c0_129, %c8, %c0_130, %c0_131] : memref<1x18x64x16xbf16, #tpu.memory_space<vmem>>, vector<1x1x64x16xbf16>
    %134 = vector.shape_cast %133 : vector<1x1x64x16xbf16> to vector<64x16xbf16>
    %c2_132 = arith.constant 2 : index
    %c0_133 = arith.constant 0 : index
    %c0_134 = arith.constant 0 : index
    %135 = vector.load %arg2[%c2_132, %c0_133, %c0_134] : memref<4x16x8xbf16, #tpu.memory_space<vmem>>, vector<1x16x8xbf16>
    %136 = vector.shape_cast %135 : vector<1x16x8xbf16> to vector<16x8xbf16>
    %cst_135 = arith.constant dense<0.000000e+00> : vector<64x8xf32>
    %137 = tpu.matmul %134, %136, %cst_135 {dimension_numbers = #tpu.dot_dimension_numbers<[1], [0], [0], [1], [0, 0, 1, 1], [], []>} : vector<64x16xbf16>, vector<16x8xbf16>, vector<64x8xf32> -> vector<64x8xf32>
    %138 = arith.addf %132, %137 : vector<64x8xf32>
    %c0_136 = arith.constant 0 : index
    %c9 = arith.constant 9 : index
    %c0_137 = arith.constant 0 : index
    %c0_138 = arith.constant 0 : index
    %139 = vector.load %arg1[%c0_136, %c9, %c0_137, %c0_138] : memref<1x18x64x16xbf16, #tpu.memory_space<vmem>>, vector<1x1x64x16xbf16>
    %140 = vector.shape_cast %139 : vector<1x1x64x16xbf16> to vector<64x16xbf16>
    %c3_139 = arith.constant 3 : index
    %c0_140 = arith.constant 0 : index
    %c0_141 = arith.constant 0 : index
    %141 = vector.load %arg2[%c3_139, %c0_140, %c0_141] : memref<4x16x8xbf16, #tpu.memory_space<vmem>>, vector<1x16x8xbf16>
    %142 = vector.shape_cast %141 : vector<1x16x8xbf16> to vector<16x8xbf16>
    %cst_142 = arith.constant dense<0.000000e+00> : vector<64x8xf32>
    %143 = tpu.matmul %140, %142, %cst_142 {dimension_numbers = #tpu.dot_dimension_numbers<[1], [0], [0], [1], [0, 0, 1, 1], [], []>} : vector<64x16xbf16>, vector<16x8xbf16>, vector<64x8xf32> -> vector<64x8xf32>
    %144 = arith.addf %138, %143 : vector<64x8xf32>
    %145 = vector.broadcast %0 : vector<1x8xf32> to vector<64x8xf32>
    %146 = arith.addf %144, %145 : vector<64x8xf32>
    %cst_143 = arith.constant dense<0.000000e+00> : vector<8xf32>
    %147 = vector.multi_reduction <add>, %146, %cst_143 [0] : vector<64x8xf32> to vector<8xf32>
    %148 = vector.shape_cast %147 : vector<8xf32> to vector<1x8xf32>
    %149 = arith.addf %110, %148 : vector<1x8xf32>
    %150 = arith.mulf %146, %146 : vector<64x8xf32>
    %cst_144 = arith.constant dense<0.000000e+00> : vector<8xf32>
    %151 = vector.multi_reduction <add>, %150, %cst_144 [0] : vector<64x8xf32> to vector<8xf32>
    %152 = vector.shape_cast %151 : vector<8xf32> to vector<1x8xf32>
    %153 = arith.addf %114, %152 : vector<1x8xf32>
    %154 = vector.shape_cast %146 : vector<64x8xf32> to vector<1x64x8xf32>
    %155 = arith.truncf %154 : vector<1x64x8xf32> to vector<1x64x8xbf16>
    %c0_145 = arith.constant 0 : index
    %c3_146 = arith.constant 3 : index
    %c0_147 = arith.constant 0 : index
    %c0_148 = arith.constant 0 : index
    %156 = vector.load %arg4[%c0_145, %c3_146, %c0_147, %c0_148] : memref<1x8x64x8xbf16, #tpu.memory_space<vmem>>, vector<1x1x64x8xbf16>
    %157 = vector.shape_cast %156 : vector<1x1x64x8xbf16> to vector<1x64x8xbf16>
    %158 = vector.shape_cast %155 : vector<1x64x8xbf16> to vector<1x1x64x8xbf16>
    tpu.vector_store %arg4[%c0_145, %c3_146, %c0_147, %c0_148], %158 {strides = array<i32>} : memref<1x8x64x8xbf16, #tpu.memory_space<vmem>>, vector<1x1x64x8xbf16>,
    %cst_149 = arith.constant 0.000000e+00 : f32
    %159 = vector.broadcast %cst_149 : f32 to vector<64x8xf32>
    %c0_150 = arith.constant 0 : index
    %c8_151 = arith.constant 8 : index
    %c0_152 = arith.constant 0 : index
    %c0_153 = arith.constant 0 : index
    %160 = vector.load %arg1[%c0_150, %c8_151, %c0_152, %c0_153] : memref<1x18x64x16xbf16, #tpu.memory_space<vmem>>, vector<1x1x64x16xbf16>
    %161 = vector.shape_cast %160 : vector<1x1x64x16xbf16> to vector<64x16xbf16>
    %c0_154 = arith.constant 0 : index
    %c0_155 = arith.constant 0 : index
    %c0_156 = arith.constant 0 : index
    %162 = vector.load %arg2[%c0_154, %c0_155, %c0_156] : memref<4x16x8xbf16, #tpu.memory_space<vmem>>, vector<1x16x8xbf16>
    %163 = vector.shape_cast %162 : vector<1x16x8xbf16> to vector<16x8xbf16>
    %cst_157 = arith.constant dense<0.000000e+00> : vector<64x8xf32>
    %164 = tpu.matmul %161, %163, %cst_157 {dimension_numbers = #tpu.dot_dimension_numbers<[1], [0], [0], [1], [0, 0, 1, 1], [], []>} : vector<64x16xbf16>, vector<16x8xbf16>, vector<64x8xf32> -> vector<64x8xf32>
    %165 = arith.addf %159, %164 : vector<64x8xf32>
    %c0_158 = arith.constant 0 : index
    %c9_159 = arith.constant 9 : index
    %c0_160 = arith.constant 0 : index
    %c0_161 = arith.constant 0 : index
    %166 = vector.load %arg1[%c0_158, %c9_159, %c0_160, %c0_161] : memref<1x18x64x16xbf16, #tpu.memory_space<vmem>>, vector<1x1x64x16xbf16>
    %167 = vector.shape_cast %166 : vector<1x1x64x16xbf16> to vector<64x16xbf16>
    %c1_162 = arith.constant 1 : index
    %c0_163 = arith.constant 0 : index
    %c0_164 = arith.constant 0 : index
    %168 = vector.load %arg2[%c1_162, %c0_163, %c0_164] : memref<4x16x8xbf16, #tpu.memory_space<vmem>>, vector<1x16x8xbf16>
    %169 = vector.shape_cast %168 : vector<1x16x8xbf16> to vector<16x8xbf16>
    %cst_165 = arith.constant dense<0.000000e+00> : vector<64x8xf32>
    %170 = tpu.matmul %167, %169, %cst_165 {dimension_numbers = #tpu.dot_dimension_numbers<[1], [0], [0], [1], [0, 0, 1, 1], [], []>} : vector<64x16xbf16>, vector<16x8xbf16>, vector<64x8xf32> -> vector<64x8xf32>
    %171 = arith.addf %165, %170 : vector<64x8xf32>
    %c0_166 = arith.constant 0 : index
    %c10 = arith.constant 10 : index
    %c0_167 = arith.constant 0 : index
    %c0_168 = arith.constant 0 : index
    %172 = vector.load %arg1[%c0_166, %c10, %c0_167, %c0_168] : memref<1x18x64x16xbf16, #tpu.memory_space<vmem>>, vector<1x1x64x16xbf16>
    %173 = vector.shape_cast %172 : vector<1x1x64x16xbf16> to vector<64x16xbf16>
    %c2_169 = arith.constant 2 : index
    %c0_170 = arith.constant 0 : index
    %c0_171 = arith.constant 0 : index
    %174 = vector.load %arg2[%c2_169, %c0_170, %c0_171] : memref<4x16x8xbf16, #tpu.memory_space<vmem>>, vector<1x16x8xbf16>
    %175 = vector.shape_cast %174 : vector<1x16x8xbf16> to vector<16x8xbf16>
    %cst_172 = arith.constant dense<0.000000e+00> : vector<64x8xf32>
    %176 = tpu.matmul %173, %175, %cst_172 {dimension_numbers = #tpu.dot_dimension_numbers<[1], [0], [0], [1], [0, 0, 1, 1], [], []>} : vector<64x16xbf16>, vector<16x8xbf16>, vector<64x8xf32> -> vector<64x8xf32>
    %177 = arith.addf %171, %176 : vector<64x8xf32>
    %c0_173 = arith.constant 0 : index
    %c11 = arith.constant 11 : index
    %c0_174 = arith.constant 0 : index
    %c0_175 = arith.constant 0 : index
    %178 = vector.load %arg1[%c0_173, %c11, %c0_174, %c0_175] : memref<1x18x64x16xbf16, #tpu.memory_space<vmem>>, vector<1x1x64x16xbf16>
    %179 = vector.shape_cast %178 : vector<1x1x64x16xbf16> to vector<64x16xbf16>
    %c3_176 = arith.constant 3 : index
    %c0_177 = arith.constant 0 : index
    %c0_178 = arith.constant 0 : index
    %180 = vector.load %arg2[%c3_176, %c0_177, %c0_178] : memref<4x16x8xbf16, #tpu.memory_space<vmem>>, vector<1x16x8xbf16>
    %181 = vector.shape_cast %180 : vector<1x16x8xbf16> to vector<16x8xbf16>
    %cst_179 = arith.constant dense<0.000000e+00> : vector<64x8xf32>
    %182 = tpu.matmul %179, %181, %cst_179 {dimension_numbers = #tpu.dot_dimension_numbers<[1], [0], [0], [1], [0, 0, 1, 1], [], []>} : vector<64x16xbf16>, vector<16x8xbf16>, vector<64x8xf32> -> vector<64x8xf32>
    %183 = arith.addf %177, %182 : vector<64x8xf32>
    %184 = vector.broadcast %0 : vector<1x8xf32> to vector<64x8xf32>
    %185 = arith.addf %183, %184 : vector<64x8xf32>
    %cst_180 = arith.constant dense<0.000000e+00> : vector<8xf32>
    %186 = vector.multi_reduction <add>, %185, %cst_180 [0] : vector<64x8xf32> to vector<8xf32>
    %187 = vector.shape_cast %186 : vector<8xf32> to vector<1x8xf32>
    %188 = arith.addf %149, %187 : vector<1x8xf32>
    %189 = arith.mulf %185, %185 : vector<64x8xf32>
    %cst_181 = arith.constant dense<0.000000e+00> : vector<8xf32>
    %190 = vector.multi_reduction <add>, %189, %cst_181 [0] : vector<64x8xf32> to vector<8xf32>
    %191 = vector.shape_cast %190 : vector<8xf32> to vector<1x8xf32>
    %192 = arith.addf %153, %191 : vector<1x8xf32>
    %193 = vector.shape_cast %185 : vector<64x8xf32> to vector<1x64x8xf32>
    %194 = arith.truncf %193 : vector<1x64x8xf32> to vector<1x64x8xbf16>
    %c0_182 = arith.constant 0 : index
    %c4_183 = arith.constant 4 : index
    %c0_184 = arith.constant 0 : index
    %c0_185 = arith.constant 0 : index
    %195 = vector.load %arg4[%c0_182, %c4_183, %c0_184, %c0_185] : memref<1x8x64x8xbf16, #tpu.memory_space<vmem>>, vector<1x1x64x8xbf16>
    %196 = vector.shape_cast %195 : vector<1x1x64x8xbf16> to vector<1x64x8xbf16>
    %197 = vector.shape_cast %194 : vector<1x64x8xbf16> to vector<1x1x64x8xbf16>
    tpu.vector_store %arg4[%c0_182, %c4_183, %c0_184, %c0_185], %197 {strides = array<i32>} : memref<1x8x64x8xbf16, #tpu.memory_space<vmem>>, vector<1x1x64x8xbf16>,
    %cst_186 = arith.constant 0.000000e+00 : f32
    %198 = vector.broadcast %cst_186 : f32 to vector<64x8xf32>
    %c0_187 = arith.constant 0 : index
    %c10_188 = arith.constant 10 : index
    %c0_189 = arith.constant 0 : index
    %c0_190 = arith.constant 0 : index
    %199 = vector.load %arg1[%c0_187, %c10_188, %c0_189, %c0_190] : memref<1x18x64x16xbf16, #tpu.memory_space<vmem>>, vector<1x1x64x16xbf16>
    %200 = vector.shape_cast %199 : vector<1x1x64x16xbf16> to vector<64x16xbf16>
    %c0_191 = arith.constant 0 : index
    %c0_192 = arith.constant 0 : index
    %c0_193 = arith.constant 0 : index
    %201 = vector.load %arg2[%c0_191, %c0_192, %c0_193] : memref<4x16x8xbf16, #tpu.memory_space<vmem>>, vector<1x16x8xbf16>
    %202 = vector.shape_cast %201 : vector<1x16x8xbf16> to vector<16x8xbf16>
    %cst_194 = arith.constant dense<0.000000e+00> : vector<64x8xf32>
    %203 = tpu.matmul %200, %202, %cst_194 {dimension_numbers = #tpu.dot_dimension_numbers<[1], [0], [0], [1], [0, 0, 1, 1], [], []>} : vector<64x16xbf16>, vector<16x8xbf16>, vector<64x8xf32> -> vector<64x8xf32>
    %204 = arith.addf %198, %203 : vector<64x8xf32>
    %c0_195 = arith.constant 0 : index
    %c11_196 = arith.constant 11 : index
    %c0_197 = arith.constant 0 : index
    %c0_198 = arith.constant 0 : index
    %205 = vector.load %arg1[%c0_195, %c11_196, %c0_197, %c0_198] : memref<1x18x64x16xbf16, #tpu.memory_space<vmem>>, vector<1x1x64x16xbf16>
    %206 = vector.shape_cast %205 : vector<1x1x64x16xbf16> to vector<64x16xbf16>
    %c1_199 = arith.constant 1 : index
    %c0_200 = arith.constant 0 : index
    %c0_201 = arith.constant 0 : index
    %207 = vector.load %arg2[%c1_199, %c0_200, %c0_201] : memref<4x16x8xbf16, #tpu.memory_space<vmem>>, vector<1x16x8xbf16>
    %208 = vector.shape_cast %207 : vector<1x16x8xbf16> to vector<16x8xbf16>
    %cst_202 = arith.constant dense<0.000000e+00> : vector<64x8xf32>
    %209 = tpu.matmul %206, %208, %cst_202 {dimension_numbers = #tpu.dot_dimension_numbers<[1], [0], [0], [1], [0, 0, 1, 1], [], []>} : vector<64x16xbf16>, vector<16x8xbf16>, vector<64x8xf32> -> vector<64x8xf32>
    %210 = arith.addf %204, %209 : vector<64x8xf32>
    %c0_203 = arith.constant 0 : index
    %c12 = arith.constant 12 : index
    %c0_204 = arith.constant 0 : index
    %c0_205 = arith.constant 0 : index
    %211 = vector.load %arg1[%c0_203, %c12, %c0_204, %c0_205] : memref<1x18x64x16xbf16, #tpu.memory_space<vmem>>, vector<1x1x64x16xbf16>
    %212 = vector.shape_cast %211 : vector<1x1x64x16xbf16> to vector<64x16xbf16>
    %c2_206 = arith.constant 2 : index
    %c0_207 = arith.constant 0 : index
    %c0_208 = arith.constant 0 : index
    %213 = vector.load %arg2[%c2_206, %c0_207, %c0_208] : memref<4x16x8xbf16, #tpu.memory_space<vmem>>, vector<1x16x8xbf16>
    %214 = vector.shape_cast %213 : vector<1x16x8xbf16> to vector<16x8xbf16>
    %cst_209 = arith.constant dense<0.000000e+00> : vector<64x8xf32>
    %215 = tpu.matmul %212, %214, %cst_209 {dimension_numbers = #tpu.dot_dimension_numbers<[1], [0], [0], [1], [0, 0, 1, 1], [], []>} : vector<64x16xbf16>, vector<16x8xbf16>, vector<64x8xf32> -> vector<64x8xf32>
    %216 = arith.addf %210, %215 : vector<64x8xf32>
    %c0_210 = arith.constant 0 : index
    %c13 = arith.constant 13 : index
    %c0_211 = arith.constant 0 : index
    %c0_212 = arith.constant 0 : index
    %217 = vector.load %arg1[%c0_210, %c13, %c0_211, %c0_212] : memref<1x18x64x16xbf16, #tpu.memory_space<vmem>>, vector<1x1x64x16xbf16>
    %218 = vector.shape_cast %217 : vector<1x1x64x16xbf16> to vector<64x16xbf16>
    %c3_213 = arith.constant 3 : index
    %c0_214 = arith.constant 0 : index
    %c0_215 = arith.constant 0 : index
    %219 = vector.load %arg2[%c3_213, %c0_214, %c0_215] : memref<4x16x8xbf16, #tpu.memory_space<vmem>>, vector<1x16x8xbf16>
    %220 = vector.shape_cast %219 : vector<1x16x8xbf16> to vector<16x8xbf16>
    %cst_216 = arith.constant dense<0.000000e+00> : vector<64x8xf32>
    %221 = tpu.matmul %218, %220, %cst_216 {dimension_numbers = #tpu.dot_dimension_numbers<[1], [0], [0], [1], [0, 0, 1, 1], [], []>} : vector<64x16xbf16>, vector<16x8xbf16>, vector<64x8xf32> -> vector<64x8xf32>
    %222 = arith.addf %216, %221 : vector<64x8xf32>
    %223 = vector.broadcast %0 : vector<1x8xf32> to vector<64x8xf32>
    %224 = arith.addf %222, %223 : vector<64x8xf32>
    %cst_217 = arith.constant dense<0.000000e+00> : vector<8xf32>
    %225 = vector.multi_reduction <add>, %224, %cst_217 [0] : vector<64x8xf32> to vector<8xf32>
    %226 = vector.shape_cast %225 : vector<8xf32> to vector<1x8xf32>
    %227 = arith.addf %188, %226 : vector<1x8xf32>
    %228 = arith.mulf %224, %224 : vector<64x8xf32>
    %cst_218 = arith.constant dense<0.000000e+00> : vector<8xf32>
    %229 = vector.multi_reduction <add>, %228, %cst_218 [0] : vector<64x8xf32> to vector<8xf32>
    %230 = vector.shape_cast %229 : vector<8xf32> to vector<1x8xf32>
    %231 = arith.addf %192, %230 : vector<1x8xf32>
    %232 = vector.shape_cast %224 : vector<64x8xf32> to vector<1x64x8xf32>
    %233 = arith.truncf %232 : vector<1x64x8xf32> to vector<1x64x8xbf16>
    %c0_219 = arith.constant 0 : index
    %c5_220 = arith.constant 5 : index
    %c0_221 = arith.constant 0 : index
    %c0_222 = arith.constant 0 : index
    %234 = vector.load %arg4[%c0_219, %c5_220, %c0_221, %c0_222] : memref<1x8x64x8xbf16, #tpu.memory_space<vmem>>, vector<1x1x64x8xbf16>
    %235 = vector.shape_cast %234 : vector<1x1x64x8xbf16> to vector<1x64x8xbf16>
    %236 = vector.shape_cast %233 : vector<1x64x8xbf16> to vector<1x1x64x8xbf16>
    tpu.vector_store %arg4[%c0_219, %c5_220, %c0_221, %c0_222], %236 {strides = array<i32>} : memref<1x8x64x8xbf16, #tpu.memory_space<vmem>>, vector<1x1x64x8xbf16>,
    %cst_223 = arith.constant 0.000000e+00 : f32
    %237 = vector.broadcast %cst_223 : f32 to vector<64x8xf32>
    %c0_224 = arith.constant 0 : index
    %c12_225 = arith.constant 12 : index
    %c0_226 = arith.constant 0 : index
    %c0_227 = arith.constant 0 : index
    %238 = vector.load %arg1[%c0_224, %c12_225, %c0_226, %c0_227] : memref<1x18x64x16xbf16, #tpu.memory_space<vmem>>, vector<1x1x64x16xbf16>
    %239 = vector.shape_cast %238 : vector<1x1x64x16xbf16> to vector<64x16xbf16>
    %c0_228 = arith.constant 0 : index
    %c0_229 = arith.constant 0 : index
    %c0_230 = arith.constant 0 : index
    %240 = vector.load %arg2[%c0_228, %c0_229, %c0_230] : memref<4x16x8xbf16, #tpu.memory_space<vmem>>, vector<1x16x8xbf16>
    %241 = vector.shape_cast %240 : vector<1x16x8xbf16> to vector<16x8xbf16>
    %cst_231 = arith.constant dense<0.000000e+00> : vector<64x8xf32>
    %242 = tpu.matmul %239, %241, %cst_231 {dimension_numbers = #tpu.dot_dimension_numbers<[1], [0], [0], [1], [0, 0, 1, 1], [], []>} : vector<64x16xbf16>, vector<16x8xbf16>, vector<64x8xf32> -> vector<64x8xf32>
    %243 = arith.addf %237, %242 : vector<64x8xf32>
    %c0_232 = arith.constant 0 : index
    %c13_233 = arith.constant 13 : index
    %c0_234 = arith.constant 0 : index
    %c0_235 = arith.constant 0 : index
    %244 = vector.load %arg1[%c0_232, %c13_233, %c0_234, %c0_235] : memref<1x18x64x16xbf16, #tpu.memory_space<vmem>>, vector<1x1x64x16xbf16>
    %245 = vector.shape_cast %244 : vector<1x1x64x16xbf16> to vector<64x16xbf16>
    %c1_236 = arith.constant 1 : index
    %c0_237 = arith.constant 0 : index
    %c0_238 = arith.constant 0 : index
    %246 = vector.load %arg2[%c1_236, %c0_237, %c0_238] : memref<4x16x8xbf16, #tpu.memory_space<vmem>>, vector<1x16x8xbf16>
    %247 = vector.shape_cast %246 : vector<1x16x8xbf16> to vector<16x8xbf16>
    %cst_239 = arith.constant dense<0.000000e+00> : vector<64x8xf32>
    %248 = tpu.matmul %245, %247, %cst_239 {dimension_numbers = #tpu.dot_dimension_numbers<[1], [0], [0], [1], [0, 0, 1, 1], [], []>} : vector<64x16xbf16>, vector<16x8xbf16>, vector<64x8xf32> -> vector<64x8xf32>
    %249 = arith.addf %243, %248 : vector<64x8xf32>
    %c0_240 = arith.constant 0 : index
    %c14 = arith.constant 14 : index
    %c0_241 = arith.constant 0 : index
    %c0_242 = arith.constant 0 : index
    %250 = vector.load %arg1[%c0_240, %c14, %c0_241, %c0_242] : memref<1x18x64x16xbf16, #tpu.memory_space<vmem>>, vector<1x1x64x16xbf16>
    %251 = vector.shape_cast %250 : vector<1x1x64x16xbf16> to vector<64x16xbf16>
    %c2_243 = arith.constant 2 : index
    %c0_244 = arith.constant 0 : index
    %c0_245 = arith.constant 0 : index
    %252 = vector.load %arg2[%c2_243, %c0_244, %c0_245] : memref<4x16x8xbf16, #tpu.memory_space<vmem>>, vector<1x16x8xbf16>
    %253 = vector.shape_cast %252 : vector<1x16x8xbf16> to vector<16x8xbf16>
    %cst_246 = arith.constant dense<0.000000e+00> : vector<64x8xf32>
    %254 = tpu.matmul %251, %253, %cst_246 {dimension_numbers = #tpu.dot_dimension_numbers<[1], [0], [0], [1], [0, 0, 1, 1], [], []>} : vector<64x16xbf16>, vector<16x8xbf16>, vector<64x8xf32> -> vector<64x8xf32>
    %255 = arith.addf %249, %254 : vector<64x8xf32>
    %c0_247 = arith.constant 0 : index
    %c15 = arith.constant 15 : index
    %c0_248 = arith.constant 0 : index
    %c0_249 = arith.constant 0 : index
    %256 = vector.load %arg1[%c0_247, %c15, %c0_248, %c0_249] : memref<1x18x64x16xbf16, #tpu.memory_space<vmem>>, vector<1x1x64x16xbf16>
    %257 = vector.shape_cast %256 : vector<1x1x64x16xbf16> to vector<64x16xbf16>
    %c3_250 = arith.constant 3 : index
    %c0_251 = arith.constant 0 : index
    %c0_252 = arith.constant 0 : index
    %258 = vector.load %arg2[%c3_250, %c0_251, %c0_252] : memref<4x16x8xbf16, #tpu.memory_space<vmem>>, vector<1x16x8xbf16>
    %259 = vector.shape_cast %258 : vector<1x16x8xbf16> to vector<16x8xbf16>
    %cst_253 = arith.constant dense<0.000000e+00> : vector<64x8xf32>
    %260 = tpu.matmul %257, %259, %cst_253 {dimension_numbers = #tpu.dot_dimension_numbers<[1], [0], [0], [1], [0, 0, 1, 1], [], []>} : vector<64x16xbf16>, vector<16x8xbf16>, vector<64x8xf32> -> vector<64x8xf32>
    %261 = arith.addf %255, %260 : vector<64x8xf32>
    %262 = vector.broadcast %0 : vector<1x8xf32> to vector<64x8xf32>
    %263 = arith.addf %261, %262 : vector<64x8xf32>
    %cst_254 = arith.constant dense<0.000000e+00> : vector<8xf32>
    %264 = vector.multi_reduction <add>, %263, %cst_254 [0] : vector<64x8xf32> to vector<8xf32>
    %265 = vector.shape_cast %264 : vector<8xf32> to vector<1x8xf32>
    %266 = arith.addf %227, %265 : vector<1x8xf32>
    %267 = arith.mulf %263, %263 : vector<64x8xf32>
    %cst_255 = arith.constant dense<0.000000e+00> : vector<8xf32>
    %268 = vector.multi_reduction <add>, %267, %cst_255 [0] : vector<64x8xf32> to vector<8xf32>
    %269 = vector.shape_cast %268 : vector<8xf32> to vector<1x8xf32>
    %270 = arith.addf %231, %269 : vector<1x8xf32>
    %271 = vector.shape_cast %263 : vector<64x8xf32> to vector<1x64x8xf32>
    %272 = arith.truncf %271 : vector<1x64x8xf32> to vector<1x64x8xbf16>
    %c0_256 = arith.constant 0 : index
    %c6_257 = arith.constant 6 : index
    %c0_258 = arith.constant 0 : index
    %c0_259 = arith.constant 0 : index
    %273 = vector.load %arg4[%c0_256, %c6_257, %c0_258, %c0_259] : memref<1x8x64x8xbf16, #tpu.memory_space<vmem>>, vector<1x1x64x8xbf16>
    %274 = vector.shape_cast %273 : vector<1x1x64x8xbf16> to vector<1x64x8xbf16>
    %275 = vector.shape_cast %272 : vector<1x64x8xbf16> to vector<1x1x64x8xbf16>
    tpu.vector_store %arg4[%c0_256, %c6_257, %c0_258, %c0_259], %275 {strides = array<i32>} : memref<1x8x64x8xbf16, #tpu.memory_space<vmem>>, vector<1x1x64x8xbf16>,
    %cst_260 = arith.constant 0.000000e+00 : f32
    %276 = vector.broadcast %cst_260 : f32 to vector<64x8xf32>
    %c0_261 = arith.constant 0 : index
    %c14_262 = arith.constant 14 : index
    %c0_263 = arith.constant 0 : index
    %c0_264 = arith.constant 0 : index
    %277 = vector.load %arg1[%c0_261, %c14_262, %c0_263, %c0_264] : memref<1x18x64x16xbf16, #tpu.memory_space<vmem>>, vector<1x1x64x16xbf16>
    %278 = vector.shape_cast %277 : vector<1x1x64x16xbf16> to vector<64x16xbf16>
    %c0_265 = arith.constant 0 : index
    %c0_266 = arith.constant 0 : index
    %c0_267 = arith.constant 0 : index
    %279 = vector.load %arg2[%c0_265, %c0_266, %c0_267] : memref<4x16x8xbf16, #tpu.memory_space<vmem>>, vector<1x16x8xbf16>
    %280 = vector.shape_cast %279 : vector<1x16x8xbf16> to vector<16x8xbf16>
    %cst_268 = arith.constant dense<0.000000e+00> : vector<64x8xf32>
    %281 = tpu.matmul %278, %280, %cst_268 {dimension_numbers = #tpu.dot_dimension_numbers<[1], [0], [0], [1], [0, 0, 1, 1], [], []>} : vector<64x16xbf16>, vector<16x8xbf16>, vector<64x8xf32> -> vector<64x8xf32>
    %282 = arith.addf %276, %281 : vector<64x8xf32>
    %c0_269 = arith.constant 0 : index
    %c15_270 = arith.constant 15 : index
    %c0_271 = arith.constant 0 : index
    %c0_272 = arith.constant 0 : index
    %283 = vector.load %arg1[%c0_269, %c15_270, %c0_271, %c0_272] : memref<1x18x64x16xbf16, #tpu.memory_space<vmem>>, vector<1x1x64x16xbf16>
    %284 = vector.shape_cast %283 : vector<1x1x64x16xbf16> to vector<64x16xbf16>
    %c1_273 = arith.constant 1 : index
    %c0_274 = arith.constant 0 : index
    %c0_275 = arith.constant 0 : index
    %285 = vector.load %arg2[%c1_273, %c0_274, %c0_275] : memref<4x16x8xbf16, #tpu.memory_space<vmem>>, vector<1x16x8xbf16>
    %286 = vector.shape_cast %285 : vector<1x16x8xbf16> to vector<16x8xbf16>
    %cst_276 = arith.constant dense<0.000000e+00> : vector<64x8xf32>
    %287 = tpu.matmul %284, %286, %cst_276 {dimension_numbers = #tpu.dot_dimension_numbers<[1], [0], [0], [1], [0, 0, 1, 1], [], []>} : vector<64x16xbf16>, vector<16x8xbf16>, vector<64x8xf32> -> vector<64x8xf32>
    %288 = arith.addf %282, %287 : vector<64x8xf32>
    %c0_277 = arith.constant 0 : index
    %c16 = arith.constant 16 : index
    %c0_278 = arith.constant 0 : index
    %c0_279 = arith.constant 0 : index
    %289 = vector.load %arg1[%c0_277, %c16, %c0_278, %c0_279] : memref<1x18x64x16xbf16, #tpu.memory_space<vmem>>, vector<1x1x64x16xbf16>
    %290 = vector.shape_cast %289 : vector<1x1x64x16xbf16> to vector<64x16xbf16>
    %c2_280 = arith.constant 2 : index
    %c0_281 = arith.constant 0 : index
    %c0_282 = arith.constant 0 : index
    %291 = vector.load %arg2[%c2_280, %c0_281, %c0_282] : memref<4x16x8xbf16, #tpu.memory_space<vmem>>, vector<1x16x8xbf16>
    %292 = vector.shape_cast %291 : vector<1x16x8xbf16> to vector<16x8xbf16>
    %cst_283 = arith.constant dense<0.000000e+00> : vector<64x8xf32>
    %293 = tpu.matmul %290, %292, %cst_283 {dimension_numbers = #tpu.dot_dimension_numbers<[1], [0], [0], [1], [0, 0, 1, 1], [], []>} : vector<64x16xbf16>, vector<16x8xbf16>, vector<64x8xf32> -> vector<64x8xf32>
    %294 = arith.addf %288, %293 : vector<64x8xf32>
    %c0_284 = arith.constant 0 : index
    %c17 = arith.constant 17 : index
    %c0_285 = arith.constant 0 : index
    %c0_286 = arith.constant 0 : index
    %295 = vector.load %arg1[%c0_284, %c17, %c0_285, %c0_286] : memref<1x18x64x16xbf16, #tpu.memory_space<vmem>>, vector<1x1x64x16xbf16>
    %296 = vector.shape_cast %295 : vector<1x1x64x16xbf16> to vector<64x16xbf16>
    %c3_287 = arith.constant 3 : index
    %c0_288 = arith.constant 0 : index
    %c0_289 = arith.constant 0 : index
    %297 = vector.load %arg2[%c3_287, %c0_288, %c0_289] : memref<4x16x8xbf16, #tpu.memory_space<vmem>>, vector<1x16x8xbf16>
    %298 = vector.shape_cast %297 : vector<1x16x8xbf16> to vector<16x8xbf16>
    %cst_290 = arith.constant dense<0.000000e+00> : vector<64x8xf32>
    %299 = tpu.matmul %296, %298, %cst_290 {dimension_numbers = #tpu.dot_dimension_numbers<[1], [0], [0], [1], [0, 0, 1, 1], [], []>} : vector<64x16xbf16>, vector<16x8xbf16>, vector<64x8xf32> -> vector<64x8xf32>
    %300 = arith.addf %294, %299 : vector<64x8xf32>
    %301 = vector.broadcast %0 : vector<1x8xf32> to vector<64x8xf32>
    %302 = arith.addf %300, %301 : vector<64x8xf32>
    %cst_291 = arith.constant dense<0.000000e+00> : vector<8xf32>
    %303 = vector.multi_reduction <add>, %302, %cst_291 [0] : vector<64x8xf32> to vector<8xf32>
    %304 = vector.shape_cast %303 : vector<8xf32> to vector<1x8xf32>
    %305 = arith.addf %266, %304 : vector<1x8xf32>
    %306 = arith.mulf %302, %302 : vector<64x8xf32>
    %cst_292 = arith.constant dense<0.000000e+00> : vector<8xf32>
    %307 = vector.multi_reduction <add>, %306, %cst_292 [0] : vector<64x8xf32> to vector<8xf32>
    %308 = vector.shape_cast %307 : vector<8xf32> to vector<1x8xf32>
    %309 = arith.addf %270, %308 : vector<1x8xf32>
    %310 = vector.shape_cast %302 : vector<64x8xf32> to vector<1x64x8xf32>
    %311 = arith.truncf %310 : vector<1x64x8xf32> to vector<1x64x8xbf16>
    %c0_293 = arith.constant 0 : index
    %c7_294 = arith.constant 7 : index
    %c0_295 = arith.constant 0 : index
    %c0_296 = arith.constant 0 : index
    %312 = vector.load %arg4[%c0_293, %c7_294, %c0_295, %c0_296] : memref<1x8x64x8xbf16, #tpu.memory_space<vmem>>, vector<1x1x64x8xbf16>
    %313 = vector.shape_cast %312 : vector<1x1x64x8xbf16> to vector<1x64x8xbf16>
    %314 = vector.shape_cast %311 : vector<1x64x8xbf16> to vector<1x1x64x8xbf16>
    tpu.vector_store %arg4[%c0_293, %c7_294, %c0_295, %c0_296], %314 {strides = array<i32>} : memref<1x8x64x8xbf16, #tpu.memory_space<vmem>>, vector<1x1x64x8xbf16>,
    %c0_297 = arith.constant 0 : index
    %c0_298 = arith.constant 0 : index
    %c0_299 = arith.constant 0 : index
    %315 = vector.load %arg5[%c0_297, %c0_298, %c0_299] : memref<1x1x8xf32, #tpu.memory_space<vmem>>, vector<1x1x8xf32>
    %316 = vector.shape_cast %315 : vector<1x1x8xf32> to vector<1x8xf32>
    %317 = vector.shape_cast %305 : vector<1x8xf32> to vector<1x1x8xf32>
    tpu.vector_store %arg5[%c0_297, %c0_298, %c0_299], %317 {strides = array<i32>} : memref<1x1x8xf32, #tpu.memory_space<vmem>>, vector<1x1x8xf32>,
    %c0_300 = arith.constant 0 : index
    %c0_301 = arith.constant 0 : index
    %c0_302 = arith.constant 0 : index
    %318 = vector.load %arg6[%c0_300, %c0_301, %c0_302] : memref<1x1x8xf32, #tpu.memory_space<vmem>>, vector<1x1x8xf32>
    %319 = vector.shape_cast %318 : vector<1x1x8xf32> to vector<1x8xf32>
    %320 = vector.shape_cast %309 : vector<1x8xf32> to vector<1x1x8xf32>
    tpu.vector_store %arg6[%c0_300, %c0_301, %c0_302], %320 {strides = array<i32>} : memref<1x1x8xf32, #tpu.memory_space<vmem>>, vector<1x1x8xf32>,
    return
  }
  func.func @transform_0(%arg0: i32) -> (i32, i32, i32, i32) {
    %c0_i32 = arith.constant 0 : i32
    %c0_i32_0 = arith.constant 0 : i32
    %c0_i32_1 = arith.constant 0 : i32
    %c0_i32_2 = arith.constant 0 : i32
    return %arg0, %c0_i32, %c0_i32_0, %c0_i32_1 : i32, i32, i32, i32
  }
  func.func @transform_1(%arg0: i32) -> (i32, i32, i32) {
    %c0_i32 = arith.constant 0 : i32
    %c0_i32_0 = arith.constant 0 : i32
    %c0_i32_1 = arith.constant 0 : i32
    %c0_i32_2 = arith.constant 0 : i32
    return %c0_i32, %c0_i32_0, %c0_i32_1 : i32, i32, i32
  }
  func.func @transform_2(%arg0: i32) -> (i32, i32) {
    %c0_i32 = arith.constant 0 : i32
    %c0_i32_0 = arith.constant 0 : i32
    %c0_i32_1 = arith.constant 0 : i32
    return %c0_i32, %c0_i32_0 : i32, i32
  }
  func.func @transform_3(%arg0: i32) -> (i32, i32, i32, i32) {
    %c0_i32 = arith.constant 0 : i32
    %c0_i32_0 = arith.constant 0 : i32
    %c0_i32_1 = arith.constant 0 : i32
    %c0_i32_2 = arith.constant 0 : i32
    return %arg0, %c0_i32, %c0_i32_0, %c0_i32_1 : i32, i32, i32, i32
  }
  func.func @transform_4(%arg0: i32) -> (i32, i32, i32) {
    %c0_i32 = arith.constant 0 : i32
    %c0_i32_0 = arith.constant 0 : i32
    %c0_i32_1 = arith.constant 0 : i32
    return %arg0, %c0_i32, %c0_i32_0 : i32, i32, i32
  }
  func.func @transform_5(%arg0: i32) -> (i32, i32, i32) {
    %c0_i32 = arith.constant 0 : i32
    %c0_i32_0 = arith.constant 0 : i32
    %c0_i32_1 = arith.constant 0 : i32
    return %arg0, %c0_i32, %c0_i32_0 : i32, i32, i32
  }
}

module attributes {stable_mosaic.version = 11 : i64} {
  func.func @_bn_lrelu_kernel(%arg0: i32, %arg1: memref<8x512xbf16, #tpu.memory_space<vmem>>, %arg2: memref<1x512xf32, #tpu.memory_space<vmem>>, %arg3: memref<1x512xf32, #tpu.memory_space<vmem>>, %arg4: memref<8x512xbf16, #tpu.memory_space<vmem>>) attributes {dimension_semantics = [#tpu.dimension_semantics<parallel>], iteration_bounds = array<i64: 2>, scalar_prefetch = 0 : i64, scratch_operands = 0 : i64, tpu.core_type = #tpu.core_type<tc>, window_params = [{transform_indices = @transform_0, window_bounds = array<i64: 8, 512>}, {pipeline_mode = #tpu.pipeline_mode<synchronous>, transform_indices = @transform_1, window_bounds = array<i64: 1, 512>}, {pipeline_mode = #tpu.pipeline_mode<synchronous>, transform_indices = @transform_2, window_bounds = array<i64: 1, 512>}, {transform_indices = @transform_3, window_bounds = array<i64: 8, 512>}]} {
    %c0 = arith.constant 0 : index
    %c0_0 = arith.constant 0 : index
    %0 = vector.load %arg1[%c0, %c0_0] : memref<8x512xbf16, #tpu.memory_space<vmem>>, vector<8x512xbf16>
    %1 = arith.extf %0 : vector<8x512xbf16> to vector<8x512xf32>
    %c0_1 = arith.constant 0 : index
    %c0_2 = arith.constant 0 : index
    %2 = vector.load %arg2[%c0_1, %c0_2] : memref<1x512xf32, #tpu.memory_space<vmem>>, vector<1x512xf32>
    %3 = vector.broadcast %2 : vector<1x512xf32> to vector<8x512xf32>
    %4 = arith.mulf %1, %3 : vector<8x512xf32>
    %c0_3 = arith.constant 0 : index
    %c0_4 = arith.constant 0 : index
    %5 = vector.load %arg3[%c0_3, %c0_4] : memref<1x512xf32, #tpu.memory_space<vmem>>, vector<1x512xf32>
    %6 = vector.broadcast %5 : vector<1x512xf32> to vector<8x512xf32>
    %7 = arith.addf %4, %6 : vector<8x512xf32>
    %cst = arith.constant 0.000000e+00 : f32
    %8 = vector.broadcast %cst : f32 to vector<8x512xf32>
    %9 = arith.cmpf oge, %7, %8 : vector<8x512xf32>
    %cst_5 = arith.constant 2.000000e-01 : f32
    %10 = vector.broadcast %cst_5 : f32 to vector<8x512xf32>
    %11 = arith.mulf %10, %7 : vector<8x512xf32>
    %12 = arith.select %9, %7, %11 : vector<8x512xi1>, vector<8x512xf32>
    %13 = arith.truncf %12 : vector<8x512xf32> to vector<8x512xbf16>
    %c0_6 = arith.constant 0 : index
    %c0_7 = arith.constant 0 : index
    %14 = vector.load %arg4[%c0_6, %c0_7] : memref<8x512xbf16, #tpu.memory_space<vmem>>, vector<8x512xbf16>
    tpu.vector_store %arg4[%c0_6, %c0_7], %13 {strides = array<i32>} : memref<8x512xbf16, #tpu.memory_space<vmem>>, vector<8x512xbf16>,
    return
  }
  func.func @transform_0(%arg0: i32) -> (i32, i32) {
    %c0_i32 = arith.constant 0 : i32
    %c0_i32_0 = arith.constant 0 : i32
    return %arg0, %c0_i32 : i32, i32
  }
  func.func @transform_1(%arg0: i32) -> (i32, i32) {
    %c0_i32 = arith.constant 0 : i32
    %c0_i32_0 = arith.constant 0 : i32
    %c0_i32_1 = arith.constant 0 : i32
    return %c0_i32, %c0_i32_0 : i32, i32
  }
  func.func @transform_2(%arg0: i32) -> (i32, i32) {
    %c0_i32 = arith.constant 0 : i32
    %c0_i32_0 = arith.constant 0 : i32
    %c0_i32_1 = arith.constant 0 : i32
    return %c0_i32, %c0_i32_0 : i32, i32
  }
  func.func @transform_3(%arg0: i32) -> (i32, i32) {
    %c0_i32 = arith.constant 0 : i32
    %c0_i32_0 = arith.constant 0 : i32
    return %arg0, %c0_i32 : i32, i32
  }
}

module attributes {stable_mosaic.version = 11 : i64} {
  func.func @_conv_layer_kernel(%arg0: i32, %arg1: memref<1x10x16x128xbf16, #tpu.memory_space<vmem>>, %arg2: memref<4x128x16xbf16, #tpu.memory_space<vmem>>, %arg3: memref<1x16xf32, #tpu.memory_space<vmem>>, %arg4: memref<1x4x16x16xbf16, #tpu.memory_space<vmem>>, %arg5: memref<1x1x16xf32, #tpu.memory_space<vmem>>, %arg6: memref<1x1x16xf32, #tpu.memory_space<vmem>>) attributes {dimension_semantics = [#tpu.dimension_semantics<parallel>], iteration_bounds = array<i64: 2>, scalar_prefetch = 0 : i64, scratch_operands = 0 : i64, tpu.core_type = #tpu.core_type<tc>, window_params = [{transform_indices = @transform_0, window_bounds = array<i64: 1, 10, 16, 128>}, {pipeline_mode = #tpu.pipeline_mode<synchronous>, transform_indices = @transform_1, window_bounds = array<i64: 4, 128, 16>}, {pipeline_mode = #tpu.pipeline_mode<synchronous>, transform_indices = @transform_2, window_bounds = array<i64: 1, 16>}, {transform_indices = @transform_3, window_bounds = array<i64: 1, 4, 16, 16>}, {transform_indices = @transform_4, window_bounds = array<i64: 1, 1, 16>}, {transform_indices = @transform_5, window_bounds = array<i64: 1, 1, 16>}]} {
    %c0 = arith.constant 0 : index
    %c0_0 = arith.constant 0 : index
    %0 = vector.load %arg3[%c0, %c0_0] : memref<1x16xf32, #tpu.memory_space<vmem>>, vector<1x16xf32>
    %cst = arith.constant 0.000000e+00 : f32
    %1 = vector.broadcast %cst : f32 to vector<1x16xf32>
    %cst_1 = arith.constant 0.000000e+00 : f32
    %2 = vector.broadcast %cst_1 : f32 to vector<1x16xf32>
    %cst_2 = arith.constant 0.000000e+00 : f32
    %3 = vector.broadcast %cst_2 : f32 to vector<16x16xf32>
    %c0_3 = arith.constant 0 : index
    %c0_4 = arith.constant 0 : index
    %c0_5 = arith.constant 0 : index
    %c0_6 = arith.constant 0 : index
    %4 = vector.load %arg1[%c0_3, %c0_4, %c0_5, %c0_6] : memref<1x10x16x128xbf16, #tpu.memory_space<vmem>>, vector<1x1x16x128xbf16>
    %5 = vector.shape_cast %4 : vector<1x1x16x128xbf16> to vector<16x128xbf16>
    %c0_7 = arith.constant 0 : index
    %c0_8 = arith.constant 0 : index
    %c0_9 = arith.constant 0 : index
    %6 = vector.load %arg2[%c0_7, %c0_8, %c0_9] : memref<4x128x16xbf16, #tpu.memory_space<vmem>>, vector<1x128x16xbf16>
    %7 = vector.shape_cast %6 : vector<1x128x16xbf16> to vector<128x16xbf16>
    %cst_10 = arith.constant dense<0.000000e+00> : vector<16x16xf32>
    %8 = tpu.matmul %5, %7, %cst_10 {dimension_numbers = #tpu.dot_dimension_numbers<[1], [0], [0], [1], [0, 0, 1, 1], [], []>} : vector<16x128xbf16>, vector<128x16xbf16>, vector<16x16xf32> -> vector<16x16xf32>
    %9 = arith.addf %3, %8 : vector<16x16xf32>
    %c0_11 = arith.constant 0 : index
    %c1 = arith.constant 1 : index
    %c0_12 = arith.constant 0 : index
    %c0_13 = arith.constant 0 : index
    %10 = vector.load %arg1[%c0_11, %c1, %c0_12, %c0_13] : memref<1x10x16x128xbf16, #tpu.memory_space<vmem>>, vector<1x1x16x128xbf16>
    %11 = vector.shape_cast %10 : vector<1x1x16x128xbf16> to vector<16x128xbf16>
    %c1_14 = arith.constant 1 : index
    %c0_15 = arith.constant 0 : index
    %c0_16 = arith.constant 0 : index
    %12 = vector.load %arg2[%c1_14, %c0_15, %c0_16] : memref<4x128x16xbf16, #tpu.memory_space<vmem>>, vector<1x128x16xbf16>
    %13 = vector.shape_cast %12 : vector<1x128x16xbf16> to vector<128x16xbf16>
    %cst_17 = arith.constant dense<0.000000e+00> : vector<16x16xf32>
    %14 = tpu.matmul %11, %13, %cst_17 {dimension_numbers = #tpu.dot_dimension_numbers<[1], [0], [0], [1], [0, 0, 1, 1], [], []>} : vector<16x128xbf16>, vector<128x16xbf16>, vector<16x16xf32> -> vector<16x16xf32>
    %15 = arith.addf %9, %14 : vector<16x16xf32>
    %c0_18 = arith.constant 0 : index
    %c2 = arith.constant 2 : index
    %c0_19 = arith.constant 0 : index
    %c0_20 = arith.constant 0 : index
    %16 = vector.load %arg1[%c0_18, %c2, %c0_19, %c0_20] : memref<1x10x16x128xbf16, #tpu.memory_space<vmem>>, vector<1x1x16x128xbf16>
    %17 = vector.shape_cast %16 : vector<1x1x16x128xbf16> to vector<16x128xbf16>
    %c2_21 = arith.constant 2 : index
    %c0_22 = arith.constant 0 : index
    %c0_23 = arith.constant 0 : index
    %18 = vector.load %arg2[%c2_21, %c0_22, %c0_23] : memref<4x128x16xbf16, #tpu.memory_space<vmem>>, vector<1x128x16xbf16>
    %19 = vector.shape_cast %18 : vector<1x128x16xbf16> to vector<128x16xbf16>
    %cst_24 = arith.constant dense<0.000000e+00> : vector<16x16xf32>
    %20 = tpu.matmul %17, %19, %cst_24 {dimension_numbers = #tpu.dot_dimension_numbers<[1], [0], [0], [1], [0, 0, 1, 1], [], []>} : vector<16x128xbf16>, vector<128x16xbf16>, vector<16x16xf32> -> vector<16x16xf32>
    %21 = arith.addf %15, %20 : vector<16x16xf32>
    %c0_25 = arith.constant 0 : index
    %c3 = arith.constant 3 : index
    %c0_26 = arith.constant 0 : index
    %c0_27 = arith.constant 0 : index
    %22 = vector.load %arg1[%c0_25, %c3, %c0_26, %c0_27] : memref<1x10x16x128xbf16, #tpu.memory_space<vmem>>, vector<1x1x16x128xbf16>
    %23 = vector.shape_cast %22 : vector<1x1x16x128xbf16> to vector<16x128xbf16>
    %c3_28 = arith.constant 3 : index
    %c0_29 = arith.constant 0 : index
    %c0_30 = arith.constant 0 : index
    %24 = vector.load %arg2[%c3_28, %c0_29, %c0_30] : memref<4x128x16xbf16, #tpu.memory_space<vmem>>, vector<1x128x16xbf16>
    %25 = vector.shape_cast %24 : vector<1x128x16xbf16> to vector<128x16xbf16>
    %cst_31 = arith.constant dense<0.000000e+00> : vector<16x16xf32>
    %26 = tpu.matmul %23, %25, %cst_31 {dimension_numbers = #tpu.dot_dimension_numbers<[1], [0], [0], [1], [0, 0, 1, 1], [], []>} : vector<16x128xbf16>, vector<128x16xbf16>, vector<16x16xf32> -> vector<16x16xf32>
    %27 = arith.addf %21, %26 : vector<16x16xf32>
    %28 = vector.broadcast %0 : vector<1x16xf32> to vector<16x16xf32>
    %29 = arith.addf %27, %28 : vector<16x16xf32>
    %cst_32 = arith.constant dense<0.000000e+00> : vector<16xf32>
    %30 = vector.multi_reduction <add>, %29, %cst_32 [0] : vector<16x16xf32> to vector<16xf32>
    %31 = vector.shape_cast %30 : vector<16xf32> to vector<1x16xf32>
    %32 = arith.addf %1, %31 : vector<1x16xf32>
    %33 = arith.mulf %29, %29 : vector<16x16xf32>
    %cst_33 = arith.constant dense<0.000000e+00> : vector<16xf32>
    %34 = vector.multi_reduction <add>, %33, %cst_33 [0] : vector<16x16xf32> to vector<16xf32>
    %35 = vector.shape_cast %34 : vector<16xf32> to vector<1x16xf32>
    %36 = arith.addf %2, %35 : vector<1x16xf32>
    %37 = vector.shape_cast %29 : vector<16x16xf32> to vector<1x16x16xf32>
    %38 = arith.truncf %37 : vector<1x16x16xf32> to vector<1x16x16xbf16>
    %c0_34 = arith.constant 0 : index
    %c0_35 = arith.constant 0 : index
    %c0_36 = arith.constant 0 : index
    %c0_37 = arith.constant 0 : index
    %39 = vector.load %arg4[%c0_34, %c0_35, %c0_36, %c0_37] : memref<1x4x16x16xbf16, #tpu.memory_space<vmem>>, vector<1x1x16x16xbf16>
    %40 = vector.shape_cast %39 : vector<1x1x16x16xbf16> to vector<1x16x16xbf16>
    %41 = vector.shape_cast %38 : vector<1x16x16xbf16> to vector<1x1x16x16xbf16>
    tpu.vector_store %arg4[%c0_34, %c0_35, %c0_36, %c0_37], %41 {strides = array<i32>} : memref<1x4x16x16xbf16, #tpu.memory_space<vmem>>, vector<1x1x16x16xbf16>,
    %cst_38 = arith.constant 0.000000e+00 : f32
    %42 = vector.broadcast %cst_38 : f32 to vector<16x16xf32>
    %c0_39 = arith.constant 0 : index
    %c2_40 = arith.constant 2 : index
    %c0_41 = arith.constant 0 : index
    %c0_42 = arith.constant 0 : index
    %43 = vector.load %arg1[%c0_39, %c2_40, %c0_41, %c0_42] : memref<1x10x16x128xbf16, #tpu.memory_space<vmem>>, vector<1x1x16x128xbf16>
    %44 = vector.shape_cast %43 : vector<1x1x16x128xbf16> to vector<16x128xbf16>
    %c0_43 = arith.constant 0 : index
    %c0_44 = arith.constant 0 : index
    %c0_45 = arith.constant 0 : index
    %45 = vector.load %arg2[%c0_43, %c0_44, %c0_45] : memref<4x128x16xbf16, #tpu.memory_space<vmem>>, vector<1x128x16xbf16>
    %46 = vector.shape_cast %45 : vector<1x128x16xbf16> to vector<128x16xbf16>
    %cst_46 = arith.constant dense<0.000000e+00> : vector<16x16xf32>
    %47 = tpu.matmul %44, %46, %cst_46 {dimension_numbers = #tpu.dot_dimension_numbers<[1], [0], [0], [1], [0, 0, 1, 1], [], []>} : vector<16x128xbf16>, vector<128x16xbf16>, vector<16x16xf32> -> vector<16x16xf32>
    %48 = arith.addf %42, %47 : vector<16x16xf32>
    %c0_47 = arith.constant 0 : index
    %c3_48 = arith.constant 3 : index
    %c0_49 = arith.constant 0 : index
    %c0_50 = arith.constant 0 : index
    %49 = vector.load %arg1[%c0_47, %c3_48, %c0_49, %c0_50] : memref<1x10x16x128xbf16, #tpu.memory_space<vmem>>, vector<1x1x16x128xbf16>
    %50 = vector.shape_cast %49 : vector<1x1x16x128xbf16> to vector<16x128xbf16>
    %c1_51 = arith.constant 1 : index
    %c0_52 = arith.constant 0 : index
    %c0_53 = arith.constant 0 : index
    %51 = vector.load %arg2[%c1_51, %c0_52, %c0_53] : memref<4x128x16xbf16, #tpu.memory_space<vmem>>, vector<1x128x16xbf16>
    %52 = vector.shape_cast %51 : vector<1x128x16xbf16> to vector<128x16xbf16>
    %cst_54 = arith.constant dense<0.000000e+00> : vector<16x16xf32>
    %53 = tpu.matmul %50, %52, %cst_54 {dimension_numbers = #tpu.dot_dimension_numbers<[1], [0], [0], [1], [0, 0, 1, 1], [], []>} : vector<16x128xbf16>, vector<128x16xbf16>, vector<16x16xf32> -> vector<16x16xf32>
    %54 = arith.addf %48, %53 : vector<16x16xf32>
    %c0_55 = arith.constant 0 : index
    %c4 = arith.constant 4 : index
    %c0_56 = arith.constant 0 : index
    %c0_57 = arith.constant 0 : index
    %55 = vector.load %arg1[%c0_55, %c4, %c0_56, %c0_57] : memref<1x10x16x128xbf16, #tpu.memory_space<vmem>>, vector<1x1x16x128xbf16>
    %56 = vector.shape_cast %55 : vector<1x1x16x128xbf16> to vector<16x128xbf16>
    %c2_58 = arith.constant 2 : index
    %c0_59 = arith.constant 0 : index
    %c0_60 = arith.constant 0 : index
    %57 = vector.load %arg2[%c2_58, %c0_59, %c0_60] : memref<4x128x16xbf16, #tpu.memory_space<vmem>>, vector<1x128x16xbf16>
    %58 = vector.shape_cast %57 : vector<1x128x16xbf16> to vector<128x16xbf16>
    %cst_61 = arith.constant dense<0.000000e+00> : vector<16x16xf32>
    %59 = tpu.matmul %56, %58, %cst_61 {dimension_numbers = #tpu.dot_dimension_numbers<[1], [0], [0], [1], [0, 0, 1, 1], [], []>} : vector<16x128xbf16>, vector<128x16xbf16>, vector<16x16xf32> -> vector<16x16xf32>
    %60 = arith.addf %54, %59 : vector<16x16xf32>
    %c0_62 = arith.constant 0 : index
    %c5 = arith.constant 5 : index
    %c0_63 = arith.constant 0 : index
    %c0_64 = arith.constant 0 : index
    %61 = vector.load %arg1[%c0_62, %c5, %c0_63, %c0_64] : memref<1x10x16x128xbf16, #tpu.memory_space<vmem>>, vector<1x1x16x128xbf16>
    %62 = vector.shape_cast %61 : vector<1x1x16x128xbf16> to vector<16x128xbf16>
    %c3_65 = arith.constant 3 : index
    %c0_66 = arith.constant 0 : index
    %c0_67 = arith.constant 0 : index
    %63 = vector.load %arg2[%c3_65, %c0_66, %c0_67] : memref<4x128x16xbf16, #tpu.memory_space<vmem>>, vector<1x128x16xbf16>
    %64 = vector.shape_cast %63 : vector<1x128x16xbf16> to vector<128x16xbf16>
    %cst_68 = arith.constant dense<0.000000e+00> : vector<16x16xf32>
    %65 = tpu.matmul %62, %64, %cst_68 {dimension_numbers = #tpu.dot_dimension_numbers<[1], [0], [0], [1], [0, 0, 1, 1], [], []>} : vector<16x128xbf16>, vector<128x16xbf16>, vector<16x16xf32> -> vector<16x16xf32>
    %66 = arith.addf %60, %65 : vector<16x16xf32>
    %67 = vector.broadcast %0 : vector<1x16xf32> to vector<16x16xf32>
    %68 = arith.addf %66, %67 : vector<16x16xf32>
    %cst_69 = arith.constant dense<0.000000e+00> : vector<16xf32>
    %69 = vector.multi_reduction <add>, %68, %cst_69 [0] : vector<16x16xf32> to vector<16xf32>
    %70 = vector.shape_cast %69 : vector<16xf32> to vector<1x16xf32>
    %71 = arith.addf %32, %70 : vector<1x16xf32>
    %72 = arith.mulf %68, %68 : vector<16x16xf32>
    %cst_70 = arith.constant dense<0.000000e+00> : vector<16xf32>
    %73 = vector.multi_reduction <add>, %72, %cst_70 [0] : vector<16x16xf32> to vector<16xf32>
    %74 = vector.shape_cast %73 : vector<16xf32> to vector<1x16xf32>
    %75 = arith.addf %36, %74 : vector<1x16xf32>
    %76 = vector.shape_cast %68 : vector<16x16xf32> to vector<1x16x16xf32>
    %77 = arith.truncf %76 : vector<1x16x16xf32> to vector<1x16x16xbf16>
    %c0_71 = arith.constant 0 : index
    %c1_72 = arith.constant 1 : index
    %c0_73 = arith.constant 0 : index
    %c0_74 = arith.constant 0 : index
    %78 = vector.load %arg4[%c0_71, %c1_72, %c0_73, %c0_74] : memref<1x4x16x16xbf16, #tpu.memory_space<vmem>>, vector<1x1x16x16xbf16>
    %79 = vector.shape_cast %78 : vector<1x1x16x16xbf16> to vector<1x16x16xbf16>
    %80 = vector.shape_cast %77 : vector<1x16x16xbf16> to vector<1x1x16x16xbf16>
    tpu.vector_store %arg4[%c0_71, %c1_72, %c0_73, %c0_74], %80 {strides = array<i32>} : memref<1x4x16x16xbf16, #tpu.memory_space<vmem>>, vector<1x1x16x16xbf16>,
    %cst_75 = arith.constant 0.000000e+00 : f32
    %81 = vector.broadcast %cst_75 : f32 to vector<16x16xf32>
    %c0_76 = arith.constant 0 : index
    %c4_77 = arith.constant 4 : index
    %c0_78 = arith.constant 0 : index
    %c0_79 = arith.constant 0 : index
    %82 = vector.load %arg1[%c0_76, %c4_77, %c0_78, %c0_79] : memref<1x10x16x128xbf16, #tpu.memory_space<vmem>>, vector<1x1x16x128xbf16>
    %83 = vector.shape_cast %82 : vector<1x1x16x128xbf16> to vector<16x128xbf16>
    %c0_80 = arith.constant 0 : index
    %c0_81 = arith.constant 0 : index
    %c0_82 = arith.constant 0 : index
    %84 = vector.load %arg2[%c0_80, %c0_81, %c0_82] : memref<4x128x16xbf16, #tpu.memory_space<vmem>>, vector<1x128x16xbf16>
    %85 = vector.shape_cast %84 : vector<1x128x16xbf16> to vector<128x16xbf16>
    %cst_83 = arith.constant dense<0.000000e+00> : vector<16x16xf32>
    %86 = tpu.matmul %83, %85, %cst_83 {dimension_numbers = #tpu.dot_dimension_numbers<[1], [0], [0], [1], [0, 0, 1, 1], [], []>} : vector<16x128xbf16>, vector<128x16xbf16>, vector<16x16xf32> -> vector<16x16xf32>
    %87 = arith.addf %81, %86 : vector<16x16xf32>
    %c0_84 = arith.constant 0 : index
    %c5_85 = arith.constant 5 : index
    %c0_86 = arith.constant 0 : index
    %c0_87 = arith.constant 0 : index
    %88 = vector.load %arg1[%c0_84, %c5_85, %c0_86, %c0_87] : memref<1x10x16x128xbf16, #tpu.memory_space<vmem>>, vector<1x1x16x128xbf16>
    %89 = vector.shape_cast %88 : vector<1x1x16x128xbf16> to vector<16x128xbf16>
    %c1_88 = arith.constant 1 : index
    %c0_89 = arith.constant 0 : index
    %c0_90 = arith.constant 0 : index
    %90 = vector.load %arg2[%c1_88, %c0_89, %c0_90] : memref<4x128x16xbf16, #tpu.memory_space<vmem>>, vector<1x128x16xbf16>
    %91 = vector.shape_cast %90 : vector<1x128x16xbf16> to vector<128x16xbf16>
    %cst_91 = arith.constant dense<0.000000e+00> : vector<16x16xf32>
    %92 = tpu.matmul %89, %91, %cst_91 {dimension_numbers = #tpu.dot_dimension_numbers<[1], [0], [0], [1], [0, 0, 1, 1], [], []>} : vector<16x128xbf16>, vector<128x16xbf16>, vector<16x16xf32> -> vector<16x16xf32>
    %93 = arith.addf %87, %92 : vector<16x16xf32>
    %c0_92 = arith.constant 0 : index
    %c6 = arith.constant 6 : index
    %c0_93 = arith.constant 0 : index
    %c0_94 = arith.constant 0 : index
    %94 = vector.load %arg1[%c0_92, %c6, %c0_93, %c0_94] : memref<1x10x16x128xbf16, #tpu.memory_space<vmem>>, vector<1x1x16x128xbf16>
    %95 = vector.shape_cast %94 : vector<1x1x16x128xbf16> to vector<16x128xbf16>
    %c2_95 = arith.constant 2 : index
    %c0_96 = arith.constant 0 : index
    %c0_97 = arith.constant 0 : index
    %96 = vector.load %arg2[%c2_95, %c0_96, %c0_97] : memref<4x128x16xbf16, #tpu.memory_space<vmem>>, vector<1x128x16xbf16>
    %97 = vector.shape_cast %96 : vector<1x128x16xbf16> to vector<128x16xbf16>
    %cst_98 = arith.constant dense<0.000000e+00> : vector<16x16xf32>
    %98 = tpu.matmul %95, %97, %cst_98 {dimension_numbers = #tpu.dot_dimension_numbers<[1], [0], [0], [1], [0, 0, 1, 1], [], []>} : vector<16x128xbf16>, vector<128x16xbf16>, vector<16x16xf32> -> vector<16x16xf32>
    %99 = arith.addf %93, %98 : vector<16x16xf32>
    %c0_99 = arith.constant 0 : index
    %c7 = arith.constant 7 : index
    %c0_100 = arith.constant 0 : index
    %c0_101 = arith.constant 0 : index
    %100 = vector.load %arg1[%c0_99, %c7, %c0_100, %c0_101] : memref<1x10x16x128xbf16, #tpu.memory_space<vmem>>, vector<1x1x16x128xbf16>
    %101 = vector.shape_cast %100 : vector<1x1x16x128xbf16> to vector<16x128xbf16>
    %c3_102 = arith.constant 3 : index
    %c0_103 = arith.constant 0 : index
    %c0_104 = arith.constant 0 : index
    %102 = vector.load %arg2[%c3_102, %c0_103, %c0_104] : memref<4x128x16xbf16, #tpu.memory_space<vmem>>, vector<1x128x16xbf16>
    %103 = vector.shape_cast %102 : vector<1x128x16xbf16> to vector<128x16xbf16>
    %cst_105 = arith.constant dense<0.000000e+00> : vector<16x16xf32>
    %104 = tpu.matmul %101, %103, %cst_105 {dimension_numbers = #tpu.dot_dimension_numbers<[1], [0], [0], [1], [0, 0, 1, 1], [], []>} : vector<16x128xbf16>, vector<128x16xbf16>, vector<16x16xf32> -> vector<16x16xf32>
    %105 = arith.addf %99, %104 : vector<16x16xf32>
    %106 = vector.broadcast %0 : vector<1x16xf32> to vector<16x16xf32>
    %107 = arith.addf %105, %106 : vector<16x16xf32>
    %cst_106 = arith.constant dense<0.000000e+00> : vector<16xf32>
    %108 = vector.multi_reduction <add>, %107, %cst_106 [0] : vector<16x16xf32> to vector<16xf32>
    %109 = vector.shape_cast %108 : vector<16xf32> to vector<1x16xf32>
    %110 = arith.addf %71, %109 : vector<1x16xf32>
    %111 = arith.mulf %107, %107 : vector<16x16xf32>
    %cst_107 = arith.constant dense<0.000000e+00> : vector<16xf32>
    %112 = vector.multi_reduction <add>, %111, %cst_107 [0] : vector<16x16xf32> to vector<16xf32>
    %113 = vector.shape_cast %112 : vector<16xf32> to vector<1x16xf32>
    %114 = arith.addf %75, %113 : vector<1x16xf32>
    %115 = vector.shape_cast %107 : vector<16x16xf32> to vector<1x16x16xf32>
    %116 = arith.truncf %115 : vector<1x16x16xf32> to vector<1x16x16xbf16>
    %c0_108 = arith.constant 0 : index
    %c2_109 = arith.constant 2 : index
    %c0_110 = arith.constant 0 : index
    %c0_111 = arith.constant 0 : index
    %117 = vector.load %arg4[%c0_108, %c2_109, %c0_110, %c0_111] : memref<1x4x16x16xbf16, #tpu.memory_space<vmem>>, vector<1x1x16x16xbf16>
    %118 = vector.shape_cast %117 : vector<1x1x16x16xbf16> to vector<1x16x16xbf16>
    %119 = vector.shape_cast %116 : vector<1x16x16xbf16> to vector<1x1x16x16xbf16>
    tpu.vector_store %arg4[%c0_108, %c2_109, %c0_110, %c0_111], %119 {strides = array<i32>} : memref<1x4x16x16xbf16, #tpu.memory_space<vmem>>, vector<1x1x16x16xbf16>,
    %cst_112 = arith.constant 0.000000e+00 : f32
    %120 = vector.broadcast %cst_112 : f32 to vector<16x16xf32>
    %c0_113 = arith.constant 0 : index
    %c6_114 = arith.constant 6 : index
    %c0_115 = arith.constant 0 : index
    %c0_116 = arith.constant 0 : index
    %121 = vector.load %arg1[%c0_113, %c6_114, %c0_115, %c0_116] : memref<1x10x16x128xbf16, #tpu.memory_space<vmem>>, vector<1x1x16x128xbf16>
    %122 = vector.shape_cast %121 : vector<1x1x16x128xbf16> to vector<16x128xbf16>
    %c0_117 = arith.constant 0 : index
    %c0_118 = arith.constant 0 : index
    %c0_119 = arith.constant 0 : index
    %123 = vector.load %arg2[%c0_117, %c0_118, %c0_119] : memref<4x128x16xbf16, #tpu.memory_space<vmem>>, vector<1x128x16xbf16>
    %124 = vector.shape_cast %123 : vector<1x128x16xbf16> to vector<128x16xbf16>
    %cst_120 = arith.constant dense<0.000000e+00> : vector<16x16xf32>
    %125 = tpu.matmul %122, %124, %cst_120 {dimension_numbers = #tpu.dot_dimension_numbers<[1], [0], [0], [1], [0, 0, 1, 1], [], []>} : vector<16x128xbf16>, vector<128x16xbf16>, vector<16x16xf32> -> vector<16x16xf32>
    %126 = arith.addf %120, %125 : vector<16x16xf32>
    %c0_121 = arith.constant 0 : index
    %c7_122 = arith.constant 7 : index
    %c0_123 = arith.constant 0 : index
    %c0_124 = arith.constant 0 : index
    %127 = vector.load %arg1[%c0_121, %c7_122, %c0_123, %c0_124] : memref<1x10x16x128xbf16, #tpu.memory_space<vmem>>, vector<1x1x16x128xbf16>
    %128 = vector.shape_cast %127 : vector<1x1x16x128xbf16> to vector<16x128xbf16>
    %c1_125 = arith.constant 1 : index
    %c0_126 = arith.constant 0 : index
    %c0_127 = arith.constant 0 : index
    %129 = vector.load %arg2[%c1_125, %c0_126, %c0_127] : memref<4x128x16xbf16, #tpu.memory_space<vmem>>, vector<1x128x16xbf16>
    %130 = vector.shape_cast %129 : vector<1x128x16xbf16> to vector<128x16xbf16>
    %cst_128 = arith.constant dense<0.000000e+00> : vector<16x16xf32>
    %131 = tpu.matmul %128, %130, %cst_128 {dimension_numbers = #tpu.dot_dimension_numbers<[1], [0], [0], [1], [0, 0, 1, 1], [], []>} : vector<16x128xbf16>, vector<128x16xbf16>, vector<16x16xf32> -> vector<16x16xf32>
    %132 = arith.addf %126, %131 : vector<16x16xf32>
    %c0_129 = arith.constant 0 : index
    %c8 = arith.constant 8 : index
    %c0_130 = arith.constant 0 : index
    %c0_131 = arith.constant 0 : index
    %133 = vector.load %arg1[%c0_129, %c8, %c0_130, %c0_131] : memref<1x10x16x128xbf16, #tpu.memory_space<vmem>>, vector<1x1x16x128xbf16>
    %134 = vector.shape_cast %133 : vector<1x1x16x128xbf16> to vector<16x128xbf16>
    %c2_132 = arith.constant 2 : index
    %c0_133 = arith.constant 0 : index
    %c0_134 = arith.constant 0 : index
    %135 = vector.load %arg2[%c2_132, %c0_133, %c0_134] : memref<4x128x16xbf16, #tpu.memory_space<vmem>>, vector<1x128x16xbf16>
    %136 = vector.shape_cast %135 : vector<1x128x16xbf16> to vector<128x16xbf16>
    %cst_135 = arith.constant dense<0.000000e+00> : vector<16x16xf32>
    %137 = tpu.matmul %134, %136, %cst_135 {dimension_numbers = #tpu.dot_dimension_numbers<[1], [0], [0], [1], [0, 0, 1, 1], [], []>} : vector<16x128xbf16>, vector<128x16xbf16>, vector<16x16xf32> -> vector<16x16xf32>
    %138 = arith.addf %132, %137 : vector<16x16xf32>
    %c0_136 = arith.constant 0 : index
    %c9 = arith.constant 9 : index
    %c0_137 = arith.constant 0 : index
    %c0_138 = arith.constant 0 : index
    %139 = vector.load %arg1[%c0_136, %c9, %c0_137, %c0_138] : memref<1x10x16x128xbf16, #tpu.memory_space<vmem>>, vector<1x1x16x128xbf16>
    %140 = vector.shape_cast %139 : vector<1x1x16x128xbf16> to vector<16x128xbf16>
    %c3_139 = arith.constant 3 : index
    %c0_140 = arith.constant 0 : index
    %c0_141 = arith.constant 0 : index
    %141 = vector.load %arg2[%c3_139, %c0_140, %c0_141] : memref<4x128x16xbf16, #tpu.memory_space<vmem>>, vector<1x128x16xbf16>
    %142 = vector.shape_cast %141 : vector<1x128x16xbf16> to vector<128x16xbf16>
    %cst_142 = arith.constant dense<0.000000e+00> : vector<16x16xf32>
    %143 = tpu.matmul %140, %142, %cst_142 {dimension_numbers = #tpu.dot_dimension_numbers<[1], [0], [0], [1], [0, 0, 1, 1], [], []>} : vector<16x128xbf16>, vector<128x16xbf16>, vector<16x16xf32> -> vector<16x16xf32>
    %144 = arith.addf %138, %143 : vector<16x16xf32>
    %145 = vector.broadcast %0 : vector<1x16xf32> to vector<16x16xf32>
    %146 = arith.addf %144, %145 : vector<16x16xf32>
    %cst_143 = arith.constant dense<0.000000e+00> : vector<16xf32>
    %147 = vector.multi_reduction <add>, %146, %cst_143 [0] : vector<16x16xf32> to vector<16xf32>
    %148 = vector.shape_cast %147 : vector<16xf32> to vector<1x16xf32>
    %149 = arith.addf %110, %148 : vector<1x16xf32>
    %150 = arith.mulf %146, %146 : vector<16x16xf32>
    %cst_144 = arith.constant dense<0.000000e+00> : vector<16xf32>
    %151 = vector.multi_reduction <add>, %150, %cst_144 [0] : vector<16x16xf32> to vector<16xf32>
    %152 = vector.shape_cast %151 : vector<16xf32> to vector<1x16xf32>
    %153 = arith.addf %114, %152 : vector<1x16xf32>
    %154 = vector.shape_cast %146 : vector<16x16xf32> to vector<1x16x16xf32>
    %155 = arith.truncf %154 : vector<1x16x16xf32> to vector<1x16x16xbf16>
    %c0_145 = arith.constant 0 : index
    %c3_146 = arith.constant 3 : index
    %c0_147 = arith.constant 0 : index
    %c0_148 = arith.constant 0 : index
    %156 = vector.load %arg4[%c0_145, %c3_146, %c0_147, %c0_148] : memref<1x4x16x16xbf16, #tpu.memory_space<vmem>>, vector<1x1x16x16xbf16>
    %157 = vector.shape_cast %156 : vector<1x1x16x16xbf16> to vector<1x16x16xbf16>
    %158 = vector.shape_cast %155 : vector<1x16x16xbf16> to vector<1x1x16x16xbf16>
    tpu.vector_store %arg4[%c0_145, %c3_146, %c0_147, %c0_148], %158 {strides = array<i32>} : memref<1x4x16x16xbf16, #tpu.memory_space<vmem>>, vector<1x1x16x16xbf16>,
    %c0_149 = arith.constant 0 : index
    %c0_150 = arith.constant 0 : index
    %c0_151 = arith.constant 0 : index
    %159 = vector.load %arg5[%c0_149, %c0_150, %c0_151] : memref<1x1x16xf32, #tpu.memory_space<vmem>>, vector<1x1x16xf32>
    %160 = vector.shape_cast %159 : vector<1x1x16xf32> to vector<1x16xf32>
    %161 = vector.shape_cast %149 : vector<1x16xf32> to vector<1x1x16xf32>
    tpu.vector_store %arg5[%c0_149, %c0_150, %c0_151], %161 {strides = array<i32>} : memref<1x1x16xf32, #tpu.memory_space<vmem>>, vector<1x1x16xf32>,
    %c0_152 = arith.constant 0 : index
    %c0_153 = arith.constant 0 : index
    %c0_154 = arith.constant 0 : index
    %162 = vector.load %arg6[%c0_152, %c0_153, %c0_154] : memref<1x1x16xf32, #tpu.memory_space<vmem>>, vector<1x1x16xf32>
    %163 = vector.shape_cast %162 : vector<1x1x16xf32> to vector<1x16xf32>
    %164 = vector.shape_cast %153 : vector<1x16xf32> to vector<1x1x16xf32>
    tpu.vector_store %arg6[%c0_152, %c0_153, %c0_154], %164 {strides = array<i32>} : memref<1x1x16xf32, #tpu.memory_space<vmem>>, vector<1x1x16xf32>,
    return
  }
  func.func @transform_0(%arg0: i32) -> (i32, i32, i32, i32) {
    %c0_i32 = arith.constant 0 : i32
    %c0_i32_0 = arith.constant 0 : i32
    %c0_i32_1 = arith.constant 0 : i32
    %c0_i32_2 = arith.constant 0 : i32
    return %arg0, %c0_i32, %c0_i32_0, %c0_i32_1 : i32, i32, i32, i32
  }
  func.func @transform_1(%arg0: i32) -> (i32, i32, i32) {
    %c0_i32 = arith.constant 0 : i32
    %c0_i32_0 = arith.constant 0 : i32
    %c0_i32_1 = arith.constant 0 : i32
    %c0_i32_2 = arith.constant 0 : i32
    return %c0_i32, %c0_i32_0, %c0_i32_1 : i32, i32, i32
  }
  func.func @transform_2(%arg0: i32) -> (i32, i32) {
    %c0_i32 = arith.constant 0 : i32
    %c0_i32_0 = arith.constant 0 : i32
    %c0_i32_1 = arith.constant 0 : i32
    return %c0_i32, %c0_i32_0 : i32, i32
  }
  func.func @transform_3(%arg0: i32) -> (i32, i32, i32, i32) {
    %c0_i32 = arith.constant 0 : i32
    %c0_i32_0 = arith.constant 0 : i32
    %c0_i32_1 = arith.constant 0 : i32
    %c0_i32_2 = arith.constant 0 : i32
    return %arg0, %c0_i32, %c0_i32_0, %c0_i32_1 : i32, i32, i32, i32
  }
  func.func @transform_4(%arg0: i32) -> (i32, i32, i32) {
    %c0_i32 = arith.constant 0 : i32
    %c0_i32_0 = arith.constant 0 : i32
    %c0_i32_1 = arith.constant 0 : i32
    return %arg0, %c0_i32, %c0_i32_0 : i32, i32, i32
  }
  func.func @transform_5(%arg0: i32) -> (i32, i32, i32) {
    %c0_i32 = arith.constant 0 : i32
    %c0_i32_0 = arith.constant 0 : i32
    %c0_i32_1 = arith.constant 0 : i32
    return %arg0, %c0_i32, %c0_i32_0 : i32, i32, i32
  }
}

module attributes {stable_mosaic.version = 11 : i64} {
  func.func @_bn_lrelu_kernel(%arg0: i32, %arg1: memref<8x256xbf16, #tpu.memory_space<vmem>>, %arg2: memref<1x256xf32, #tpu.memory_space<vmem>>, %arg3: memref<1x256xf32, #tpu.memory_space<vmem>>, %arg4: memref<8x256xbf16, #tpu.memory_space<vmem>>) attributes {dimension_semantics = [#tpu.dimension_semantics<parallel>], iteration_bounds = array<i64: 1>, scalar_prefetch = 0 : i64, scratch_operands = 0 : i64, tpu.core_type = #tpu.core_type<tc>, window_params = [{transform_indices = @transform_0, window_bounds = array<i64: 8, 256>}, {pipeline_mode = #tpu.pipeline_mode<synchronous>, transform_indices = @transform_1, window_bounds = array<i64: 1, 256>}, {pipeline_mode = #tpu.pipeline_mode<synchronous>, transform_indices = @transform_2, window_bounds = array<i64: 1, 256>}, {transform_indices = @transform_3, window_bounds = array<i64: 8, 256>}]} {
    %c0 = arith.constant 0 : index
    %c0_0 = arith.constant 0 : index
    %0 = vector.load %arg1[%c0, %c0_0] : memref<8x256xbf16, #tpu.memory_space<vmem>>, vector<8x256xbf16>
    %1 = arith.extf %0 : vector<8x256xbf16> to vector<8x256xf32>
    %c0_1 = arith.constant 0 : index
    %c0_2 = arith.constant 0 : index
    %2 = vector.load %arg2[%c0_1, %c0_2] : memref<1x256xf32, #tpu.memory_space<vmem>>, vector<1x256xf32>
    %3 = vector.broadcast %2 : vector<1x256xf32> to vector<8x256xf32>
    %4 = arith.mulf %1, %3 : vector<8x256xf32>
    %c0_3 = arith.constant 0 : index
    %c0_4 = arith.constant 0 : index
    %5 = vector.load %arg3[%c0_3, %c0_4] : memref<1x256xf32, #tpu.memory_space<vmem>>, vector<1x256xf32>
    %6 = vector.broadcast %5 : vector<1x256xf32> to vector<8x256xf32>
    %7 = arith.addf %4, %6 : vector<8x256xf32>
    %cst = arith.constant 0.000000e+00 : f32
    %8 = vector.broadcast %cst : f32 to vector<8x256xf32>
    %9 = arith.cmpf oge, %7, %8 : vector<8x256xf32>
    %cst_5 = arith.constant 2.000000e-01 : f32
    %10 = vector.broadcast %cst_5 : f32 to vector<8x256xf32>
    %11 = arith.mulf %10, %7 : vector<8x256xf32>
    %12 = arith.select %9, %7, %11 : vector<8x256xi1>, vector<8x256xf32>
    %13 = arith.truncf %12 : vector<8x256xf32> to vector<8x256xbf16>
    %c0_6 = arith.constant 0 : index
    %c0_7 = arith.constant 0 : index
    %14 = vector.load %arg4[%c0_6, %c0_7] : memref<8x256xbf16, #tpu.memory_space<vmem>>, vector<8x256xbf16>
    tpu.vector_store %arg4[%c0_6, %c0_7], %13 {strides = array<i32>} : memref<8x256xbf16, #tpu.memory_space<vmem>>, vector<8x256xbf16>,
    return
  }
  func.func @transform_0(%arg0: i32) -> (i32, i32) {
    %c0_i32 = arith.constant 0 : i32
    %c0_i32_0 = arith.constant 0 : i32
    return %arg0, %c0_i32 : i32, i32
  }
  func.func @transform_1(%arg0: i32) -> (i32, i32) {
    %c0_i32 = arith.constant 0 : i32
    %c0_i32_0 = arith.constant 0 : i32
    %c0_i32_1 = arith.constant 0 : i32
    return %c0_i32, %c0_i32_0 : i32, i32
  }
  func.func @transform_2(%arg0: i32) -> (i32, i32) {
    %c0_i32 = arith.constant 0 : i32
    %c0_i32_0 = arith.constant 0 : i32
    %c0_i32_1 = arith.constant 0 : i32
    return %c0_i32, %c0_i32_0 : i32, i32
  }
  func.func @transform_3(%arg0: i32) -> (i32, i32) {
    %c0_i32 = arith.constant 0 : i32
    %c0_i32_0 = arith.constant 0 : i32
    return %arg0, %c0_i32 : i32, i32
  }
}

module attributes {stable_mosaic.version = 11 : i64} {
  func.func @_conv_layer_kernel(%arg0: i32, %arg1: memref<1x6x4x256xbf16, #tpu.memory_space<vmem>>, %arg2: memref<4x256x32xbf16, #tpu.memory_space<vmem>>, %arg3: memref<1x32xf32, #tpu.memory_space<vmem>>, %arg4: memref<1x2x4x32xbf16, #tpu.memory_space<vmem>>, %arg5: memref<1x1x32xf32, #tpu.memory_space<vmem>>, %arg6: memref<1x1x32xf32, #tpu.memory_space<vmem>>) attributes {dimension_semantics = [#tpu.dimension_semantics<parallel>], iteration_bounds = array<i64: 2>, scalar_prefetch = 0 : i64, scratch_operands = 0 : i64, tpu.core_type = #tpu.core_type<tc>, window_params = [{transform_indices = @transform_0, window_bounds = array<i64: 1, 6, 4, 256>}, {pipeline_mode = #tpu.pipeline_mode<synchronous>, transform_indices = @transform_1, window_bounds = array<i64: 4, 256, 32>}, {pipeline_mode = #tpu.pipeline_mode<synchronous>, transform_indices = @transform_2, window_bounds = array<i64: 1, 32>}, {transform_indices = @transform_3, window_bounds = array<i64: 1, 2, 4, 32>}, {transform_indices = @transform_4, window_bounds = array<i64: 1, 1, 32>}, {transform_indices = @transform_5, window_bounds = array<i64: 1, 1, 32>}]} {
    %c0 = arith.constant 0 : index
    %c0_0 = arith.constant 0 : index
    %0 = vector.load %arg3[%c0, %c0_0] : memref<1x32xf32, #tpu.memory_space<vmem>>, vector<1x32xf32>
    %cst = arith.constant 0.000000e+00 : f32
    %1 = vector.broadcast %cst : f32 to vector<1x32xf32>
    %cst_1 = arith.constant 0.000000e+00 : f32
    %2 = vector.broadcast %cst_1 : f32 to vector<1x32xf32>
    %cst_2 = arith.constant 0.000000e+00 : f32
    %3 = vector.broadcast %cst_2 : f32 to vector<4x32xf32>
    %c0_3 = arith.constant 0 : index
    %c0_4 = arith.constant 0 : index
    %c0_5 = arith.constant 0 : index
    %c0_6 = arith.constant 0 : index
    %4 = vector.load %arg1[%c0_3, %c0_4, %c0_5, %c0_6] : memref<1x6x4x256xbf16, #tpu.memory_space<vmem>>, vector<1x1x4x256xbf16>
    %5 = vector.shape_cast %4 : vector<1x1x4x256xbf16> to vector<4x256xbf16>
    %c0_7 = arith.constant 0 : index
    %c0_8 = arith.constant 0 : index
    %c0_9 = arith.constant 0 : index
    %6 = vector.load %arg2[%c0_7, %c0_8, %c0_9] : memref<4x256x32xbf16, #tpu.memory_space<vmem>>, vector<1x256x32xbf16>
    %7 = vector.shape_cast %6 : vector<1x256x32xbf16> to vector<256x32xbf16>
    %cst_10 = arith.constant dense<0.000000e+00> : vector<4x32xf32>
    %8 = tpu.matmul %5, %7, %cst_10 {dimension_numbers = #tpu.dot_dimension_numbers<[1], [0], [0], [1], [0, 0, 1, 1], [], []>} : vector<4x256xbf16>, vector<256x32xbf16>, vector<4x32xf32> -> vector<4x32xf32>
    %9 = arith.addf %3, %8 : vector<4x32xf32>
    %c0_11 = arith.constant 0 : index
    %c1 = arith.constant 1 : index
    %c0_12 = arith.constant 0 : index
    %c0_13 = arith.constant 0 : index
    %10 = vector.load %arg1[%c0_11, %c1, %c0_12, %c0_13] : memref<1x6x4x256xbf16, #tpu.memory_space<vmem>>, vector<1x1x4x256xbf16>
    %11 = vector.shape_cast %10 : vector<1x1x4x256xbf16> to vector<4x256xbf16>
    %c1_14 = arith.constant 1 : index
    %c0_15 = arith.constant 0 : index
    %c0_16 = arith.constant 0 : index
    %12 = vector.load %arg2[%c1_14, %c0_15, %c0_16] : memref<4x256x32xbf16, #tpu.memory_space<vmem>>, vector<1x256x32xbf16>
    %13 = vector.shape_cast %12 : vector<1x256x32xbf16> to vector<256x32xbf16>
    %cst_17 = arith.constant dense<0.000000e+00> : vector<4x32xf32>
    %14 = tpu.matmul %11, %13, %cst_17 {dimension_numbers = #tpu.dot_dimension_numbers<[1], [0], [0], [1], [0, 0, 1, 1], [], []>} : vector<4x256xbf16>, vector<256x32xbf16>, vector<4x32xf32> -> vector<4x32xf32>
    %15 = arith.addf %9, %14 : vector<4x32xf32>
    %c0_18 = arith.constant 0 : index
    %c2 = arith.constant 2 : index
    %c0_19 = arith.constant 0 : index
    %c0_20 = arith.constant 0 : index
    %16 = vector.load %arg1[%c0_18, %c2, %c0_19, %c0_20] : memref<1x6x4x256xbf16, #tpu.memory_space<vmem>>, vector<1x1x4x256xbf16>
    %17 = vector.shape_cast %16 : vector<1x1x4x256xbf16> to vector<4x256xbf16>
    %c2_21 = arith.constant 2 : index
    %c0_22 = arith.constant 0 : index
    %c0_23 = arith.constant 0 : index
    %18 = vector.load %arg2[%c2_21, %c0_22, %c0_23] : memref<4x256x32xbf16, #tpu.memory_space<vmem>>, vector<1x256x32xbf16>
    %19 = vector.shape_cast %18 : vector<1x256x32xbf16> to vector<256x32xbf16>
    %cst_24 = arith.constant dense<0.000000e+00> : vector<4x32xf32>
    %20 = tpu.matmul %17, %19, %cst_24 {dimension_numbers = #tpu.dot_dimension_numbers<[1], [0], [0], [1], [0, 0, 1, 1], [], []>} : vector<4x256xbf16>, vector<256x32xbf16>, vector<4x32xf32> -> vector<4x32xf32>
    %21 = arith.addf %15, %20 : vector<4x32xf32>
    %c0_25 = arith.constant 0 : index
    %c3 = arith.constant 3 : index
    %c0_26 = arith.constant 0 : index
    %c0_27 = arith.constant 0 : index
    %22 = vector.load %arg1[%c0_25, %c3, %c0_26, %c0_27] : memref<1x6x4x256xbf16, #tpu.memory_space<vmem>>, vector<1x1x4x256xbf16>
    %23 = vector.shape_cast %22 : vector<1x1x4x256xbf16> to vector<4x256xbf16>
    %c3_28 = arith.constant 3 : index
    %c0_29 = arith.constant 0 : index
    %c0_30 = arith.constant 0 : index
    %24 = vector.load %arg2[%c3_28, %c0_29, %c0_30] : memref<4x256x32xbf16, #tpu.memory_space<vmem>>, vector<1x256x32xbf16>
    %25 = vector.shape_cast %24 : vector<1x256x32xbf16> to vector<256x32xbf16>
    %cst_31 = arith.constant dense<0.000000e+00> : vector<4x32xf32>
    %26 = tpu.matmul %23, %25, %cst_31 {dimension_numbers = #tpu.dot_dimension_numbers<[1], [0], [0], [1], [0, 0, 1, 1], [], []>} : vector<4x256xbf16>, vector<256x32xbf16>, vector<4x32xf32> -> vector<4x32xf32>
    %27 = arith.addf %21, %26 : vector<4x32xf32>
    %28 = vector.broadcast %0 : vector<1x32xf32> to vector<4x32xf32>
    %29 = arith.addf %27, %28 : vector<4x32xf32>
    %cst_32 = arith.constant dense<0.000000e+00> : vector<32xf32>
    %30 = vector.multi_reduction <add>, %29, %cst_32 [0] : vector<4x32xf32> to vector<32xf32>
    %31 = vector.shape_cast %30 : vector<32xf32> to vector<1x32xf32>
    %32 = arith.addf %1, %31 : vector<1x32xf32>
    %33 = arith.mulf %29, %29 : vector<4x32xf32>
    %cst_33 = arith.constant dense<0.000000e+00> : vector<32xf32>
    %34 = vector.multi_reduction <add>, %33, %cst_33 [0] : vector<4x32xf32> to vector<32xf32>
    %35 = vector.shape_cast %34 : vector<32xf32> to vector<1x32xf32>
    %36 = arith.addf %2, %35 : vector<1x32xf32>
    %37 = vector.shape_cast %29 : vector<4x32xf32> to vector<1x4x32xf32>
    %38 = arith.truncf %37 : vector<1x4x32xf32> to vector<1x4x32xbf16>
    %c0_34 = arith.constant 0 : index
    %c0_35 = arith.constant 0 : index
    %c0_36 = arith.constant 0 : index
    %c0_37 = arith.constant 0 : index
    %39 = vector.load %arg4[%c0_34, %c0_35, %c0_36, %c0_37] : memref<1x2x4x32xbf16, #tpu.memory_space<vmem>>, vector<1x1x4x32xbf16>
    %40 = vector.shape_cast %39 : vector<1x1x4x32xbf16> to vector<1x4x32xbf16>
    %41 = vector.shape_cast %38 : vector<1x4x32xbf16> to vector<1x1x4x32xbf16>
    tpu.vector_store %arg4[%c0_34, %c0_35, %c0_36, %c0_37], %41 {strides = array<i32>} : memref<1x2x4x32xbf16, #tpu.memory_space<vmem>>, vector<1x1x4x32xbf16>,
    %cst_38 = arith.constant 0.000000e+00 : f32
    %42 = vector.broadcast %cst_38 : f32 to vector<4x32xf32>
    %c0_39 = arith.constant 0 : index
    %c2_40 = arith.constant 2 : index
    %c0_41 = arith.constant 0 : index
    %c0_42 = arith.constant 0 : index
    %43 = vector.load %arg1[%c0_39, %c2_40, %c0_41, %c0_42] : memref<1x6x4x256xbf16, #tpu.memory_space<vmem>>, vector<1x1x4x256xbf16>
    %44 = vector.shape_cast %43 : vector<1x1x4x256xbf16> to vector<4x256xbf16>
    %c0_43 = arith.constant 0 : index
    %c0_44 = arith.constant 0 : index
    %c0_45 = arith.constant 0 : index
    %45 = vector.load %arg2[%c0_43, %c0_44, %c0_45] : memref<4x256x32xbf16, #tpu.memory_space<vmem>>, vector<1x256x32xbf16>
    %46 = vector.shape_cast %45 : vector<1x256x32xbf16> to vector<256x32xbf16>
    %cst_46 = arith.constant dense<0.000000e+00> : vector<4x32xf32>
    %47 = tpu.matmul %44, %46, %cst_46 {dimension_numbers = #tpu.dot_dimension_numbers<[1], [0], [0], [1], [0, 0, 1, 1], [], []>} : vector<4x256xbf16>, vector<256x32xbf16>, vector<4x32xf32> -> vector<4x32xf32>
    %48 = arith.addf %42, %47 : vector<4x32xf32>
    %c0_47 = arith.constant 0 : index
    %c3_48 = arith.constant 3 : index
    %c0_49 = arith.constant 0 : index
    %c0_50 = arith.constant 0 : index
    %49 = vector.load %arg1[%c0_47, %c3_48, %c0_49, %c0_50] : memref<1x6x4x256xbf16, #tpu.memory_space<vmem>>, vector<1x1x4x256xbf16>
    %50 = vector.shape_cast %49 : vector<1x1x4x256xbf16> to vector<4x256xbf16>
    %c1_51 = arith.constant 1 : index
    %c0_52 = arith.constant 0 : index
    %c0_53 = arith.constant 0 : index
    %51 = vector.load %arg2[%c1_51, %c0_52, %c0_53] : memref<4x256x32xbf16, #tpu.memory_space<vmem>>, vector<1x256x32xbf16>
    %52 = vector.shape_cast %51 : vector<1x256x32xbf16> to vector<256x32xbf16>
    %cst_54 = arith.constant dense<0.000000e+00> : vector<4x32xf32>
    %53 = tpu.matmul %50, %52, %cst_54 {dimension_numbers = #tpu.dot_dimension_numbers<[1], [0], [0], [1], [0, 0, 1, 1], [], []>} : vector<4x256xbf16>, vector<256x32xbf16>, vector<4x32xf32> -> vector<4x32xf32>
    %54 = arith.addf %48, %53 : vector<4x32xf32>
    %c0_55 = arith.constant 0 : index
    %c4 = arith.constant 4 : index
    %c0_56 = arith.constant 0 : index
    %c0_57 = arith.constant 0 : index
    %55 = vector.load %arg1[%c0_55, %c4, %c0_56, %c0_57] : memref<1x6x4x256xbf16, #tpu.memory_space<vmem>>, vector<1x1x4x256xbf16>
    %56 = vector.shape_cast %55 : vector<1x1x4x256xbf16> to vector<4x256xbf16>
    %c2_58 = arith.constant 2 : index
    %c0_59 = arith.constant 0 : index
    %c0_60 = arith.constant 0 : index
    %57 = vector.load %arg2[%c2_58, %c0_59, %c0_60] : memref<4x256x32xbf16, #tpu.memory_space<vmem>>, vector<1x256x32xbf16>
    %58 = vector.shape_cast %57 : vector<1x256x32xbf16> to vector<256x32xbf16>
    %cst_61 = arith.constant dense<0.000000e+00> : vector<4x32xf32>
    %59 = tpu.matmul %56, %58, %cst_61 {dimension_numbers = #tpu.dot_dimension_numbers<[1], [0], [0], [1], [0, 0, 1, 1], [], []>} : vector<4x256xbf16>, vector<256x32xbf16>, vector<4x32xf32> -> vector<4x32xf32>
    %60 = arith.addf %54, %59 : vector<4x32xf32>
    %c0_62 = arith.constant 0 : index
    %c5 = arith.constant 5 : index
    %c0_63 = arith.constant 0 : index
    %c0_64 = arith.constant 0 : index
    %61 = vector.load %arg1[%c0_62, %c5, %c0_63, %c0_64] : memref<1x6x4x256xbf16, #tpu.memory_space<vmem>>, vector<1x1x4x256xbf16>
    %62 = vector.shape_cast %61 : vector<1x1x4x256xbf16> to vector<4x256xbf16>
    %c3_65 = arith.constant 3 : index
    %c0_66 = arith.constant 0 : index
    %c0_67 = arith.constant 0 : index
    %63 = vector.load %arg2[%c3_65, %c0_66, %c0_67] : memref<4x256x32xbf16, #tpu.memory_space<vmem>>, vector<1x256x32xbf16>
    %64 = vector.shape_cast %63 : vector<1x256x32xbf16> to vector<256x32xbf16>
    %cst_68 = arith.constant dense<0.000000e+00> : vector<4x32xf32>
    %65 = tpu.matmul %62, %64, %cst_68 {dimension_numbers = #tpu.dot_dimension_numbers<[1], [0], [0], [1], [0, 0, 1, 1], [], []>} : vector<4x256xbf16>, vector<256x32xbf16>, vector<4x32xf32> -> vector<4x32xf32>
    %66 = arith.addf %60, %65 : vector<4x32xf32>
    %67 = vector.broadcast %0 : vector<1x32xf32> to vector<4x32xf32>
    %68 = arith.addf %66, %67 : vector<4x32xf32>
    %cst_69 = arith.constant dense<0.000000e+00> : vector<32xf32>
    %69 = vector.multi_reduction <add>, %68, %cst_69 [0] : vector<4x32xf32> to vector<32xf32>
    %70 = vector.shape_cast %69 : vector<32xf32> to vector<1x32xf32>
    %71 = arith.addf %32, %70 : vector<1x32xf32>
    %72 = arith.mulf %68, %68 : vector<4x32xf32>
    %cst_70 = arith.constant dense<0.000000e+00> : vector<32xf32>
    %73 = vector.multi_reduction <add>, %72, %cst_70 [0] : vector<4x32xf32> to vector<32xf32>
    %74 = vector.shape_cast %73 : vector<32xf32> to vector<1x32xf32>
    %75 = arith.addf %36, %74 : vector<1x32xf32>
    %76 = vector.shape_cast %68 : vector<4x32xf32> to vector<1x4x32xf32>
    %77 = arith.truncf %76 : vector<1x4x32xf32> to vector<1x4x32xbf16>
    %c0_71 = arith.constant 0 : index
    %c1_72 = arith.constant 1 : index
    %c0_73 = arith.constant 0 : index
    %c0_74 = arith.constant 0 : index
    %78 = vector.load %arg4[%c0_71, %c1_72, %c0_73, %c0_74] : memref<1x2x4x32xbf16, #tpu.memory_space<vmem>>, vector<1x1x4x32xbf16>
    %79 = vector.shape_cast %78 : vector<1x1x4x32xbf16> to vector<1x4x32xbf16>
    %80 = vector.shape_cast %77 : vector<1x4x32xbf16> to vector<1x1x4x32xbf16>
    tpu.vector_store %arg4[%c0_71, %c1_72, %c0_73, %c0_74], %80 {strides = array<i32>} : memref<1x2x4x32xbf16, #tpu.memory_space<vmem>>, vector<1x1x4x32xbf16>,
    %c0_75 = arith.constant 0 : index
    %c0_76 = arith.constant 0 : index
    %c0_77 = arith.constant 0 : index
    %81 = vector.load %arg5[%c0_75, %c0_76, %c0_77] : memref<1x1x32xf32, #tpu.memory_space<vmem>>, vector<1x1x32xf32>
    %82 = vector.shape_cast %81 : vector<1x1x32xf32> to vector<1x32xf32>
    %83 = vector.shape_cast %71 : vector<1x32xf32> to vector<1x1x32xf32>
    tpu.vector_store %arg5[%c0_75, %c0_76, %c0_77], %83 {strides = array<i32>} : memref<1x1x32xf32, #tpu.memory_space<vmem>>, vector<1x1x32xf32>,
    %c0_78 = arith.constant 0 : index
    %c0_79 = arith.constant 0 : index
    %c0_80 = arith.constant 0 : index
    %84 = vector.load %arg6[%c0_78, %c0_79, %c0_80] : memref<1x1x32xf32, #tpu.memory_space<vmem>>, vector<1x1x32xf32>
    %85 = vector.shape_cast %84 : vector<1x1x32xf32> to vector<1x32xf32>
    %86 = vector.shape_cast %75 : vector<1x32xf32> to vector<1x1x32xf32>
    tpu.vector_store %arg6[%c0_78, %c0_79, %c0_80], %86 {strides = array<i32>} : memref<1x1x32xf32, #tpu.memory_space<vmem>>, vector<1x1x32xf32>,
    return
  }
  func.func @transform_0(%arg0: i32) -> (i32, i32, i32, i32) {
    %c0_i32 = arith.constant 0 : i32
    %c0_i32_0 = arith.constant 0 : i32
    %c0_i32_1 = arith.constant 0 : i32
    %c0_i32_2 = arith.constant 0 : i32
    return %arg0, %c0_i32, %c0_i32_0, %c0_i32_1 : i32, i32, i32, i32
  }
  func.func @transform_1(%arg0: i32) -> (i32, i32, i32) {
    %c0_i32 = arith.constant 0 : i32
    %c0_i32_0 = arith.constant 0 : i32
    %c0_i32_1 = arith.constant 0 : i32
    %c0_i32_2 = arith.constant 0 : i32
    return %c0_i32, %c0_i32_0, %c0_i32_1 : i32, i32, i32
  }
  func.func @transform_2(%arg0: i32) -> (i32, i32) {
    %c0_i32 = arith.constant 0 : i32
    %c0_i32_0 = arith.constant 0 : i32
    %c0_i32_1 = arith.constant 0 : i32
    return %c0_i32, %c0_i32_0 : i32, i32
  }
  func.func @transform_3(%arg0: i32) -> (i32, i32, i32, i32) {
    %c0_i32 = arith.constant 0 : i32
    %c0_i32_0 = arith.constant 0 : i32
    %c0_i32_1 = arith.constant 0 : i32
    %c0_i32_2 = arith.constant 0 : i32
    return %arg0, %c0_i32, %c0_i32_0, %c0_i32_1 : i32, i32, i32, i32
  }
  func.func @transform_4(%arg0: i32) -> (i32, i32, i32) {
    %c0_i32 = arith.constant 0 : i32
    %c0_i32_0 = arith.constant 0 : i32
    %c0_i32_1 = arith.constant 0 : i32
    return %arg0, %c0_i32, %c0_i32_0 : i32, i32, i32
  }
  func.func @transform_5(%arg0: i32) -> (i32, i32, i32) {
    %c0_i32 = arith.constant 0 : i32
    %c0_i32_0 = arith.constant 0 : i32
    %c0_i32_1 = arith.constant 0 : i32
    return %arg0, %c0_i32, %c0_i32_0 : i32, i32, i32
  }
}

module attributes {stable_mosaic.version = 11 : i64} {
  func.func @_bn_lrelu_kernel(%arg0: i32, %arg1: memref<4x128xbf16, #tpu.memory_space<vmem>>, %arg2: memref<1x128xf32, #tpu.memory_space<vmem>>, %arg3: memref<1x128xf32, #tpu.memory_space<vmem>>, %arg4: memref<4x128xbf16, #tpu.memory_space<vmem>>) attributes {dimension_semantics = [#tpu.dimension_semantics<parallel>], iteration_bounds = array<i64: 1>, scalar_prefetch = 0 : i64, scratch_operands = 0 : i64, tpu.core_type = #tpu.core_type<tc>, window_params = [{transform_indices = @transform_0, window_bounds = array<i64: 4, 128>}, {pipeline_mode = #tpu.pipeline_mode<synchronous>, transform_indices = @transform_1, window_bounds = array<i64: 1, 128>}, {pipeline_mode = #tpu.pipeline_mode<synchronous>, transform_indices = @transform_2, window_bounds = array<i64: 1, 128>}, {transform_indices = @transform_3, window_bounds = array<i64: 4, 128>}]} {
    %c0 = arith.constant 0 : index
    %c0_0 = arith.constant 0 : index
    %0 = vector.load %arg1[%c0, %c0_0] : memref<4x128xbf16, #tpu.memory_space<vmem>>, vector<4x128xbf16>
    %1 = arith.extf %0 : vector<4x128xbf16> to vector<4x128xf32>
    %c0_1 = arith.constant 0 : index
    %c0_2 = arith.constant 0 : index
    %2 = vector.load %arg2[%c0_1, %c0_2] : memref<1x128xf32, #tpu.memory_space<vmem>>, vector<1x128xf32>
    %3 = vector.broadcast %2 : vector<1x128xf32> to vector<4x128xf32>
    %4 = arith.mulf %1, %3 : vector<4x128xf32>
    %c0_3 = arith.constant 0 : index
    %c0_4 = arith.constant 0 : index
    %5 = vector.load %arg3[%c0_3, %c0_4] : memref<1x128xf32, #tpu.memory_space<vmem>>, vector<1x128xf32>
    %6 = vector.broadcast %5 : vector<1x128xf32> to vector<4x128xf32>
    %7 = arith.addf %4, %6 : vector<4x128xf32>
    %cst = arith.constant 0.000000e+00 : f32
    %8 = vector.broadcast %cst : f32 to vector<4x128xf32>
    %9 = arith.cmpf oge, %7, %8 : vector<4x128xf32>
    %cst_5 = arith.constant 2.000000e-01 : f32
    %10 = vector.broadcast %cst_5 : f32 to vector<4x128xf32>
    %11 = arith.mulf %10, %7 : vector<4x128xf32>
    %12 = arith.select %9, %7, %11 : vector<4x128xi1>, vector<4x128xf32>
    %13 = arith.truncf %12 : vector<4x128xf32> to vector<4x128xbf16>
    %c0_6 = arith.constant 0 : index
    %c0_7 = arith.constant 0 : index
    %14 = vector.load %arg4[%c0_6, %c0_7] : memref<4x128xbf16, #tpu.memory_space<vmem>>, vector<4x128xbf16>
    tpu.vector_store %arg4[%c0_6, %c0_7], %13 {strides = array<i32>} : memref<4x128xbf16, #tpu.memory_space<vmem>>, vector<4x128xbf16>,
    return
  }
  func.func @transform_0(%arg0: i32) -> (i32, i32) {
    %c0_i32 = arith.constant 0 : i32
    %c0_i32_0 = arith.constant 0 : i32
    return %arg0, %c0_i32 : i32, i32
  }
  func.func @transform_1(%arg0: i32) -> (i32, i32) {
    %c0_i32 = arith.constant 0 : i32
    %c0_i32_0 = arith.constant 0 : i32
    %c0_i32_1 = arith.constant 0 : i32
    return %c0_i32, %c0_i32_0 : i32, i32
  }
  func.func @transform_2(%arg0: i32) -> (i32, i32) {
    %c0_i32 = arith.constant 0 : i32
    %c0_i32_0 = arith.constant 0 : i32
    %c0_i32_1 = arith.constant 0 : i32
    return %c0_i32, %c0_i32_0 : i32, i32
  }
  func.func @transform_3(%arg0: i32) -> (i32, i32) {
    %c0_i32 = arith.constant 0 : i32
    %c0_i32_0 = arith.constant 0 : i32
    return %arg0, %c0_i32 : i32, i32
  }
}

module attributes {stable_mosaic.version = 11 : i64} {
  func.func @_fc_kernel(%arg0: i32, %arg1: memref<2x256xbf16, #tpu.memory_space<vmem>>, %arg2: memref<256x1xbf16, #tpu.memory_space<vmem>>, %arg3: memref<1x1xf32, #tpu.memory_space<vmem>>, %arg4: memref<2x1xf32, #tpu.memory_space<vmem>>) attributes {dimension_semantics = [#tpu.dimension_semantics<arbitrary>], iteration_bounds = array<i64: 1>, scalar_prefetch = 0 : i64, scratch_operands = 0 : i64, tpu.core_type = #tpu.core_type<tc>, window_params = [{pipeline_mode = #tpu.pipeline_mode<synchronous>, transform_indices = @transform_0, window_bounds = array<i64: 2, 256>}, {pipeline_mode = #tpu.pipeline_mode<synchronous>, transform_indices = @transform_1, window_bounds = array<i64: 256, 1>}, {pipeline_mode = #tpu.pipeline_mode<synchronous>, transform_indices = @transform_2, window_bounds = array<i64: 1, 1>}, {pipeline_mode = #tpu.pipeline_mode<synchronous>, transform_indices = @transform_3, window_bounds = array<i64: 2, 1>}]} {
    %c0 = arith.constant 0 : index
    %c0_0 = arith.constant 0 : index
    %0 = vector.load %arg1[%c0, %c0_0] : memref<2x256xbf16, #tpu.memory_space<vmem>>, vector<2x256xbf16>
    %c0_1 = arith.constant 0 : index
    %c0_2 = arith.constant 0 : index
    %1 = vector.load %arg2[%c0_1, %c0_2] : memref<256x1xbf16, #tpu.memory_space<vmem>>, vector<256x1xbf16>
    %cst = arith.constant dense<0.000000e+00> : vector<2x1xf32>
    %2 = tpu.matmul %0, %1, %cst {dimension_numbers = #tpu.dot_dimension_numbers<[1], [0], [0], [1], [0, 0, 1, 1], [], []>} : vector<2x256xbf16>, vector<256x1xbf16>, vector<2x1xf32> -> vector<2x1xf32>
    %c0_3 = arith.constant 0 : index
    %c0_4 = arith.constant 0 : index
    %3 = vector.load %arg3[%c0_3, %c0_4] : memref<1x1xf32, #tpu.memory_space<vmem>>, vector<1x1xf32>
    %4 = vector.broadcast %3 : vector<1x1xf32> to vector<2x1xf32>
    %5 = arith.addf %2, %4 : vector<2x1xf32>
    %c0_5 = arith.constant 0 : index
    %c0_6 = arith.constant 0 : index
    %6 = vector.load %arg4[%c0_5, %c0_6] : memref<2x1xf32, #tpu.memory_space<vmem>>, vector<2x1xf32>
    tpu.vector_store %arg4[%c0_5, %c0_6], %5 {strides = array<i32>} : memref<2x1xf32, #tpu.memory_space<vmem>>, vector<2x1xf32>,
    return
  }
  func.func @transform_0(%arg0: i32) -> (i32, i32) {
    %c0_i32 = arith.constant 0 : i32
    %c0_i32_0 = arith.constant 0 : i32
    %c0_i32_1 = arith.constant 0 : i32
    return %c0_i32, %c0_i32_0 : i32, i32
  }
  func.func @transform_1(%arg0: i32) -> (i32, i32) {
    %c0_i32 = arith.constant 0 : i32
    %c0_i32_0 = arith.constant 0 : i32
    %c0_i32_1 = arith.constant 0 : i32
    return %c0_i32, %c0_i32_0 : i32, i32
  }
  func.func @transform_2(%arg0: i32) -> (i32, i32) {
    %c0_i32 = arith.constant 0 : i32
    %c0_i32_0 = arith.constant 0 : i32
    %c0_i32_1 = arith.constant 0 : i32
    return %c0_i32, %c0_i32_0 : i32, i32
  }
  func.func @transform_3(%arg0: i32) -> (i32, i32) {
    %c0_i32 = arith.constant 0 : i32
    %c0_i32_0 = arith.constant 0 : i32
    %c0_i32_1 = arith.constant 0 : i32
    return %c0_i32, %c0_i32_0 : i32, i32
  }
}

</mosaic_0001>

<bundles_post_ra>
// kernel: tile.33
= control target key start
LH: loop header
LB: loop body
LE: loop exit
PB: predicated region body
PF: predicated region fallthrough
CT: control target
= control target key end

     0   :  { %s64_s0 = inlined_call_operand.vmem [shape: f32[8], index: 0, kind: input, shape index: {}]   ;;  %s65_s1 = inlined_call_operand.vmem [shape: f32[64,8], index: 1, kind: output, shape index: {}]  }
   0x1   :  { %v4_v0 = vld [vmem:[%s64_s0] ss:$0 sm:$0xff] }
   0x2   :  { %5 = vst [vmem:[%s65_s1] sm:$0xff] %v4_v0  ;;  %20 = vst [vmem:[%s65_s1 + $0x8] sm:$0xff] %v4_v0 }
   0x3   :  { %21 = vst [vmem:[%s65_s1 + $0x10] sm:$0xff] %v4_v0  ;;  %22 = vst [vmem:[%s65_s1 + $0x18] sm:$0xff] %v4_v0 }
   0x4   :  { %23 = vst [vmem:[%s65_s1 + $0x20] sm:$0xff] %v4_v0  ;;  %24 = vst [vmem:[%s65_s1 + $0x28] sm:$0xff] %v4_v0 }
   0x5   :  { %25 = vst [vmem:[%s65_s1 + $0x30] sm:$0xff] %v4_v0  ;;  %26 = vst [vmem:[%s65_s1 + $0x38] sm:$0xff] %v4_v0 }

// kernel: tile.34
= control target key start
LH: loop header
LB: loop body
LE: loop exit
PB: predicated region body
PF: predicated region fallthrough
CT: control target
= control target key end

     0   :  { %vm6_vm0 = vcmask 1043458   ;;  %s11_s6 = smov 3  ;;  %s14_s7 = smov 12  ;;  %vm8_vm1 = vcmask 64512   ;;  %vm20_vm2 = vcmask 1048512   ;;  %vm32_vm3 = vcmask 982912   ;;  %s412_s0 = inlined_call_operand.vmem [shape: f32[64,8], index: 0, kind: input, shape index: {}]   ;;  %s413_s1 = inlined_call_operand.vmem [shape: f32[1,512], index: 1, kind: output, shape index: {}]  }
   0x1   :  { %v215_v0 = vld [vmem:[%s412_s0 + $0xf] ss:$16 sm:%s11_s6]   ;;  %s35_s12 = smov 3  ;;  %s38_s15 = smov 12  ;;  %vm44_vm4 = vcmask 917312   ;;  %vm56_vm5 = vcmask 851712  }
   0x2   :  { %v216_v1 = vld [vmem:[%s412_s0 + $0xf] ss:$16 sm:%s14_s7]   ;;  %v219_v3 = vld [vmem:[%s412_s0 + $0xd] ss:$16 sm:%s35_s12]   ;;  %s263_s16 = smov 120   ;;  %s23_s19 = smov 3 }
   0x3   :  { %v17_v2 = vsel %vm6_vm0, %v216_v1, %v215_v0  ;;  %v220_v4 = vld [vmem:[%s412_s0 + $0xd] ss:$16 sm:%s38_s15]   ;;  %s26_s20 = smov 12  ;;  %v217_v6 = vld [vmem:[%s412_s0 + $0xe] ss:$16 sm:%s23_s19]   ;;  %s47_s25 = smov 3 }
   0x4   :  { %18 = vrot.lane.b32.xlu0 %v17_v2, %s263_s16  ;;  %v41_v5 = vsel %vm6_vm0, %v220_v4, %v219_v3  ;;  %v218_v7 = vld [vmem:[%s412_s0 + $0xe] ss:$16 sm:%s26_s20]   ;;  %s264_s26 = smov 104   ;;  %s50_s29 = smov 12  ;;  %vm68_vm6 = vcmask 786112   ;;  %vm80_vm7 = vcmask 720512  }
   0x5   :  { %42 = vrot.lane.b32.xlu1 %v41_v5, %s264_s26  ;;  %v29_v8 = vsel %vm6_vm0, %v218_v7, %v217_v6  ;;  %v221_v9 = vld [vmem:[%s412_s0 + $0xc] ss:$16 sm:%s47_s25]   ;;  %s59_s3 = smov 3  ;;  %s62_s4 = smov 12  ;;  %vm92_vm8 = vcmask 654912   ;;  %vm104_vm9 = vcmask 589312  }
   0x6   :  { %v222_v10 = vld [vmem:[%s412_s0 + $0xc] ss:$16 sm:%s50_s29]   ;;  %s265_s5 = smov 112   ;;  %v223_v12 = vld [vmem:[%s412_s0 + $0xb] ss:$16 sm:%s59_s3]   ;;  %s71_s8 = smov 3 }
   0x7   :  { %v53_v11 = vsel %vm6_vm0, %v222_v10, %v221_v9  ;;  %v224_v13 = vld [vmem:[%s412_s0 + $0xb] ss:$16 sm:%s62_s4]   ;;  %v225_v14 = vld [vmem:[%s412_s0 + $0xa] ss:$16 sm:%s71_s8]   ;;  %s74_s13 = smov 12  ;;  %s266_s14 = smov 96  }
   0x8   :  { %30 = vrot.lane.b32.xlu0 %v29_v8, %s265_s5  ;;  %v65_v15 = vsel %vm6_vm0, %v224_v13, %v223_v12  ;;  %v226_v16 = vld [vmem:[%s412_s0 + $0xa] ss:$16 sm:%s74_s13]   ;;  %s83_s17 = smov 3  ;;  %s86_s18 = smov 12  ;;  %vm116_vm10 = vcmask 523712   ;;  %vm128_vm11 = vcmask 458112  }
   0x9   :  { %54 = vrot.lane.b32.xlu1 %v53_v11, %s266_s14  ;;  %v77_v17 = vsel %vm6_vm0, %v226_v16, %v225_v14  ;;  %v227_v18 = vld [vmem:[%s412_s0 + $0x9] ss:$16 sm:%s83_s17]   ;;  %s95_s23 = smov 3  ;;  %s267_s24 = smov 88   ;;  %vm140_vm12 = vcmask 392512   ;;  %vm152_vm13 = vcmask 326912  }
   0xa   :  { %v228_v19 = vld [vmem:[%s412_s0 + $0x9] ss:$16 sm:%s86_s18]   ;;  %v229_v20 = vld [vmem:[%s412_s0 + $0x8] ss:$16 sm:%s95_s23]   ;;  %s98_s27 = smov 12  ;;  %s107_s30 = smov 3 }
   0xb   :  { %v89_v21 = vsel %vm6_vm0, %v228_v19, %v227_v18  ;;  %v230_v22 = vld [vmem:[%s412_s0 + $0x8] ss:$16 sm:%s98_s27]   ;;  %s110_s2 = smov 12  ;;  %s268_s3 = smov 80   ;;  %v231_v23 = vld [vmem:[%s412_s0 + $0x7] ss:$16 sm:%s107_s30]  }
   0xc   :  { %66 = vrot.lane.b32.xlu0 %v65_v15, %s267_s24  ;;  %s119_s6 = smov 3  ;;  %v101_v24 = vsel %vm6_vm0, %v230_v22, %v229_v20  ;;  %v232_v25 = vld [vmem:[%s412_s0 + $0x7] ss:$16 sm:%s110_s2]   ;;  %s122_s11 = smov 12  ;;  %vm164_vm14 = vcmask 261312   ;;  %vm176_vm15 = vcmask 195712  }
   0xd   :  { %78 = vrot.lane.b32.xlu1 %v77_v17, %s268_s3  ;;  %v233_v26 = vld [vmem:[%s412_s0 + $0x6] ss:$16 sm:%s119_s6]   ;;  %s269_s12 = smov 72   ;;  %s131_s15 = smov 3  ;;  %v113_v28 = vsel %vm6_vm0, %v232_v25, %v231_v23 }
   0xe   :  { %v234_v27 = vld [vmem:[%s412_s0 + $0x6] ss:$16 sm:%s122_s11]   ;;  %s134_s16 = smov 12  ;;  %v235_v29 = vld [vmem:[%s412_s0 + $0x5] ss:$16 sm:%s131_s15]   ;;  %s143_s19 = smov 3 }
   0xf   :  { %s270_s20 = smov 64   ;;  %v236_v30 = vld [vmem:[%s412_s0 + $0x5] ss:$16 sm:%s134_s16]   ;;  %s146_s23 = smov 12  ;;  %v125_v31 = vsel %vm6_vm0, %v234_v27, %v233_v26  ;;  %v237_v32 = vld [vmem:[%s412_s0 + $0x4] ss:$16 sm:%s143_s19]  }
  0x10   :  { %90 = vrot.lane.b32.xlu0 %v89_v21, %s269_s12  ;;  %s155_s26 = smov 3  ;;  %s158_s27 = smov 12  ;;  %v238_v33 = vld [vmem:[%s412_s0 + $0x4] ss:$16 sm:%s146_s23]   ;;  %v137_v34 = vsel %vm6_vm0, %v236_v30, %v235_v29 }
  0x11   :  { %102 = vrot.lane.b32.xlu1 %v101_v24, %s270_s20  ;;  %s271_s28 = smov 56   ;;  %s167_s2 = smov 3  ;;  %v239_v35 = vld [vmem:[%s412_s0 + $0x3] ss:$16 sm:%s155_s26]   ;;  %v149_v37 = vsel %vm6_vm0, %v238_v33, %v237_v32 }
  0x12   :  { %s170_s5 = smov 12  ;;  %s272_s6 = smov 48   ;;  %v240_v36 = vld [vmem:[%s412_s0 + $0x3] ss:$16 sm:%s158_s27]   ;;  %v241_v38 = vld [vmem:[%s412_s0 + $0x2] ss:$16 sm:%s167_s2]  }
  0x13   :  { %s179_s9 = smov 3  ;;  %v242_v39 = vld [vmem:[%s412_s0 + $0x2] ss:$16 sm:%s170_s5]   ;;  %s182_s14 = smov 12  ;;  %v161_v41 = vsel %vm6_vm0, %v240_v36, %v239_v35 }
  0x14   :  { %114 = vrot.lane.b32.xlu0 %v113_v28, %s271_s28  ;;  %s2_s15 = smov 3  ;;  %s273_s16 = smov 40   ;;  %v243_v42 = vld [vmem:[%s412_s0 + $0x1] ss:$16 sm:%s179_s9]   ;;  %v173_v46 = vsel %vm6_vm0, %v242_v39, %v241_v38 }
  0x15   :  { %126 = vrot.lane.b32.xlu1 %v125_v31, %s272_s6  ;;  %v3_v40 = vld [vmem:[%s412_s0] ss:$16 sm:%s2_s15]   ;;  %s4_s19 = smov 12  ;;  %s274_s24 = smov 32  }
  0x16   :  { %v5_v43 = vld [vmem:[%s412_s0] ss:$16 sm:%s4_s19]   ;;  %v244_v44 = vld [vmem:[%s412_s0 + $0x1] ss:$16 sm:%s182_s14]   ;;  %s275_s0 = smov 24   ;;  %s276_s27 = smov 16  }
  0x17   :  { %v7_v45 = vsel %vm6_vm0, %v5_v43, %v3_v40  ;;  %v185_v47 = vsel %vm6_vm0, %v244_v44, %v243_v42  ;;  %s277_s28 = smov 8   ;;  %vm188_vm0 = vcmask 130112  }
  0x18   :  { %138 = vrot.lane.b32.xlu0 %v137_v34, %s273_s16  ;;  %9 = vst.msk [vmem:[#allocation0] ss:$8 sm:$0xf] %vm8_vm1, %v7_v45  }
  0x19   :  { %150 = vrot.lane.b32.xlu1 %v149_v37, %s274_s24 }
  0x1c   :  { %162 = vrot.lane.b32.xlu0 %v161_v41, %s275_s0 }
  0x1d   :  { %174 = vrot.lane.b32.xlu1 %v173_v46, %s276_s27 }
  0x20   :  { %186 = vrot.lane.b32.xlu0 %v185_v47, %s277_s28 }
  0x76   :  { %v19_v48 = vpop.permute.xlu0 %18  }
  0x77   :  { %21 = vst.msk [vmem:[#allocation0] ss:$8 sm:$0xf] %vm20_vm2, %v19_v48   ;;  %v43_v49 = vpop.permute.xlu1 %42  }
  0x7a   :  { %v31_v50 = vpop.permute.xlu0 %30  }
  0x7b   :  { %33 = vst.msk [vmem:[#allocation0] ss:$8 sm:$0xf] %vm32_vm3, %v31_v50   ;;  %v55_v51 = vpop.permute.xlu1 %54  }
  0x7c   :  { %45 = vst.msk [vmem:[#allocation0] ss:$8 sm:$0xf] %vm44_vm4, %v43_v49  }
  0x7d   :  { %57 = vst.msk [vmem:[#allocation0] ss:$8 sm:$0xf] %vm56_vm5, %v55_v51  }
  0x7e   :  { %v67_v52 = vpop.permute.xlu0 %66  }
  0x7f   :  { %69 = vst.msk [vmem:[#allocation0] ss:$8 sm:$0xf] %vm68_vm6, %v67_v52   ;;  %v79_v53 = vpop.permute.xlu1 %78  }
  0x80   :  { %81 = vst.msk [vmem:[#allocation0] ss:$8 sm:$0xf] %vm80_vm7, %v79_v53  }
  0x82   :  { %v91_v54 = vpop.permute.xlu0 %90  }
  0x83   :  { %93 = vst.msk [vmem:[#allocation0] ss:$8 sm:$0xf] %vm92_vm8, %v91_v54   ;;  %v103_v55 = vpop.permute.xlu1 %102  }
  0x84   :  { %105 = vst.msk [vmem:[#allocation0] ss:$8 sm:$0xf] %vm104_vm9, %v103_v55  }
  0x86   :  { %v115_v56 = vpop.permute.xlu0 %114  }
  0x87   :  { %117 = vst.msk [vmem:[#allocation0] ss:$8 sm:$0xf] %vm116_vm10, %v115_v56   ;;  %v127_v57 = vpop.permute.xlu1 %126  }
  0x88   :  { %129 = vst.msk [vmem:[#allocation0] ss:$8 sm:$0xf] %vm128_vm11, %v127_v57  }
  0x8a   :  { %v139_v58 = vpop.permute.xlu0 %138  }
  0x8b   :  { %141 = vst.msk [vmem:[#allocation0] ss:$8 sm:$0xf] %vm140_vm12, %v139_v58   ;;  %v151_v59 = vpop.permute.xlu1 %150  }
  0x8c   :  { %153 = vst.msk [vmem:[#allocation0] ss:$8 sm:$0xf] %vm152_vm13, %v151_v59  }
  0x8e   :  { %v163_v60 = vpop.permute.xlu0 %162  }
  0x8f   :  { %165 = vst.msk [vmem:[#allocation0] ss:$8 sm:$0xf] %vm164_vm14, %v163_v60   ;;  %v175_v61 = vpop.permute.xlu1 %174  }
  0x90   :  { %177 = vst.msk [vmem:[#allocation0] ss:$8 sm:$0xf] %vm176_vm15, %v175_v61  }
  0x92   :  { %v187_v62 = vpop.permute.xlu0 %186  }
  0x93   :  { %189 = vst.msk [vmem:[#allocation0] ss:$8 sm:$0xf] %vm188_vm0, %v187_v62  }
  0x9a   :  { %v193_v63 = vld [vmem:[#allocation0] sm:$0x1]  ;;  %v197_v0 = vld [vmem:[#allocation0 + $0x8] sm:$0x1]  ;;  %v202_v1 = vld [vmem:[#allocation0 + $0x10] sm:$0x1] }
  0x9b   :  { %195 = vst [vmem:[%s413_s1] sm:$0x1] %v193_v63  ;;  %245 = vst [vmem:[%s413_s1 + $0x1] sm:$0x1] %v197_v0  ;;  %v208_v2 = vld [vmem:[#allocation0 + $0x18] sm:$0x1] }
  0x9c   :  { %246 = vst [vmem:[%s413_s1 + $0x2] sm:$0x1] %v202_v1  ;;  %247 = vst [vmem:[%s413_s1 + $0x3] sm:$0x1] %v208_v2 }

// kernel: discriminator3d_forward.8
= control target key start
LH: loop header
LB: loop body
LE: loop exit
PB: predicated region body
PF: predicated region fallthrough
CT: control target
= control target key end

     0   :  { %s367_s12 = smov 0   ;;  %s397_s0 = inlined_call_operand.vmem [shape: bf16[16,512], index: 0, kind: input, shape index: {}]   ;;  %s398_s1 = inlined_call_operand.vmem [shape: f32[1,512], index: 1, kind: input, shape index: {}]   ;;  %s399_s2 = inlined_call_operand.vmem [shape: f32[1,512], index: 2, kind: input, shape index: {}]   ;;  %s400_s3 = inlined_call_operand.vmem [shape: bf16[16,512], index: 3, kind: output, shape index: {}]  }
   0x1 LB: > { %s314_s13 = sadd.s32 4294967295, %s345_s12   ;;  %p318_p0 = scmp.ge.s32.totalorder %s345_s12, 1  ;;  %s345_s12 = sphi %s367_s12, %s13_s12  }
   0x2   : > { %p137_p1 = scmp.lt.s32.totalorder %s345_s12, 3 }
   0x4   : > { %p138_p2 = pnand %p318_p0, %p137_p1 }
   0x5   : > { %p161_p3 = scmp.lt.s32.totalorder (!%p138_p2), %s314_s13, 1  ;;  %v179_v0 = vlaneseq (!%p138_p2)  ;;  %v177_v2 = vld [vmem:[%s398_s1] sm:$0xf] (!%p138_p2) }
   0x6   : > { %141 = sbr.rel (%p138_p2) target bundleno = 30 (0x1e), region = 32  ;;  %v203_v7 = vld [vmem:[%s399_s2] sm:$0xf] (!%p138_p2) }
   0x7   : > { %v180_v1 = vshrl.u32 (!%p138_p2), %v179_v0, 7 }
   0x9   : > { %v181_v3 = vsub.s32 (!%p138_p2), 0, %v180_v1  ;;  %v185_v4 = vsub.s32 (!%p138_p2), 1, %v180_v1  ;;  %v189_v5 = vsub.s32 (!%p138_p2), 2, %v180_v1  ;;  %v193_v6 = vsub.s32 (!%p138_p2), 3, %v180_v1 }
   0xb   : > { %v182_v10 = vrot.slane (!%p138_p2), %v177_v2, %v181_v3  ;;  %v186_v11 = vrot.slane (!%p138_p2), %v177_v2, %v185_v4  ;;  %v190_v12 = vrot.slane (!%p138_p2), %v177_v2, %v189_v5  ;;  %v194_v13 = vrot.slane (!%p138_p2), %v177_v2, %v193_v6 }
   0xc   : > { %v208_v18 = vrot.slane (!%p138_p2), %v203_v7, %v181_v3  ;;  %v212_v19 = vrot.slane (!%p138_p2), %v203_v7, %v185_v4  ;;  %v216_v20 = vrot.slane (!%p138_p2), %v203_v7, %v189_v5  ;;  %v220_v21 = vrot.slane (!%p138_p2), %v203_v7, %v193_v6 }
   0xd   : > { %s402_s13 = smov (!%p161_p3, %s314_s13), 1 }
   0xe   : > { %s327_s16 = sshll.u32 %s402_s13, 4 }
   0xf   : > { %s165_s19 = scalar_lea.vmem %s397_s0, %s327_s16  ;;  %s170_s24 = scalar_lea.vmem %s400_s3, %s327_s16 }
  0x10   : > { %v171_v8 = vld [vmem:[%s165_s19] sm:$0xff]  ;;  %v172_v9 = vld [vmem:[%s165_s19 + $0x8] sm:$0xff] }
  0x11   : > { %v173_v14 = vunpack.c.l.bf16 %v171_v8  ;;  %v174_v15 = vunpack.c.h.bf16 %v171_v8  ;;  %v175_v16 = vunpack.c.l.bf16 %v172_v9  ;;  %v176_v17 = vunpack.c.h.bf16 %v172_v9 }
  0x13   : > { %v199_v22 = vmul.f32 %v182_v10, %v173_v14  ;;  %v200_v23 = vmul.f32 %v186_v11, %v174_v15  ;;  %v201_v24 = vmul.f32 %v190_v12, %v175_v16  ;;  %v202_v25 = vmul.f32 %v194_v13, %v176_v17 }
  0x15   : > { %v225_v26 = vadd.f32 %v208_v18, %v199_v22  ;;  %v226_v27 = vadd.f32 %v212_v19, %v200_v23  ;;  %v227_v28 = vadd.f32 %v216_v20, %v201_v24  ;;  %v228_v29 = vadd.f32 %v220_v21, %v202_v25 }
  0x17   : > { %vm229_vm0 = vcmp.ge.f32.partialorder %v225_v26, 0.0  ;;  %vm230_vm1 = vcmp.ge.f32.partialorder %v226_v27, 0.0  ;;  %v233_v30 = vmul.f32 0.2, %v225_v26  ;;  %v234_v31 = vmul.f32 0.2, %v226_v27 }
  0x18   : > { %vm231_vm2 = vcmp.ge.f32.partialorder %v227_v28, 0.0  ;;  %vm232_vm3 = vcmp.ge.f32.partialorder %v228_v29, 0.0  ;;  %v235_v32 = vmul.f32 0.2, %v227_v28  ;;  %v236_v33 = vmul.f32 0.2, %v228_v29 }
  0x19   : > { %v237_v34 = vsel %vm229_vm0, %v225_v26, %v233_v30  ;;  %v238_v35 = vsel %vm230_vm1, %v226_v27, %v234_v31 }
  0x1a   : > { %v329_v36 = vpack.c.bf16 %v238_v35, %v237_v34  ;;  %v239_v37 = vsel %vm231_vm2, %v227_v28, %v235_v32  ;;  %v240_v38 = vsel %vm232_vm3, %v228_v29, %v236_v33 }
  0x1b   : > { %v330_v39 = vpack.c.bf16 %v240_v38, %v239_v37 }
  0x1c   : > { %257 = vst [vmem:[%s170_s24] sm:$0xff] %v329_v36 }
  0x1d   : > { %258 = vst [vmem:[%s170_s24 + $0x8] sm:$0xff] %v330_v39 }
  0x1e PF: > { %s13_s12 = sadd.s32 1, %s345_s12  }
  0x1f   : > { %p10_p4 = scmp.ge.s32.totalorder %s13_s12, 4  }
  0x21   :  { %12 = sbr.rel (!%p10_p4) target bundleno = 1 (0x1), region = 62 }

// kernel: discriminator3d_forward.7
= control target key start
LH: loop header
LB: loop body
LE: loop exit
PB: predicated region body
PF: predicated region fallthrough
CT: control target
= control target key end

     0   :  { %s6592_s18 = smov 0   ;;  %s7325_s0 = inlined_call_operand.vmem [shape: bf16[2,18,64,16], index: 0, kind: input, shape index: {}]   ;;  %s7326_s1 = inlined_call_operand.vmem [shape: bf16[4,16,8], index: 1, kind: input, shape index: {}]   ;;  %s7327_s2 = inlined_call_operand.vmem [shape: f32[1,8], index: 2, kind: input, shape index: {}]   ;;  %s7328_s3 = inlined_call_operand.vmem [shape: bf16[2,8,64,8], index: 3, kind: output, shape index: {0}]   ;;  %s7329_s4 = inlined_call_operand.vmem [shape: f32[2,1,8], index: 4, kind: output, shape index: {1}]   ;;  %s7330_s5 = inlined_call_operand.vmem [shape: f32[2,1,8], index: 5, kind: output, shape index: {2}]  }
   0x1 LB: > { %s4932_s19 = sadd.s32 4294967295, %s6560_s18   ;;  %p4936_p0 = scmp.ge.s32.totalorder %s6560_s18, 1  ;;  %s6560_s18 = sphi %s6592_s18, %s16_s18  }
   0x2   : > { %p192_p1 = scmp.lt.s32.totalorder %s6560_s18, 3 }
   0x4   : > { %p193_p2 = pnand %p4936_p0, %p192_p1 }
   0x5   : > { %v6393_v0 = vld [vmem:[%s7326_s1 + $0x8] sm:$0xff] (!%p193_p2)   ;;  %p226_p3 = scmp.lt.s32.totalorder (!%p193_p2), %s4932_s19, 1  ;;  %v6396_v2 = vld [vmem:[%s7326_s1] sm:$0xff] (!%p193_p2)   ;;  %vm292_vm0 = vcmask (!%p193_p2), 130048   ;;  %v6406_v6 = vld [vmem:[%s7326_s1 + $0x10] sm:$0xff] (!%p193_p2)   ;;  %vm733_vm1 = vcmask (!%p193_p2), 64512  }
   0x6   : > { %196 = sbr.rel (%p193_p2) target bundleno = 518 (0x206), region = 32  ;;  %v6394_v1 = vld [vmem:[%s7326_s1 + $0x8] sm:$0xff] (!%p193_p2)   ;;  %5872 = vmatprep.subr.bf16.mxu0 (!%p193_p2), %v6393_v0  ;;  %v6400_v3 = vld [vmem:[%s7326_s1] sm:$0xff] (!%p193_p2)   ;;  %v6410_v8 = vld [vmem:[%s7326_s1 + $0x10] sm:$0xff] (!%p193_p2)   ;;  %vm818_vm2 = vcmask (!%p193_p2), 60416   ;;  %vm4824_vm3 = vcmask (!%p193_p2), 57344  }
   0x7   : > { %5873 = vmatpush3.bf16.msra.mxu0 (!%p193_p2), %v6393_v0  ;;  %5912 = vmatprep.subr.bf16.mxu1 (!%p193_p2), %v6394_v1  ;;  %v6416_v18 = vld [vmem:[%s7326_s1 + $0x18] sm:$0xff] (!%p193_p2)   ;;  %v6427_v30 = vld [vmem:[%s7326_s1 + $0x8] sm:$0xff] (!%p193_p2)   ;;  %v6436_v40 = vld [vmem:[%s7326_s1] sm:$0xff] (!%p193_p2)  }
   0x8   : > { %5913 = vmatpush3.bf16.msra.mxu1 (!%p193_p2), %v6394_v1  ;;  %5882 = vmatprep.subr.bf16.mxu0 (!%p193_p2), %v6396_v2  ;;  %v6420_v21 = vld [vmem:[%s7326_s1 + $0x18] sm:$0xff] (!%p193_p2)   ;;  %v6430_v31 = vld [vmem:[%s7326_s1 + $0x8] sm:$0xff] (!%p193_p2)   ;;  %v6440_v41 = vld [vmem:[%s7326_s1] sm:$0xff] (!%p193_p2)  }
   0x9   : > { %5922 = vmatprep.subr.bf16.mxu1 (!%p193_p2), %v6400_v3  ;;  %v6446_v50 = vld [vmem:[%s7326_s1 + $0x10] sm:$0xff] (!%p193_p2)   ;;  %v6456_v60 = vld [vmem:[%s7326_s1 + $0x18] sm:$0xff] (!%p193_p2)  }
   0xa   : > { %v6450_v51 = vld [vmem:[%s7326_s1 + $0x10] sm:$0xff] (!%p193_p2)   ;;  %v6460_v61 = vld [vmem:[%s7326_s1 + $0x18] sm:$0xff] (!%p193_p2)  }
   0xd   : > { %s7332_s19 = smov (!%p226_p3, %s4932_s19), 1 }
   0xe   : > { %s6384_s28 = smul.u32 576, %s7332_s19  ;;  %s5647_s23 = sshll.u32 %s7332_s19, 8 }
   0xf   : > { %s6970_s26 = scalar_lea.vmem %s7328_s3, %s5647_s23  ;;  %s238_s30 = scalar_lea.vmem %s7329_s4, %s7332_s19 }
  0x10   : > { %s6618_s6 = scalar_lea.vmem %s7325_s0, %s6384_s28  ;;  %s241_s9 = scalar_lea.vmem %s7330_s5, %s7332_s19 }
  0x11   : > { %v6395_v4 = vld [vmem:[%s6618_s6 + $0x20] sm:$0xff]   ;;  %v6398_v7 = vld [vmem:[%s6618_s6 + $0x28] sm:$0xff]   ;;  %v6401_v10 = vld [vmem:[%s6618_s6 + $0x30] sm:$0xff]  }
  0x12   : > { %v6397_v5 = vld [vmem:[%s6618_s6 + $0x60] sm:$0xff]   ;;  %5874 = vmatprep.mubr.msk.bf16.mxu0 %vm292_vm0, %v6395_v4  ;;  %v6399_v9 = vld [vmem:[%s6618_s6 + $0x68] sm:$0xff]   ;;  %v6402_v11 = vld [vmem:[%s6618_s6 + $0x70] sm:$0xff]  }
  0x13   : > { %5914 = vmatprep.mubr.msk.bf16.mxu1 %vm292_vm0, %v6397_v5  ;;  %5875 = vmatmul.mubr.msk.bf16.vlgmr.msra.gmra.mrb[0].mxu0 %vm292_vm0, %v6398_v7  ;;  %v6403_v12 = vld [vmem:[%s6618_s6 + $0x38] sm:$0xff]   ;;  %v6405_v14 = vld [vmem:[%s6618_s6] sm:$0xff]   ;;  %v6408_v16 = vld [vmem:[%s6618_s6 + $0x8] sm:$0xff]  }
  0x14   : > { %5883 = vmatpush3.bf16.msra.mxu0 %v6396_v2  ;;  %5915 = vmatmul.mubr.msk.bf16.vlgmr.msra.gmra.mrb[0].mxu1 %vm292_vm0, %v6399_v9  ;;  %v6404_v13 = vld [vmem:[%s6618_s6 + $0x78] sm:$0xff]   ;;  %v6407_v15 = vld [vmem:[%s6618_s6 + $0x40] sm:$0xff]   ;;  %v6409_v17 = vld [vmem:[%s6618_s6 + $0x48] sm:$0xff]  }
  0x15   : > { %5923 = vmatpush3.bf16.msra.mxu1 %v6400_v3  ;;  %5878 = vmatprep.mubr.msk.bf16.mxu0 %vm292_vm0, %v6401_v10  ;;  %v6411_v19 = vld [vmem:[%s6618_s6 + $0x10] sm:$0xff]   ;;  %v6413_v22 = vld [vmem:[%s6618_s6 + $0x18] sm:$0xff]   ;;  %v6415_v24 = vld [vmem:[%s6618_s6 + $0x40] sm:$0xff]  }
  0x16   : > { %5918 = vmatprep.mubr.msk.bf16.mxu1 %vm292_vm0, %v6402_v11  ;;  %5892 = vmatprep.subr.bf16.mxu0 %v6406_v6  ;;  %v6412_v20 = vld [vmem:[%s6618_s6 + $0x50] sm:$0xff]   ;;  %v6414_v23 = vld [vmem:[%s6618_s6 + $0x58] sm:$0xff]   ;;  %v6417_v25 = vld [vmem:[%s6618_s6 + $0x80] sm:$0xff]  }
  0x17   : > { %5932 = vmatprep.subr.bf16.mxu1 %v6410_v8  ;;  %v6418_v26 = vld [vmem:[%s6618_s6 + $0x48] sm:$0xff]   ;;  %v6421_v28 = vld [vmem:[%s6618_s6 + $0x50] sm:$0xff]   ;;  %v6423_v32 = vld [vmem:[%s6618_s6 + $0x58] sm:$0xff]  }
  0x18   : > { %v6419_v27 = vld [vmem:[%s6618_s6 + $0x88] sm:$0xff]   ;;  %v6422_v29 = vld [vmem:[%s6618_s6 + $0x90] sm:$0xff]   ;;  %v6424_v33 = vld [vmem:[%s6618_s6 + $0x98] sm:$0xff]  }
  0x19   : > { %v6425_v34 = vld [vmem:[%s6618_s6 + $0x60] sm:$0xff]   ;;  %v6428_v36 = vld [vmem:[%s6618_s6 + $0x68] sm:$0xff]   ;;  %v6431_v38 = vld [vmem:[%s6618_s6 + $0x70] sm:$0xff]  }
  0x1a   : > { %v6426_v35 = vld [vmem:[%s6618_s6 + $0xa0] sm:$0xff]   ;;  %v6429_v37 = vld [vmem:[%s6618_s6 + $0xa8] sm:$0xff]   ;;  %v6432_v39 = vld [vmem:[%s6618_s6 + $0xb0] sm:$0xff]  }
  0x1b   : > { %5879 = vmatmul.mubr.msk.bf16.gmra.mrb[4].mxu0 %vm292_vm0, %v6403_v12  ;;  %v6433_v42 = vld [vmem:[%s6618_s6 + $0x78] sm:$0xff]   ;;  %v6435_v44 = vld [vmem:[%s6618_s6 + $0xa0] sm:$0xff]   ;;  %v6438_v46 = vld [vmem:[%s6618_s6 + $0xa8] sm:$0xff]  }
  0x1c   : > { %5919 = vmatmul.mubr.msk.bf16.gmra.mrb[4].mxu1 %vm292_vm0, %v6404_v13  ;;  %5884 = vmatprep.mubr.msk.bf16.mxu0 %vm292_vm0, %v6405_v14  ;;  %v6434_v43 = vld [vmem:[%s6618_s6 + $0xb8] sm:$0xff]   ;;  %v6437_v45 = vld [vmem:[%s6618_s6 + $0xe0] sm:$0xff]   ;;  %v6439_v47 = vld [vmem:[%s6618_s6 + $0xe8] sm:$0xff]  }
  0x1d   : > { %5924 = vmatprep.mubr.msk.bf16.mxu1 %vm292_vm0, %v6407_v15  ;;  %v6441_v48 = vld [vmem:[%s6618_s6 + $0xb0] sm:$0xff]   ;;  %v6443_v52 = vld [vmem:[%s6618_s6 + $0xb8] sm:$0xff]   ;;  %v6445_v54 = vld [vmem:[%s6618_s6 + $0x80] sm:$0xff]  }
  0x1e   : > { %v6442_v49 = vld [vmem:[%s6618_s6 + $0xf0] sm:$0xff]   ;;  %v6444_v53 = vld [vmem:[%s6618_s6 + $0xf8] sm:$0xff]   ;;  %v6447_v55 = vld [vmem:[%s6618_s6 + $0xc0] sm:$0xff]  }
  0x1f   : > { %v6448_v56 = vld [vmem:[%s6618_s6 + $0x88] sm:$0xff]   ;;  %v6451_v58 = vld [vmem:[%s6618_s6 + $0x90] sm:$0xff]   ;;  %v6453_v62 = vld [vmem:[%s6618_s6 + $0x98] sm:$0xff]  }
  0x20   : > { %v6449_v57 = vld [vmem:[%s6618_s6 + $0xc8] sm:$0xff]   ;;  %v6452_v59 = vld [vmem:[%s6618_s6 + $0xd0] sm:$0xff]   ;;  %v6454_v63 = vld [vmem:[%s6618_s6 + $0xd8] sm:$0xff]  }
  0x21   : > { %v6455_v0 = vld [vmem:[%s6618_s6 + $0xc0] sm:$0xff]   ;;  %v6458_v2 = vld [vmem:[%s6618_s6 + $0xc8] sm:$0xff]   ;;  %v6461_v4 = vld [vmem:[%s6618_s6 + $0xd0] sm:$0xff]  }
  0x22   : > { %v6457_v1 = vld [vmem:[%s6618_s6 + $0x100] sm:$0xff]   ;;  %v6459_v3 = vld [vmem:[%s6618_s6 + $0x108] sm:$0xff]   ;;  %v6462_v5 = vld [vmem:[%s6618_s6 + $0x110] sm:$0xff]  }
  0x23   : > { %5885 = vmatmul.mubr.msk.bf16.vlgmr.msra.gmra.mrb[0].mxu0 %vm292_vm0, %v6408_v16  ;;  %v6470_v7 = vld [vmem:[%s7326_s1 + $0x8] sm:$0xff]   ;;  %v6464_v9 = vld [vmem:[%s6618_s6 + $0x118] sm:$0xff]   ;;  %v6465_v10 = vld [vmem:[%s6618_s6 + $0xe0] sm:$0xff]  }
  0x24   : > { %5893 = vmatpush3.bf16.msra.mxu0 %v6406_v6  ;;  %5925 = vmatmul.mubr.msk.bf16.vlgmr.msra.gmra.mrb[0].mxu1 %vm292_vm0, %v6409_v17  ;;  %v6467_v6 = vld [vmem:[%s7326_s1 + $0x8] sm:$0xff]   ;;  %v6466_v11 = vld [vmem:[%s6618_s6 + $0x120] sm:$0xff]   ;;  %v6471_v14 = vld [vmem:[%s6618_s6 + $0xf0] sm:$0xff]  }
  0x25   : > { %5933 = vmatpush3.bf16.msra.mxu1 %v6410_v8  ;;  %5888 = vmatprep.mubr.msk.bf16.mxu0 %vm292_vm0, %v6411_v19  ;;  %v6463_v8 = vld [vmem:[%s6618_s6 + $0xd8] sm:$0xff]   ;;  %v6468_v12 = vld [vmem:[%s6618_s6 + $0xe8] sm:$0xff]   ;;  %v6472_v15 = vld [vmem:[%s6618_s6 + $0x130] sm:$0xff]  }
  0x26   : > { %5928 = vmatprep.mubr.msk.bf16.mxu1 %vm292_vm0, %v6412_v20  ;;  %5902 = vmatprep.subr.bf16.mxu0 %v6416_v18  ;;  %v6469_v13 = vld [vmem:[%s6618_s6 + $0x128] sm:$0xff]   ;;  %v6476_v16 = vld [vmem:[%s7326_s1] sm:$0xff]   ;;  %v6474_v19 = vld [vmem:[%s6618_s6 + $0x138] sm:$0xff]  }
  0x27   : > { %5942 = vmatprep.subr.bf16.mxu1 %v6420_v21  ;;  %v6480_v17 = vld [vmem:[%s7326_s1] sm:$0xff]  }
  0x28   : > { %v6475_v20 = vld [vmem:[%s6618_s6 + $0x120] sm:$0xff]  }
  0x2b   : > { %5889 = vmatmul.mubr.msk.bf16.gmra.mrb[4].mxu0 %vm292_vm0, %v6413_v22  ;;  %v6478_v22 = vld [vmem:[%s6618_s6 + $0x128] sm:$0xff]  }
  0x2c   : > { %5929 = vmatmul.mubr.msk.bf16.gmra.mrb[4].mxu1 %vm292_vm0, %v6414_v23  ;;  %5894 = vmatprep.mubr.msk.bf16.mxu0 %vm292_vm0, %v6415_v24  ;;  %v6479_v23 = vld [vmem:[%s6618_s6 + $0x168] sm:$0xff]   ;;  %v6481_v24 = vld [vmem:[%s6618_s6 + $0x130] sm:$0xff]  }
  0x2d   : > { %5934 = vmatprep.mubr.msk.bf16.mxu1 %vm292_vm0, %v6417_v25  ;;  %v6482_v25 = vld [vmem:[%s6618_s6 + $0x170] sm:$0xff]  }
  0x33   : > { %5895 = vmatmul.mubr.msk.bf16.vlgmr.msra.gmra.mrb[0].mxu0 %vm292_vm0, %v6418_v26  ;;  %v6486_v26 = vld [vmem:[%s7326_s1 + $0x10] sm:$0xff]  }
  0x34   : > { %5903 = vmatpush3.bf16.msra.mxu0 %v6416_v18  ;;  %5935 = vmatmul.mubr.msk.bf16.vlgmr.msra.gmra.mrb[0].mxu1 %vm292_vm0, %v6419_v27  ;;  %v6473_v18 = vld [vmem:[%s6618_s6 + $0xf8] sm:$0xff]   ;;  %v6490_v27 = vld [vmem:[%s7326_s1 + $0x10] sm:$0xff]  }
  0x35   : > { %5943 = vmatpush3.bf16.msra.mxu1 %v6420_v21  ;;  %5898 = vmatprep.mubr.msk.bf16.mxu0 %vm292_vm0, %v6421_v28  ;;  %v6477_v21 = vld [vmem:[%s6618_s6 + $0x160] sm:$0xff]   ;;  %v6483_v28 = vld [vmem:[%s6618_s6 + $0x138] sm:$0xff]  }
  0x36   : > { %5938 = vmatprep.mubr.msk.bf16.mxu1 %vm292_vm0, %v6422_v29  ;;  %5952 = vmatprep.subr.bf16.mxu0 %v6427_v30  ;;  %v6484_v29 = vld [vmem:[%s6618_s6 + $0x178] sm:$0xff]  }
  0x37   : > { %5992 = vmatprep.subr.bf16.mxu1 %v6430_v31 }
  0x3b   : > { %5899 = vmatmul.mubr.msk.bf16.gmra.mrb[4].mxu0 %vm292_vm0, %v6423_v32  ;;  %v6488_v32 = vld [vmem:[%s6618_s6 + $0x108] sm:$0xff]  }
  0x3c   : > { %5939 = vmatmul.mubr.msk.bf16.gmra.mrb[4].mxu1 %vm292_vm0, %v6424_v33  ;;  %5904 = vmatprep.mubr.msk.bf16.mxu0 %vm292_vm0, %v6425_v34  ;;  %v6489_v33 = vld [vmem:[%s6618_s6 + $0x148] sm:$0xff]   ;;  %v6491_v34 = vld [vmem:[%s6618_s6 + $0x110] sm:$0xff]  }
  0x3d   : > { %5944 = vmatprep.mubr.msk.bf16.mxu1 %vm292_vm0, %v6426_v35  ;;  %v6492_v35 = vld [vmem:[%s6618_s6 + $0x150] sm:$0xff]  }
  0x43   : > { %5905 = vmatmul.mubr.msk.bf16.vlgmr.msra.gmra.mrb[0].mxu0 %vm292_vm0, %v6428_v36  ;;  %v6496_v36 = vld [vmem:[%s7326_s1 + $0x18] sm:$0xff]  }
  0x44   : > { %5945 = vmatmul.mubr.msk.bf16.vlgmr.msra.gmra.mrb[0].mxu1 %vm292_vm0, %v6429_v37  ;;  %5953 = vmatpush3.bf16.msra.mxu0 %v6427_v30  ;;  %v6485_v30 = vld [vmem:[%s6618_s6 + $0x100] sm:$0xff]   ;;  %v6500_v37 = vld [vmem:[%s7326_s1 + $0x18] sm:$0xff]  }
  0x45   : > { %5993 = vmatpush3.bf16.msra.mxu1 %v6430_v31  ;;  %5908 = vmatprep.mubr.msk.bf16.mxu0 %vm292_vm0, %v6431_v38  ;;  %v6487_v31 = vld [vmem:[%s6618_s6 + $0x140] sm:$0xff]   ;;  %v6493_v38 = vld [vmem:[%s6618_s6 + $0x118] sm:$0xff]  }
  0x46   : > { %5948 = vmatprep.mubr.msk.bf16.mxu1 %vm292_vm0, %v6432_v39  ;;  %5962 = vmatprep.subr.bf16.mxu0 %v6436_v40  ;;  %v6494_v39 = vld [vmem:[%s6618_s6 + $0x158] sm:$0xff]  }
  0x47   : > { %6002 = vmatprep.subr.bf16.mxu1 %v6440_v41 }
  0x4b   : > { %5909 = vmatmul.mubr.msk.bf16.gmra.mrb[4].mxu0 %vm292_vm0, %v6433_v42  ;;  %v6498_v42 = vld [vmem:[%s6618_s6 + $0x148] sm:$0xff]  }
  0x4c   : > { %5949 = vmatmul.mubr.msk.bf16.gmra.mrb[4].mxu1 %vm292_vm0, %v6434_v43  ;;  %5954 = vmatprep.mubr.msk.bf16.mxu0 %vm292_vm0, %v6435_v44  ;;  %v6499_v43 = vld [vmem:[%s6618_s6 + $0x188] sm:$0xff]   ;;  %v6501_v44 = vld [vmem:[%s6618_s6 + $0x150] sm:$0xff]  }
  0x4d   : > { %5994 = vmatprep.mubr.msk.bf16.mxu1 %vm292_vm0, %v6437_v45  ;;  %v6502_v45 = vld [vmem:[%s6618_s6 + $0x190] sm:$0xff]  }
  0x53   : > { %5955 = vmatmul.mubr.msk.bf16.vlgmr.msra.gmra.mrb[8].mxu0 %vm292_vm0, %v6438_v46  ;;  %v6507_v46 = vld [vmem:[%s7326_s1 + $0x8] sm:$0xff]  }
  0x54   : > { %5963 = vmatpush3.bf16.msra.mxu0 %v6436_v40  ;;  %5995 = vmatmul.mubr.msk.bf16.vlgmr.msra.gmra.mrb[8].mxu1 %vm292_vm0, %v6439_v47  ;;  %v6495_v40 = vld [vmem:[%s6618_s6 + $0x140] sm:$0xff]   ;;  %v6510_v47 = vld [vmem:[%s7326_s1 + $0x8] sm:$0xff]  }
  0x55   : > { %6003 = vmatpush3.bf16.msra.mxu1 %v6440_v41  ;;  %5958 = vmatprep.mubr.msk.bf16.mxu0 %vm292_vm0, %v6441_v48  ;;  %v6497_v41 = vld [vmem:[%s6618_s6 + $0x180] sm:$0xff]   ;;  %v6503_v48 = vld [vmem:[%s6618_s6 + $0x158] sm:$0xff]  }
  0x56   : > { %5998 = vmatprep.mubr.msk.bf16.mxu1 %vm292_vm0, %v6442_v49  ;;  %5972 = vmatprep.subr.bf16.mxu0 %v6446_v50  ;;  %v6504_v49 = vld [vmem:[%s6618_s6 + $0x198] sm:$0xff]  }
  0x57   : > { %6012 = vmatprep.subr.bf16.mxu1 %v6450_v51 }
  0x5b   : > { %5959 = vmatmul.mubr.msk.bf16.gmra.mrb[12].mxu0 %vm292_vm0, %v6443_v52  ;;  %v6508_v52 = vld [vmem:[%s6618_s6 + $0x168] sm:$0xff]  }
  0x5c   : > { %5999 = vmatmul.mubr.msk.bf16.gmra.mrb[12].mxu1 %vm292_vm0, %v6444_v53  ;;  %5964 = vmatprep.mubr.msk.bf16.mxu0 %vm292_vm0, %v6445_v54  ;;  %v6509_v53 = vld [vmem:[%s6618_s6 + $0x1a8] sm:$0xff]   ;;  %v6511_v54 = vld [vmem:[%s6618_s6 + $0x170] sm:$0xff]  }
  0x5d   : > { %6004 = vmatprep.mubr.msk.bf16.mxu1 %vm292_vm0, %v6447_v55  ;;  %v6512_v55 = vld [vmem:[%s6618_s6 + $0x1b0] sm:$0xff]  }
  0x63   : > { %5965 = vmatmul.mubr.msk.bf16.vlgmr.msra.gmra.mrb[8].mxu0 %vm292_vm0, %v6448_v56  ;;  %v6516_v56 = vld [vmem:[%s7326_s1] sm:$0xff]  }
  0x64   : > { %5973 = vmatpush3.bf16.msra.mxu0 %v6446_v50  ;;  %6005 = vmatmul.mubr.msk.bf16.vlgmr.msra.gmra.mrb[8].mxu1 %vm292_vm0, %v6449_v57  ;;  %v6505_v50 = vld [vmem:[%s6618_s6 + $0x160] sm:$0xff]  }
  0x65   : > { %6013 = vmatpush3.bf16.msra.mxu1 %v6450_v51  ;;  %5968 = vmatprep.mubr.msk.bf16.mxu0 %vm292_vm0, %v6451_v58  ;;  %v6506_v51 = vld [vmem:[%s6618_s6 + $0x1a0] sm:$0xff]   ;;  %v6513_v58 = vld [vmem:[%s6618_s6 + $0x178] sm:$0xff]  }
  0x66   : > { %6008 = vmatprep.mubr.msk.bf16.mxu1 %vm292_vm0, %v6452_v59  ;;  %5982 = vmatprep.subr.bf16.mxu0 %v6456_v60  ;;  %v6520_v57 = vld [vmem:[%s7326_s1] sm:$0xff]   ;;  %v6514_v59 = vld [vmem:[%s6618_s6 + $0x1b8] sm:$0xff]  }
  0x67   : > { %6022 = vmatprep.subr.bf16.mxu1 %v6460_v61 }
  0x6b   : > { %5969 = vmatmul.mubr.msk.bf16.gmra.mrb[12].mxu0 %vm292_vm0, %v6453_v62  ;;  %v6518_v62 = vld [vmem:[%s6618_s6 + $0x1a8] sm:$0xff]  }
  0x6c   : > { %6009 = vmatmul.mubr.msk.bf16.gmra.mrb[12].mxu1 %vm292_vm0, %v6454_v63  ;;  %5974 = vmatprep.mubr.msk.bf16.mxu0 %vm292_vm0, %v6455_v0  ;;  %v6519_v63 = vld [vmem:[%s6618_s6 + $0x1e8] sm:$0xff]   ;;  %v6521_v0 = vld [vmem:[%s6618_s6 + $0x1b0] sm:$0xff]  }
  0x6d   : > { %6014 = vmatprep.mubr.msk.bf16.mxu1 %vm292_vm0, %v6457_v1  ;;  %v6522_v1 = vld [vmem:[%s6618_s6 + $0x1f0] sm:$0xff]  }
  0x73   : > { %5975 = vmatmul.mubr.msk.bf16.vlgmr.msra.gmra.mrb[8].mxu0 %vm292_vm0, %v6458_v2  ;;  %v6526_v2 = vld [vmem:[%s7326_s1 + $0x10] sm:$0xff]  }
  0x74   : > { %5983 = vmatpush3.bf16.msra.mxu0 %v6456_v60  ;;  %6015 = vmatmul.mubr.msk.bf16.vlgmr.msra.gmra.mrb[8].mxu1 %vm292_vm0, %v6459_v3  ;;  %v6515_v60 = vld [vmem:[%s6618_s6 + $0x1a0] sm:$0xff]   ;;  %v6530_v3 = vld [vmem:[%s7326_s1 + $0x10] sm:$0xff]  }
  0x75   : > { %6023 = vmatpush3.bf16.msra.mxu1 %v6460_v61  ;;  %5978 = vmatprep.mubr.msk.bf16.mxu0 %vm292_vm0, %v6461_v4  ;;  %v6517_v61 = vld [vmem:[%s6618_s6 + $0x1e0] sm:$0xff]   ;;  %v6523_v4 = vld [vmem:[%s6618_s6 + $0x1b8] sm:$0xff]  }
  0x76   : > { %6018 = vmatprep.mubr.msk.bf16.mxu1 %vm292_vm0, %v6462_v5  ;;  %6032 = vmatprep.subr.bf16.mxu0 %v6467_v6  ;;  %v6524_v5 = vld [vmem:[%s6618_s6 + $0x1f8] sm:$0xff]  }
  0x77   : > { %6072 = vmatprep.subr.bf16.mxu1 %v6470_v7 }
  0x7b   : > { %5979 = vmatmul.mubr.msk.bf16.gmra.mrb[12].mxu0 %vm292_vm0, %v6463_v8  ;;  %v6528_v8 = vld [vmem:[%s6618_s6 + $0x188] sm:$0xff]  }
  0x7c   : > { %6019 = vmatmul.mubr.msk.bf16.gmra.mrb[12].mxu1 %vm292_vm0, %v6464_v9  ;;  %5984 = vmatprep.mubr.msk.bf16.mxu0 %vm292_vm0, %v6465_v10  ;;  %v6529_v9 = vld [vmem:[%s6618_s6 + $0x1c8] sm:$0xff]   ;;  %v6531_v10 = vld [vmem:[%s6618_s6 + $0x190] sm:$0xff]  }
  0x7d   : > { %6024 = vmatprep.mubr.msk.bf16.mxu1 %vm292_vm0, %v6466_v11  ;;  %v6532_v11 = vld [vmem:[%s6618_s6 + $0x1d0] sm:$0xff]  }
  0x83   : > { %5985 = vmatmul.mubr.msk.bf16.vlgmr.msra.gmra.mrb[8].mxu0 %vm292_vm0, %v6468_v12  ;;  %v6536_v12 = vld [vmem:[%s7326_s1 + $0x18] sm:$0xff]  }
  0x84   : > { %6025 = vmatmul.mubr.msk.bf16.vlgmr.msra.gmra.mrb[8].mxu1 %vm292_vm0, %v6469_v13  ;;  %6033 = vmatpush3.bf16.msra.mxu0 %v6467_v6  ;;  %v6525_v6 = vld [vmem:[%s6618_s6 + $0x180] sm:$0xff]   ;;  %v6540_v13 = vld [vmem:[%s7326_s1 + $0x18] sm:$0xff]  }
  0x85   : > { %6073 = vmatpush3.bf16.msra.mxu1 %v6470_v7  ;;  %5988 = vmatprep.mubr.msk.bf16.mxu0 %vm292_vm0, %v6471_v14  ;;  %v6527_v7 = vld [vmem:[%s6618_s6 + $0x1c0] sm:$0xff]   ;;  %v6533_v14 = vld [vmem:[%s6618_s6 + $0x198] sm:$0xff]  }
  0x86   : > { %6028 = vmatprep.mubr.msk.bf16.mxu1 %vm292_vm0, %v6472_v15  ;;  %6042 = vmatprep.subr.bf16.mxu0 %v6476_v16  ;;  %v6534_v15 = vld [vmem:[%s6618_s6 + $0x1d8] sm:$0xff]  }
  0x87   : > { %6082 = vmatprep.subr.bf16.mxu1 %v6480_v17 }
  0x8b   : > { %5989 = vmatmul.mubr.msk.bf16.gmra.mrb[12].mxu0 %vm292_vm0, %v6473_v18  ;;  %v6538_v18 = vld [vmem:[%s6618_s6 + $0x1c8] sm:$0xff]  }
  0x8c   : > { %6029 = vmatmul.mubr.msk.bf16.gmra.mrb[12].mxu1 %vm292_vm0, %v6474_v19  ;;  %6034 = vmatprep.mubr.msk.bf16.mxu0 %vm292_vm0, %v6475_v20  ;;  %v6539_v19 = vld [vmem:[%s6618_s6 + $0x208] sm:$0xff]   ;;  %v6541_v20 = vld [vmem:[%s6618_s6 + $0x1d0] sm:$0xff]  }
  0x8d   : > { %6074 = vmatprep.mubr.msk.bf16.mxu1 %vm292_vm0, %v6477_v21  ;;  %v6542_v21 = vld [vmem:[%s6618_s6 + $0x210] sm:$0xff]  }
  0x93   : > { %6035 = vmatmul.mubr.msk.bf16.vlgmr.msra.gmra.mrb[16].mxu0 %vm292_vm0, %v6478_v22  ;;  %v6543_v22 = vld [vmem:[%s6618_s6 + $0x1d8] sm:$0xff]  }
  0x94   : > { %6043 = vmatpush3.bf16.msra.mxu0 %v6476_v16  ;;  %6075 = vmatmul.mubr.msk.bf16.vlgmr.msra.gmra.mrb[16].mxu1 %vm292_vm0, %v6479_v23  ;;  %v6535_v16 = vld [vmem:[%s6618_s6 + $0x1c0] sm:$0xff]   ;;  %v6544_v23 = vld [vmem:[%s6618_s6 + $0x218] sm:$0xff]  }
  0x95   : > { %6083 = vmatpush3.bf16.msra.mxu1 %v6480_v17  ;;  %6038 = vmatprep.mubr.msk.bf16.mxu0 %vm292_vm0, %v6481_v24  ;;  %v6537_v17 = vld [vmem:[%s6618_s6 + $0x200] sm:$0xff]  }
  0x96   : > { %6078 = vmatprep.mubr.msk.bf16.mxu1 %vm292_vm0, %v6482_v25  ;;  %6052 = vmatprep.subr.bf16.mxu0 %v6486_v26  ;;  %v6545_v24 = vld [vmem:[%s6618_s6 + $0x1e0] sm:$0xff]  }
  0x97   : > { %6092 = vmatprep.subr.bf16.mxu1 %v6490_v27  ;;  %v6546_v25 = vld [vmem:[%s6618_s6 + $0x220] sm:$0xff]  }
  0x9b   : > { %6039 = vmatmul.mubr.msk.bf16.gmra.mrb[20].mxu0 %vm292_vm0, %v6483_v28  ;;  %v6549_v28 = vld [vmem:[%s6618_s6 + $0x1f0] sm:$0xff]  }
  0x9c   : > { %6079 = vmatmul.mubr.msk.bf16.gmra.mrb[20].mxu1 %vm292_vm0, %v6484_v29  ;;  %6044 = vmatprep.mubr.msk.bf16.mxu0 %vm292_vm0, %v6485_v30  ;;  %v6550_v29 = vld [vmem:[%s6618_s6 + $0x230] sm:$0xff]   ;;  %v6551_v30 = vld [vmem:[%s6618_s6 + $0x1f8] sm:$0xff]  }
  0x9d   : > { %6084 = vmatprep.mubr.msk.bf16.mxu1 %vm292_vm0, %v6487_v31  ;;  %v6552_v31 = vld [vmem:[%s6618_s6 + $0x238] sm:$0xff]  }
  0xa3   : > { %6045 = vmatmul.mubr.msk.bf16.vlgmr.msra.gmra.mrb[16].mxu0 %vm292_vm0, %v6488_v32  ;;  %v6963_v32 = vld [vmem:[%s7327_s2] ss:$0 sm:$0xff] }
  0xa4   : > { %6053 = vmatpush3.bf16.msra.mxu0 %v6486_v26  ;;  %6085 = vmatmul.mubr.msk.bf16.vlgmr.msra.gmra.mrb[16].mxu1 %vm292_vm0, %v6489_v33  ;;  %v6547_v26 = vld [vmem:[%s6618_s6 + $0x1e8] sm:$0xff]  }
  0xa5   : > { %6093 = vmatpush3.bf16.msra.mxu1 %v6490_v27  ;;  %6048 = vmatprep.mubr.msk.bf16.mxu0 %vm292_vm0, %v6491_v34  ;;  %v6548_v27 = vld [vmem:[%s6618_s6 + $0x228] sm:$0xff]  }
  0xa6   : > { %6088 = vmatprep.mubr.msk.bf16.mxu1 %vm292_vm0, %v6492_v35  ;;  %6062 = vmatprep.subr.bf16.mxu0 %v6496_v36 }
  0xa7   : > { %6102 = vmatprep.subr.bf16.mxu1 %v6500_v37 }
  0xab   : > { %6049 = vmatmul.mubr.msk.bf16.gmra.mrb[20].mxu0 %vm292_vm0, %v6493_v38 }
  0xac   : > { %6089 = vmatmul.mubr.msk.bf16.gmra.mrb[20].mxu1 %vm292_vm0, %v6494_v39  ;;  %6054 = vmatprep.mubr.msk.bf16.mxu0 %vm292_vm0, %v6495_v40 }
  0xad   : > { %6094 = vmatprep.mubr.msk.bf16.mxu1 %vm292_vm0, %v6497_v41 }
  0xb3   : > { %6055 = vmatmul.mubr.msk.bf16.vlgmr.msra.gmra.mrb[16].mxu0 %vm292_vm0, %v6498_v42 }
  0xb4   : > { %6063 = vmatpush3.bf16.msra.mxu0 %v6496_v36  ;;  %6095 = vmatmul.mubr.msk.bf16.vlgmr.msra.gmra.mrb[16].mxu1 %vm292_vm0, %v6499_v43 }
  0xb5   : > { %6103 = vmatpush3.bf16.msra.mxu1 %v6500_v37  ;;  %6058 = vmatprep.mubr.msk.bf16.mxu0 %vm292_vm0, %v6501_v44 }
  0xb6   : > { %6098 = vmatprep.mubr.msk.bf16.mxu1 %vm292_vm0, %v6502_v45  ;;  %6112 = vmatprep.subr.bf16.mxu0 %v6507_v46 }
  0xb7   : > { %6152 = vmatprep.subr.bf16.mxu1 %v6510_v47 }
  0xbb   : > { %6059 = vmatmul.mubr.msk.bf16.gmra.mrb[20].mxu0 %vm292_vm0, %v6503_v48 }
  0xbc   : > { %6099 = vmatmul.mubr.msk.bf16.gmra.mrb[20].mxu1 %vm292_vm0, %v6504_v49  ;;  %6064 = vmatprep.mubr.msk.bf16.mxu0 %vm292_vm0, %v6505_v50 }
  0xbd   : > { %6104 = vmatprep.mubr.msk.bf16.mxu1 %vm292_vm0, %v6506_v51 }
  0xc3   : > { %6065 = vmatmul.mubr.msk.bf16.vlgmr.msra.gmra.mrb[16].mxu0 %vm292_vm0, %v6508_v52 }
  0xc4   : > { %6105 = vmatmul.mubr.msk.bf16.vlgmr.msra.gmra.mrb[16].mxu1 %vm292_vm0, %v6509_v53  ;;  %6113 = vmatpush3.bf16.msra.mxu0 %v6507_v46 }
  0xc5   : > { %6153 = vmatpush3.bf16.msra.mxu1 %v6510_v47  ;;  %6068 = vmatprep.mubr.msk.bf16.mxu0 %vm292_vm0, %v6511_v54 }
  0xc6   : > { %6108 = vmatprep.mubr.msk.bf16.mxu1 %vm292_vm0, %v6512_v55  ;;  %6122 = vmatprep.subr.bf16.mxu0 %v6516_v56 }
  0xc7   : > { %6162 = vmatprep.subr.bf16.mxu1 %v6520_v57 }
  0xcb   : > { %6069 = vmatmul.mubr.msk.bf16.gmra.mrb[20].mxu0 %vm292_vm0, %v6513_v58 }
  0xcc   : > { %6109 = vmatmul.mubr.msk.bf16.gmra.mrb[20].mxu1 %vm292_vm0, %v6514_v59  ;;  %6114 = vmatprep.mubr.msk.bf16.mxu0 %vm292_vm0, %v6515_v60 }
  0xcd   : > { %6154 = vmatprep.mubr.msk.bf16.mxu1 %vm292_vm0, %v6517_v61 }
  0xd3   : > { %6115 = vmatmul.mubr.msk.bf16.vlgmr.msra.gmra.mrb[24].mxu0 %vm292_vm0, %v6518_v62 }
  0xd4   : > { %6123 = vmatpush3.bf16.msra.mxu0 %v6516_v56  ;;  %6155 = vmatmul.mubr.msk.bf16.vlgmr.msra.gmra.mrb[24].mxu1 %vm292_vm0, %v6519_v63 }
  0xd5   : > { %6163 = vmatpush3.bf16.msra.mxu1 %v6520_v57  ;;  %6118 = vmatprep.mubr.msk.bf16.mxu0 %vm292_vm0, %v6521_v0 }
  0xd6   : > { %6158 = vmatprep.mubr.msk.bf16.mxu1 %vm292_vm0, %v6522_v1  ;;  %6132 = vmatprep.subr.bf16.mxu0 %v6526_v2 }
  0xd7   : > { %6172 = vmatprep.subr.bf16.mxu1 %v6530_v3 }
  0xdb   : > { %6119 = vmatmul.mubr.msk.bf16.gmra.mrb[28].mxu0 %vm292_vm0, %v6523_v4 }
  0xdc   : > { %6159 = vmatmul.mubr.msk.bf16.gmra.mrb[28].mxu1 %vm292_vm0, %v6524_v5  ;;  %6124 = vmatprep.mubr.msk.bf16.mxu0 %vm292_vm0, %v6525_v6 }
  0xdd   : > { %6164 = vmatprep.mubr.msk.bf16.mxu1 %vm292_vm0, %v6527_v7 }
  0xe3   : > { %6125 = vmatmul.mubr.msk.bf16.vlgmr.msra.gmra.mrb[24].mxu0 %vm292_vm0, %v6528_v8 }
  0xe4   : > { %6133 = vmatpush3.bf16.msra.mxu0 %v6526_v2  ;;  %6165 = vmatmul.mubr.msk.bf16.vlgmr.msra.gmra.mrb[24].mxu1 %vm292_vm0, %v6529_v9 }
  0xe5   : > { %6173 = vmatpush3.bf16.msra.mxu1 %v6530_v3  ;;  %6128 = vmatprep.mubr.msk.bf16.mxu0 %vm292_vm0, %v6531_v10 }
  0xe6   : > { %6168 = vmatprep.mubr.msk.bf16.mxu1 %vm292_vm0, %v6532_v11  ;;  %6142 = vmatprep.subr.bf16.mxu0 %v6536_v12 }
  0xe7   : > { %6182 = vmatprep.subr.bf16.mxu1 %v6540_v13 }
  0xeb   : > { %6129 = vmatmul.mubr.msk.bf16.gmra.mrb[28].mxu0 %vm292_vm0, %v6533_v14 }
  0xec   : > { %6169 = vmatmul.mubr.msk.bf16.gmra.mrb[28].mxu1 %vm292_vm0, %v6534_v15  ;;  %6134 = vmatprep.mubr.msk.bf16.mxu0 %vm292_vm0, %v6535_v16 }
  0xed   : > { %6174 = vmatprep.mubr.msk.bf16.mxu1 %vm292_vm0, %v6537_v17 }
  0xf3   : > { %6135 = vmatmul.mubr.msk.bf16.vlgmr.msra.gmra.mrb[24].mxu0 %vm292_vm0, %v6538_v18 }
  0xf4   : > { %6143 = vmatpush3.bf16.msra.mxu0 %v6536_v12  ;;  %6175 = vmatmul.mubr.msk.bf16.vlgmr.msra.gmra.mrb[24].mxu1 %vm292_vm0, %v6539_v19 }
  0xf5   : > { %6183 = vmatpush3.bf16.msra.mxu1 %v6540_v13  ;;  %6138 = vmatprep.mubr.msk.bf16.mxu0 %vm292_vm0, %v6541_v20 }
  0xf6   : > { %6178 = vmatprep.mubr.msk.bf16.mxu1 %vm292_vm0, %v6542_v21 }
  0xfb   : > { %6139 = vmatmul.mubr.msk.bf16.gmra.mrb[28].mxu0 %vm292_vm0, %v6543_v22 }
  0xfc   : > { %6179 = vmatmul.mubr.msk.bf16.gmra.mrb[28].mxu1 %vm292_vm0, %v6544_v23  ;;  %6144 = vmatprep.mubr.msk.bf16.mxu0 %vm292_vm0, %v6545_v24 }
  0xfd   : > { %6184 = vmatprep.mubr.msk.bf16.mxu1 %vm292_vm0, %v6546_v25 }
 0x103   : > { %6145 = vmatmul.mubr.msk.bf16.vlgmr.msra.gmra.mrb[24].mxu0 %vm292_vm0, %v6547_v26 }
 0x104   : > { %6185 = vmatmul.mubr.msk.bf16.vlgmr.msra.gmra.mrb[24].mxu1 %vm292_vm0, %v6548_v27  ;;  %6148 = vmatprep.mubr.msk.bf16.mxu0 %vm292_vm0, %v6549_v28 }
 0x105   : > { %6188 = vmatprep.mubr.msk.bf16.mxu1 %vm292_vm0, %v6550_v29 }
 0x10b   : > { %6149 = vmatmul.mubr.msk.bf16.gmra.mrb[28].mxu0 %vm292_vm0, %v6551_v30 }
 0x10c   : > { %6189 = vmatmul.mubr.msk.bf16.gmra.mrb[28].mxu1 %vm292_vm0, %v6552_v31 }
 0x116   : > { %v5906_v33 = vpop.f32.mrb[0].mxu0 }
 0x117   : > { %v727_v34 = vadd.f32 %v5906_v33, %v6963_v32  ;;  %v5946_v35 = vpop.f32.mrb[0].mxu1  ;;  %v680_v36 = vpop.f32.mrb[1].mxu0 }
 0x118   : > { %v1299_v37 = vadd.f32 %v5946_v35, %v6963_v32  ;;  %v725_v38 = vadd.f32 %v6963_v32, %v680_v36  ;;  %v1258_v39 = vpop.f32.mrb[1].mxu1  ;;  %v5907_v40 = vpop.f32.mrb[2].mxu0 }
 0x119   : > { %v5650_v41 = vpack.c.bf16 %v727_v34, %v727_v34  ;;  %v1297_v42 = vadd.f32 %v6963_v32, %v1258_v39  ;;  %v5947_v43 = vpop.f32.mrb[2].mxu1  ;;  %v683_v44 = vpop.f32.mrb[3].mxu0  ;;  %v737_v47 = vsel %vm733_vm1, %v727_v34, 0.0  ;;  %v758_v50 = vmul.f32 %v727_v34, %v727_v34 }
 0x11a   : > { %v5658_v45 = vpack.c.bf16 %v1299_v37, %v1299_v37  ;;  %v1261_v46 = vpop.f32.mrb[3].mxu1  ;;  %v756_v48 = vmul.f32 %v725_v38, %v725_v38  ;;  %v5648_v49 = vpack.c.bf16 %v725_v38, %v725_v38  ;;  %v728_v53 = vadd.f32 %v5907_v40, %v6963_v32 }
 0x11b   : > { %821 = vst.msk [vmem:[%s6970_s26 + $0x8] sm:$0xf] %vm818_vm2, %v5650_v41  ;;  %v1327_v51 = vmul.f32 %v1297_v42, %v1297_v42  ;;  %v5656_v52 = vpack.c.bf16 %v1297_v42, %v1297_v42  ;;  %v1308_v54 = vsel %vm733_vm1, %v1299_v37, 0.0  ;;  %v1300_v55 = vadd.f32 %v5947_v43, %v6963_v32 }
 0x11c   : > { %5099 = vst.msk [vmem:[%s6970_s26 + $0x28] sm:$0xf] %vm818_vm2, %v5658_v45  ;;  %819 = vst.msk [vmem:[%s6970_s26] sm:$0xf] %vm818_vm2, %v5648_v49  ;;  %v726_v56 = vadd.f32 %v6963_v32, %v683_v44  ;;  %v1298_v57 = vadd.f32 %v6963_v32, %v1261_v46  ;;  %v1329_v58 = vmul.f32 %v1299_v37, %v1299_v37  ;;  %v734_v59 = vsel %vm733_vm1, %v725_v38, 0.0 }
 0x11d   : > { %v1305_v60 = vsel %vm733_vm1, %v1297_v42, 0.0  ;;  %5097 = vst.msk [vmem:[%s6970_s26 + $0x20] sm:$0xf] %vm818_vm2, %v5656_v52  ;;  %v5651_v61 = vpack.c.bf16 %v728_v53, %v728_v53  ;;  %v764_v63 = vsel %vm733_vm1, %v756_v48, 0.0  ;;  %v1335_v0 = vsel %vm733_vm1, %v1327_v51, 0.0 }
 0x11e   : > { %v5910_v62 = vpop.f32.mrb[4].mxu0  ;;  %v5659_v1 = vpack.c.bf16 %v1300_v55, %v1300_v55  ;;  %v735_v2 = vsel %vm733_vm1, %v726_v56, 0.0  ;;  %v759_v5 = vmul.f32 %v728_v53, %v728_v53  ;;  %v757_v7 = vmul.f32 %v726_v56, %v726_v56 }
 0x11f   : > { %v5950_v3 = vpop.f32.mrb[4].mxu1  ;;  %v696_v4 = vpop.f32.mrb[5].mxu0  ;;  %822 = vst.msk [vmem:[%s6970_s26 + $0xc] sm:$0xf] %vm818_vm2, %v5651_v61  ;;  %v736_v6 = vadd.f32 %v735_v2, %v734_v59  ;;  %v5649_v8 = vpack.c.bf16 %v726_v56, %v726_v56  ;;  %v1330_v11 = vmul.f32 %v1300_v55, %v1300_v55  ;;  %v1306_v12 = vsel %vm733_vm1, %v1298_v57, 0.0 }
 0x120   : > { %v1274_v9 = vpop.f32.mrb[5].mxu1  ;;  %v5911_v10 = vpop.f32.mrb[6].mxu0  ;;  %5100 = vst.msk [vmem:[%s6970_s26 + $0x2c] sm:$0xf] %vm818_vm2, %v5659_v1  ;;  %v1328_v13 = vmul.f32 %v1298_v57, %v1298_v57  ;;  %v5657_v14 = vpack.c.bf16 %v1298_v57, %v1298_v57  ;;  %v765_v18 = vsel %vm733_vm1, %v757_v7, 0.0  ;;  %v1307_v19 = vadd.f32 %v1306_v12, %v1305_v60 }
 0x121   : > { %v5951_v15 = vpop.f32.mrb[6].mxu1  ;;  %v699_v16 = vpop.f32.mrb[7].mxu0  ;;  %v738_v17 = vadd.f32 %v737_v47, %v736_v6  ;;  %820 = vst.msk [vmem:[%s6970_s26 + $0x4] sm:$0xf] %vm818_vm2, %v5649_v8  ;;  %v731_v20 = vadd.f32 %v5910_v62, %v6963_v32  ;;  %v766_v22 = vadd.f32 %v765_v18, %v764_v63  ;;  %v1303_v24 = vadd.f32 %v5950_v3, %v6963_v32 }
 0x122   : > { %v1277_v21 = vpop.f32.mrb[7].mxu1  ;;  %v1336_v23 = vsel %vm733_vm1, %v1328_v13, 0.0  ;;  %5098 = vst.msk [vmem:[%s6970_s26 + $0x24] sm:$0xf] %vm818_vm2, %v5657_v14  ;;  %v729_v25 = vadd.f32 %v6963_v32, %v696_v4  ;;  %v767_v26 = vsel %vm733_vm1, %v758_v50, 0.0  ;;  %v1338_v27 = vsel %vm733_vm1, %v1329_v58, 0.0 }
 0x123   : > { %v1309_v28 = vadd.f32 %v1308_v54, %v1307_v19  ;;  %v1337_v29 = vadd.f32 %v1336_v23, %v1335_v0  ;;  %v739_v30 = vsel %vm733_vm1, %v728_v53, 0.0  ;;  %v1310_v31 = vsel %vm733_vm1, %v1300_v55, 0.0 }
 0x124   : > { %v768_v33 = vadd.f32 %v767_v26, %v766_v22  ;;  %v5654_v34 = vpack.c.bf16 %v731_v20, %v731_v20  ;;  %v769_v35 = vsel %vm733_vm1, %v759_v5, 0.0  ;;  %v5662_v37 = vpack.c.bf16 %v1303_v24, %v1303_v24 }
 0x125   : > { %v1339_v36 = vadd.f32 %v1338_v27, %v1337_v29  ;;  %v740_v38 = vadd.f32 %v739_v30, %v738_v17  ;;  %v1340_v39 = vsel %vm733_vm1, %v1330_v11, 0.0  ;;  %v741_v40 = vsel %vm733_vm1, %v729_v25, 0.0 }
 0x126   : > { %825 = vst.msk [vmem:[%s6970_s26 + $0x18] sm:$0xf] %vm818_vm2, %v5654_v34  ;;  %v760_v41 = vmul.f32 %v729_v25, %v729_v25  ;;  %v770_v42 = vadd.f32 %v769_v35, %v768_v33  ;;  %5103 = vst.msk [vmem:[%s6970_s26 + $0x38] sm:$0xf] %vm818_vm2, %v5662_v37  ;;  %v5652_v44 = vpack.c.bf16 %v729_v25, %v729_v25  ;;  %v745_v62 = vsel %vm733_vm1, %v731_v20, 0.0 }
 0x127   : > { %v742_v43 = vadd.f32 %v741_v40, %v740_v38  ;;  %v1301_v45 = vadd.f32 %v6963_v32, %v1274_v9  ;;  %v1311_v46 = vadd.f32 %v1310_v31, %v1309_v28  ;;  %v1341_v48 = vadd.f32 %v1340_v39, %v1339_v36 }
 0x128   : > { %v771_v47 = vsel %vm733_vm1, %v760_v41, 0.0  ;;  %v732_v49 = vadd.f32 %v5911_v10, %v6963_v32  ;;  %v1304_v50 = vadd.f32 %v5951_v15, %v6963_v32  ;;  %823 = vst.msk [vmem:[%s6970_s26 + $0x10] sm:$0xf] %vm818_vm2, %v5652_v44  ;;  %v730_v60 = vadd.f32 %v6963_v32, %v699_v16 }
 0x129   : > { %v772_v51 = vadd.f32 %v771_v47, %v770_v42  ;;  %v1312_v52 = vsel %vm733_vm1, %v1301_v45, 0.0  ;;  %v1331_v53 = vmul.f32 %v1301_v45, %v1301_v45  ;;  %v5660_v54 = vpack.c.bf16 %v1301_v45, %v1301_v45 }
 0x12a   : > { %v1313_v55 = vadd.f32 %v1312_v52, %v1311_v46  ;;  %v5655_v56 = vpack.c.bf16 %v732_v49, %v732_v49  ;;  %v5663_v58 = vpack.c.bf16 %v1304_v50, %v1304_v50  ;;  %v1302_v61 = vadd.f32 %v6963_v32, %v1277_v21 }
 0x12b   : > { %v1342_v57 = vsel %vm733_vm1, %v1331_v53, 0.0  ;;  %5101 = vst.msk [vmem:[%s6970_s26 + $0x30] sm:$0xf] %vm818_vm2, %v5660_v54  ;;  %v762_v63 = vmul.f32 %v731_v20, %v731_v20  ;;  %v1333_v0 = vmul.f32 %v1303_v24, %v1303_v24  ;;  %v743_v1 = vsel %vm733_vm1, %v730_v60, 0.0 }
 0x12c   : > { %v1343_v59 = vadd.f32 %v1342_v57, %v1341_v48  ;;  %826 = vst.msk [vmem:[%s6970_s26 + $0x1c] sm:$0xf] %vm818_vm2, %v5655_v56  ;;  %5104 = vst.msk [vmem:[%s6970_s26 + $0x3c] sm:$0xf] %vm818_vm2, %v5663_v58  ;;  %v761_v2 = vmul.f32 %v730_v60, %v730_v60  ;;  %v5653_v3 = vpack.c.bf16 %v730_v60, %v730_v60  ;;  %v1314_v4 = vsel %vm733_vm1, %v1302_v61, 0.0 }
 0x12d   : > { %v744_v5 = vadd.f32 %v743_v1, %v742_v43  ;;  %v1315_v6 = vadd.f32 %v1314_v4, %v1313_v55  ;;  %v1332_v7 = vmul.f32 %v1302_v61, %v1302_v61  ;;  %v5661_v8 = vpack.c.bf16 %v1302_v61, %v1302_v61 }
 0x12e   : > { %v1316_v9 = vsel %vm733_vm1, %v1303_v24, 0.0  ;;  %v763_v10 = vmul.f32 %v732_v49, %v732_v49  ;;  %v1334_v11 = vmul.f32 %v1304_v50, %v1304_v50  ;;  %v773_v12 = vsel %vm733_vm1, %v761_v2, 0.0  ;;  %824 = vst.msk [vmem:[%s6970_s26 + $0x14] sm:$0xf] %vm818_vm2, %v5653_v3 }
 0x12f   : > { %v746_v13 = vadd.f32 %v745_v62, %v744_v5  ;;  %v774_v14 = vadd.f32 %v773_v12, %v772_v51  ;;  %v1317_v15 = vadd.f32 %v1316_v9, %v1315_v6  ;;  %v1344_v16 = vsel %vm733_vm1, %v1332_v7, 0.0  ;;  %5102 = vst.msk [vmem:[%s6970_s26 + $0x34] sm:$0xf] %vm818_vm2, %v5661_v8 }
 0x130   : > { %v775_v17 = vsel %vm733_vm1, %v762_v63, 0.0  ;;  %v747_v18 = vsel %vm733_vm1, %v732_v49, 0.0  ;;  %v1318_v19 = vsel %vm733_vm1, %v1304_v50, 0.0  ;;  %v1345_v20 = vadd.f32 %v1344_v16, %v1343_v59 }
 0x131   : > { %v1346_v21 = vsel %vm733_vm1, %v1333_v0, 0.0  ;;  %v748_v22 = vadd.f32 %v747_v18, %v746_v13  ;;  %v776_v23 = vadd.f32 %v775_v17, %v774_v14  ;;  %v1319_v24 = vadd.f32 %v1318_v19, %v1317_v15 }
 0x132   : > { %v777_v25 = vsel %vm733_vm1, %v763_v10, 0.0  ;;  %v1347_v26 = vadd.f32 %v1346_v21, %v1345_v20  ;;  %v1348_v27 = vsel %vm733_vm1, %v1334_v11, 0.0 }
 0x133   : > { %v749_v28 = vrot.slane %v748_v22, 4  ;;  %v778_v29 = vadd.f32 %v777_v25, %v776_v23  ;;  %v1320_v30 = vrot.slane %v1319_v24, 4 }
 0x134   : > { %v1349_v31 = vadd.f32 %v1348_v27, %v1347_v26 }
 0x135   : > { %v750_v33 = vadd.f32 %v749_v28, %v748_v22  ;;  %v779_v34 = vrot.slane %v778_v29, 4  ;;  %v1321_v35 = vadd.f32 %v1320_v30, %v1319_v24 }
 0x136   : > { %v1350_v36 = vrot.slane %v1349_v31, 4 }
 0x137   : > { %v751_v37 = vrot.slane %v750_v33, 2  ;;  %v780_v38 = vadd.f32 %v779_v34, %v778_v29  ;;  %v1322_v39 = vrot.slane %v1321_v35, 2 }
 0x138   : > { %v1351_v40 = vadd.f32 %v1350_v36, %v1349_v31 }
 0x139   : > { %v752_v41 = vadd.f32 %v751_v37, %v750_v33  ;;  %v781_v42 = vrot.slane %v780_v38, 2  ;;  %v1323_v43 = vadd.f32 %v1322_v39, %v1321_v35 }
 0x13a   : > { %v1352_v44 = vrot.slane %v1351_v40, 2 }
 0x13b   : > { %v753_v45 = vrot.slane %v752_v41, 1  ;;  %v782_v46 = vadd.f32 %v781_v42, %v780_v38  ;;  %v1324_v47 = vrot.slane %v1323_v43, 1 }
 0x13c   : > { %v1353_v48 = vadd.f32 %v1352_v44, %v1351_v40 }
 0x13d   : > { %v754_v49 = vadd.f32 %v753_v45, %v752_v41  ;;  %v783_v50 = vrot.slane %v782_v46, 1  ;;  %v1325_v51 = vadd.f32 %v1324_v47, %v1323_v43 }
 0x13e   : > { %v1354_v52 = vrot.slane %v1353_v48, 1 }
 0x13f   : > { %v784_v53 = vadd.f32 %v783_v50, %v782_v46  ;;  %v7051_v54 = vadd.f32 %v1325_v51, %v754_v49 }
 0x140   : > { %v1355_v55 = vadd.f32 %v1354_v52, %v1353_v48 }
 0x142   : > { %v7053_v56 = vadd.f32 %v1355_v55, %v784_v53 }
 0x156   : > { %v5986_v57 = vpop.f32.mrb[8].mxu0 }
 0x157   : > { %v1870_v58 = vadd.f32 %v5986_v57, %v6963_v32  ;;  %v6026_v59 = vpop.f32.mrb[8].mxu1  ;;  %v1829_v60 = vpop.f32.mrb[9].mxu0 }
 0x158   : > { %v2441_v61 = vadd.f32 %v6026_v59, %v6963_v32  ;;  %v1868_v62 = vadd.f32 %v6963_v32, %v1829_v60  ;;  %v2400_v63 = vpop.f32.mrb[9].mxu1  ;;  %v5987_v0 = vpop.f32.mrb[10].mxu0 }
 0x159   : > { %v5666_v1 = vpack.c.bf16 %v1870_v58, %v1870_v58  ;;  %v2439_v2 = vadd.f32 %v6963_v32, %v2400_v63  ;;  %v6027_v3 = vpop.f32.mrb[10].mxu1  ;;  %v1832_v4 = vpop.f32.mrb[11].mxu0  ;;  %v1879_v7 = vsel %vm733_vm1, %v1870_v58, 0.0  ;;  %v1900_v10 = vmul.f32 %v1870_v58, %v1870_v58 }
 0x15a   : > { %v5674_v5 = vpack.c.bf16 %v2441_v61, %v2441_v61  ;;  %v2403_v6 = vpop.f32.mrb[11].mxu1  ;;  %v1898_v8 = vmul.f32 %v1868_v62, %v1868_v62  ;;  %v5664_v9 = vpack.c.bf16 %v1868_v62, %v1868_v62  ;;  %v1871_v13 = vadd.f32 %v5987_v0, %v6963_v32 }
 0x15b   : > { %5189 = vst.msk [vmem:[%s6970_s26 + $0x48] sm:$0xf] %vm818_vm2, %v5666_v1  ;;  %v2469_v11 = vmul.f32 %v2439_v2, %v2439_v2  ;;  %v5672_v12 = vpack.c.bf16 %v2439_v2, %v2439_v2  ;;  %v2450_v14 = vsel %vm733_vm1, %v2441_v61, 0.0  ;;  %v2442_v15 = vadd.f32 %v6027_v3, %v6963_v32 }
 0x15c   : > { %5279 = vst.msk [vmem:[%s6970_s26 + $0x68] sm:$0xf] %vm818_vm2, %v5674_v5  ;;  %5187 = vst.msk [vmem:[%s6970_s26 + $0x40] sm:$0xf] %vm818_vm2, %v5664_v9  ;;  %v1869_v16 = vadd.f32 %v6963_v32, %v1832_v4  ;;  %v2440_v17 = vadd.f32 %v6963_v32, %v2403_v6  ;;  %v2471_v18 = vmul.f32 %v2441_v61, %v2441_v61  ;;  %v1876_v19 = vsel %vm733_vm1, %v1868_v62, 0.0 }
 0x15d   : > { %v2447_v20 = vsel %vm733_vm1, %v2439_v2, 0.0  ;;  %5277 = vst.msk [vmem:[%s6970_s26 + $0x60] sm:$0xf] %vm818_vm2, %v5672_v12  ;;  %v5667_v21 = vpack.c.bf16 %v1871_v13, %v1871_v13  ;;  %v1906_v23 = vsel %vm733_vm1, %v1898_v8, 0.0  ;;  %v2477_v24 = vsel %vm733_vm1, %v2469_v11, 0.0 }
 0x15e   : > { %v5990_v22 = vpop.f32.mrb[12].mxu0  ;;  %v5675_v25 = vpack.c.bf16 %v2442_v15, %v2442_v15  ;;  %v1877_v26 = vsel %vm733_vm1, %v1869_v16, 0.0  ;;  %v1901_v29 = vmul.f32 %v1871_v13, %v1871_v13  ;;  %v1899_v31 = vmul.f32 %v1869_v16, %v1869_v16 }
 0x15f   : > { %v6030_v27 = vpop.f32.mrb[12].mxu1  ;;  %v1845_v28 = vpop.f32.mrb[13].mxu0  ;;  %5190 = vst.msk [vmem:[%s6970_s26 + $0x4c] sm:$0xf] %vm818_vm2, %v5667_v21  ;;  %v1878_v30 = vadd.f32 %v1877_v26, %v1876_v19  ;;  %v5665_v33 = vpack.c.bf16 %v1869_v16, %v1869_v16  ;;  %v2472_v36 = vmul.f32 %v2442_v15, %v2442_v15  ;;  %v2448_v37 = vsel %vm733_vm1, %v2440_v17, 0.0 }
 0x160   : > { %v2416_v34 = vpop.f32.mrb[13].mxu1  ;;  %v5991_v35 = vpop.f32.mrb[14].mxu0  ;;  %5280 = vst.msk [vmem:[%s6970_s26 + $0x6c] sm:$0xf] %vm818_vm2, %v5675_v25  ;;  %v2470_v38 = vmul.f32 %v2440_v17, %v2440_v17  ;;  %v5673_v39 = vpack.c.bf16 %v2440_v17, %v2440_v17  ;;  %v1907_v43 = vsel %vm733_vm1, %v1899_v31, 0.0  ;;  %v2449_v44 = vadd.f32 %v2448_v37, %v2447_v20 }
 0x161   : > { %v6031_v40 = vpop.f32.mrb[14].mxu1  ;;  %v1848_v41 = vpop.f32.mrb[15].mxu0  ;;  %v1880_v42 = vadd.f32 %v1879_v7, %v1878_v30  ;;  %5188 = vst.msk [vmem:[%s6970_s26 + $0x44] sm:$0xf] %vm818_vm2, %v5665_v33  ;;  %v1874_v45 = vadd.f32 %v5990_v22, %v6963_v32  ;;  %v1908_v47 = vadd.f32 %v1907_v43, %v1906_v23  ;;  %v2445_v49 = vadd.f32 %v6030_v27, %v6963_v32 }
 0x162   : > { %v2419_v46 = vpop.f32.mrb[15].mxu1  ;;  %v2478_v48 = vsel %vm733_vm1, %v2470_v38, 0.0  ;;  %5278 = vst.msk [vmem:[%s6970_s26 + $0x64] sm:$0xf] %vm818_vm2, %v5673_v39  ;;  %v1872_v50 = vadd.f32 %v6963_v32, %v1845_v28  ;;  %v1909_v51 = vsel %vm733_vm1, %v1900_v10, 0.0  ;;  %v2480_v52 = vsel %vm733_vm1, %v2471_v18, 0.0 }
 0x163   : > { %v2451_v53 = vadd.f32 %v2450_v14, %v2449_v44  ;;  %v2479_v55 = vadd.f32 %v2478_v48, %v2477_v24  ;;  %v1881_v57 = vsel %vm733_vm1, %v1871_v13, 0.0  ;;  %v2452_v58 = vsel %vm733_vm1, %v2442_v15, 0.0 }
 0x164   : > { %v1910_v59 = vadd.f32 %v1909_v51, %v1908_v47  ;;  %v5670_v60 = vpack.c.bf16 %v1874_v45, %v1874_v45  ;;  %v1911_v61 = vsel %vm733_vm1, %v1901_v29, 0.0  ;;  %v5678_v63 = vpack.c.bf16 %v2445_v49, %v2445_v49 }
 0x165   : > { %v2481_v62 = vadd.f32 %v2480_v52, %v2479_v55  ;;  %v1882_v0 = vadd.f32 %v1881_v57, %v1880_v42  ;;  %v2482_v1 = vsel %vm733_vm1, %v2472_v36, 0.0  ;;  %v1883_v2 = vsel %vm733_vm1, %v1872_v50, 0.0 }
 0x166   : > { %5193 = vst.msk [vmem:[%s6970_s26 + $0x58] sm:$0xf] %vm818_vm2, %v5670_v60  ;;  %v1902_v3 = vmul.f32 %v1872_v50, %v1872_v50  ;;  %v1912_v4 = vadd.f32 %v1911_v61, %v1910_v59  ;;  %5283 = vst.msk [vmem:[%s6970_s26 + $0x78] sm:$0xf] %vm818_vm2, %v5678_v63  ;;  %v5668_v6 = vpack.c.bf16 %v1872_v50, %v1872_v50  ;;  %v1887_v24 = vsel %vm733_vm1, %v1874_v45, 0.0 }
 0x167   : > { %v1884_v5 = vadd.f32 %v1883_v2, %v1882_v0  ;;  %v2443_v7 = vadd.f32 %v6963_v32, %v2416_v34  ;;  %v2453_v8 = vadd.f32 %v2452_v58, %v2451_v53  ;;  %v2483_v10 = vadd.f32 %v2482_v1, %v2481_v62 }
 0x168   : > { %v1913_v9 = vsel %vm733_vm1, %v1902_v3, 0.0  ;;  %v1875_v11 = vadd.f32 %v5991_v35, %v6963_v32  ;;  %v2446_v12 = vadd.f32 %v6031_v40, %v6963_v32  ;;  %5191 = vst.msk [vmem:[%s6970_s26 + $0x50] sm:$0xf] %vm818_vm2, %v5668_v6  ;;  %v1873_v22 = vadd.f32 %v6963_v32, %v1848_v41 }
 0x169   : > { %v1914_v13 = vadd.f32 %v1913_v9, %v1912_v4  ;;  %v2454_v14 = vsel %vm733_vm1, %v2443_v7, 0.0  ;;  %v2473_v15 = vmul.f32 %v2443_v7, %v2443_v7  ;;  %v5676_v16 = vpack.c.bf16 %v2443_v7, %v2443_v7 }
 0x16a   : > { %v2455_v17 = vadd.f32 %v2454_v14, %v2453_v8  ;;  %v5671_v18 = vpack.c.bf16 %v1875_v11, %v1875_v11  ;;  %v5679_v20 = vpack.c.bf16 %v2446_v12, %v2446_v12  ;;  %v2444_v23 = vadd.f32 %v6963_v32, %v2419_v46 }
 0x16b   : > { %v2484_v19 = vsel %vm733_vm1, %v2473_v15, 0.0  ;;  %5281 = vst.msk [vmem:[%s6970_s26 + $0x70] sm:$0xf] %vm818_vm2, %v5676_v16  ;;  %v1904_v25 = vmul.f32 %v1874_v45, %v1874_v45  ;;  %v2475_v26 = vmul.f32 %v2445_v49, %v2445_v49  ;;  %v1885_v27 = vsel %vm733_vm1, %v1873_v22, 0.0 }
 0x16c   : > { %v2485_v21 = vadd.f32 %v2484_v19, %v2483_v10  ;;  %5194 = vst.msk [vmem:[%s6970_s26 + $0x5c] sm:$0xf] %vm818_vm2, %v5671_v18  ;;  %5284 = vst.msk [vmem:[%s6970_s26 + $0x7c] sm:$0xf] %vm818_vm2, %v5679_v20  ;;  %v1903_v28 = vmul.f32 %v1873_v22, %v1873_v22  ;;  %v5669_v29 = vpack.c.bf16 %v1873_v22, %v1873_v22  ;;  %v2456_v30 = vsel %vm733_vm1, %v2444_v23, 0.0 }
 0x16d   : > { %v1886_v31 = vadd.f32 %v1885_v27, %v1884_v5  ;;  %v2457_v33 = vadd.f32 %v2456_v30, %v2455_v17  ;;  %v2474_v34 = vmul.f32 %v2444_v23, %v2444_v23  ;;  %v5677_v35 = vpack.c.bf16 %v2444_v23, %v2444_v23 }
 0x16e   : > { %v2458_v36 = vsel %vm733_vm1, %v2445_v49, 0.0  ;;  %v1905_v37 = vmul.f32 %v1875_v11, %v1875_v11  ;;  %v2476_v38 = vmul.f32 %v2446_v12, %v2446_v12  ;;  %v1915_v39 = vsel %vm733_vm1, %v1903_v28, 0.0  ;;  %5192 = vst.msk [vmem:[%s6970_s26 + $0x54] sm:$0xf] %vm818_vm2, %v5669_v29 }
 0x16f   : > { %v1888_v40 = vadd.f32 %v1887_v24, %v1886_v31  ;;  %v1916_v41 = vadd.f32 %v1915_v39, %v1914_v13  ;;  %v2459_v42 = vadd.f32 %v2458_v36, %v2457_v33  ;;  %v2486_v43 = vsel %vm733_vm1, %v2474_v34, 0.0  ;;  %5282 = vst.msk [vmem:[%s6970_s26 + $0x74] sm:$0xf] %vm818_vm2, %v5677_v35 }
 0x170   : > { %v1917_v44 = vsel %vm733_vm1, %v1904_v25, 0.0  ;;  %v1889_v45 = vsel %vm733_vm1, %v1875_v11, 0.0  ;;  %v2460_v46 = vsel %vm733_vm1, %v2446_v12, 0.0  ;;  %v2487_v47 = vadd.f32 %v2486_v43, %v2485_v21 }
 0x171   : > { %v2488_v48 = vsel %vm733_vm1, %v2475_v26, 0.0  ;;  %v1890_v49 = vadd.f32 %v1889_v45, %v1888_v40  ;;  %v1918_v50 = vadd.f32 %v1917_v44, %v1916_v41  ;;  %v2461_v51 = vadd.f32 %v2460_v46, %v2459_v42 }
 0x172   : > { %v1919_v52 = vsel %vm733_vm1, %v1905_v37, 0.0  ;;  %v2489_v53 = vadd.f32 %v2488_v48, %v2487_v47  ;;  %v2490_v55 = vsel %vm733_vm1, %v2476_v38, 0.0 }
 0x173   : > { %v1891_v57 = vrot.slane %v1890_v49, 4  ;;  %v1920_v58 = vadd.f32 %v1919_v52, %v1918_v50  ;;  %v2462_v59 = vrot.slane %v2461_v51, 4 }
 0x174   : > { %v2491_v60 = vadd.f32 %v2490_v55, %v2489_v53 }
 0x175   : > { %v1892_v61 = vadd.f32 %v1891_v57, %v1890_v49  ;;  %v1921_v62 = vrot.slane %v1920_v58, 4  ;;  %v2463_v63 = vadd.f32 %v2462_v59, %v2461_v51 }
 0x176   : > { %v2492_v0 = vrot.slane %v2491_v60, 4 }
 0x177   : > { %v1893_v1 = vrot.slane %v1892_v61, 2  ;;  %v1922_v2 = vadd.f32 %v1921_v62, %v1920_v58  ;;  %v2464_v3 = vrot.slane %v2463_v63, 2 }
 0x178   : > { %v2493_v4 = vadd.f32 %v2492_v0, %v2491_v60 }
 0x179   : > { %v1894_v5 = vadd.f32 %v1893_v1, %v1892_v61  ;;  %v1923_v6 = vrot.slane %v1922_v2, 2  ;;  %v2465_v7 = vadd.f32 %v2464_v3, %v2463_v63 }
 0x17a   : > { %v2494_v8 = vrot.slane %v2493_v4, 2 }
 0x17b   : > { %v1895_v9 = vrot.slane %v1894_v5, 1  ;;  %v1924_v10 = vadd.f32 %v1923_v6, %v1922_v2  ;;  %v2466_v11 = vrot.slane %v2465_v7, 1 }
 0x17c   : > { %v2495_v12 = vadd.f32 %v2494_v8, %v2493_v4 }
 0x17d   : > { %v1896_v13 = vadd.f32 %v1895_v9, %v1894_v5  ;;  %v1925_v14 = vrot.slane %v1924_v10, 1  ;;  %v2467_v18 = vadd.f32 %v2466_v11, %v2465_v7 }
 0x17e   : > { %v2496_v15 = vrot.slane %v2495_v12, 1 }
 0x17f   : > { %v1897_v16 = vadd.f32 %v1896_v13, %v7051_v54  ;;  %v1926_v17 = vadd.f32 %v1925_v14, %v1924_v10 }
 0x180   : > { %v2497_v21 = vadd.f32 %v2496_v15, %v2495_v12 }
 0x181   : > { %v1927_v19 = vadd.f32 %v1926_v17, %v7053_v56  ;;  %v7137_v20 = vadd.f32 %v2467_v18, %v1897_v16 }
 0x183   : > { %v7139_v22 = vadd.f32 %v2497_v21, %v1927_v19 }
 0x196   : > { %v6066_v23 = vpop.f32.mrb[16].mxu0 }
 0x197   : > { %v3012_v24 = vadd.f32 %v6066_v23, %v6963_v32  ;;  %v6106_v25 = vpop.f32.mrb[16].mxu1  ;;  %v2971_v26 = vpop.f32.mrb[17].mxu0 }
 0x198   : > { %v3583_v27 = vadd.f32 %v6106_v25, %v6963_v32  ;;  %v3010_v54 = vadd.f32 %v6963_v32, %v2971_v26  ;;  %v3542_v28 = vpop.f32.mrb[17].mxu1  ;;  %v6067_v29 = vpop.f32.mrb[18].mxu0 }
 0x199   : > { %v5682_v30 = vpack.c.bf16 %v3012_v24, %v3012_v24  ;;  %v3581_v56 = vadd.f32 %v6963_v32, %v3542_v28  ;;  %v6107_v31 = vpop.f32.mrb[18].mxu1  ;;  %v2974_v33 = vpop.f32.mrb[19].mxu0  ;;  %v3021_v36 = vsel %vm733_vm1, %v3012_v24, 0.0  ;;  %v3042_v39 = vmul.f32 %v3012_v24, %v3012_v24 }
 0x19a   : > { %v5690_v34 = vpack.c.bf16 %v3583_v27, %v3583_v27  ;;  %v3545_v35 = vpop.f32.mrb[19].mxu1  ;;  %v3040_v37 = vmul.f32 %v3010_v54, %v3010_v54  ;;  %v5680_v38 = vpack.c.bf16 %v3010_v54, %v3010_v54  ;;  %v3013_v42 = vadd.f32 %v6067_v29, %v6963_v32 }
 0x19b   : > { %5369 = vst.msk [vmem:[%s6970_s26 + $0x88] sm:$0xf] %vm818_vm2, %v5682_v30  ;;  %v3611_v40 = vmul.f32 %v3581_v56, %v3581_v56  ;;  %v5688_v41 = vpack.c.bf16 %v3581_v56, %v3581_v56  ;;  %v3592_v43 = vsel %vm733_vm1, %v3583_v27, 0.0  ;;  %v3584_v44 = vadd.f32 %v6107_v31, %v6963_v32 }
 0x19c   : > { %5459 = vst.msk [vmem:[%s6970_s26 + $0xa8] sm:$0xf] %vm818_vm2, %v5690_v34  ;;  %5367 = vst.msk [vmem:[%s6970_s26 + $0x80] sm:$0xf] %vm818_vm2, %v5680_v38  ;;  %v3011_v45 = vadd.f32 %v6963_v32, %v2974_v33  ;;  %v3582_v46 = vadd.f32 %v6963_v32, %v3545_v35  ;;  %v3613_v47 = vmul.f32 %v3583_v27, %v3583_v27  ;;  %v3018_v48 = vsel %vm733_vm1, %v3010_v54, 0.0 }
 0x19d   : > { %v3589_v49 = vsel %vm733_vm1, %v3581_v56, 0.0  ;;  %5457 = vst.msk [vmem:[%s6970_s26 + $0xa0] sm:$0xf] %vm818_vm2, %v5688_v41  ;;  %v5683_v50 = vpack.c.bf16 %v3013_v42, %v3013_v42  ;;  %v3048_v52 = vsel %vm733_vm1, %v3040_v37, 0.0  ;;  %v3619_v53 = vsel %vm733_vm1, %v3611_v40, 0.0 }
 0x19e   : > { %v6070_v51 = vpop.f32.mrb[20].mxu0  ;;  %v5691_v55 = vpack.c.bf16 %v3584_v44, %v3584_v44  ;;  %v3019_v57 = vsel %vm733_vm1, %v3011_v45, 0.0  ;;  %v3043_v60 = vmul.f32 %v3013_v42, %v3013_v42  ;;  %v3041_v62 = vmul.f32 %v3011_v45, %v3011_v45 }
 0x19f   : > { %v6110_v58 = vpop.f32.mrb[20].mxu1  ;;  %v2987_v59 = vpop.f32.mrb[21].mxu0  ;;  %5370 = vst.msk [vmem:[%s6970_s26 + $0x8c] sm:$0xf] %vm818_vm2, %v5683_v50  ;;  %v3020_v61 = vadd.f32 %v3019_v57, %v3018_v48  ;;  %v5681_v63 = vpack.c.bf16 %v3011_v45, %v3011_v45  ;;  %v3614_v2 = vmul.f32 %v3584_v44, %v3584_v44  ;;  %v3590_v3 = vsel %vm733_vm1, %v3582_v46, 0.0 }
 0x1a0   : > { %v3558_v0 = vpop.f32.mrb[21].mxu1  ;;  %v6071_v1 = vpop.f32.mrb[22].mxu0  ;;  %5460 = vst.msk [vmem:[%s6970_s26 + $0xac] sm:$0xf] %vm818_vm2, %v5691_v55  ;;  %v3612_v4 = vmul.f32 %v3582_v46, %v3582_v46  ;;  %v5689_v5 = vpack.c.bf16 %v3582_v46, %v3582_v46  ;;  %v3049_v9 = vsel %vm733_vm1, %v3041_v62, 0.0  ;;  %v3591_v10 = vadd.f32 %v3590_v3, %v3589_v49 }
 0x1a1   : > { %v6111_v6 = vpop.f32.mrb[22].mxu1  ;;  %v2990_v7 = vpop.f32.mrb[23].mxu0  ;;  %v3022_v8 = vadd.f32 %v3021_v36, %v3020_v61  ;;  %5368 = vst.msk [vmem:[%s6970_s26 + $0x84] sm:$0xf] %vm818_vm2, %v5681_v63  ;;  %v3016_v11 = vadd.f32 %v6070_v51, %v6963_v32  ;;  %v3050_v13 = vadd.f32 %v3049_v9, %v3048_v52  ;;  %v3587_v15 = vadd.f32 %v6110_v58, %v6963_v32 }
 0x1a2   : > { %v3561_v12 = vpop.f32.mrb[23].mxu1  ;;  %v3620_v14 = vsel %vm733_vm1, %v3612_v4, 0.0  ;;  %5458 = vst.msk [vmem:[%s6970_s26 + $0xa4] sm:$0xf] %vm818_vm2, %v5689_v5  ;;  %v3014_v16 = vadd.f32 %v6963_v32, %v2987_v59  ;;  %v3051_v17 = vsel %vm733_vm1, %v3042_v39, 0.0  ;;  %v3622_v18 = vsel %vm733_vm1, %v3613_v47, 0.0 }
 0x1a3   : > { %v3593_v19 = vadd.f32 %v3592_v43, %v3591_v10  ;;  %v3621_v21 = vadd.f32 %v3620_v14, %v3619_v53  ;;  %v3023_v23 = vsel %vm733_vm1, %v3013_v42, 0.0  ;;  %v3594_v24 = vsel %vm733_vm1, %v3584_v44, 0.0 }
 0x1a4   : > { %v3052_v25 = vadd.f32 %v3051_v17, %v3050_v13  ;;  %v5686_v26 = vpack.c.bf16 %v3016_v11, %v3016_v11  ;;  %v3053_v27 = vsel %vm733_vm1, %v3043_v60, 0.0  ;;  %v5694_v28 = vpack.c.bf16 %v3587_v15, %v3587_v15 }
 0x1a5   : > { %v3623_v54 = vadd.f32 %v3622_v18, %v3621_v21  ;;  %v3024_v29 = vadd.f32 %v3023_v23, %v3022_v8  ;;  %v3624_v30 = vsel %vm733_vm1, %v3614_v2, 0.0  ;;  %v3025_v56 = vsel %vm733_vm1, %v3014_v16, 0.0 }
 0x1a6   : > { %5373 = vst.msk [vmem:[%s6970_s26 + $0x98] sm:$0xf] %vm818_vm2, %v5686_v26  ;;  %v3044_v31 = vmul.f32 %v3014_v16, %v3014_v16  ;;  %v3054_v33 = vadd.f32 %v3053_v27, %v3052_v25  ;;  %5463 = vst.msk [vmem:[%s6970_s26 + $0xb8] sm:$0xf] %vm818_vm2, %v5694_v28  ;;  %v5684_v35 = vpack.c.bf16 %v3014_v16, %v3014_v16  ;;  %v3029_v53 = vsel %vm733_vm1, %v3016_v11, 0.0 }
 0x1a7   : > { %v3026_v34 = vadd.f32 %v3025_v56, %v3024_v29  ;;  %v3585_v36 = vadd.f32 %v6963_v32, %v3558_v0  ;;  %v3595_v37 = vadd.f32 %v3594_v24, %v3593_v19  ;;  %v3625_v39 = vadd.f32 %v3624_v30, %v3623_v54 }
 0x1a8   : > { %v3055_v38 = vsel %vm733_vm1, %v3044_v31, 0.0  ;;  %v3017_v40 = vadd.f32 %v6071_v1, %v6963_v32  ;;  %v3588_v41 = vadd.f32 %v6111_v6, %v6963_v32  ;;  %5371 = vst.msk [vmem:[%s6970_s26 + $0x90] sm:$0xf] %vm818_vm2, %v5684_v35  ;;  %v3015_v51 = vadd.f32 %v6963_v32, %v2990_v7 }
 0x1a9   : > { %v3056_v42 = vadd.f32 %v3055_v38, %v3054_v33  ;;  %v3596_v43 = vsel %vm733_vm1, %v3585_v36, 0.0  ;;  %v3615_v44 = vmul.f32 %v3585_v36, %v3585_v36  ;;  %v5692_v45 = vpack.c.bf16 %v3585_v36, %v3585_v36 }
 0x1aa   : > { %v3597_v46 = vadd.f32 %v3596_v43, %v3595_v37  ;;  %v5687_v47 = vpack.c.bf16 %v3017_v40, %v3017_v40  ;;  %v5695_v49 = vpack.c.bf16 %v3588_v41, %v3588_v41  ;;  %v3586_v52 = vadd.f32 %v6963_v32, %v3561_v12 }
 0x1ab   : > { %v3626_v48 = vsel %vm733_vm1, %v3615_v44, 0.0  ;;  %5461 = vst.msk [vmem:[%s6970_s26 + $0xb0] sm:$0xf] %vm818_vm2, %v5692_v45  ;;  %v3046_v55 = vmul.f32 %v3016_v11, %v3016_v11  ;;  %v3617_v57 = vmul.f32 %v3587_v15, %v3587_v15  ;;  %v3027_v58 = vsel %vm733_vm1, %v3015_v51, 0.0 }
 0x1ac   : > { %v3627_v50 = vadd.f32 %v3626_v48, %v3625_v39  ;;  %5374 = vst.msk [vmem:[%s6970_s26 + $0x9c] sm:$0xf] %vm818_vm2, %v5687_v47  ;;  %5464 = vst.msk [vmem:[%s6970_s26 + $0xbc] sm:$0xf] %vm818_vm2, %v5695_v49  ;;  %v3045_v59 = vmul.f32 %v3015_v51, %v3015_v51  ;;  %v5685_v60 = vpack.c.bf16 %v3015_v51, %v3015_v51  ;;  %v3598_v61 = vsel %vm733_vm1, %v3586_v52, 0.0 }
 0x1ad   : > { %v3028_v62 = vadd.f32 %v3027_v58, %v3026_v34  ;;  %v3599_v63 = vadd.f32 %v3598_v61, %v3597_v46  ;;  %v3616_v0 = vmul.f32 %v3586_v52, %v3586_v52  ;;  %v5693_v1 = vpack.c.bf16 %v3586_v52, %v3586_v52 }
 0x1ae   : > { %v3600_v2 = vsel %vm733_vm1, %v3587_v15, 0.0  ;;  %v3047_v3 = vmul.f32 %v3017_v40, %v3017_v40  ;;  %v3618_v4 = vmul.f32 %v3588_v41, %v3588_v41  ;;  %v3057_v5 = vsel %vm733_vm1, %v3045_v59, 0.0  ;;  %5372 = vst.msk [vmem:[%s6970_s26 + $0x94] sm:$0xf] %vm818_vm2, %v5685_v60 }
 0x1af   : > { %v3030_v6 = vadd.f32 %v3029_v53, %v3028_v62  ;;  %v3058_v7 = vadd.f32 %v3057_v5, %v3056_v42  ;;  %v3601_v8 = vadd.f32 %v3600_v2, %v3599_v63  ;;  %v3628_v9 = vsel %vm733_vm1, %v3616_v0, 0.0  ;;  %5462 = vst.msk [vmem:[%s6970_s26 + $0xb4] sm:$0xf] %vm818_vm2, %v5693_v1 }
 0x1b0   : > { %v3059_v10 = vsel %vm733_vm1, %v3046_v55, 0.0  ;;  %v3031_v11 = vsel %vm733_vm1, %v3017_v40, 0.0  ;;  %v3602_v12 = vsel %vm733_vm1, %v3588_v41, 0.0  ;;  %v3629_v13 = vadd.f32 %v3628_v9, %v3627_v50 }
 0x1b1   : > { %v3630_v14 = vsel %vm733_vm1, %v3617_v57, 0.0  ;;  %v3032_v15 = vadd.f32 %v3031_v11, %v3030_v6  ;;  %v3060_v16 = vadd.f32 %v3059_v10, %v3058_v7  ;;  %v3603_v17 = vadd.f32 %v3602_v12, %v3601_v8 }
 0x1b2   : > { %v3061_v18 = vsel %vm733_vm1, %v3047_v3, 0.0  ;;  %v3631_v19 = vadd.f32 %v3630_v14, %v3629_v13  ;;  %v3632_v21 = vsel %vm733_vm1, %v3618_v4, 0.0 }
 0x1b3   : > { %v3033_v23 = vrot.slane %v3032_v15, 4  ;;  %v3062_v24 = vadd.f32 %v3061_v18, %v3060_v16  ;;  %v3604_v25 = vrot.slane %v3603_v17, 4 }
 0x1b4   : > { %v3633_v26 = vadd.f32 %v3632_v21, %v3631_v19 }
 0x1b5   : > { %v3034_v27 = vadd.f32 %v3033_v23, %v3032_v15  ;;  %v3063_v54 = vrot.slane %v3062_v24, 4  ;;  %v3605_v28 = vadd.f32 %v3604_v25, %v3603_v17 }
 0x1b6   : > { %v3634_v29 = vrot.slane %v3633_v26, 4 }
 0x1b7   : > { %v3035_v30 = vrot.slane %v3034_v27, 2  ;;  %v3064_v56 = vadd.f32 %v3063_v54, %v3062_v24  ;;  %v3606_v31 = vrot.slane %v3605_v28, 2 }
 0x1b8   : > { %v3635_v33 = vadd.f32 %v3634_v29, %v3633_v26 }
 0x1b9   : > { %v3036_v34 = vadd.f32 %v3035_v30, %v3034_v27  ;;  %v3065_v35 = vrot.slane %v3064_v56, 2  ;;  %v3607_v36 = vadd.f32 %v3606_v31, %v3605_v28 }
 0x1ba   : > { %v3636_v37 = vrot.slane %v3635_v33, 2 }
 0x1bb   : > { %v3037_v38 = vrot.slane %v3036_v34, 1  ;;  %v3066_v39 = vadd.f32 %v3065_v35, %v3064_v56  ;;  %v3608_v40 = vrot.slane %v3607_v36, 1 }
 0x1bc   : > { %v3637_v41 = vadd.f32 %v3636_v37, %v3635_v33 }
 0x1bd   : > { %v3038_v42 = vadd.f32 %v3037_v38, %v3036_v34  ;;  %v3067_v43 = vrot.slane %v3066_v39, 1  ;;  %v3609_v47 = vadd.f32 %v3608_v40, %v3607_v36 }
 0x1be   : > { %v3638_v44 = vrot.slane %v3637_v41, 1 }
 0x1bf   : > { %v3039_v45 = vadd.f32 %v3038_v42, %v7137_v20  ;;  %v3068_v46 = vadd.f32 %v3067_v43, %v3066_v39  ;;  %v7232_v20 = vld [vmem:[%s7327_s2] ss:$0 sm:$0xff] }
 0x1c0   : > { %v3639_v50 = vadd.f32 %v3638_v44, %v3637_v41 }
 0x1c1   : > { %v3069_v48 = vadd.f32 %v3068_v46, %v7139_v22  ;;  %v7223_v49 = vadd.f32 %v3609_v47, %v3039_v45 }
 0x1c3   : > { %v7225_v51 = vadd.f32 %v3639_v50, %v3069_v48 }
 0x1d6   : > { %v6146_v52 = vpop.f32.mrb[24].mxu0 }
 0x1d7   : > { %v4154_v53 = vadd.f32 %v6146_v52, %v6963_v32  ;;  %v6186_v55 = vpop.f32.mrb[24].mxu1  ;;  %v4113_v57 = vpop.f32.mrb[25].mxu0 }
 0x1d8   : > { %v4725_v58 = vadd.f32 %v6186_v55, %v6963_v32  ;;  %v4152_v22 = vadd.f32 %v7232_v20, %v4113_v57  ;;  %v4684_v59 = vpop.f32.mrb[25].mxu1  ;;  %v6147_v60 = vpop.f32.mrb[26].mxu0 }
 0x1d9   : > { %v5698_v61 = vpack.c.bf16 %v4154_v53, %v4154_v53  ;;  %v4723_v62 = vadd.f32 %v7232_v20, %v4684_v59  ;;  %v6187_v63 = vpop.f32.mrb[26].mxu1  ;;  %v4116_v0 = vpop.f32.mrb[27].mxu0  ;;  %v4163_v32 = vsel %vm733_vm1, %v4154_v53, 0.0  ;;  %v4184_v5 = vmul.f32 %v4154_v53, %v4154_v53 }
 0x1da   : > { %v5706_v1 = vpack.c.bf16 %v4725_v58, %v4725_v58  ;;  %v4687_v2 = vpop.f32.mrb[27].mxu1  ;;  %v4182_v3 = vmul.f32 %v4152_v22, %v4152_v22  ;;  %v5696_v4 = vpack.c.bf16 %v4152_v22, %v4152_v22  ;;  %v4155_v8 = vadd.f32 %v7232_v20, %v6147_v60 }
 0x1db   : > { %5549 = vst.msk [vmem:[%s6970_s26 + $0xc8] sm:$0xf] %vm818_vm2, %v5698_v61  ;;  %v4753_v6 = vmul.f32 %v4723_v62, %v4723_v62  ;;  %v5704_v7 = vpack.c.bf16 %v4723_v62, %v4723_v62  ;;  %v4734_v9 = vsel %vm733_vm1, %v4725_v58, 0.0  ;;  %v4726_v10 = vadd.f32 %v7232_v20, %v6187_v63 }
 0x1dc   : > { %5639 = vst.msk [vmem:[%s6970_s26 + $0xe8] sm:$0xf] %vm818_vm2, %v5706_v1  ;;  %5547 = vst.msk [vmem:[%s6970_s26 + $0xc0] sm:$0xf] %vm818_vm2, %v5696_v4  ;;  %v4153_v11 = vadd.f32 %v7232_v20, %v4116_v0  ;;  %v4724_v12 = vadd.f32 %v7232_v20, %v4687_v2  ;;  %v4755_v13 = vmul.f32 %v4725_v58, %v4725_v58  ;;  %v4160_v14 = vsel %vm733_vm1, %v4152_v22, 0.0 }
 0x1dd   : > { %v4731_v15 = vsel %vm733_vm1, %v4723_v62, 0.0  ;;  %5637 = vst.msk [vmem:[%s6970_s26 + $0xe0] sm:$0xf] %vm818_vm2, %v5704_v7  ;;  %v5699_v16 = vpack.c.bf16 %v4155_v8, %v4155_v8  ;;  %v4190_v18 = vsel %vm733_vm1, %v4182_v3, 0.0  ;;  %v4761_v19 = vsel %vm733_vm1, %v4753_v6, 0.0 }
 0x1de   : > { %v6150_v17 = vpop.f32.mrb[28].mxu0  ;;  %v5707_v21 = vpack.c.bf16 %v4726_v10, %v4726_v10  ;;  %v4161_v23 = vsel %vm733_vm1, %v4153_v11, 0.0  ;;  %v4185_v26 = vmul.f32 %v4155_v8, %v4155_v8  ;;  %v4183_v54 = vmul.f32 %v4153_v11, %v4153_v11 }
 0x1df   : > { %v6190_v24 = vpop.f32.mrb[28].mxu1  ;;  %v4129_v25 = vpop.f32.mrb[29].mxu0  ;;  %5550 = vst.msk [vmem:[%s6970_s26 + $0xcc] sm:$0xf] %vm818_vm2, %v5699_v16  ;;  %v4162_v27 = vadd.f32 %v4161_v23, %v4160_v14  ;;  %v5697_v28 = vpack.c.bf16 %v4153_v11, %v4153_v11  ;;  %v4756_v56 = vmul.f32 %v4726_v10, %v4726_v10  ;;  %v4732_v31 = vsel %vm733_vm1, %v4724_v12, 0.0 }
 0x1e0   : > { %v4700_v29 = vpop.f32.mrb[29].mxu1  ;;  %v6151_v30 = vpop.f32.mrb[30].mxu0  ;;  %5640 = vst.msk [vmem:[%s6970_s26 + $0xec] sm:$0xf] %vm818_vm2, %v5707_v21  ;;  %v4754_v33 = vmul.f32 %v4724_v12, %v4724_v12  ;;  %v5705_v34 = vpack.c.bf16 %v4724_v12, %v4724_v12  ;;  %v4191_v38 = vsel %vm733_vm1, %v4183_v54, 0.0  ;;  %v4733_v39 = vadd.f32 %v4732_v31, %v4731_v15 }
 0x1e1   : > { %v6191_v35 = vpop.f32.mrb[30].mxu1  ;;  %v4132_v36 = vpop.f32.mrb[31].mxu0  ;;  %v4164_v37 = vadd.f32 %v4163_v32, %v4162_v27  ;;  %5548 = vst.msk [vmem:[%s6970_s26 + $0xc4] sm:$0xf] %vm818_vm2, %v5697_v28  ;;  %v4158_v40 = vadd.f32 %v7232_v20, %v6150_v17  ;;  %v4192_v42 = vadd.f32 %v4191_v38, %v4190_v18  ;;  %v4729_v44 = vadd.f32 %v7232_v20, %v6190_v24 }
 0x1e2   : > { %v4703_v41 = vpop.f32.mrb[31].mxu1  ;;  %v4762_v43 = vsel %vm733_vm1, %v4754_v33, 0.0  ;;  %5638 = vst.msk [vmem:[%s6970_s26 + $0xe4] sm:$0xf] %vm818_vm2, %v5705_v34  ;;  %v4156_v45 = vadd.f32 %v7232_v20, %v4129_v25  ;;  %v4193_v46 = vsel %vm733_vm1, %v4184_v5, 0.0  ;;  %v4764_v47 = vsel %vm733_vm1, %v4755_v13, 0.0 }
 0x1e3   : > { %v4735_v48 = vadd.f32 %v4734_v9, %v4733_v39  ;;  %v4763_v50 = vadd.f32 %v4762_v43, %v4761_v19  ;;  %v4165_v52 = vsel %vm733_vm1, %v4155_v8, 0.0  ;;  %v4736_v53 = vsel %vm733_vm1, %v4726_v10, 0.0 }
 0x1e4   : > { %v4194_v55 = vadd.f32 %v4193_v46, %v4192_v42  ;;  %v5702_v57 = vpack.c.bf16 %v4158_v40, %v4158_v40  ;;  %v4195_v58 = vsel %vm733_vm1, %v4185_v26, 0.0  ;;  %v5710_v59 = vpack.c.bf16 %v4729_v44, %v4729_v44 }
 0x1e5   : > { %v4765_v22 = vadd.f32 %v4764_v47, %v4763_v50  ;;  %v4166_v60 = vadd.f32 %v4165_v52, %v4164_v37  ;;  %v4766_v61 = vsel %vm733_vm1, %v4756_v56, 0.0  ;;  %v4167_v62 = vsel %vm733_vm1, %v4156_v45, 0.0 }
 0x1e6   : > { %5553 = vst.msk [vmem:[%s6970_s26 + $0xd8] sm:$0xf] %vm818_vm2, %v5702_v57  ;;  %v4186_v63 = vmul.f32 %v4156_v45, %v4156_v45  ;;  %v4196_v0 = vadd.f32 %v4195_v58, %v4194_v55  ;;  %5643 = vst.msk [vmem:[%s6970_s26 + $0xf8] sm:$0xf] %vm818_vm2, %v5710_v59  ;;  %v5700_v2 = vpack.c.bf16 %v4156_v45, %v4156_v45  ;;  %v4171_v19 = vsel %vm733_vm1, %v4158_v40, 0.0 }
 0x1e7   : > { %v4168_v1 = vadd.f32 %v4167_v62, %v4166_v60  ;;  %v4727_v32 = vadd.f32 %v7232_v20, %v4700_v29  ;;  %v4737_v3 = vadd.f32 %v4736_v53, %v4735_v48  ;;  %v4767_v5 = vadd.f32 %v4766_v61, %v4765_v22 }
 0x1e8   : > { %v4197_v4 = vsel %vm733_vm1, %v4186_v63, 0.0  ;;  %v4159_v6 = vadd.f32 %v7232_v20, %v6151_v30  ;;  %v4730_v7 = vadd.f32 %v7232_v20, %v6191_v35  ;;  %5551 = vst.msk [vmem:[%s6970_s26 + $0xd0] sm:$0xf] %vm818_vm2, %v5700_v2  ;;  %v4157_v17 = vadd.f32 %v7232_v20, %v4132_v36 }
 0x1e9   : > { %v4198_v8 = vadd.f32 %v4197_v4, %v4196_v0  ;;  %v4738_v9 = vsel %vm733_vm1, %v4727_v32, 0.0  ;;  %v4757_v10 = vmul.f32 %v4727_v32, %v4727_v32  ;;  %v5708_v11 = vpack.c.bf16 %v4727_v32, %v4727_v32 }
 0x1ea   : > { %v4739_v12 = vadd.f32 %v4738_v9, %v4737_v3  ;;  %v5703_v13 = vpack.c.bf16 %v4159_v6, %v4159_v6  ;;  %v5711_v15 = vpack.c.bf16 %v4730_v7, %v4730_v7  ;;  %v4728_v18 = vadd.f32 %v7232_v20, %v4703_v41 }
 0x1eb   : > { %v4768_v14 = vsel %vm733_vm1, %v4757_v10, 0.0  ;;  %5641 = vst.msk [vmem:[%s6970_s26 + $0xf0] sm:$0xf] %vm818_vm2, %v5708_v11  ;;  %v4188_v21 = vmul.f32 %v4158_v40, %v4158_v40  ;;  %v4759_v23 = vmul.f32 %v4729_v44, %v4729_v44  ;;  %v4169_v24 = vsel %vm733_vm1, %v4157_v17, 0.0 }
 0x1ec   : > { %v4769_v16 = vadd.f32 %v4768_v14, %v4767_v5  ;;  %5554 = vst.msk [vmem:[%s6970_s26 + $0xdc] sm:$0xf] %vm818_vm2, %v5703_v13  ;;  %5644 = vst.msk [vmem:[%s6970_s26 + $0xfc] sm:$0xf] %vm818_vm2, %v5711_v15  ;;  %v4187_v25 = vmul.f32 %v4157_v17, %v4157_v17  ;;  %v5701_v26 = vpack.c.bf16 %v4157_v17, %v4157_v17  ;;  %v4740_v27 = vsel %vm733_vm1, %v4728_v18, 0.0 }
 0x1ed   : > { %v4170_v54 = vadd.f32 %v4169_v24, %v4168_v1  ;;  %v4741_v28 = vadd.f32 %v4740_v27, %v4739_v12  ;;  %v4758_v29 = vmul.f32 %v4728_v18, %v4728_v18  ;;  %v5709_v30 = vpack.c.bf16 %v4728_v18, %v4728_v18 }
 0x1ee   : > { %v4742_v20 = vsel %vm733_vm1, %v4729_v44, 0.0  ;;  %v4189_v56 = vmul.f32 %v4159_v6, %v4159_v6  ;;  %v4760_v31 = vmul.f32 %v4730_v7, %v4730_v7  ;;  %v4199_v33 = vsel %vm733_vm1, %v4187_v25, 0.0  ;;  %5552 = vst.msk [vmem:[%s6970_s26 + $0xd4] sm:$0xf] %vm818_vm2, %v5701_v26 }
 0x1ef   : > { %v4172_v34 = vadd.f32 %v4171_v19, %v4170_v54  ;;  %v4200_v35 = vadd.f32 %v4199_v33, %v4198_v8  ;;  %v4743_v36 = vadd.f32 %v4742_v20, %v4741_v28  ;;  %v4770_v37 = vsel %vm733_vm1, %v4758_v29, 0.0  ;;  %5642 = vst.msk [vmem:[%s6970_s26 + $0xf4] sm:$0xf] %vm818_vm2, %v5709_v30 }
 0x1f0   : > { %v4201_v38 = vsel %vm733_vm1, %v4188_v21, 0.0  ;;  %v4173_v39 = vsel %vm733_vm1, %v4159_v6, 0.0  ;;  %v4744_v40 = vsel %vm733_vm1, %v4730_v7, 0.0  ;;  %v4771_v41 = vadd.f32 %v4770_v37, %v4769_v16 }
 0x1f1   : > { %v4772_v42 = vsel %vm733_vm1, %v4759_v23, 0.0  ;;  %v4174_v43 = vadd.f32 %v4173_v39, %v4172_v34  ;;  %v4202_v44 = vadd.f32 %v4201_v38, %v4200_v35  ;;  %v4745_v45 = vadd.f32 %v4744_v40, %v4743_v36 }
 0x1f2   : > { %v4203_v46 = vsel %vm733_vm1, %v4189_v56, 0.0  ;;  %v4773_v47 = vadd.f32 %v4772_v42, %v4771_v41  ;;  %v4774_v48 = vsel %vm733_vm1, %v4760_v31, 0.0 }
 0x1f3   : > { %v4175_v50 = vrot.slane %v4174_v43, 4  ;;  %v4204_v52 = vadd.f32 %v4203_v46, %v4202_v44  ;;  %v4746_v53 = vrot.slane %v4745_v45, 4 }
 0x1f4   : > { %v4775_v55 = vadd.f32 %v4774_v48, %v4773_v47 }
 0x1f5   : > { %v4176_v57 = vadd.f32 %v4175_v50, %v4174_v43  ;;  %v4205_v58 = vrot.slane %v4204_v52, 4  ;;  %v4747_v22 = vadd.f32 %v4746_v53, %v4745_v45 }
 0x1f6   : > { %v4776_v59 = vrot.slane %v4775_v55, 4 }
 0x1f7   : > { %v4177_v60 = vrot.slane %v4176_v57, 2  ;;  %v4206_v61 = vadd.f32 %v4205_v58, %v4204_v52  ;;  %v4748_v62 = vrot.slane %v4747_v22, 2 }
 0x1f8   : > { %v4777_v63 = vadd.f32 %v4776_v59, %v4775_v55 }
 0x1f9   : > { %v4178_v0 = vadd.f32 %v4177_v60, %v4176_v57  ;;  %v4207_v1 = vrot.slane %v4206_v61, 2  ;;  %v4749_v2 = vadd.f32 %v4748_v62, %v4747_v22 }
 0x1fa   : > { %v4778_v32 = vrot.slane %v4777_v63, 2 }
 0x1fb   : > { %v4179_v3 = vrot.slane %v4178_v0, 1  ;;  %v4208_v4 = vadd.f32 %v4207_v1, %v4206_v61  ;;  %v4750_v5 = vrot.slane %v4749_v2, 1 }
 0x1fc   : > { %v4779_v6 = vadd.f32 %v4778_v32, %v4777_v63 }
 0x1fd   : > { %v4180_v7 = vadd.f32 %v4179_v3, %v4178_v0  ;;  %v4209_v8 = vrot.slane %v4208_v4, 1  ;;  %v4751_v12 = vadd.f32 %v4750_v5, %v4749_v2 }
 0x1fe   : > { %v4780_v9 = vrot.slane %v4779_v6, 1 }
 0x1ff   : > { %v4181_v10 = vadd.f32 %v4180_v7, %v7223_v49  ;;  %v4210_v11 = vadd.f32 %v4209_v8, %v4208_v4 }
 0x200   : > { %v4781_v15 = vadd.f32 %v4780_v9, %v4779_v6 }
 0x201   : > { %v4211_v13 = vadd.f32 %v4210_v11, %v7225_v51  ;;  %v4752_v14 = vadd.f32 %v4751_v12, %v4181_v10 }
 0x203   : > { %v4782_v16 = vadd.f32 %v4781_v15, %v4211_v13  ;;  %4825 = vst.msk [vmem:[%s238_s30] sm:$0x1] %vm4824_vm3, %v4752_v14 }
 0x205   : > { %4826 = vst.msk [vmem:[%s241_s9] sm:$0x1] %vm4824_vm3, %v4782_v16 }
 0x206 PF: > { %s16_s18 = sadd.s32 1, %s6560_s18  }
 0x207   : > { %p13_p4 = scmp.ge.s32.totalorder %s16_s18, 4  }
 0x209   :  { %15 = sbr.rel (!%p13_p4) target bundleno = 1 (0x1), region = 113 }

// kernel: tile.43
= control target key start
LH: loop header
LB: loop body
LE: loop exit
PB: predicated region body
PF: predicated region fallthrough
CT: control target
= control target key end

     0   :  { %s28_s0 = inlined_call_operand.vmem [shape: f32[16], index: 0, kind: input, shape index: {}]   ;;  %s29_s1 = inlined_call_operand.vmem [shape: f32[16,16], index: 1, kind: output, shape index: {}]  }
   0x1   :  { %v4_v0 = vld [vmem:[%s28_s0] ss:$0 sm:$0xff] }
   0x2   :  { %5 = vst [vmem:[%s29_s1] sm:$0xff] %v4_v0  ;;  %8 = vst [vmem:[%s29_s1 + $0x8] sm:$0xff] %v4_v0 }

// kernel: tile.44
= control target key start
LH: loop header
LB: loop body
LE: loop exit
PB: predicated region body
PF: predicated region fallthrough
CT: control target
= control target key end

     0   :  { %s7_s6 = smov 3  ;;  %s21_s9 = smov 3  ;;  %vm4_vm0 = vcmask 130048   ;;  %vm11_vm1 = vcmask 1048448   ;;  %vm18_vm2 = vcmask 917248   ;;  %vm25_vm3 = vcmask 786048   ;;  %s128_s0 = inlined_call_operand.vmem [shape: f32[16,16], index: 0, kind: input, shape index: {}]   ;;  %s129_s1 = inlined_call_operand.vmem [shape: f32[1,256], index: 1, kind: output, shape index: {}]  }
   0x1   :  { %v66_v0 = vld [vmem:[%s128_s0 + $0x7] ss:$8 sm:%s7_s6]   ;;  %s81_s10 = smov 112   ;;  %v68_v1 = vld [vmem:[%s128_s0 + $0x5] ss:$8 sm:%s21_s9]   ;;  %s14_s13 = smov 3 }
   0x2   :  { %9 = vrot.lane.b32.xlu0 %v66_v0, %s81_s10  ;;  %s82_s14 = smov 80   ;;  %v67_v2 = vld [vmem:[%s128_s0 + $0x6] ss:$8 sm:%s14_s13]   ;;  %s28_s17 = smov 3  ;;  %vm32_vm4 = vcmask 654848   ;;  %vm39_vm5 = vcmask 523648  }
   0x3   :  { %23 = vrot.lane.b32.xlu1 %v68_v1, %s82_s14  ;;  %v69_v3 = vld [vmem:[%s128_s0 + $0x4] ss:$8 sm:%s28_s17]   ;;  %s35_s20 = smov 3  ;;  %s42_s21 = smov 3  ;;  %vm46_vm6 = vcmask 392448   ;;  %vm53_vm7 = vcmask 261248  }
   0x4   :  { %s83_s22 = smov 96   ;;  %s84_s23 = smov 64   ;;  %v70_v4 = vld [vmem:[%s128_s0 + $0x3] ss:$8 sm:%s35_s20]   ;;  %v71_v5 = vld [vmem:[%s128_s0 + $0x2] ss:$8 sm:%s42_s21]  }
   0x5   :  { %s2_s26 = smov 3  ;;  %s49_s29 = smov 3 }
   0x6   :  { %16 = vrot.lane.b32.xlu0 %v67_v2, %s83_s22  ;;  %v3_v6 = vld [vmem:[%s128_s0] ss:$8 sm:%s2_s26]   ;;  %s85_s3 = smov 48   ;;  %s86_s4 = smov 32  }
   0x7   :  { %30 = vrot.lane.b32.xlu1 %v69_v3, %s84_s23  ;;  %5 = vst.msk [vmem:[#allocation0] ss:$8 sm:$0x3] %vm4_vm0, %v3_v6   ;;  %v72_v7 = vld [vmem:[%s128_s0 + $0x1] ss:$8 sm:%s49_s29]   ;;  %s87_s0 = smov 16  }
   0xa   :  { %37 = vrot.lane.b32.xlu0 %v70_v4, %s85_s3 }
   0xb   :  { %44 = vrot.lane.b32.xlu1 %v71_v5, %s86_s4 }
   0xe   :  { %51 = vrot.lane.b32.xlu0 %v72_v7, %s87_s0 }
  0x74   :  { %v10_v8 = vpop.permute.xlu0 %9  }
  0x75   :  { %12 = vst.msk [vmem:[#allocation0] ss:$8 sm:$0x3] %vm11_vm1, %v10_v8   ;;  %v24_v9 = vpop.permute.xlu1 %23  }
  0x78   :  { %v17_v10 = vpop.permute.xlu0 %16  }
  0x79   :  { %19 = vst.msk [vmem:[#allocation0] ss:$8 sm:$0x3] %vm18_vm2, %v17_v10   ;;  %v31_v11 = vpop.permute.xlu1 %30  }
  0x7a   :  { %26 = vst.msk [vmem:[#allocation0] ss:$8 sm:$0x3] %vm25_vm3, %v24_v9  }
  0x7b   :  { %33 = vst.msk [vmem:[#allocation0] ss:$8 sm:$0x3] %vm32_vm4, %v31_v11  }
  0x7c   :  { %v38_v12 = vpop.permute.xlu0 %37  }
  0x7d   :  { %40 = vst.msk [vmem:[#allocation0] ss:$8 sm:$0x3] %vm39_vm5, %v38_v12   ;;  %v45_v13 = vpop.permute.xlu1 %44  }
  0x7e   :  { %47 = vst.msk [vmem:[#allocation0] ss:$8 sm:$0x3] %vm46_vm6, %v45_v13  }
  0x80   :  { %v52_v14 = vpop.permute.xlu0 %51  }
  0x81   :  { %54 = vst.msk [vmem:[#allocation0] ss:$8 sm:$0x3] %vm53_vm7, %v52_v14  }
  0x88   :  { %v58_v15 = vld [vmem:[#allocation0] sm:$0x1]  ;;  %v62_v16 = vld [vmem:[#allocation0 + $0x8] sm:$0x1] }
  0x89   :  { %60 = vst [vmem:[%s129_s1] sm:$0x1] %v58_v15  ;;  %73 = vst [vmem:[%s129_s1 + $0x1] sm:$0x1] %v62_v16 }

// kernel: discriminator3d_forward.10
= control target key start
LH: loop header
LB: loop body
LE: loop exit
PB: predicated region body
PF: predicated region fallthrough
CT: control target
= control target key end

     0   :  { %v19_v0 = vlaneseq  ;;  %s98_s0 = inlined_call_operand.vmem [shape: bf16[8,256], index: 0, kind: input, shape index: {}]   ;;  %s99_s1 = inlined_call_operand.vmem [shape: f32[1,256], index: 1, kind: input, shape index: {}]   ;;  %s100_s2 = inlined_call_operand.vmem [shape: f32[1,256], index: 2, kind: input, shape index: {}]   ;;  %s101_s3 = inlined_call_operand.vmem [shape: bf16[8,256], index: 3, kind: output, shape index: {}]  }
   0x1   :  { %v14_v1 = vld [vmem:[%s98_s0] sm:$0xff] }
   0x2   :  { %v20_v2 = vshrl.u32 %v19_v0, 7  ;;  %v17_v3 = vld [vmem:[%s99_s1] sm:$0x3]  ;;  %v15_v5 = vunpack.c.l.bf16 %v14_v1  ;;  %v16_v6 = vunpack.c.h.bf16 %v14_v1 }
   0x3   :  { %v31_v4 = vld [vmem:[%s100_s2] sm:$0x3] }
   0x4   :  { %v21_v7 = vsub.s32 0, %v20_v2  ;;  %v25_v8 = vsub.s32 1, %v20_v2 }
   0x6   :  { %v22_v9 = vrot.slane %v17_v3, %v21_v7  ;;  %v26_v10 = vrot.slane %v17_v3, %v25_v8  ;;  %v36_v11 = vrot.slane %v31_v4, %v21_v7  ;;  %v40_v12 = vrot.slane %v31_v4, %v25_v8 }
   0x8   :  { %v29_v13 = vmul.f32 %v22_v9, %v15_v5  ;;  %v30_v14 = vmul.f32 %v26_v10, %v16_v6 }
   0xa   :  { %v43_v15 = vadd.f32 %v36_v11, %v29_v13  ;;  %v44_v16 = vadd.f32 %v40_v12, %v30_v14 }
   0xc   :  { %vm45_vm0 = vcmp.ge.f32.partialorder %v43_v15, 0.0  ;;  %vm46_vm1 = vcmp.ge.f32.partialorder %v44_v16, 0.0  ;;  %v47_v17 = vmul.f32 0.2, %v43_v15  ;;  %v48_v18 = vmul.f32 0.2, %v44_v16 }
   0xe   :  { %v49_v19 = vsel %vm45_vm0, %v43_v15, %v47_v17  ;;  %v50_v20 = vsel %vm46_vm1, %v44_v16, %v48_v18 }
   0xf   :  { %v65_v21 = vpack.c.bf16 %v50_v20, %v49_v19 }
  0x11   :  { %59 = vst [vmem:[%s101_s3] sm:$0xff] %v65_v21 }

// kernel: discriminator3d_forward.9
= control target key start
LH: loop header
LB: loop body
LE: loop exit
PB: predicated region body
PF: predicated region fallthrough
CT: control target
= control target key end

     0   :  { %s3394_s18 = smov 0   ;;  %s4032_s0 = inlined_call_operand.vmem [shape: bf16[2,10,16,128], index: 0, kind: input, shape index: {}]   ;;  %s4033_s1 = inlined_call_operand.vmem [shape: bf16[4,128,16], index: 1, kind: input, shape index: {}]   ;;  %s4034_s2 = inlined_call_operand.vmem [shape: f32[1,16], index: 2, kind: input, shape index: {}]   ;;  %s4035_s3 = inlined_call_operand.vmem [shape: bf16[2,4,16,16], index: 3, kind: output, shape index: {0}]   ;;  %s4036_s4 = inlined_call_operand.vmem [shape: f32[2,1,16], index: 4, kind: output, shape index: {1}]   ;;  %s4037_s5 = inlined_call_operand.vmem [shape: f32[2,1,16], index: 5, kind: output, shape index: {2}]  }
   0x1 LB: > { %s2335_s19 = sadd.s32 4294967295, %s3360_s18   ;;  %p2339_p0 = scmp.ge.s32.totalorder %s3360_s18, 1  ;;  %s3360_s18 = sphi %s3394_s18, %s16_s18  }
   0x2   : > { %p192_p1 = scmp.lt.s32.totalorder %s3360_s18, 3 }
   0x4   : > { %p193_p2 = pnand %p2339_p0, %p192_p1 }
   0x5   : > { %v3210_v0 = vld [vmem:[%s4033_s1 + $0x40] sm:$0xff] (!%p193_p2)   ;;  %v3362_v1 = vmov (!%p193_p2), 0.0   ;;  %v3212_v3 = vld [vmem:[%s4033_s1 + $0x48] sm:$0xff] (!%p193_p2)   ;;  %vm3363_vm0 = vmmov (!%p193_p2), 0   ;;  %p226_p3 = scmp.lt.s32.totalorder (!%p193_p2), %s2335_s19, 1  ;;  %v3214_v5 = vld [vmem:[%s4033_s1 + $0x50] sm:$0xff] (!%p193_p2)  }
   0x6   : > { %196 = sbr.rel (%p193_p2) target bundleno = 502 (0x1f6), region = 32  ;;  %2879 = vmatprep.subr.bf16.mxu0 (!%p193_p2), %v3362_v1  ;;  %2899 = vmatprep.subr.bf16.mxu1 (!%p193_p2), %v3362_v1  ;;  %v3211_v2 = vld [vmem:[%s4033_s1] sm:$0xff] (!%p193_p2)   ;;  %v3213_v4 = vld [vmem:[%s4033_s1 + $0x8] sm:$0xff] (!%p193_p2)   ;;  %v3215_v6 = vld [vmem:[%s4033_s1 + $0x10] sm:$0xff] (!%p193_p2)   ;;  %vm714_vm1 = vcmask (!%p193_p2), 130048   ;;  %vm745_vm2 = vcmask (!%p193_p2), 125952  }
   0x7   : > { %2880 = vmatpush3.bf16.msra.mxu0 (!%p193_p2), %v3210_v0  ;;  %2895 = vmatprep.mubr.msk.bf16.mxu0 (!%p193_p2), %vm3363_vm0, %v3362_v1  ;;  %v3216_v7 = vld [vmem:[%s4033_s1 + $0x58] sm:$0xff] (!%p193_p2)   ;;  %v3218_v9 = vld [vmem:[%s4033_s1 + $0x60] sm:$0xff] (!%p193_p2)   ;;  %v3220_v11 = vld [vmem:[%s4033_s1 + $0x68] sm:$0xff] (!%p193_p2)   ;;  %vm2227_vm3 = vcmask (!%p193_p2), 122880  }
   0x8   : > { %2900 = vmatpush3.bf16.msra.mxu1 (!%p193_p2), %v3211_v2  ;;  %2881 = vmatprep.subr.bf16.mxu0 (!%p193_p2), %v3362_v1  ;;  %v3217_v8 = vld [vmem:[%s4033_s1 + $0x18] sm:$0xff] (!%p193_p2)   ;;  %v3219_v10 = vld [vmem:[%s4033_s1 + $0x20] sm:$0xff] (!%p193_p2)   ;;  %v3221_v12 = vld [vmem:[%s4033_s1 + $0x28] sm:$0xff] (!%p193_p2)  }
   0x9   : > { %2901 = vmatprep.subr.bf16.mxu1 (!%p193_p2), %v3362_v1  ;;  %2915 = vmatprep.mubr.msk.bf16.mxu1 (!%p193_p2), %vm3363_vm0, %v3362_v1  ;;  %v3222_v13 = vld [vmem:[%s4033_s1 + $0x70] sm:$0xff] (!%p193_p2)   ;;  %v3224_v15 = vld [vmem:[%s4033_s1 + $0x78] sm:$0xff] (!%p193_p2)   ;;  %v3228_v19 = vld [vmem:[%s4033_s1 + $0x80] sm:$0xff] (!%p193_p2)  }
   0xa   : > { %v3223_v14 = vld [vmem:[%s4033_s1 + $0x30] sm:$0xff] (!%p193_p2)   ;;  %v3225_v16 = vld [vmem:[%s4033_s1 + $0x38] sm:$0xff] (!%p193_p2)   ;;  %v3229_v20 = vld [vmem:[%s4033_s1 + $0xc0] sm:$0xff] (!%p193_p2)  }
   0xb   : > { %2882 = vmatpush3.bf16.msra.mxu0 (!%p193_p2), %v3212_v3  ;;  %v3230_v21 = vld [vmem:[%s4033_s1 + $0x88] sm:$0xff] (!%p193_p2)   ;;  %v3232_v23 = vld [vmem:[%s4033_s1 + $0x90] sm:$0xff] (!%p193_p2)   ;;  %v3234_v25 = vld [vmem:[%s4033_s1 + $0x98] sm:$0xff] (!%p193_p2)  }
   0xc   : > { %2902 = vmatpush3.bf16.msra.mxu1 (!%p193_p2), %v3213_v4  ;;  %2883 = vmatprep.subr.bf16.mxu0 (!%p193_p2), %v3362_v1  ;;  %v3231_v22 = vld [vmem:[%s4033_s1 + $0xc8] sm:$0xff] (!%p193_p2)   ;;  %v3233_v24 = vld [vmem:[%s4033_s1 + $0xd0] sm:$0xff] (!%p193_p2)   ;;  %v3235_v26 = vld [vmem:[%s4033_s1 + $0xd8] sm:$0xff] (!%p193_p2)  }
   0xd   : > { %s4039_s19 = smov (!%p226_p3, %s2335_s19), 1  ;;  %2903 = vmatprep.subr.bf16.mxu1 %v3362_v1  ;;  %v3236_v27 = vld [vmem:[%s4033_s1 + $0xa0] sm:$0xff]   ;;  %v3238_v29 = vld [vmem:[%s4033_s1 + $0xa8] sm:$0xff]   ;;  %v3240_v31 = vld [vmem:[%s4033_s1 + $0xb0] sm:$0xff]  }
   0xe   : > { %s3199_s11 = smul.u32 80, %s4039_s19  ;;  %v3237_v28 = vld [vmem:[%s4033_s1 + $0xe0] sm:$0xff]   ;;  %v3239_v30 = vld [vmem:[%s4033_s1 + $0xe8] sm:$0xff]   ;;  %v3241_v32 = vld [vmem:[%s4033_s1 + $0xf0] sm:$0xff]   ;;  %s2726_s14 = sshll.u32 %s4039_s19, 5 }
   0xf   : > { %2884 = vmatpush3.bf16.msra.mxu0 %v3214_v5  ;;  %v3242_v33 = vld [vmem:[%s4033_s1 + $0xb8] sm:$0xff]   ;;  %v3246_v37 = vld [vmem:[%s4033_s1 + $0x40] sm:$0xff]   ;;  %v3248_v39 = vld [vmem:[%s4033_s1 + $0x48] sm:$0xff]   ;;  %s3980_s16 = scalar_lea.vmem %s4035_s3, %s2726_s14  ;;  %s238_s22 = scalar_lea.vmem %s4036_s4, %s4039_s19 }
  0x10   : > { %2904 = vmatpush3.bf16.msra.mxu1 %v3215_v6  ;;  %2885 = vmatprep.subr.bf16.mxu0 %v3362_v1  ;;  %s3451_s20 = scalar_lea.vmem %s4032_s0, %s3199_s11  ;;  %v3243_v34 = vld [vmem:[%s4033_s1 + $0xf8] sm:$0xff]   ;;  %v3247_v38 = vld [vmem:[%s4033_s1] sm:$0xff]   ;;  %v3249_v40 = vld [vmem:[%s4033_s1 + $0x8] sm:$0xff]   ;;  %s241_s25 = scalar_lea.vmem %s4037_s5, %s4039_s19 }
  0x11   : > { %2905 = vmatprep.subr.bf16.mxu1 %v3362_v1  ;;  %v3226_v17 = vld [vmem:[%s3451_s20 + $0x8] sm:$0xff]   ;;  %v3227_v18 = vld [vmem:[%s3451_s20] sm:$0xff]   ;;  %v3244_v35 = vld [vmem:[%s3451_s20 + $0x10] sm:$0xff]  }
  0x12   : > { %v3245_v36 = vld [vmem:[%s3451_s20 + $0x18] sm:$0xff]   ;;  %v3250_v41 = vld [vmem:[%s4033_s1 + $0x50] sm:$0xff]   ;;  %v3254_v45 = vld [vmem:[%s4033_s1 + $0x60] sm:$0xff]  }
  0x13   : > { %2886 = vmatpush3.bf16.msra.mxu0 %v3216_v7  ;;  %v3251_v42 = vld [vmem:[%s4033_s1 + $0x10] sm:$0xff]   ;;  %v3252_v43 = vld [vmem:[%s4033_s1 + $0x58] sm:$0xff]   ;;  %v3255_v46 = vld [vmem:[%s4033_s1 + $0x20] sm:$0xff]  }
  0x14   : > { %2906 = vmatpush3.bf16.msra.mxu1 %v3217_v8  ;;  %2887 = vmatprep.subr.bf16.mxu0 %v3362_v1  ;;  %v3253_v44 = vld [vmem:[%s4033_s1 + $0x18] sm:$0xff]   ;;  %v3256_v47 = vld [vmem:[%s4033_s1 + $0x68] sm:$0xff]   ;;  %v3258_v49 = vld [vmem:[%s4033_s1 + $0x70] sm:$0xff]  }
  0x15   : > { %2907 = vmatprep.subr.bf16.mxu1 %v3362_v1  ;;  %v3257_v48 = vld [vmem:[%s4033_s1 + $0x28] sm:$0xff]   ;;  %v3259_v50 = vld [vmem:[%s4033_s1 + $0x30] sm:$0xff]   ;;  %v3260_v51 = vld [vmem:[%s4033_s1 + $0x78] sm:$0xff]  }
  0x16   : > { %v3261_v52 = vld [vmem:[%s4033_s1 + $0x38] sm:$0xff]   ;;  %v3263_v54 = vld [vmem:[%s3451_s20 + $0x10] sm:$0xff]   ;;  %v3264_v55 = vld [vmem:[%s4033_s1 + $0x80] sm:$0xff]  }
  0x17   : > { %2888 = vmatpush3.bf16.msra.mxu0 %v3218_v9  ;;  %v3262_v53 = vld [vmem:[%s3451_s20 + $0x18] sm:$0xff]   ;;  %v3265_v56 = vld [vmem:[%s4033_s1 + $0xc0] sm:$0xff]   ;;  %v3266_v57 = vld [vmem:[%s4033_s1 + $0x88] sm:$0xff]  }
  0x18   : > { %2908 = vmatpush3.bf16.msra.mxu1 %v3219_v10  ;;  %2889 = vmatprep.subr.bf16.mxu0 %v3362_v1  ;;  %v3267_v58 = vld [vmem:[%s4033_s1 + $0xc8] sm:$0xff]   ;;  %v3268_v59 = vld [vmem:[%s4033_s1 + $0x90] sm:$0xff]   ;;  %v3270_v61 = vld [vmem:[%s4033_s1 + $0x98] sm:$0xff]  }
  0x19   : > { %2909 = vmatprep.subr.bf16.mxu1 %v3362_v1  ;;  %v3269_v60 = vld [vmem:[%s4033_s1 + $0xd0] sm:$0xff]   ;;  %v3271_v62 = vld [vmem:[%s4033_s1 + $0xd8] sm:$0xff]   ;;  %v3272_v63 = vld [vmem:[%s4033_s1 + $0xa0] sm:$0xff]  }
  0x1a   : > { %v3273_v0 = vld [vmem:[%s4033_s1 + $0xe0] sm:$0xff]   ;;  %v3274_v2 = vld [vmem:[%s4033_s1 + $0xa8] sm:$0xff]   ;;  %v3276_v4 = vld [vmem:[%s4033_s1 + $0xb0] sm:$0xff]  }
  0x1b   : > { %2890 = vmatpush3.bf16.msra.mxu0 %v3220_v11  ;;  %v3275_v3 = vld [vmem:[%s4033_s1 + $0xe8] sm:$0xff]   ;;  %v3277_v5 = vld [vmem:[%s4033_s1 + $0xf0] sm:$0xff]   ;;  %v3278_v6 = vld [vmem:[%s4033_s1 + $0xb8] sm:$0xff]  }
  0x1c   : > { %2910 = vmatpush3.bf16.msra.mxu1 %v3221_v12  ;;  %2891 = vmatprep.subr.bf16.mxu0 %v3362_v1  ;;  %v3279_v7 = vld [vmem:[%s4033_s1 + $0xf8] sm:$0xff]   ;;  %v3280_v8 = vld [vmem:[%s3451_s20 + $0x20] sm:$0xff]   ;;  %v3281_v9 = vld [vmem:[%s3451_s20 + $0x28] sm:$0xff]  }
  0x1d   : > { %2911 = vmatprep.subr.bf16.mxu1 %v3362_v1  ;;  %v3282_v10 = vld [vmem:[%s4033_s1 + $0x40] sm:$0xff]   ;;  %v3284_v12 = vld [vmem:[%s4033_s1 + $0x48] sm:$0xff]  }
  0x1e   : > { %v3283_v11 = vld [vmem:[%s4033_s1] sm:$0xff]  }
  0x1f   : > { %2892 = vmatpush3.bf16.msra.mxu0 %v3222_v13  ;;  %v3285_v13 = vld [vmem:[%s4033_s1 + $0x8] sm:$0xff]  }
  0x20   : > { %2912 = vmatpush3.bf16.msra.mxu1 %v3223_v14  ;;  %2893 = vmatprep.subr.bf16.mxu0 %v3362_v1  ;;  %v3286_v14 = vld [vmem:[%s4033_s1 + $0x50] sm:$0xff]  }
  0x21   : > { %2913 = vmatprep.subr.bf16.mxu1 %v3362_v1 }
  0x23   : > { %2894 = vmatpush3.bf16.msra.mxu0 %v3224_v15  ;;  %v3287_v15 = vld [vmem:[%s4033_s1 + $0x10] sm:$0xff]  }
  0x24   : > { %2914 = vmatpush3.bf16.msra.mxu1 %v3225_v16  ;;  %2919 = vmatprep.subr.bf16.mxu0 %v3362_v1  ;;  %v3288_v16 = vld [vmem:[%s4033_s1 + $0x58] sm:$0xff]  }
  0x25   : > { %2939 = vmatprep.subr.bf16.mxu1 %v3362_v1 }
  0x26   : > { %2896 = vmatmul.mubr.bf16.vlgmr.msra.gmra.mrb[0].mxu0 %v3226_v17  ;;  %v3289_v17 = vld [vmem:[%s4033_s1 + $0x18] sm:$0xff]  }
  0x27   : > { %2916 = vmatmul.mubr.bf16.vlgmr.msra.gmra.mrb[0].mxu1 %v3227_v18  ;;  %2920 = vmatpush3.bf16.msra.mxu0 %v3228_v19  ;;  %v3290_v18 = vld [vmem:[%s4033_s1 + $0x60] sm:$0xff]  }
  0x28   : > { %2940 = vmatpush3.bf16.msra.mxu1 %v3229_v20  ;;  %2921 = vmatprep.subr.bf16.mxu0 %v3362_v1  ;;  %v3291_v19 = vld [vmem:[%s4033_s1 + $0x20] sm:$0xff]   ;;  %v3292_v20 = vld [vmem:[%s4033_s1 + $0x68] sm:$0xff]  }
  0x29   : > { %2941 = vmatprep.subr.bf16.mxu1 %v3362_v1  ;;  %2935 = vmatprep.mubr.msk.bf16.mxu0 %vm3363_vm0, %v3362_v1 }
  0x2a   : > { %2955 = vmatprep.mubr.msk.bf16.mxu1 %vm3363_vm0, %v3362_v1 }
  0x2b   : > { %2922 = vmatpush3.bf16.msra.mxu0 %v3230_v21  ;;  %v3293_v21 = vld [vmem:[%s4033_s1 + $0x28] sm:$0xff]  }
  0x2c   : > { %2942 = vmatpush3.bf16.msra.mxu1 %v3231_v22  ;;  %2923 = vmatprep.subr.bf16.mxu0 %v3362_v1  ;;  %v3294_v22 = vld [vmem:[%s4033_s1 + $0x70] sm:$0xff]  }
  0x2d   : > { %2943 = vmatprep.subr.bf16.mxu1 %v3362_v1 }
  0x2f   : > { %2924 = vmatpush3.bf16.msra.mxu0 %v3232_v23  ;;  %v3295_v23 = vld [vmem:[%s4033_s1 + $0x30] sm:$0xff]  }
  0x30   : > { %2944 = vmatpush3.bf16.msra.mxu1 %v3233_v24  ;;  %2925 = vmatprep.subr.bf16.mxu0 %v3362_v1  ;;  %v3296_v24 = vld [vmem:[%s4033_s1 + $0x78] sm:$0xff]  }
  0x31   : > { %2945 = vmatprep.subr.bf16.mxu1 %v3362_v1 }
  0x33   : > { %2926 = vmatpush3.bf16.msra.mxu0 %v3234_v25  ;;  %v3297_v25 = vld [vmem:[%s4033_s1 + $0x38] sm:$0xff]  }
  0x34   : > { %2946 = vmatpush3.bf16.msra.mxu1 %v3235_v26  ;;  %2927 = vmatprep.subr.bf16.mxu0 %v3362_v1  ;;  %v3298_v26 = vld [vmem:[%s3451_s20 + $0x28] sm:$0xff]  }
  0x35   : > { %2947 = vmatprep.subr.bf16.mxu1 %v3362_v1 }
  0x37   : > { %2928 = vmatpush3.bf16.msra.mxu0 %v3236_v27  ;;  %v3299_v27 = vld [vmem:[%s3451_s20 + $0x20] sm:$0xff]  }
  0x38   : > { %2948 = vmatpush3.bf16.msra.mxu1 %v3237_v28  ;;  %2929 = vmatprep.subr.bf16.mxu0 %v3362_v1  ;;  %v3300_v28 = vld [vmem:[%s4033_s1 + $0x80] sm:$0xff]  }
  0x39   : > { %2949 = vmatprep.subr.bf16.mxu1 %v3362_v1 }
  0x3b   : > { %2930 = vmatpush3.bf16.msra.mxu0 %v3238_v29  ;;  %v3301_v29 = vld [vmem:[%s4033_s1 + $0xc0] sm:$0xff]  }
  0x3c   : > { %2950 = vmatpush3.bf16.msra.mxu1 %v3239_v30  ;;  %2931 = vmatprep.subr.bf16.mxu0 %v3362_v1  ;;  %v3302_v30 = vld [vmem:[%s4033_s1 + $0x88] sm:$0xff]  }
  0x3d   : > { %2951 = vmatprep.subr.bf16.mxu1 %v3362_v1 }
  0x3f   : > { %2932 = vmatpush3.bf16.msra.mxu0 %v3240_v31  ;;  %v3303_v31 = vld [vmem:[%s4033_s1 + $0xc8] sm:$0xff]  }
  0x40   : > { %2952 = vmatpush3.bf16.msra.mxu1 %v3241_v32  ;;  %2933 = vmatprep.subr.bf16.mxu0 %v3362_v1  ;;  %v3304_v32 = vld [vmem:[%s4033_s1 + $0x90] sm:$0xff]  }
  0x41   : > { %2953 = vmatprep.subr.bf16.mxu1 %v3362_v1 }
  0x43   : > { %2934 = vmatpush3.bf16.msra.mxu0 %v3242_v33  ;;  %v3305_v33 = vld [vmem:[%s4033_s1 + $0xd0] sm:$0xff]  }
  0x44   : > { %2954 = vmatpush3.bf16.msra.mxu1 %v3243_v34  ;;  %2959 = vmatprep.subr.bf16.mxu0 %v3362_v1  ;;  %v3306_v34 = vld [vmem:[%s4033_s1 + $0x98] sm:$0xff]  }
  0x45   : > { %2979 = vmatprep.subr.bf16.mxu1 %v3362_v1 }
  0x46   : > { %2936 = vmatmul.mubr.bf16.vlgmr.msra.gmra.mrb[4].mxu0 %v3244_v35  ;;  %v3307_v35 = vld [vmem:[%s4033_s1 + $0xd8] sm:$0xff]  }
  0x47   : > { %2956 = vmatmul.mubr.bf16.vlgmr.msra.gmra.mrb[4].mxu1 %v3245_v36  ;;  %2960 = vmatpush3.bf16.msra.mxu0 %v3246_v37  ;;  %v3308_v36 = vld [vmem:[%s4033_s1 + $0xa0] sm:$0xff]  }
  0x48   : > { %2980 = vmatpush3.bf16.msra.mxu1 %v3247_v38  ;;  %2961 = vmatprep.subr.bf16.mxu0 %v3362_v1  ;;  %v3309_v37 = vld [vmem:[%s4033_s1 + $0xe0] sm:$0xff]   ;;  %v3310_v38 = vld [vmem:[%s4033_s1 + $0xa8] sm:$0xff]  }
  0x49   : > { %2981 = vmatprep.subr.bf16.mxu1 %v3362_v1  ;;  %2975 = vmatprep.mubr.msk.bf16.mxu0 %vm3363_vm0, %v3362_v1 }
  0x4a   : > { %2995 = vmatprep.mubr.msk.bf16.mxu1 %vm3363_vm0, %v3362_v1 }
  0x4b   : > { %2962 = vmatpush3.bf16.msra.mxu0 %v3248_v39  ;;  %v3311_v39 = vld [vmem:[%s4033_s1 + $0xe8] sm:$0xff]  }
  0x4c   : > { %2982 = vmatpush3.bf16.msra.mxu1 %v3249_v40  ;;  %2963 = vmatprep.subr.bf16.mxu0 %v3362_v1  ;;  %v3312_v40 = vld [vmem:[%s4033_s1 + $0xb0] sm:$0xff]  }
  0x4d   : > { %2983 = vmatprep.subr.bf16.mxu1 %v3362_v1 }
  0x4f   : > { %2964 = vmatpush3.bf16.msra.mxu0 %v3250_v41  ;;  %v3313_v41 = vld [vmem:[%s4033_s1 + $0xf0] sm:$0xff]  }
  0x50   : > { %2984 = vmatpush3.bf16.msra.mxu1 %v3251_v42  ;;  %2965 = vmatprep.subr.bf16.mxu0 %v3362_v1  ;;  %v3314_v42 = vld [vmem:[%s4033_s1 + $0xb8] sm:$0xff]  }
  0x51   : > { %2985 = vmatprep.subr.bf16.mxu1 %v3362_v1 }
  0x53   : > { %2966 = vmatpush3.bf16.msra.mxu0 %v3252_v43  ;;  %v3315_v43 = vld [vmem:[%s4033_s1 + $0xf8] sm:$0xff]  }
  0x54   : > { %2986 = vmatpush3.bf16.msra.mxu1 %v3253_v44  ;;  %2967 = vmatprep.subr.bf16.mxu0 %v3362_v1  ;;  %v3316_v44 = vld [vmem:[%s3451_s20 + $0x30] sm:$0xff]  }
  0x55   : > { %2987 = vmatprep.subr.bf16.mxu1 %v3362_v1 }
  0x57   : > { %2968 = vmatpush3.bf16.msra.mxu0 %v3254_v45  ;;  %v3317_v45 = vld [vmem:[%s3451_s20 + $0x38] sm:$0xff]  }
  0x58   : > { %2988 = vmatpush3.bf16.msra.mxu1 %v3255_v46  ;;  %2969 = vmatprep.subr.bf16.mxu0 %v3362_v1  ;;  %v3318_v46 = vld [vmem:[%s4033_s1 + $0x40] sm:$0xff]  }
  0x59   : > { %2989 = vmatprep.subr.bf16.mxu1 %v3362_v1 }
  0x5b   : > { %2970 = vmatpush3.bf16.msra.mxu0 %v3256_v47  ;;  %v3319_v47 = vld [vmem:[%s4033_s1] sm:$0xff]  }
  0x5c   : > { %2990 = vmatpush3.bf16.msra.mxu1 %v3257_v48  ;;  %2971 = vmatprep.subr.bf16.mxu0 %v3362_v1  ;;  %v3320_v48 = vld [vmem:[%s4033_s1 + $0x48] sm:$0xff]  }
  0x5d   : > { %2991 = vmatprep.subr.bf16.mxu1 %v3362_v1 }
  0x5f   : > { %2972 = vmatpush3.bf16.msra.mxu0 %v3258_v49  ;;  %v3321_v49 = vld [vmem:[%s4033_s1 + $0x8] sm:$0xff]  }
  0x60   : > { %2992 = vmatpush3.bf16.msra.mxu1 %v3259_v50  ;;  %2973 = vmatprep.subr.bf16.mxu0 %v3362_v1  ;;  %v3322_v50 = vld [vmem:[%s4033_s1 + $0x50] sm:$0xff]  }
  0x61   : > { %2993 = vmatprep.subr.bf16.mxu1 %v3362_v1 }
  0x63   : > { %2974 = vmatpush3.bf16.msra.mxu0 %v3260_v51  ;;  %v3323_v51 = vld [vmem:[%s4033_s1 + $0x10] sm:$0xff]  }
  0x64   : > { %2994 = vmatpush3.bf16.msra.mxu1 %v3261_v52  ;;  %2999 = vmatprep.subr.bf16.mxu0 %v3362_v1  ;;  %v3324_v52 = vld [vmem:[%s4033_s1 + $0x58] sm:$0xff]  }
  0x65   : > { %3019 = vmatprep.subr.bf16.mxu1 %v3362_v1 }
  0x66   : > { %2976 = vmatmul.mubr.bf16.vlgmr.msra.gmra.mrb[8].mxu0 %v3262_v53  ;;  %v3325_v53 = vld [vmem:[%s4033_s1 + $0x18] sm:$0xff]  }
  0x67   : > { %2996 = vmatmul.mubr.bf16.vlgmr.msra.gmra.mrb[8].mxu1 %v3263_v54  ;;  %3000 = vmatpush3.bf16.msra.mxu0 %v3264_v55  ;;  %v3326_v54 = vld [vmem:[%s4033_s1 + $0x60] sm:$0xff]  }
  0x68   : > { %3020 = vmatpush3.bf16.msra.mxu1 %v3265_v56  ;;  %3001 = vmatprep.subr.bf16.mxu0 %v3362_v1  ;;  %v3327_v55 = vld [vmem:[%s4033_s1 + $0x20] sm:$0xff]   ;;  %v3328_v56 = vld [vmem:[%s4033_s1 + $0x68] sm:$0xff]  }
  0x69   : > { %3021 = vmatprep.subr.bf16.mxu1 %v3362_v1  ;;  %3015 = vmatprep.mubr.msk.bf16.mxu0 %vm3363_vm0, %v3362_v1 }
  0x6a   : > { %3035 = vmatprep.mubr.msk.bf16.mxu1 %vm3363_vm0, %v3362_v1 }
  0x6b   : > { %3002 = vmatpush3.bf16.msra.mxu0 %v3266_v57  ;;  %v3329_v57 = vld [vmem:[%s4033_s1 + $0x28] sm:$0xff]  }
  0x6c   : > { %3022 = vmatpush3.bf16.msra.mxu1 %v3267_v58  ;;  %3003 = vmatprep.subr.bf16.mxu0 %v3362_v1  ;;  %v3330_v58 = vld [vmem:[%s4033_s1 + $0x70] sm:$0xff]  }
  0x6d   : > { %3023 = vmatprep.subr.bf16.mxu1 %v3362_v1 }
  0x6f   : > { %3004 = vmatpush3.bf16.msra.mxu0 %v3268_v59  ;;  %v3331_v59 = vld [vmem:[%s4033_s1 + $0x30] sm:$0xff]  }
  0x70   : > { %3024 = vmatpush3.bf16.msra.mxu1 %v3269_v60  ;;  %3005 = vmatprep.subr.bf16.mxu0 %v3362_v1  ;;  %v3332_v60 = vld [vmem:[%s4033_s1 + $0x78] sm:$0xff]  }
  0x71   : > { %3025 = vmatprep.subr.bf16.mxu1 %v3362_v1 }
  0x73   : > { %3006 = vmatpush3.bf16.msra.mxu0 %v3270_v61  ;;  %v3333_v61 = vld [vmem:[%s4033_s1 + $0x38] sm:$0xff]  }
  0x74   : > { %3026 = vmatpush3.bf16.msra.mxu1 %v3271_v62  ;;  %3007 = vmatprep.subr.bf16.mxu0 %v3362_v1  ;;  %v3334_v62 = vld [vmem:[%s3451_s20 + $0x38] sm:$0xff]  }
  0x75   : > { %3027 = vmatprep.subr.bf16.mxu1 %v3362_v1 }
  0x77   : > { %3008 = vmatpush3.bf16.msra.mxu0 %v3272_v63  ;;  %v3335_v63 = vld [vmem:[%s3451_s20 + $0x30] sm:$0xff]  }
  0x78   : > { %3028 = vmatpush3.bf16.msra.mxu1 %v3273_v0  ;;  %3009 = vmatprep.subr.bf16.mxu0 %v3362_v1  ;;  %v3336_v0 = vld [vmem:[%s4033_s1 + $0x80] sm:$0xff]  }
  0x79   : > { %3029 = vmatprep.subr.bf16.mxu1 %v3362_v1 }
  0x7b   : > { %3010 = vmatpush3.bf16.msra.mxu0 %v3274_v2  ;;  %v3337_v2 = vld [vmem:[%s4033_s1 + $0xc0] sm:$0xff]  }
  0x7c   : > { %3030 = vmatpush3.bf16.msra.mxu1 %v3275_v3  ;;  %3011 = vmatprep.subr.bf16.mxu0 %v3362_v1  ;;  %v3338_v3 = vld [vmem:[%s4033_s1 + $0x88] sm:$0xff]  }
  0x7d   : > { %3031 = vmatprep.subr.bf16.mxu1 %v3362_v1 }
  0x7f   : > { %3012 = vmatpush3.bf16.msra.mxu0 %v3276_v4  ;;  %v3339_v4 = vld [vmem:[%s4033_s1 + $0xc8] sm:$0xff]  }
  0x80   : > { %3032 = vmatpush3.bf16.msra.mxu1 %v3277_v5  ;;  %3013 = vmatprep.subr.bf16.mxu0 %v3362_v1  ;;  %v3340_v5 = vld [vmem:[%s4033_s1 + $0x90] sm:$0xff]  }
  0x81   : > { %3033 = vmatprep.subr.bf16.mxu1 %v3362_v1 }
  0x83   : > { %3014 = vmatpush3.bf16.msra.mxu0 %v3278_v6  ;;  %v3341_v6 = vld [vmem:[%s4033_s1 + $0xd0] sm:$0xff]  }
  0x84   : > { %3034 = vmatpush3.bf16.msra.mxu1 %v3279_v7  ;;  %3039 = vmatprep.subr.bf16.mxu0 %v3362_v1  ;;  %v3342_v7 = vld [vmem:[%s4033_s1 + $0x98] sm:$0xff]  }
  0x85   : > { %3059 = vmatprep.subr.bf16.mxu1 %v3362_v1 }
  0x86   : > { %3016 = vmatmul.mubr.bf16.vlgmr.msra.gmra.mrb[12].mxu0 %v3280_v8  ;;  %v3343_v8 = vld [vmem:[%s4033_s1 + $0xd8] sm:$0xff]  }
  0x87   : > { %3036 = vmatmul.mubr.bf16.vlgmr.msra.gmra.mrb[12].mxu1 %v3281_v9  ;;  %3040 = vmatpush3.bf16.msra.mxu0 %v3282_v10  ;;  %v3344_v9 = vld [vmem:[%s4033_s1 + $0xa0] sm:$0xff]  }
  0x88   : > { %3060 = vmatpush3.bf16.msra.mxu1 %v3283_v11  ;;  %3041 = vmatprep.subr.bf16.mxu0 %v3362_v1  ;;  %v3345_v10 = vld [vmem:[%s4033_s1 + $0xe0] sm:$0xff]   ;;  %v3346_v11 = vld [vmem:[%s4033_s1 + $0xa8] sm:$0xff]  }
  0x89   : > { %3061 = vmatprep.subr.bf16.mxu1 %v3362_v1  ;;  %3055 = vmatprep.mubr.msk.bf16.mxu0 %vm3363_vm0, %v3362_v1 }
  0x8a   : > { %3075 = vmatprep.mubr.msk.bf16.mxu1 %vm3363_vm0, %v3362_v1 }
  0x8b   : > { %3042 = vmatpush3.bf16.msra.mxu0 %v3284_v12  ;;  %v3347_v12 = vld [vmem:[%s4033_s1 + $0xe8] sm:$0xff]  }
  0x8c   : > { %3062 = vmatpush3.bf16.msra.mxu1 %v3285_v13  ;;  %3043 = vmatprep.subr.bf16.mxu0 %v3362_v1 }
  0x8d   : > { %3063 = vmatprep.subr.bf16.mxu1 %v3362_v1 }
  0x8f   : > { %3044 = vmatpush3.bf16.msra.mxu0 %v3286_v14 }
  0x90   : > { %3064 = vmatpush3.bf16.msra.mxu1 %v3287_v15  ;;  %3045 = vmatprep.subr.bf16.mxu0 %v3362_v1 }
  0x91   : > { %3065 = vmatprep.subr.bf16.mxu1 %v3362_v1 }
  0x93   : > { %3046 = vmatpush3.bf16.msra.mxu0 %v3288_v16 }
  0x94   : > { %3066 = vmatpush3.bf16.msra.mxu1 %v3289_v17  ;;  %3047 = vmatprep.subr.bf16.mxu0 %v3362_v1 }
  0x95   : > { %3067 = vmatprep.subr.bf16.mxu1 %v3362_v1 }
  0x97   : > { %3048 = vmatpush3.bf16.msra.mxu0 %v3290_v18 }
  0x98   : > { %3068 = vmatpush3.bf16.msra.mxu1 %v3291_v19  ;;  %3049 = vmatprep.subr.bf16.mxu0 %v3362_v1  ;;  %v3348_v19 = vld [vmem:[%s4033_s1 + $0xb0] sm:$0xff]  }
  0x99   : > { %3069 = vmatprep.subr.bf16.mxu1 %v3362_v1 }
  0x9b   : > { %3050 = vmatpush3.bf16.msra.mxu0 %v3292_v20 }
  0x9c   : > { %3070 = vmatpush3.bf16.msra.mxu1 %v3293_v21  ;;  %3051 = vmatprep.subr.bf16.mxu0 %v3362_v1 }
  0x9d   : > { %3071 = vmatprep.subr.bf16.mxu1 %v3362_v1 }
  0x9f   : > { %3052 = vmatpush3.bf16.msra.mxu0 %v3294_v22  ;;  %v3349_v22 = vld [vmem:[%s4033_s1 + $0xf0] sm:$0xff]  }
  0xa0   : > { %3072 = vmatpush3.bf16.msra.mxu1 %v3295_v23  ;;  %3053 = vmatprep.subr.bf16.mxu0 %v3362_v1 }
  0xa1   : > { %3073 = vmatprep.subr.bf16.mxu1 %v3362_v1 }
  0xa3   : > { %3054 = vmatpush3.bf16.msra.mxu0 %v3296_v24 }
  0xa4   : > { %3074 = vmatpush3.bf16.msra.mxu1 %v3297_v25  ;;  %3079 = vmatprep.subr.bf16.mxu0 %v3362_v1  ;;  %v3350_v25 = vld [vmem:[%s4033_s1 + $0xb8] sm:$0xff]  }
  0xa5   : > { %3099 = vmatprep.subr.bf16.mxu1 %v3362_v1 }
  0xa6   : > { %3056 = vmatmul.mubr.bf16.vlgmr.msra.gmra.mrb[16].mxu0 %v3298_v26  ;;  %v3351_v26 = vld [vmem:[%s4033_s1 + $0xf8] sm:$0xff]  }
  0xa7   : > { %3076 = vmatmul.mubr.bf16.vlgmr.msra.gmra.mrb[16].mxu1 %v3299_v27  ;;  %3080 = vmatpush3.bf16.msra.mxu0 %v3300_v28  ;;  %v3352_v27 = vld [vmem:[%s3451_s20 + $0x40] sm:$0xff]   ;;  %v3353_v28 = vld [vmem:[%s3451_s20 + $0x48] sm:$0xff]  }
  0xa8   : > { %3100 = vmatpush3.bf16.msra.mxu1 %v3301_v29  ;;  %3081 = vmatprep.subr.bf16.mxu0 %v3362_v1 }
  0xa9   : > { %3101 = vmatprep.subr.bf16.mxu1 %v3362_v1  ;;  %3095 = vmatprep.mubr.msk.bf16.mxu0 %vm3363_vm0, %v3362_v1 }
  0xaa   : > { %3115 = vmatprep.mubr.msk.bf16.mxu1 %vm3363_vm0, %v3362_v1 }
  0xab   : > { %3082 = vmatpush3.bf16.msra.mxu0 %v3302_v30 }
  0xac   : > { %3102 = vmatpush3.bf16.msra.mxu1 %v3303_v31  ;;  %3083 = vmatprep.subr.bf16.mxu0 %v3362_v1 }
  0xad   : > { %3103 = vmatprep.subr.bf16.mxu1 %v3362_v1 }
  0xaf   : > { %3084 = vmatpush3.bf16.msra.mxu0 %v3304_v32 }
  0xb0   : > { %3104 = vmatpush3.bf16.msra.mxu1 %v3305_v33  ;;  %3085 = vmatprep.subr.bf16.mxu0 %v3362_v1  ;;  %v3973_v33 = vld [vmem:[%s4034_s2] ss:$0 sm:$0xff] }
  0xb1   : > { %3105 = vmatprep.subr.bf16.mxu1 %v3362_v1 }
  0xb3   : > { %3086 = vmatpush3.bf16.msra.mxu0 %v3306_v34 }
  0xb4   : > { %3106 = vmatpush3.bf16.msra.mxu1 %v3307_v35  ;;  %3087 = vmatprep.subr.bf16.mxu0 %v3362_v1 }
  0xb5   : > { %3107 = vmatprep.subr.bf16.mxu1 %v3362_v1 }
  0xb7   : > { %3088 = vmatpush3.bf16.msra.mxu0 %v3308_v36 }
  0xb8   : > { %3108 = vmatpush3.bf16.msra.mxu1 %v3309_v37  ;;  %3089 = vmatprep.subr.bf16.mxu0 %v3362_v1 }
  0xb9   : > { %3109 = vmatprep.subr.bf16.mxu1 %v3362_v1 }
  0xbb   : > { %3090 = vmatpush3.bf16.msra.mxu0 %v3310_v38 }
  0xbc   : > { %3110 = vmatpush3.bf16.msra.mxu1 %v3311_v39  ;;  %3091 = vmatprep.subr.bf16.mxu0 %v3362_v1 }
  0xbd   : > { %3111 = vmatprep.subr.bf16.mxu1 %v3362_v1 }
  0xbf   : > { %3092 = vmatpush3.bf16.msra.mxu0 %v3312_v40 }
  0xc0   : > { %3112 = vmatpush3.bf16.msra.mxu1 %v3313_v41  ;;  %3093 = vmatprep.subr.bf16.mxu0 %v3362_v1 }
  0xc1   : > { %3113 = vmatprep.subr.bf16.mxu1 %v3362_v1 }
  0xc3   : > { %3094 = vmatpush3.bf16.msra.mxu0 %v3314_v42 }
  0xc4   : > { %3114 = vmatpush3.bf16.msra.mxu1 %v3315_v43  ;;  %3119 = vmatprep.subr.bf16.mxu0 %v3362_v1 }
  0xc5   : > { %3139 = vmatprep.subr.bf16.mxu1 %v3362_v1 }
  0xc6   : > { %3096 = vmatmul.mubr.bf16.vlgmr.msra.gmra.mrb[20].mxu0 %v3316_v44 }
  0xc7   : > { %3116 = vmatmul.mubr.bf16.vlgmr.msra.gmra.mrb[20].mxu1 %v3317_v45  ;;  %3120 = vmatpush3.bf16.msra.mxu0 %v3318_v46 }
  0xc8   : > { %3140 = vmatpush3.bf16.msra.mxu1 %v3319_v47  ;;  %3121 = vmatprep.subr.bf16.mxu0 %v3362_v1 }
  0xc9   : > { %3141 = vmatprep.subr.bf16.mxu1 %v3362_v1  ;;  %3135 = vmatprep.mubr.msk.bf16.mxu0 %vm3363_vm0, %v3362_v1 }
  0xca   : > { %3155 = vmatprep.mubr.msk.bf16.mxu1 %vm3363_vm0, %v3362_v1 }
  0xcb   : > { %3122 = vmatpush3.bf16.msra.mxu0 %v3320_v48 }
  0xcc   : > { %3142 = vmatpush3.bf16.msra.mxu1 %v3321_v49  ;;  %3123 = vmatprep.subr.bf16.mxu0 %v3362_v1 }
  0xcd   : > { %3143 = vmatprep.subr.bf16.mxu1 %v3362_v1 }
  0xcf   : > { %3124 = vmatpush3.bf16.msra.mxu0 %v3322_v50 }
  0xd0   : > { %3144 = vmatpush3.bf16.msra.mxu1 %v3323_v51  ;;  %3125 = vmatprep.subr.bf16.mxu0 %v3362_v1 }
  0xd1   : > { %3145 = vmatprep.subr.bf16.mxu1 %v3362_v1 }
  0xd3   : > { %3126 = vmatpush3.bf16.msra.mxu0 %v3324_v52 }
  0xd4   : > { %3146 = vmatpush3.bf16.msra.mxu1 %v3325_v53  ;;  %3127 = vmatprep.subr.bf16.mxu0 %v3362_v1 }
  0xd5   : > { %3147 = vmatprep.subr.bf16.mxu1 %v3362_v1 }
  0xd7   : > { %3128 = vmatpush3.bf16.msra.mxu0 %v3326_v54 }
  0xd8   : > { %3148 = vmatpush3.bf16.msra.mxu1 %v3327_v55  ;;  %3129 = vmatprep.subr.bf16.mxu0 %v3362_v1 }
  0xd9   : > { %3149 = vmatprep.subr.bf16.mxu1 %v3362_v1 }
  0xdb   : > { %3130 = vmatpush3.bf16.msra.mxu0 %v3328_v56 }
  0xdc   : > { %3150 = vmatpush3.bf16.msra.mxu1 %v3329_v57  ;;  %3131 = vmatprep.subr.bf16.mxu0 %v3362_v1 }
  0xdd   : > { %3151 = vmatprep.subr.bf16.mxu1 %v3362_v1 }
  0xdf   : > { %3132 = vmatpush3.bf16.msra.mxu0 %v3330_v58 }
  0xe0   : > { %3152 = vmatpush3.bf16.msra.mxu1 %v3331_v59  ;;  %3133 = vmatprep.subr.bf16.mxu0 %v3362_v1 }
  0xe1   : > { %3153 = vmatprep.subr.bf16.mxu1 %v3362_v1 }
  0xe3   : > { %3134 = vmatpush3.bf16.msra.mxu0 %v3332_v60 }
  0xe4   : > { %3154 = vmatpush3.bf16.msra.mxu1 %v3333_v61  ;;  %3159 = vmatprep.subr.bf16.mxu0 %v3362_v1 }
  0xe5   : > { %3179 = vmatprep.subr.bf16.mxu1 %v3362_v1 }
  0xe6   : > { %3136 = vmatmul.mubr.bf16.vlgmr.msra.gmra.mrb[24].mxu0 %v3334_v62 }
  0xe7   : > { %3156 = vmatmul.mubr.bf16.vlgmr.msra.gmra.mrb[24].mxu1 %v3335_v63  ;;  %3160 = vmatpush3.bf16.msra.mxu0 %v3336_v0 }
  0xe8   : > { %3180 = vmatpush3.bf16.msra.mxu1 %v3337_v2  ;;  %3161 = vmatprep.subr.bf16.mxu0 %v3362_v1 }
  0xe9   : > { %3181 = vmatprep.subr.bf16.mxu1 %v3362_v1  ;;  %3175 = vmatprep.mubr.msk.bf16.mxu0 %vm3363_vm0, %v3362_v1 }
  0xea   : > { %3195 = vmatprep.mubr.msk.bf16.mxu1 %vm3363_vm0, %v3362_v1 }
  0xeb   : > { %3162 = vmatpush3.bf16.msra.mxu0 %v3338_v3 }
  0xec   : > { %3182 = vmatpush3.bf16.msra.mxu1 %v3339_v4  ;;  %3163 = vmatprep.subr.bf16.mxu0 %v3362_v1 }
  0xed   : > { %3183 = vmatprep.subr.bf16.mxu1 %v3362_v1 }
  0xef   : > { %3164 = vmatpush3.bf16.msra.mxu0 %v3340_v5 }
  0xf0   : > { %3184 = vmatpush3.bf16.msra.mxu1 %v3341_v6  ;;  %3165 = vmatprep.subr.bf16.mxu0 %v3362_v1 }
  0xf1   : > { %3185 = vmatprep.subr.bf16.mxu1 %v3362_v1 }
  0xf3   : > { %3166 = vmatpush3.bf16.msra.mxu0 %v3342_v7 }
  0xf4   : > { %3186 = vmatpush3.bf16.msra.mxu1 %v3343_v8  ;;  %3167 = vmatprep.subr.bf16.mxu0 %v3362_v1 }
  0xf5   : > { %3187 = vmatprep.subr.bf16.mxu1 %v3362_v1 }
  0xf7   : > { %3168 = vmatpush3.bf16.msra.mxu0 %v3344_v9 }
  0xf8   : > { %3188 = vmatpush3.bf16.msra.mxu1 %v3345_v10  ;;  %3169 = vmatprep.subr.bf16.mxu0 %v3362_v1 }
  0xf9   : > { %v370_v13 = vpop.f32.mrb[0].mxu0  ;;  %3189 = vmatprep.subr.bf16.mxu1 %v3362_v1 }
  0xfa   : > { %v465_v14 = vpop.f32.mrb[0].mxu1  ;;  %v2897_v15 = vpop.f32.mrb[1].mxu0 }
  0xfb   : > { %v466_v16 = vadd.f32 %v465_v14, %v370_v13  ;;  %v2917_v17 = vpop.f32.mrb[1].mxu1  ;;  %v373_v18 = vpop.f32.mrb[2].mxu0  ;;  %3170 = vmatpush3.bf16.msra.mxu0 %v3346_v11 }
  0xfc   : > { %v468_v20 = vpop.f32.mrb[2].mxu1  ;;  %3190 = vmatpush3.bf16.msra.mxu1 %v3347_v12  ;;  %v2898_v21 = vpop.f32.mrb[3].mxu0  ;;  %3171 = vmatprep.subr.bf16.mxu0 %v3362_v1 }
  0xfd   : > { %v469_v23 = vadd.f32 %v468_v20, %v373_v18  ;;  %v2918_v24 = vpop.f32.mrb[3].mxu1  ;;  %3191 = vmatprep.subr.bf16.mxu1 %v3362_v1 }
  0xff   : > { %3172 = vmatpush3.bf16.msra.mxu0 %v3348_v19 }
 0x100   : > { %3192 = vmatpush3.bf16.msra.mxu1 %v3349_v22  ;;  %3173 = vmatprep.subr.bf16.mxu0 %v3362_v1 }
 0x101   : > { %3193 = vmatprep.subr.bf16.mxu1 %v3362_v1 }
 0x103   : > { %3174 = vmatpush3.bf16.msra.mxu0 %v3350_v25 }
 0x104   : > { %3194 = vmatpush3.bf16.msra.mxu1 %v3351_v26 }
 0x106   : > { %3176 = vmatmul.mubr.bf16.vlgmr.msra.gmra.mrb[28].mxu0 %v3352_v27 }
 0x107   : > { %3196 = vmatmul.mubr.bf16.vlgmr.msra.gmra.mrb[28].mxu1 %v3353_v28 }
 0x119   : > { %v580_v29 = vpop.f32.mrb[4].mxu0 }
 0x11a   : > { %v587_v30 = vadd.f32 %v580_v29, %v466_v16  ;;  %v697_v31 = vpop.f32.mrb[4].mxu1  ;;  %v2937_v32 = vpop.f32.mrb[5].mxu0 }
 0x11b   : > { %v2957_v34 = vpop.f32.mrb[5].mxu1  ;;  %v583_v35 = vpop.f32.mrb[6].mxu0 }
 0x11c   : > { %v704_v36 = vadd.f32 %v697_v31, %v587_v30  ;;  %v588_v1 = vadd.f32 %v583_v35, %v469_v23  ;;  %v700_v37 = vpop.f32.mrb[6].mxu1  ;;  %v2938_v38 = vpop.f32.mrb[7].mxu0 }
 0x11d   : > { %v2958_v39 = vpop.f32.mrb[7].mxu1 }
 0x11e   : > { %v712_v40 = vadd.f32 %v3973_v33, %v704_v36  ;;  %v705_v41 = vadd.f32 %v700_v37, %v588_v1 }
 0x120   : > { %v725_v42 = vmul.f32 %v712_v40, %v712_v40  ;;  %v2727_v43 = vpack.c.bf16 %v712_v40, %v712_v40  ;;  %v713_v44 = vadd.f32 %v3973_v33, %v705_v41  ;;  %v715_v45 = vsel %vm714_vm1, %v712_v40, 0.0 }
 0x122   : > { %746 = vst.msk [vmem:[%s3980_s16] sm:$0xf] %vm745_vm2, %v2727_v43  ;;  %v716_v46 = vsel %vm714_vm1, %v713_v44, 0.0  ;;  %v726_v47 = vmul.f32 %v713_v44, %v713_v44  ;;  %v2728_v48 = vpack.c.bf16 %v713_v44, %v713_v44  ;;  %v727_v50 = vsel %vm714_vm1, %v725_v42, 0.0 }
 0x123   : > { %v717_v49 = vadd.f32 %v716_v46, %v715_v45 }
 0x124   : > { %v728_v51 = vsel %vm714_vm1, %v726_v47, 0.0  ;;  %747 = vst.msk [vmem:[%s3980_s16 + $0x4] sm:$0xf] %vm745_vm2, %v2728_v48 }
 0x125   : > { %v729_v52 = vadd.f32 %v728_v51, %v727_v50  ;;  %v718_v4 = vrot.slane %v717_v49, 4 }
 0x127   : > { %v730_v11 = vrot.slane %v729_v52, 4  ;;  %v719_v15 = vadd.f32 %v718_v4, %v717_v49 }
 0x129   : > { %v731_v19 = vadd.f32 %v730_v11, %v729_v52  ;;  %v720_v24 = vrot.slane %v719_v15, 2 }
 0x12b   : > { %v732_v28 = vrot.slane %v731_v19, 2  ;;  %v721_v31 = vadd.f32 %v720_v24, %v719_v15 }
 0x12d   : > { %v733_v35 = vadd.f32 %v732_v28, %v731_v19  ;;  %v722_v37 = vrot.slane %v721_v31, 1 }
 0x12f   : > { %v734_v40 = vrot.slane %v733_v35, 1  ;;  %v723_v43 = vadd.f32 %v722_v37, %v721_v31 }
 0x131   : > { %v735_v46 = vadd.f32 %v734_v40, %v733_v35 }
 0x139   : > { %v872_v53 = vpop.f32.mrb[8].mxu0 }
 0x13a   : > { %v967_v54 = vpop.f32.mrb[8].mxu1  ;;  %v2977_v55 = vpop.f32.mrb[9].mxu0 }
 0x13b   : > { %v968_v56 = vadd.f32 %v967_v54, %v872_v53  ;;  %v2997_v57 = vpop.f32.mrb[9].mxu1  ;;  %v875_v58 = vpop.f32.mrb[10].mxu0 }
 0x13c   : > { %v970_v59 = vpop.f32.mrb[10].mxu1  ;;  %v2978_v60 = vpop.f32.mrb[11].mxu0 }
 0x13d   : > { %v971_v61 = vadd.f32 %v970_v59, %v875_v58  ;;  %v2998_v62 = vpop.f32.mrb[11].mxu1 }
 0x159   : > { %v1081_v63 = vpop.f32.mrb[12].mxu0 }
 0x15a   : > { %v1088_v0 = vadd.f32 %v1081_v63, %v968_v56  ;;  %v1197_v2 = vpop.f32.mrb[12].mxu1  ;;  %v3017_v3 = vpop.f32.mrb[13].mxu0 }
 0x15b   : > { %v3037_v5 = vpop.f32.mrb[13].mxu1  ;;  %v1084_v6 = vpop.f32.mrb[14].mxu0 }
 0x15c   : > { %v1204_v7 = vadd.f32 %v1197_v2, %v1088_v0  ;;  %v1089_v8 = vadd.f32 %v1084_v6, %v971_v61  ;;  %v1200_v9 = vpop.f32.mrb[14].mxu1  ;;  %v3018_v10 = vpop.f32.mrb[15].mxu0 }
 0x15d   : > { %v3038_v12 = vpop.f32.mrb[15].mxu1 }
 0x15e   : > { %v1206_v13 = vadd.f32 %v3973_v33, %v1204_v7  ;;  %v1205_v14 = vadd.f32 %v1200_v9, %v1089_v8 }
 0x160   : > { %v1218_v16 = vmul.f32 %v1206_v13, %v1206_v13  ;;  %v2729_v17 = vpack.c.bf16 %v1206_v13, %v1206_v13  ;;  %v1207_v18 = vadd.f32 %v3973_v33, %v1205_v14  ;;  %v1208_v20 = vsel %vm714_vm1, %v1206_v13, 0.0 }
 0x162   : > { %2530 = vst.msk [vmem:[%s3980_s16 + $0x8] sm:$0xf] %vm745_vm2, %v2729_v17  ;;  %v1209_v21 = vsel %vm714_vm1, %v1207_v18, 0.0  ;;  %v1219_v22 = vmul.f32 %v1207_v18, %v1207_v18  ;;  %v2730_v23 = vpack.c.bf16 %v1207_v18, %v1207_v18  ;;  %v1220_v26 = vsel %vm714_vm1, %v1218_v16, 0.0 }
 0x163   : > { %v1210_v25 = vadd.f32 %v1209_v21, %v1208_v20 }
 0x164   : > { %v1221_v27 = vsel %vm714_vm1, %v1219_v22, 0.0  ;;  %2531 = vst.msk [vmem:[%s3980_s16 + $0xc] sm:$0xf] %vm745_vm2, %v2730_v23 }
 0x165   : > { %v1211_v29 = vrot.slane %v1210_v25, 4  ;;  %v1222_v30 = vadd.f32 %v1221_v27, %v1220_v26 }
 0x167   : > { %v1212_v32 = vadd.f32 %v1211_v29, %v1210_v25  ;;  %v1223_v34 = vrot.slane %v1222_v30, 4 }
 0x169   : > { %v1213_v36 = vrot.slane %v1212_v32, 2  ;;  %v1224_v1 = vadd.f32 %v1223_v34, %v1222_v30 }
 0x16b   : > { %v1214_v38 = vadd.f32 %v1213_v36, %v1212_v32  ;;  %v1225_v39 = vrot.slane %v1224_v1, 2 }
 0x16d   : > { %v1215_v41 = vrot.slane %v1214_v38, 1  ;;  %v1226_v42 = vadd.f32 %v1225_v39, %v1224_v1 }
 0x16f   : > { %v1216_v44 = vadd.f32 %v1215_v41, %v1214_v38  ;;  %v1227_v45 = vrot.slane %v1226_v42, 1 }
 0x171   : > { %v1217_v47 = vadd.f32 %v1216_v44, %v723_v43  ;;  %v1228_v48 = vadd.f32 %v1227_v45, %v1226_v42 }
 0x173   : > { %v1229_v49 = vadd.f32 %v1228_v48, %v735_v46 }
 0x179   : > { %v1365_v50 = vpop.f32.mrb[16].mxu0 }
 0x17a   : > { %v1460_v51 = vpop.f32.mrb[16].mxu1  ;;  %v3057_v52 = vpop.f32.mrb[17].mxu0 }
 0x17b   : > { %v1461_v53 = vadd.f32 %v1460_v51, %v1365_v50  ;;  %v3077_v54 = vpop.f32.mrb[17].mxu1  ;;  %v1368_v55 = vpop.f32.mrb[18].mxu0 }
 0x17c   : > { %v1463_v56 = vpop.f32.mrb[18].mxu1  ;;  %v3058_v57 = vpop.f32.mrb[19].mxu0 }
 0x17d   : > { %v1464_v58 = vadd.f32 %v1463_v56, %v1368_v55  ;;  %v3078_v59 = vpop.f32.mrb[19].mxu1 }
 0x199   : > { %v1574_v60 = vpop.f32.mrb[20].mxu0 }
 0x19a   : > { %v1581_v61 = vadd.f32 %v1574_v60, %v1461_v53  ;;  %v1690_v62 = vpop.f32.mrb[20].mxu1  ;;  %v3097_v63 = vpop.f32.mrb[21].mxu0 }
 0x19b   : > { %v3117_v0 = vpop.f32.mrb[21].mxu1  ;;  %v1577_v2 = vpop.f32.mrb[22].mxu0 }
 0x19c   : > { %v1697_v3 = vadd.f32 %v1690_v62, %v1581_v61  ;;  %v1582_v4 = vadd.f32 %v1577_v2, %v1464_v58  ;;  %v1693_v5 = vpop.f32.mrb[22].mxu1  ;;  %v3098_v6 = vpop.f32.mrb[23].mxu0 }
 0x19d   : > { %v3118_v7 = vpop.f32.mrb[23].mxu1 }
 0x19e   : > { %v1699_v8 = vadd.f32 %v3973_v33, %v1697_v3  ;;  %v1698_v9 = vadd.f32 %v1693_v5, %v1582_v4 }
 0x1a0   : > { %v1711_v10 = vmul.f32 %v1699_v8, %v1699_v8  ;;  %v2731_v11 = vpack.c.bf16 %v1699_v8, %v1699_v8  ;;  %v1700_v12 = vadd.f32 %v3973_v33, %v1698_v9  ;;  %v1701_v13 = vsel %vm714_vm1, %v1699_v8, 0.0 }
 0x1a2   : > { %2626 = vst.msk [vmem:[%s3980_s16 + $0x10] sm:$0xf] %vm745_vm2, %v2731_v11  ;;  %v1702_v14 = vsel %vm714_vm1, %v1700_v12, 0.0  ;;  %v1712_v15 = vmul.f32 %v1700_v12, %v1700_v12  ;;  %v2732_v16 = vpack.c.bf16 %v1700_v12, %v1700_v12  ;;  %v1713_v18 = vsel %vm714_vm1, %v1711_v10, 0.0 }
 0x1a3   : > { %v1703_v17 = vadd.f32 %v1702_v14, %v1701_v13 }
 0x1a4   : > { %v1714_v19 = vsel %vm714_vm1, %v1712_v15, 0.0  ;;  %2627 = vst.msk [vmem:[%s3980_s16 + $0x14] sm:$0xf] %vm745_vm2, %v2732_v16 }
 0x1a5   : > { %v1704_v20 = vrot.slane %v1703_v17, 4  ;;  %v1715_v21 = vadd.f32 %v1714_v19, %v1713_v18 }
 0x1a7   : > { %v1705_v22 = vadd.f32 %v1704_v20, %v1703_v17  ;;  %v1716_v23 = vrot.slane %v1715_v21, 4 }
 0x1a9   : > { %v1706_v24 = vrot.slane %v1705_v22, 2  ;;  %v1717_v25 = vadd.f32 %v1716_v23, %v1715_v21 }
 0x1ab   : > { %v1707_v26 = vadd.f32 %v1706_v24, %v1705_v22  ;;  %v1718_v27 = vrot.slane %v1717_v25, 2 }
 0x1ad   : > { %v1708_v28 = vrot.slane %v1707_v26, 1  ;;  %v1719_v29 = vadd.f32 %v1718_v27, %v1717_v25 }
 0x1af   : > { %v1709_v30 = vadd.f32 %v1708_v28, %v1707_v26  ;;  %v1720_v31 = vrot.slane %v1719_v29, 1 }
 0x1b1   : > { %v1710_v32 = vadd.f32 %v1709_v30, %v1217_v47  ;;  %v1721_v34 = vadd.f32 %v1720_v31, %v1719_v29 }
 0x1b3   : > { %v1722_v35 = vadd.f32 %v1721_v34, %v1229_v49 }
 0x1b9   : > { %v1858_v36 = vpop.f32.mrb[24].mxu0 }
 0x1ba   : > { %v1953_v1 = vpop.f32.mrb[24].mxu1  ;;  %v3137_v37 = vpop.f32.mrb[25].mxu0 }
 0x1bb   : > { %v1954_v38 = vadd.f32 %v1953_v1, %v1858_v36  ;;  %v3157_v39 = vpop.f32.mrb[25].mxu1  ;;  %v1861_v40 = vpop.f32.mrb[26].mxu0 }
 0x1bc   : > { %v1956_v41 = vpop.f32.mrb[26].mxu1  ;;  %v3138_v42 = vpop.f32.mrb[27].mxu0 }
 0x1bd   : > { %v1957_v43 = vadd.f32 %v1956_v41, %v1861_v40  ;;  %v3158_v44 = vpop.f32.mrb[27].mxu1 }
 0x1d9   : > { %v2067_v45 = vpop.f32.mrb[28].mxu0 }
 0x1da   : > { %v2074_v46 = vadd.f32 %v2067_v45, %v1954_v38  ;;  %v2183_v48 = vpop.f32.mrb[28].mxu1  ;;  %v3177_v50 = vpop.f32.mrb[29].mxu0 }
 0x1db   : > { %v3197_v51 = vpop.f32.mrb[29].mxu1  ;;  %v2070_v52 = vpop.f32.mrb[30].mxu0 }
 0x1dc   : > { %v2190_v47 = vadd.f32 %v2183_v48, %v2074_v46  ;;  %v2075_v53 = vadd.f32 %v2070_v52, %v1957_v43  ;;  %v2186_v49 = vpop.f32.mrb[30].mxu1  ;;  %v3178_v54 = vpop.f32.mrb[31].mxu0 }
 0x1dd   : > { %v3198_v55 = vpop.f32.mrb[31].mxu1 }
 0x1de   : > { %v2192_v56 = vadd.f32 %v3973_v33, %v2190_v47  ;;  %v2191_v57 = vadd.f32 %v2186_v49, %v2075_v53 }
 0x1e0   : > { %v2204_v58 = vmul.f32 %v2192_v56, %v2192_v56  ;;  %v2733_v59 = vpack.c.bf16 %v2192_v56, %v2192_v56  ;;  %v2193_v60 = vadd.f32 %v3973_v33, %v2191_v57  ;;  %v2194_v61 = vsel %vm714_vm1, %v2192_v56, 0.0 }
 0x1e2   : > { %2722 = vst.msk [vmem:[%s3980_s16 + $0x18] sm:$0xf] %vm745_vm2, %v2733_v59  ;;  %v2195_v62 = vsel %vm714_vm1, %v2193_v60, 0.0  ;;  %v2205_v63 = vmul.f32 %v2193_v60, %v2193_v60  ;;  %v2734_v0 = vpack.c.bf16 %v2193_v60, %v2193_v60  ;;  %v2206_v3 = vsel %vm714_vm1, %v2204_v58, 0.0 }
 0x1e3   : > { %v2196_v2 = vadd.f32 %v2195_v62, %v2194_v61 }
 0x1e4   : > { %v2207_v4 = vsel %vm714_vm1, %v2205_v63, 0.0  ;;  %2723 = vst.msk [vmem:[%s3980_s16 + $0x1c] sm:$0xf] %vm745_vm2, %v2734_v0 }
 0x1e5   : > { %v2197_v5 = vrot.slane %v2196_v2, 4  ;;  %v2208_v6 = vadd.f32 %v2207_v4, %v2206_v3 }
 0x1e7   : > { %v2198_v33 = vadd.f32 %v2197_v5, %v2196_v2  ;;  %v2209_v7 = vrot.slane %v2208_v6, 4 }
 0x1e9   : > { %v2199_v8 = vrot.slane %v2198_v33, 2  ;;  %v2210_v9 = vadd.f32 %v2209_v7, %v2208_v6 }
 0x1eb   : > { %v2200_v10 = vadd.f32 %v2199_v8, %v2198_v33  ;;  %v2211_v11 = vrot.slane %v2210_v9, 2 }
 0x1ed   : > { %v2201_v12 = vrot.slane %v2200_v10, 1  ;;  %v2212_v13 = vadd.f32 %v2211_v11, %v2210_v9 }
 0x1ef   : > { %v2202_v14 = vadd.f32 %v2201_v12, %v2200_v10  ;;  %v2213_v15 = vrot.slane %v2212_v13, 1 }
 0x1f1   : > { %v2203_v16 = vadd.f32 %v2202_v14, %v1710_v32  ;;  %v2214_v17 = vadd.f32 %v2213_v15, %v2212_v13 }
 0x1f3   : > { %v2215_v18 = vadd.f32 %v2214_v17, %v1722_v35  ;;  %2228 = vst.msk [vmem:[%s238_s22] sm:$0x1] %vm2227_vm3, %v2203_v16 }
 0x1f5   : > { %2229 = vst.msk [vmem:[%s241_s25] sm:$0x1] %vm2227_vm3, %v2215_v18 }
 0x1f6 PF: > { %s16_s18 = sadd.s32 1, %s3360_s18  }
 0x1f7   : > { %p13_p4 = scmp.ge.s32.totalorder %s16_s18, 4  }
 0x1f9   :  { %15 = sbr.rel (!%p13_p4) target bundleno = 1 (0x1), region = 101 }

// kernel: tile.53
= control target key start
LH: loop header
LB: loop body
LE: loop exit
PB: predicated region body
PF: predicated region fallthrough
CT: control target
= control target key end

     0   :  { %s22_s0 = inlined_call_operand.vmem [shape: f32[32], index: 0, kind: input, shape index: {}]   ;;  %s23_s1 = inlined_call_operand.vmem [shape: f32[4,32], index: 1, kind: output, shape index: {}]  }
   0x1   :  { %v4_v0 = vld [vmem:[%s22_s0] ss:$0 sm:$0xff] }
   0x2   :  { %5 = vst [vmem:[%s23_s1] sm:$0xf] %v4_v0 }

// kernel: tile.54
= control target key start
LH: loop header
LB: loop body
LE: loop exit
PB: predicated region body
PF: predicated region fallthrough
CT: control target
= control target key end

     0   :  { %vm7_vm0 = vcmask 261120   ;;  %s37_s8 = smov 32   ;;  %s38_s9 = smov 64   ;;  %vm13_vm1 = vcmask 1048320   ;;  %vm19_vm2 = vcmask 785920   ;;  %vm25_vm3 = vcmask 523520   ;;  %s55_s0 = inlined_call_operand.vmem [shape: f32[4,32], index: 0, kind: input, shape index: {}]   ;;  %s56_s1 = inlined_call_operand.vmem [shape: f32[1,128], index: 1, kind: output, shape index: {}]  }
   0x1   :  { %v4_v0 = vld [vmem:[%s55_s0] sm:$0xf]  ;;  %s36_s0 = smov 96  }
   0x2   :  { %5 = vst [vmem:[#allocation1] sm:$0xf] %v4_v0 }
   0x9   :  { %v10_v1 = vld [vmem:[#allocation1 + $0x3] sm:$0x1]   ;;  %v22_v2 = vld [vmem:[#allocation1 + $0x1] sm:$0x1]   ;;  %v6_v3 = vld [vmem:[#allocation1] sm:$0x1]  }
   0xa   :  { %11 = vrot.lane.b32.xlu0 %v10_v1, %s36_s0  ;;  %23 = vrot.lane.b32.xlu1 %v22_v2, %s37_s8  ;;  %v16_v4 = vld [vmem:[#allocation1 + $0x2] sm:$0x1]   ;;  %8 = vst.msk [vmem:[#allocation0] sm:$0x1] %vm7_vm0, %v6_v3  }
   0xe   :  { %17 = vrot.lane.b32.xlu0 %v16_v4, %s38_s9 }
  0x7c   :  { %v12_v5 = vpop.permute.xlu0 %11   ;;  %v24_v6 = vpop.permute.xlu1 %23  }
  0x7d   :  { %14 = vst.msk [vmem:[#allocation0] sm:$0x1] %vm13_vm1, %v12_v5  }
  0x80   :  { %v18_v7 = vpop.permute.xlu0 %17  }
  0x81   :  { %20 = vst.msk [vmem:[#allocation0] sm:$0x1] %vm19_vm2, %v18_v7  }
  0x82   :  { %26 = vst.msk [vmem:[#allocation0] sm:$0x1] %vm25_vm3, %v24_v6  }
  0x89   :  { %v30_v8 = vld [vmem:[#allocation0] sm:$0x1] }
  0x8a   :  { %32 = vst [vmem:[%s56_s1] sm:$0x1] %v30_v8 }

// kernel: discriminator3d_forward.12
= control target key start
LH: loop header
LB: loop body
LE: loop exit
PB: predicated region body
PF: predicated region fallthrough
CT: control target
= control target key end

     0   :  { %s75_s0 = inlined_call_operand.vmem [shape: bf16[4,128], index: 0, kind: input, shape index: {}]   ;;  %s76_s1 = inlined_call_operand.vmem [shape: f32[1,128], index: 1, kind: input, shape index: {}]   ;;  %s77_s2 = inlined_call_operand.vmem [shape: f32[1,128], index: 2, kind: input, shape index: {}]   ;;  %s78_s3 = inlined_call_operand.vmem [shape: bf16[4,128], index: 3, kind: output, shape index: {}]  }
   0x1   :  { %v14_v0 = vld [vmem:[%s75_s0] sm:$0x3] }
   0x2   :  { %v41_v1 = vld [vmem:[%s76_s1] ss:$0 sm:$0xff]  ;;  %v15_v2 = vunpack.c.l.bf16 %v14_v0 }
   0x3   :  { %v42_v3 = vld [vmem:[%s77_s2] ss:$0 sm:$0xff] }
   0x4   :  { %v23_v4 = vmul.f32 %v41_v1, %v15_v2 }
   0x6   :  { %v31_v5 = vadd.f32 %v42_v3, %v23_v4 }
   0x8   :  { %vm32_vm0 = vcmp.ge.f32.partialorder %v31_v5, 0.0  ;;  %v33_v6 = vmul.f32 0.2, %v31_v5 }
   0xa   :  { %v34_v7 = vsel %vm32_vm0, %v31_v5, %v33_v6 }
   0xb   :  { %v35_v8 = vpack.c.bf16 %v34_v7, %v34_v7 }
   0xd   :  { %36 = vst [vmem:[%s78_s3] sm:$0x3] %v35_v8 }

// kernel: discriminator3d_forward.13
= control target key start
LH: loop header
LB: loop body
LE: loop exit
PB: predicated region body
PF: predicated region fallthrough
CT: control target
= control target key end

     0   :  { %v281_v6 = vmov 1966171168   ;;  %v69_v8 = vlaneseq  ;;  %vm218_vm0 = vcmask 1024   ;;  %s359_s1 = inlined_call_operand.vmem [shape: bf16[256,1], index: 1, kind: input, shape index: {}]   ;;  %s360_s0 = inlined_call_operand.vmem [shape: bf16[2,256], index: 0, kind: input, shape index: {}]   ;;  %s361_s2 = inlined_call_operand.<no memory space> [shape: f32[1,1], index: 2, kind: input, shape index: {}]   ;;  %s362_s3 = inlined_call_operand.vmem [shape: f32[2,1], index: 3, kind: output, shape index: {}]  }
   0x1   :  { %v265_v0 = vld [vmem:[%s359_s1 + $0x40] sm:$0xff]   ;;  %v267_v2 = vld [vmem:[%s359_s1 + $0x48] sm:$0xff]   ;;  %v269_v4 = vld [vmem:[%s359_s1 + $0x50] sm:$0xff]   ;;  %v67_v7 = vunpack.c.l.s4 %v281_v6  ;;  %v8_v26 = vstv %s361_s2 }
   0x2   :  { %v266_v1 = vld [vmem:[%s359_s1] sm:$0xff]   ;;  %242 = vmatprep.subr.bf16.mxu0 %v265_v0  ;;  %v268_v3 = vld [vmem:[%s359_s1 + $0x8] sm:$0xff]   ;;  %v270_v5 = vld [vmem:[%s359_s1 + $0x10] sm:$0xff]   ;;  %v70_v12 = vshrl.u32 %v69_v8, 7  ;;  %9 = vst [vmem:[#allocation2] sm:$0x1] %v8_v26 }
   0x3   :  { %243 = vmatpush3.bf16.msra.mxu0 %v266_v1  ;;  %v271_v9 = vld [vmem:[%s359_s1 + $0x58] sm:$0xff]   ;;  %v68_v11 = vunpack.c.0.s8 %v67_v7  ;;  %v273_v13 = vld [vmem:[%s359_s1 + $0x60] sm:$0xff]   ;;  %v275_v16 = vld [vmem:[%s359_s1 + $0x68] sm:$0xff]  }
   0x4   :  { %244 = vmatprep.subr.bf16.mxu0 %v267_v2  ;;  %v272_v10 = vld [vmem:[%s359_s1 + $0x18] sm:$0xff]   ;;  %v274_v14 = vld [vmem:[%s359_s1 + $0x20] sm:$0xff]   ;;  %v276_v19 = vld [vmem:[%s359_s1 + $0x28] sm:$0xff]  }
   0x5   :  { %v71_v15 = vsub.s32 %v68_v11, %v70_v12  ;;  %v225_v17 = vld.sshfl [vmem:[%s360_s0] sm:$0x11 pattern:$0x75316420]  ;;  %v277_v21 = vld [vmem:[%s359_s1 + $0x70] sm:$0xff]   ;;  %v279_v23 = vld [vmem:[%s359_s1 + $0x78] sm:$0xff]  }
   0x6   :  { %v65_v18 = vcombine.high %v225_v17, %v225_v17  ;;  %v278_v22 = vld [vmem:[%s359_s1 + $0x30] sm:$0xff]   ;;  %v280_v24 = vld [vmem:[%s359_s1 + $0x38] sm:$0xff]  }
   0x7   :  { %245 = vmatpush3.bf16.msra.mxu0 %v268_v3  ;;  %v72_v25 = vrot.slane %v225_v17, %v71_v15 }
   0x8   :  { %246 = vmatprep.subr.bf16.mxu0 %v269_v4  ;;  %v79_v20 = vrot.slane %v65_v18, %v71_v15 }
   0x9   :  { %v224_v28 = vld [vmem:[#allocation2] ss:$0 sm:$0xff] }
   0xa   :  { %210 = vmatprep.mubr.bf16.mxu0 %v79_v20 }
   0xb   :  { %247 = vmatpush3.bf16.msra.mxu0 %v270_v5 }
   0xc   :  { %248 = vmatprep.subr.bf16.mxu0 %v271_v9 }
   0xf   :  { %249 = vmatpush3.bf16.msra.mxu0 %v272_v10 }
  0x10   :  { %250 = vmatprep.subr.bf16.mxu0 %v273_v13 }
  0x13   :  { %251 = vmatpush3.bf16.msra.mxu0 %v274_v14 }
  0x14   :  { %252 = vmatprep.subr.bf16.mxu0 %v275_v16 }
  0x17   :  { %253 = vmatpush3.bf16.msra.mxu0 %v276_v19 }
  0x18   :  { %254 = vmatprep.subr.bf16.mxu0 %v277_v21 }
  0x1b   :  { %255 = vmatpush3.bf16.msra.mxu0 %v278_v22 }
  0x1c   :  { %256 = vmatprep.subr.bf16.mxu0 %v279_v23 }
  0x1f   :  { %257 = vmatpush3.bf16.msra.mxu0 %v280_v24 }
  0x22   :  { %211 = vmatmul.mubr.bf16.vlgmr.msra.gmra.mrb[0].mxu0 %v72_v25 }
  0xf5   :  { %v258_v27 = vpop.f32.mrb[0].mxu0 }
  0xf6   :  { %v259_v29 = vpop.f32.mrb[1].mxu0 }
  0xf7   :  { %v260_v30 = vadd.f32 %v259_v29, %v258_v27  ;;  %v261_v31 = vpop.f32.mrb[2].mxu0 }
  0xf8   :  { %v262_v32 = vpop.f32.mrb[3].mxu0 }
  0xf9   :  { %v213_v33 = vadd.f32 %v260_v30, %v224_v28 }
  0xfb   :  { %219 = vst.msk [vmem:[%s362_s3] sm:$0x3] %vm218_vm0, %v213_v33 }

// kernel: discriminator3d_forward.11
= control target key start
LH: loop header
LB: loop body
LE: loop exit
PB: predicated region body
PF: predicated region fallthrough
CT: control target
= control target key end

     0   :  { %s2552_s18 = smov 0   ;;  %s3002_s0 = inlined_call_operand.vmem [shape: bf16[2,6,4,256], index: 0, kind: input, shape index: {}]   ;;  %s3003_s1 = inlined_call_operand.vmem [shape: bf16[4,256,32], index: 1, kind: input, shape index: {}]   ;;  %s3004_s2 = inlined_call_operand.vmem [shape: f32[1,32], index: 2, kind: input, shape index: {}]   ;;  %s3005_s3 = inlined_call_operand.vmem [shape: bf16[2,2,4,32], index: 3, kind: output, shape index: {0}]   ;;  %s3006_s4 = inlined_call_operand.vmem [shape: f32[2,1,32], index: 4, kind: output, shape index: {1}]   ;;  %s3007_s5 = inlined_call_operand.vmem [shape: f32[2,1,32], index: 5, kind: output, shape index: {2}]  }
   0x1 LB: > { %s1853_s19 = sadd.s32 4294967295, %s2520_s18   ;;  %p1857_p0 = scmp.ge.s32.totalorder %s2520_s18, 1  ;;  %s2520_s18 = sphi %s2552_s18, %s16_s18  }
   0x2   : > { %p192_p1 = scmp.lt.s32.totalorder %s2520_s18, 3 }
   0x4   : > { %p193_p2 = pnand %p1857_p0, %p192_p1 }
   0x5   : > { %v2386_v0 = vld [vmem:[%s3003_s1 + $0xc0] sm:$0xff] (!%p193_p2)   ;;  %v2390_v4 = vld [vmem:[%s3003_s1 + $0xc8] sm:$0xff] (!%p193_p2)   ;;  %v2394_v8 = vld [vmem:[%s3003_s1 + $0xd0] sm:$0xff] (!%p193_p2)   ;;  %p226_p3 = scmp.lt.s32.totalorder (!%p193_p2), %s1853_s19, 1  ;;  %vm998_vm0 = vcmask (!%p193_p2), 254976   ;;  %vm979_vm1 = vcmask (!%p193_p2), 257024  }
   0x6   : > { %196 = sbr.rel (%p193_p2) target bundleno = 374 (0x176), region = 32  ;;  %v2387_v1 = vld [vmem:[%s3003_s1 + $0x40] sm:$0xff] (!%p193_p2)   ;;  %2201 = vmatprep.subr.bf16.mxu0 (!%p193_p2), %v2386_v0  ;;  %v2391_v5 = vld [vmem:[%s3003_s1 + $0x48] sm:$0xff] (!%p193_p2)   ;;  %v2395_v9 = vld [vmem:[%s3003_s1 + $0x50] sm:$0xff] (!%p193_p2)   ;;  %vm1745_vm2 = vcmask (!%p193_p2), 253952  }
   0x7   : > { %v2388_v2 = vld [vmem:[%s3003_s1 + $0x80] sm:$0xff] (!%p193_p2)   ;;  %2223 = vmatprep.subr.bf16.mxu1 (!%p193_p2), %v2387_v1  ;;  %v2392_v6 = vld [vmem:[%s3003_s1 + $0x88] sm:$0xff] (!%p193_p2)   ;;  %v2396_v10 = vld [vmem:[%s3003_s1 + $0x90] sm:$0xff] (!%p193_p2)  }
   0x8   : > { %v2389_v3 = vld [vmem:[%s3003_s1] sm:$0xff] (!%p193_p2)   ;;  %2202 = vmatpush3.bf16.msra.mxu0 (!%p193_p2), %v2388_v2  ;;  %v2393_v7 = vld [vmem:[%s3003_s1 + $0x8] sm:$0xff] (!%p193_p2)   ;;  %v2397_v11 = vld [vmem:[%s3003_s1 + $0x10] sm:$0xff] (!%p193_p2)  }
   0x9   : > { %2224 = vmatpush3.bf16.msra.mxu1 (!%p193_p2), %v2389_v3  ;;  %2203 = vmatprep.subr.bf16.mxu0 (!%p193_p2), %v2390_v4  ;;  %v2398_v12 = vld [vmem:[%s3003_s1 + $0xd8] sm:$0xff] (!%p193_p2)   ;;  %v2402_v16 = vld [vmem:[%s3003_s1 + $0xe0] sm:$0xff] (!%p193_p2)   ;;  %v2406_v20 = vld [vmem:[%s3003_s1 + $0xe8] sm:$0xff] (!%p193_p2)  }
   0xa   : > { %2225 = vmatprep.subr.bf16.mxu1 (!%p193_p2), %v2391_v5  ;;  %v2399_v13 = vld [vmem:[%s3003_s1 + $0x58] sm:$0xff] (!%p193_p2)   ;;  %v2403_v17 = vld [vmem:[%s3003_s1 + $0x60] sm:$0xff] (!%p193_p2)   ;;  %v2407_v21 = vld [vmem:[%s3003_s1 + $0x68] sm:$0xff] (!%p193_p2)  }
   0xb   : > { %v2400_v14 = vld [vmem:[%s3003_s1 + $0x98] sm:$0xff] (!%p193_p2)   ;;  %v2404_v18 = vld [vmem:[%s3003_s1 + $0xa0] sm:$0xff] (!%p193_p2)   ;;  %v2408_v22 = vld [vmem:[%s3003_s1 + $0xa8] sm:$0xff] (!%p193_p2)  }
   0xc   : > { %2204 = vmatpush3.bf16.msra.mxu0 (!%p193_p2), %v2392_v6  ;;  %v2401_v15 = vld [vmem:[%s3003_s1 + $0x18] sm:$0xff] (!%p193_p2)   ;;  %v2405_v19 = vld [vmem:[%s3003_s1 + $0x20] sm:$0xff] (!%p193_p2)   ;;  %v2409_v23 = vld [vmem:[%s3003_s1 + $0x28] sm:$0xff] (!%p193_p2)  }
   0xd   : > { %2226 = vmatpush3.bf16.msra.mxu1 %v2393_v7  ;;  %2205 = vmatprep.subr.bf16.mxu0 %v2394_v8  ;;  %s3009_s19 = smov (!%p226_p3, %s1853_s19), 1  ;;  %v2410_v24 = vld [vmem:[%s3003_s1 + $0xf0] sm:$0xff]   ;;  %v2414_v28 = vld [vmem:[%s3003_s1 + $0xf8] sm:$0xff]   ;;  %v2418_v36 = vld [vmem:[%s3003_s1 + $0x140] sm:$0xff]  }
   0xe   : > { %2227 = vmatprep.subr.bf16.mxu1 %v2395_v9  ;;  %v2411_v25 = vld [vmem:[%s3003_s1 + $0x70] sm:$0xff]   ;;  %s2377_s26 = smul.u32 24, %s3009_s19  ;;  %v2415_v29 = vld [vmem:[%s3003_s1 + $0x78] sm:$0xff]   ;;  %v2419_v37 = vld [vmem:[%s3003_s1 + $0x1c0] sm:$0xff]   ;;  %s2200_s11 = sshll.u32 %s3009_s19, 2 }
   0xf   : > { %v2412_v26 = vld [vmem:[%s3003_s1 + $0xb0] sm:$0xff]   ;;  %v2416_v30 = vld [vmem:[%s3003_s1 + $0xb8] sm:$0xff]   ;;  %v2420_v38 = vld [vmem:[%s3003_s1 + $0x100] sm:$0xff]   ;;  %s2981_s15 = scalar_lea.vmem %s3005_s3, %s2200_s11  ;;  %s238_s20 = scalar_lea.vmem %s3006_s4, %s3009_s19 }
  0x10   : > { %2206 = vmatpush3.bf16.msra.mxu0 %v2396_v10  ;;  %v2413_v27 = vld [vmem:[%s3003_s1 + $0x30] sm:$0xff]   ;;  %s2660_s12 = scalar_lea.vmem %s3002_s0, %s2377_s26  ;;  %v2417_v31 = vld [vmem:[%s3003_s1 + $0x38] sm:$0xff]   ;;  %v2421_v39 = vld [vmem:[%s3003_s1 + $0x180] sm:$0xff]   ;;  %s241_s23 = scalar_lea.vmem %s3007_s5, %s3009_s19 }
  0x11   : > { %2228 = vmatpush3.bf16.msra.mxu1 %v2397_v11  ;;  %2207 = vmatprep.subr.bf16.mxu0 %v2398_v12  ;;  %v1894_v32 = vld.sshfl [vmem:[%s2660_s12 + $0x4] sm:$0x33 pattern:$0x76325410]  ;;  %v2422_v40 = vld [vmem:[%s3003_s1 + $0x148] sm:$0xff]   ;;  %v2426_v44 = vld [vmem:[%s3003_s1 + $0x150] sm:$0xff]  }
  0x12   : > { %2229 = vmatprep.subr.bf16.mxu1 %v2399_v13  ;;  %v320_v33 = vcombine.high %v1894_v32, %v1894_v32  ;;  %v1911_v34 = vld.sshfl [vmem:[%s2660_s12] sm:$0x33 pattern:$0x76325410]  ;;  %v2423_v41 = vld [vmem:[%s3003_s1 + $0x1c8] sm:$0xff]   ;;  %v2427_v45 = vld [vmem:[%s3003_s1 + $0x1d0] sm:$0xff]  }
  0x13   : > { %v467_v35 = vcombine.high %v1911_v34, %v1911_v34  ;;  %v2424_v42 = vld [vmem:[%s3003_s1 + $0x108] sm:$0xff]   ;;  %v2428_v46 = vld [vmem:[%s3003_s1 + $0x110] sm:$0xff]   ;;  %v2430_v48 = vld [vmem:[%s3003_s1 + $0x158] sm:$0xff]  }
  0x14   : > { %2208 = vmatpush3.bf16.msra.mxu0 %v2400_v14  ;;  %451 = vmatprep.mubr.bf16.mxu0 %v320_v33  ;;  %v2425_v43 = vld [vmem:[%s3003_s1 + $0x188] sm:$0xff]   ;;  %v2429_v47 = vld [vmem:[%s3003_s1 + $0x190] sm:$0xff]   ;;  %v2431_v49 = vld [vmem:[%s3003_s1 + $0x1d8] sm:$0xff]  }
  0x15   : > { %2230 = vmatpush3.bf16.msra.mxu1 %v2401_v15  ;;  %2209 = vmatprep.subr.bf16.mxu0 %v2402_v16  ;;  %v2432_v50 = vld [vmem:[%s3003_s1 + $0x118] sm:$0xff]   ;;  %v2434_v52 = vld [vmem:[%s3003_s1 + $0x160] sm:$0xff]   ;;  %v2438_v56 = vld [vmem:[%s3003_s1 + $0x168] sm:$0xff]  }
  0x16   : > { %2231 = vmatprep.subr.bf16.mxu1 %v2403_v17  ;;  %598 = vmatprep.mubr.bf16.mxu1 %v467_v35  ;;  %v2433_v51 = vld [vmem:[%s3003_s1 + $0x198] sm:$0xff]   ;;  %v2435_v53 = vld [vmem:[%s3003_s1 + $0x1e0] sm:$0xff]   ;;  %v2439_v57 = vld [vmem:[%s3003_s1 + $0x1e8] sm:$0xff]  }
  0x17   : > { %v2436_v54 = vld [vmem:[%s3003_s1 + $0x120] sm:$0xff]   ;;  %v2440_v58 = vld [vmem:[%s3003_s1 + $0x128] sm:$0xff]   ;;  %v2442_v60 = vld [vmem:[%s3003_s1 + $0x170] sm:$0xff]  }
  0x18   : > { %2210 = vmatpush3.bf16.msra.mxu0 %v2404_v18  ;;  %v2437_v55 = vld [vmem:[%s3003_s1 + $0x1a0] sm:$0xff]   ;;  %v2441_v59 = vld [vmem:[%s3003_s1 + $0x1a8] sm:$0xff]   ;;  %v2443_v61 = vld [vmem:[%s3003_s1 + $0x1f0] sm:$0xff]  }
  0x19   : > { %2232 = vmatpush3.bf16.msra.mxu1 %v2405_v19  ;;  %2211 = vmatprep.subr.bf16.mxu0 %v2406_v20  ;;  %v2444_v62 = vld [vmem:[%s3003_s1 + $0x130] sm:$0xff]   ;;  %v2446_v0 = vld [vmem:[%s3003_s1 + $0x178] sm:$0xff]   ;;  %v2767_v4 = vld.sshfl [vmem:[%s2660_s12 + $0x8] sm:$0x33 pattern:$0x76325410] }
  0x1a   : > { %2233 = vmatprep.subr.bf16.mxu1 %v2407_v21  ;;  %v2445_v63 = vld [vmem:[%s3003_s1 + $0x1b0] sm:$0xff]   ;;  %v2447_v1 = vld [vmem:[%s3003_s1 + $0x1f8] sm:$0xff]   ;;  %v2450_v5 = vld [vmem:[%s3003_s1 + $0xc0] sm:$0xff]   ;;  %v649_v6 = vcombine.high %v2767_v4, %v2767_v4 }
  0x1b   : > { %v2448_v2 = vld [vmem:[%s3003_s1 + $0x138] sm:$0xff]   ;;  %v2775_v7 = vld.sshfl [vmem:[%s2660_s12 + $0xc] sm:$0x33 pattern:$0x76325410]  ;;  %v2451_v9 = vld [vmem:[%s3003_s1 + $0x40] sm:$0xff]  }
  0x1c   : > { %2212 = vmatpush3.bf16.msra.mxu0 %v2408_v22  ;;  %v2449_v3 = vld [vmem:[%s3003_s1 + $0x1b8] sm:$0xff]   ;;  %v832_v8 = vcombine.high %v2775_v7, %v2775_v7  ;;  %v2452_v10 = vld [vmem:[%s3003_s1 + $0x80] sm:$0xff]   ;;  %v2454_v12 = vld [vmem:[%s3003_s1 + $0xc8] sm:$0xff]  }
  0x1d   : > { %2234 = vmatpush3.bf16.msra.mxu1 %v2409_v23  ;;  %2213 = vmatprep.subr.bf16.mxu0 %v2410_v24  ;;  %v2453_v11 = vld [vmem:[%s3003_s1] sm:$0xff]   ;;  %v2455_v13 = vld [vmem:[%s3003_s1 + $0x48] sm:$0xff]   ;;  %v2458_v16 = vld [vmem:[%s3003_s1 + $0xd0] sm:$0xff]  }
  0x1e   : > { %2235 = vmatprep.subr.bf16.mxu1 %v2411_v25  ;;  %v2456_v14 = vld [vmem:[%s3003_s1 + $0x88] sm:$0xff]   ;;  %v2459_v17 = vld [vmem:[%s3003_s1 + $0x50] sm:$0xff]   ;;  %v2462_v20 = vld [vmem:[%s3003_s1 + $0xd8] sm:$0xff]  }
  0x1f   : > { %v2457_v15 = vld [vmem:[%s3003_s1 + $0x8] sm:$0xff]   ;;  %v2460_v18 = vld [vmem:[%s3003_s1 + $0x90] sm:$0xff]   ;;  %v2463_v21 = vld [vmem:[%s3003_s1 + $0x58] sm:$0xff]  }
  0x20   : > { %2214 = vmatpush3.bf16.msra.mxu0 %v2412_v26  ;;  %v2461_v19 = vld [vmem:[%s3003_s1 + $0x10] sm:$0xff]   ;;  %v2464_v22 = vld [vmem:[%s3003_s1 + $0x98] sm:$0xff]   ;;  %v2466_v24 = vld [vmem:[%s3003_s1 + $0xe0] sm:$0xff]  }
  0x21   : > { %2236 = vmatpush3.bf16.msra.mxu1 %v2413_v27  ;;  %2215 = vmatprep.subr.bf16.mxu0 %v2414_v28  ;;  %v2465_v23 = vld [vmem:[%s3003_s1 + $0x18] sm:$0xff]   ;;  %v2467_v25 = vld [vmem:[%s3003_s1 + $0x60] sm:$0xff]   ;;  %v2470_v28 = vld [vmem:[%s3003_s1 + $0xe8] sm:$0xff]  }
  0x22   : > { %2237 = vmatprep.subr.bf16.mxu1 %v2415_v29  ;;  %v2468_v26 = vld [vmem:[%s3003_s1 + $0xa0] sm:$0xff]   ;;  %v2471_v29 = vld [vmem:[%s3003_s1 + $0x68] sm:$0xff]   ;;  %v2475_v33 = vld [vmem:[%s3003_s1 + $0x70] sm:$0xff]  }
  0x23   : > { %v2469_v27 = vld [vmem:[%s3003_s1 + $0x20] sm:$0xff]   ;;  %v2477_v35 = vld [vmem:[%s3003_s1 + $0x30] sm:$0xff]  }
  0x24   : > { %2216 = vmatpush3.bf16.msra.mxu0 %v2416_v30  ;;  %v2472_v30 = vld [vmem:[%s3003_s1 + $0xa8] sm:$0xff]  }
  0x25   : > { %2238 = vmatpush3.bf16.msra.mxu1 %v2417_v31  ;;  %2245 = vmatprep.subr.bf16.mxu0 %v2418_v36  ;;  %v2473_v31 = vld [vmem:[%s3003_s1 + $0x28] sm:$0xff]   ;;  %v2478_v36 = vld [vmem:[%s3003_s1 + $0xf8] sm:$0xff]  }
  0x26   : > { %2267 = vmatprep.subr.bf16.mxu1 %v2419_v37  ;;  %v2479_v37 = vld [vmem:[%s3003_s1 + $0x78] sm:$0xff]  }
  0x27   : > { %452 = vmatmul.mubr.bf16.vlgmr.msra.gmra.mrb[0].mxu0 %v1894_v32  ;;  %v2474_v32 = vld [vmem:[%s3003_s1 + $0xf0] sm:$0xff]  }
  0x28   : > { %599 = vmatmul.mubr.bf16.vlgmr.msra.gmra.mrb[0].mxu1 %v1911_v34  ;;  %2246 = vmatpush3.bf16.msra.mxu0 %v2420_v38  ;;  %v2476_v34 = vld [vmem:[%s3003_s1 + $0xb0] sm:$0xff]   ;;  %v2480_v38 = vld [vmem:[%s3003_s1 + $0xb8] sm:$0xff]  }
  0x29   : > { %2268 = vmatpush3.bf16.msra.mxu1 %v2421_v39  ;;  %2247 = vmatprep.subr.bf16.mxu0 %v2422_v40  ;;  %v2481_v39 = vld [vmem:[%s3003_s1 + $0x38] sm:$0xff]   ;;  %v2482_v40 = vld [vmem:[%s3003_s1 + $0x140] sm:$0xff]  }
  0x2a   : > { %2269 = vmatprep.subr.bf16.mxu1 %v2423_v41  ;;  %780 = vmatprep.mubr.bf16.mxu0 %v649_v6  ;;  %v2483_v41 = vld [vmem:[%s3003_s1 + $0x1c0] sm:$0xff]  }
  0x2b   : > { %963 = vmatprep.mubr.bf16.mxu1 %v832_v8 }
  0x2c   : > { %2248 = vmatpush3.bf16.msra.mxu0 %v2424_v42  ;;  %v2484_v42 = vld [vmem:[%s3003_s1 + $0x100] sm:$0xff]  }
  0x2d   : > { %2270 = vmatpush3.bf16.msra.mxu1 %v2425_v43  ;;  %2249 = vmatprep.subr.bf16.mxu0 %v2426_v44  ;;  %v2485_v43 = vld [vmem:[%s3003_s1 + $0x180] sm:$0xff]   ;;  %v2486_v44 = vld [vmem:[%s3003_s1 + $0x148] sm:$0xff]  }
  0x2e   : > { %2271 = vmatprep.subr.bf16.mxu1 %v2427_v45  ;;  %v2487_v45 = vld [vmem:[%s3003_s1 + $0x1c8] sm:$0xff]  }
  0x30   : > { %2250 = vmatpush3.bf16.msra.mxu0 %v2428_v46  ;;  %v2488_v46 = vld [vmem:[%s3003_s1 + $0x108] sm:$0xff]  }
  0x31   : > { %2272 = vmatpush3.bf16.msra.mxu1 %v2429_v47  ;;  %2251 = vmatprep.subr.bf16.mxu0 %v2430_v48  ;;  %v2489_v47 = vld [vmem:[%s3003_s1 + $0x188] sm:$0xff]   ;;  %v2490_v48 = vld [vmem:[%s3003_s1 + $0x150] sm:$0xff]  }
  0x32   : > { %2273 = vmatprep.subr.bf16.mxu1 %v2431_v49  ;;  %v2491_v49 = vld [vmem:[%s3003_s1 + $0x1d0] sm:$0xff]  }
  0x34   : > { %2252 = vmatpush3.bf16.msra.mxu0 %v2432_v50  ;;  %v2492_v50 = vld [vmem:[%s3003_s1 + $0x110] sm:$0xff]  }
  0x35   : > { %2274 = vmatpush3.bf16.msra.mxu1 %v2433_v51  ;;  %2253 = vmatprep.subr.bf16.mxu0 %v2434_v52  ;;  %v2493_v51 = vld [vmem:[%s3003_s1 + $0x190] sm:$0xff]   ;;  %v2494_v52 = vld [vmem:[%s3003_s1 + $0x158] sm:$0xff]  }
  0x36   : > { %2275 = vmatprep.subr.bf16.mxu1 %v2435_v53  ;;  %v2495_v53 = vld [vmem:[%s3003_s1 + $0x1d8] sm:$0xff]  }
  0x38   : > { %2254 = vmatpush3.bf16.msra.mxu0 %v2436_v54  ;;  %v2496_v54 = vld [vmem:[%s3003_s1 + $0x118] sm:$0xff]  }
  0x39   : > { %2276 = vmatpush3.bf16.msra.mxu1 %v2437_v55  ;;  %2255 = vmatprep.subr.bf16.mxu0 %v2438_v56  ;;  %v2497_v55 = vld [vmem:[%s3003_s1 + $0x198] sm:$0xff]   ;;  %v2498_v56 = vld [vmem:[%s3003_s1 + $0x160] sm:$0xff]  }
  0x3a   : > { %2277 = vmatprep.subr.bf16.mxu1 %v2439_v57  ;;  %v2499_v57 = vld [vmem:[%s3003_s1 + $0x1e0] sm:$0xff]  }
  0x3c   : > { %2256 = vmatpush3.bf16.msra.mxu0 %v2440_v58  ;;  %v2500_v58 = vld [vmem:[%s3003_s1 + $0x120] sm:$0xff]  }
  0x3d   : > { %2278 = vmatpush3.bf16.msra.mxu1 %v2441_v59  ;;  %2257 = vmatprep.subr.bf16.mxu0 %v2442_v60  ;;  %v2501_v59 = vld [vmem:[%s3003_s1 + $0x1a0] sm:$0xff]   ;;  %v2502_v60 = vld [vmem:[%s3003_s1 + $0x168] sm:$0xff]  }
  0x3e   : > { %2279 = vmatprep.subr.bf16.mxu1 %v2443_v61  ;;  %v2503_v61 = vld [vmem:[%s3003_s1 + $0x1e8] sm:$0xff]  }
  0x40   : > { %2258 = vmatpush3.bf16.msra.mxu0 %v2444_v62  ;;  %v2504_v62 = vld [vmem:[%s3003_s1 + $0x128] sm:$0xff]  }
  0x41   : > { %2280 = vmatpush3.bf16.msra.mxu1 %v2445_v63  ;;  %2259 = vmatprep.subr.bf16.mxu0 %v2446_v0  ;;  %v2505_v63 = vld [vmem:[%s3003_s1 + $0x1a8] sm:$0xff]   ;;  %v2506_v0 = vld [vmem:[%s3003_s1 + $0x170] sm:$0xff]  }
  0x42   : > { %2281 = vmatprep.subr.bf16.mxu1 %v2447_v1  ;;  %v2507_v1 = vld [vmem:[%s3003_s1 + $0x1f0] sm:$0xff]  }
  0x44   : > { %2260 = vmatpush3.bf16.msra.mxu0 %v2448_v2  ;;  %v2508_v2 = vld [vmem:[%s3003_s1 + $0x130] sm:$0xff]  }
  0x45   : > { %2282 = vmatpush3.bf16.msra.mxu1 %v2449_v3  ;;  %2289 = vmatprep.subr.bf16.mxu0 %v2450_v5  ;;  %v2509_v3 = vld [vmem:[%s3003_s1 + $0x1b0] sm:$0xff]   ;;  %v2511_v5 = vld [vmem:[%s3003_s1 + $0x1f8] sm:$0xff]  }
  0x46   : > { %2311 = vmatprep.subr.bf16.mxu1 %v2451_v9 }
  0x47   : > { %781 = vmatmul.mubr.bf16.vlgmr.msra.gmra.mrb[4].mxu0 %v2767_v4 }
  0x48   : > { %964 = vmatmul.mubr.bf16.vlgmr.msra.gmra.mrb[4].mxu1 %v2775_v7  ;;  %2290 = vmatpush3.bf16.msra.mxu0 %v2452_v10  ;;  %v2180_v10 = vld.sshfl [vmem:[%s2660_s12 + $0x14] sm:$0x33 pattern:$0x76325410] }
  0x49   : > { %1205 = vmatprep.mubr.bf16.mxu0 %v832_v8  ;;  %2312 = vmatpush3.bf16.msra.mxu1 %v2453_v11  ;;  %v2130_v8 = vld.sshfl [vmem:[%s2660_s12 + $0x10] sm:$0x33 pattern:$0x76325410]  ;;  %v1584_v11 = vcombine.high %v2180_v10, %v2180_v10 }
  0x4a   : > { %1352 = vmatprep.mubr.bf16.mxu1 %v649_v6  ;;  %2291 = vmatprep.subr.bf16.mxu0 %v2454_v12  ;;  %v2512_v6 = vld [vmem:[%s3003_s1 + $0x138] sm:$0xff]   ;;  %v1402_v9 = vcombine.high %v2130_v8, %v2130_v8 }
  0x4b   : > { %2313 = vmatprep.subr.bf16.mxu1 %v2455_v13 }
  0x4c   : > { %2292 = vmatpush3.bf16.msra.mxu0 %v2456_v14 }
  0x4d   : > { %2314 = vmatpush3.bf16.msra.mxu1 %v2457_v15  ;;  %2293 = vmatprep.subr.bf16.mxu0 %v2458_v16 }
  0x4e   : > { %2315 = vmatprep.subr.bf16.mxu1 %v2459_v17 }
  0x50   : > { %2294 = vmatpush3.bf16.msra.mxu0 %v2460_v18 }
  0x51   : > { %2316 = vmatpush3.bf16.msra.mxu1 %v2461_v19  ;;  %2295 = vmatprep.subr.bf16.mxu0 %v2462_v20 }
  0x52   : > { %2317 = vmatprep.subr.bf16.mxu1 %v2463_v21 }
  0x54   : > { %2296 = vmatpush3.bf16.msra.mxu0 %v2464_v22 }
  0x55   : > { %2318 = vmatpush3.bf16.msra.mxu1 %v2465_v23  ;;  %2297 = vmatprep.subr.bf16.mxu0 %v2466_v24 }
  0x56   : > { %2319 = vmatprep.subr.bf16.mxu1 %v2467_v25 }
  0x58   : > { %2298 = vmatpush3.bf16.msra.mxu0 %v2468_v26 }
  0x59   : > { %2320 = vmatpush3.bf16.msra.mxu1 %v2469_v27  ;;  %2299 = vmatprep.subr.bf16.mxu0 %v2470_v28 }
  0x5a   : > { %2321 = vmatprep.subr.bf16.mxu1 %v2471_v29 }
  0x5c   : > { %2300 = vmatpush3.bf16.msra.mxu0 %v2472_v30 }
  0x5d   : > { %2322 = vmatpush3.bf16.msra.mxu1 %v2473_v31  ;;  %2301 = vmatprep.subr.bf16.mxu0 %v2474_v32 }
  0x5e   : > { %2323 = vmatprep.subr.bf16.mxu1 %v2475_v33 }
  0x60   : > { %2302 = vmatpush3.bf16.msra.mxu0 %v2476_v34  ;;  %v2028_v34 = vld [vmem:[%s3004_s2] ss:$0 sm:$0xff] }
  0x61   : > { %2324 = vmatpush3.bf16.msra.mxu1 %v2477_v35  ;;  %2303 = vmatprep.subr.bf16.mxu0 %v2478_v36 }
  0x62   : > { %2325 = vmatprep.subr.bf16.mxu1 %v2479_v37 }
  0x64   : > { %2304 = vmatpush3.bf16.msra.mxu0 %v2480_v38 }
  0x65   : > { %2326 = vmatpush3.bf16.msra.mxu1 %v2481_v39  ;;  %2333 = vmatprep.subr.bf16.mxu0 %v2482_v40 }
  0x66   : > { %2355 = vmatprep.subr.bf16.mxu1 %v2483_v41 }
  0x67   : > { %1206 = vmatmul.mubr.bf16.vlgmr.msra.gmra.mrb[8].mxu0 %v2775_v7  ;;  %v2513_v7 = vld [vmem:[%s3003_s1 + $0x1b8] sm:$0xff]  }
  0x68   : > { %1353 = vmatmul.mubr.bf16.vlgmr.msra.gmra.mrb[8].mxu1 %v2767_v4  ;;  %2334 = vmatpush3.bf16.msra.mxu0 %v2484_v42  ;;  %v2510_v4 = vld [vmem:[%s3003_s1 + $0x178] sm:$0xff]  }
  0x69   : > { %2356 = vmatpush3.bf16.msra.mxu1 %v2485_v43  ;;  %2335 = vmatprep.subr.bf16.mxu0 %v2486_v44 }
  0x6a   : > { %2357 = vmatprep.subr.bf16.mxu1 %v2487_v45  ;;  %1533 = vmatprep.mubr.bf16.mxu0 %v1402_v9 }
  0x6b   : > { %1715 = vmatprep.mubr.bf16.mxu1 %v1584_v11 }
  0x6c   : > { %2336 = vmatpush3.bf16.msra.mxu0 %v2488_v46 }
  0x6d   : > { %2358 = vmatpush3.bf16.msra.mxu1 %v2489_v47  ;;  %2337 = vmatprep.subr.bf16.mxu0 %v2490_v48 }
  0x6e   : > { %2359 = vmatprep.subr.bf16.mxu1 %v2491_v49 }
  0x70   : > { %2338 = vmatpush3.bf16.msra.mxu0 %v2492_v50 }
  0x71   : > { %2360 = vmatpush3.bf16.msra.mxu1 %v2493_v51  ;;  %2339 = vmatprep.subr.bf16.mxu0 %v2494_v52 }
  0x72   : > { %2361 = vmatprep.subr.bf16.mxu1 %v2495_v53 }
  0x74   : > { %2340 = vmatpush3.bf16.msra.mxu0 %v2496_v54 }
  0x75   : > { %2362 = vmatpush3.bf16.msra.mxu1 %v2497_v55  ;;  %2341 = vmatprep.subr.bf16.mxu0 %v2498_v56 }
  0x76   : > { %2363 = vmatprep.subr.bf16.mxu1 %v2499_v57 }
  0x78   : > { %2342 = vmatpush3.bf16.msra.mxu0 %v2500_v58 }
  0x79   : > { %2364 = vmatpush3.bf16.msra.mxu1 %v2501_v59  ;;  %2343 = vmatprep.subr.bf16.mxu0 %v2502_v60 }
  0x7a   : > { %2365 = vmatprep.subr.bf16.mxu1 %v2503_v61 }
  0x7c   : > { %2344 = vmatpush3.bf16.msra.mxu0 %v2504_v62 }
  0x7d   : > { %2366 = vmatpush3.bf16.msra.mxu1 %v2505_v63  ;;  %2345 = vmatprep.subr.bf16.mxu0 %v2506_v0 }
  0x7e   : > { %2367 = vmatprep.subr.bf16.mxu1 %v2507_v1 }
  0x80   : > { %2346 = vmatpush3.bf16.msra.mxu0 %v2508_v2 }
  0x81   : > { %2368 = vmatpush3.bf16.msra.mxu1 %v2509_v3  ;;  %2347 = vmatprep.subr.bf16.mxu0 %v2510_v4 }
  0x82   : > { %2369 = vmatprep.subr.bf16.mxu1 %v2511_v5 }
  0x84   : > { %2348 = vmatpush3.bf16.msra.mxu0 %v2512_v6 }
  0x85   : > { %2370 = vmatpush3.bf16.msra.mxu1 %v2513_v7 }
  0x87   : > { %1534 = vmatmul.mubr.bf16.vlgmr.msra.gmra.mrb[12].mxu0 %v2130_v8 }
  0x88   : > { %1716 = vmatmul.mubr.bf16.vlgmr.msra.gmra.mrb[12].mxu1 %v2180_v10 }
  0xfa   : > { %v2217_v12 = vpop.f32.mrb[0].mxu0 }
  0xfb   : > { %v2239_v13 = vpop.f32.mrb[0].mxu1  ;;  %v2218_v14 = vpop.f32.mrb[1].mxu0 }
  0xfc   : > { %v2219_v15 = vadd.f32 %v2218_v14, %v2217_v12  ;;  %v2240_v16 = vpop.f32.mrb[1].mxu1  ;;  %v2220_v17 = vpop.f32.mrb[2].mxu0 }
  0xfd   : > { %v2241_v18 = vadd.f32 %v2240_v16, %v2239_v13  ;;  %v2242_v19 = vpop.f32.mrb[2].mxu1  ;;  %v2221_v20 = vpop.f32.mrb[3].mxu0 }
  0xfe   : > { %v2243_v21 = vpop.f32.mrb[3].mxu1 }
  0xff   : > { %v601_v22 = vadd.f32 %v2241_v18, %v2219_v15 }
 0x11a   : > { %v2261_v23 = vpop.f32.mrb[4].mxu0 }
 0x11b   : > { %v2283_v24 = vpop.f32.mrb[4].mxu1  ;;  %v2262_v25 = vpop.f32.mrb[5].mxu0 }
 0x11c   : > { %v2263_v26 = vadd.f32 %v2262_v25, %v2261_v23  ;;  %v2284_v27 = vpop.f32.mrb[5].mxu1  ;;  %v2264_v28 = vpop.f32.mrb[6].mxu0 }
 0x11d   : > { %v2285_v29 = vadd.f32 %v2284_v27, %v2283_v24  ;;  %v2286_v30 = vpop.f32.mrb[6].mxu1  ;;  %v2265_v31 = vpop.f32.mrb[7].mxu0 }
 0x11e   : > { %v788_v32 = vadd.f32 %v2263_v26, %v601_v22  ;;  %v2287_v33 = vpop.f32.mrb[7].mxu1 }
 0x120   : > { %v971_v35 = vadd.f32 %v2285_v29, %v788_v32 }
 0x122   : > { %v978_v36 = vadd.f32 %v2028_v34, %v971_v35 }
 0x124   : > { %v997_v37 = vpack.c.bf16 %v978_v36, %v978_v36  ;;  %v988_v49 = vmul.f32 %v978_v36, %v978_v36  ;;  %v980_v50 = vsel %vm979_vm1, %v978_v36, 0.0 }
 0x125   : > { %v981_v53 = vrot.slane %v980_v50, 4 }
 0x126   : > { %999 = vst.msk [vmem:[%s2981_s15] sm:$0x3] %vm998_vm0, %v997_v37  ;;  %v989_v51 = vsel %vm979_vm1, %v988_v49, 0.0 }
 0x127   : > { %v990_v59 = vrot.slane %v989_v51, 4  ;;  %v982_v1 = vadd.f32 %v981_v53, %v980_v50 }
 0x129   : > { %v991_v3 = vadd.f32 %v990_v59, %v989_v51  ;;  %v983_v5 = vrot.slane %v982_v1, 2 }
 0x12b   : > { %v992_v9 = vrot.slane %v991_v3, 2  ;;  %v984_v12 = vadd.f32 %v983_v5, %v982_v1 }
 0x12d   : > { %v993_v15 = vadd.f32 %v992_v9, %v991_v3  ;;  %v985_v18 = vrot.slane %v984_v12, 1 }
 0x12f   : > { %v994_v21 = vrot.slane %v993_v15, 1  ;;  %v986_v24 = vadd.f32 %v985_v18, %v984_v12 }
 0x131   : > { %v995_v27 = vadd.f32 %v994_v21, %v993_v15 }
 0x13a   : > { %v2305_v38 = vpop.f32.mrb[8].mxu0 }
 0x13b   : > { %v2327_v39 = vpop.f32.mrb[8].mxu1  ;;  %v2306_v40 = vpop.f32.mrb[9].mxu0 }
 0x13c   : > { %v2307_v41 = vadd.f32 %v2306_v40, %v2305_v38  ;;  %v2328_v42 = vpop.f32.mrb[9].mxu1  ;;  %v2308_v43 = vpop.f32.mrb[10].mxu0 }
 0x13d   : > { %v2329_v44 = vadd.f32 %v2328_v42, %v2327_v39  ;;  %v2330_v45 = vpop.f32.mrb[10].mxu1  ;;  %v2309_v46 = vpop.f32.mrb[11].mxu0 }
 0x13e   : > { %v2331_v47 = vpop.f32.mrb[11].mxu1 }
 0x13f   : > { %v1355_v48 = vadd.f32 %v2329_v44, %v2307_v41 }
 0x15a   : > { %v2349_v52 = vpop.f32.mrb[12].mxu0 }
 0x15b   : > { %v2371_v54 = vpop.f32.mrb[12].mxu1  ;;  %v2350_v55 = vpop.f32.mrb[13].mxu0 }
 0x15c   : > { %v2351_v56 = vadd.f32 %v2350_v55, %v2349_v52  ;;  %v2372_v57 = vpop.f32.mrb[13].mxu1  ;;  %v2352_v58 = vpop.f32.mrb[14].mxu0 }
 0x15d   : > { %v2373_v60 = vadd.f32 %v2372_v57, %v2371_v54  ;;  %v2374_v61 = vpop.f32.mrb[14].mxu1  ;;  %v2353_v62 = vpop.f32.mrb[15].mxu0 }
 0x15e   : > { %v1541_v63 = vadd.f32 %v2351_v56, %v1355_v48  ;;  %v2375_v0 = vpop.f32.mrb[15].mxu1 }
 0x160   : > { %v1723_v2 = vadd.f32 %v2373_v60, %v1541_v63 }
 0x162   : > { %v1724_v4 = vadd.f32 %v2028_v34, %v1723_v2 }
 0x164   : > { %v1725_v6 = vsel %vm979_vm1, %v1724_v4, 0.0  ;;  %v1733_v7 = vmul.f32 %v1724_v4, %v1724_v4  ;;  %v1742_v8 = vpack.c.bf16 %v1724_v4, %v1724_v4 }
 0x165   : > { %v1726_v10 = vrot.slane %v1725_v6, 4 }
 0x166   : > { %v1734_v11 = vsel %vm979_vm1, %v1733_v7, 0.0  ;;  %2197 = vst.msk [vmem:[%s2981_s15 + $0x2] sm:$0x3] %vm998_vm0, %v1742_v8 }
 0x167   : > { %v1727_v13 = vadd.f32 %v1726_v10, %v1725_v6  ;;  %v1735_v14 = vrot.slane %v1734_v11, 4 }
 0x169   : > { %v1728_v16 = vrot.slane %v1727_v13, 2  ;;  %v1736_v17 = vadd.f32 %v1735_v14, %v1734_v11 }
 0x16b   : > { %v1729_v19 = vadd.f32 %v1728_v16, %v1727_v13  ;;  %v1737_v20 = vrot.slane %v1736_v17, 2 }
 0x16d   : > { %v1730_v22 = vrot.slane %v1729_v19, 1  ;;  %v1738_v23 = vadd.f32 %v1737_v20, %v1736_v17 }
 0x16f   : > { %v1731_v25 = vadd.f32 %v1730_v22, %v1729_v19  ;;  %v1739_v26 = vrot.slane %v1738_v23, 1 }
 0x171   : > { %v1732_v28 = vadd.f32 %v1731_v25, %v986_v24  ;;  %v1740_v29 = vadd.f32 %v1739_v26, %v1738_v23 }
 0x173   : > { %v1741_v30 = vadd.f32 %v1740_v29, %v995_v27  ;;  %1746 = vst.msk [vmem:[%s238_s20] sm:$0x1] %vm1745_vm2, %v1732_v28 }
 0x175   : > { %1747 = vst.msk [vmem:[%s241_s23] sm:$0x1] %vm1745_vm2, %v1741_v30 }
 0x176 PF: > { %s16_s18 = sadd.s32 1, %s2520_s18  }
 0x177   : > { %p13_p4 = scmp.ge.s32.totalorder %s16_s18, 4  }
 0x179   :  { %15 = sbr.rel (!%p13_p4) target bundleno = 1 (0x1), region = 95 }

</bundles_post_ra>
